<compile_context>
chip_gen: v7x
topology: tpu7x:2x2x1
jax: 0.10.0
libtpu: 0.0.40
codegen_flags: <defaults>
</compile_context>

<pallas_src>
import functools

import jax
import jax.numpy as jnp
from jax.experimental import pallas as pl
from jax.experimental.pallas import tpu as pltpu

EPS = 1e-5


# ----------------------------------------------------------------------------
# Fused "per-point MLP -> max over points -> FC tail" Pallas kernel
# ----------------------------------------------------------------------------
def _fused_block_kernel(*refs, n_conv, n_fc, conv_relu, fc_relu,
                        n_points, tile_n):
    n_params = 3 * (n_conv + n_fc)
    x_ref = refs[0]
    p = refs[1:1 + n_params]
    o_ref = refs[1 + n_params]
    acc_ref = refs[2 + n_params]

    nt = pl.program_id(1)

    # ---- per-point MLP on this tile of points (weights VMEM-resident) ------
    h = x_ref[...]                                    # (tile_n, C_in) f32
    for i in range(n_conv):
        w = p[3 * i][...]
        s = p[3 * i + 1][...]
        sh = p[3 * i + 2][...]
        y = jnp.dot(h.astype(w.dtype), w,             # bf16 MXU, f32 accum
                    preferred_element_type=jnp.float32)
        y = y * s + sh                                # folded BN, f32 epilogue
        if conv_relu[i]:
            y = jnp.maximum(y, 0.0)
        h = y                                         # stays f32 between layers

    # ---- running max over points (mask rows past n_points) -----------------
    row = nt * tile_n + jax.lax.broadcasted_iota(jnp.int32, (tile_n, 1), 0)
    tile_max = jnp.max(jnp.where(row < n_points, h, -jnp.inf),
                       axis=0, keepdims=True)         # (1, C_pool) f32

    @pl.when(nt == 0)
    def _init():
        acc_ref[...] = jnp.full(acc_ref.shape, -jnp.inf, dtype=acc_ref.dtype)

    acc_ref[...] = jnp.maximum(acc_ref[...], tile_max)

    # ---- FC tail on the pooled global feature, last point tile only --------
    @pl.when(nt == pl.num_programs(1) - 1)
    def _epilogue():
        g = acc_ref[...]                              # (1, C_pool) f32
        for j in range(n_fc):
            w = p[3 * (n_conv + j)][...]
            s = p[3 * (n_conv + j) + 1][...]
            sh = p[3 * (n_conv + j) + 2][...]
            g = jnp.dot(g.astype(w.dtype), w,
                        preferred_element_type=jnp.float32)
            g = g * s + sh
            if fc_relu[j]:
                g = jnp.maximum(g, 0.0)
        o_ref[...] = g.astype(o_ref.dtype)


def fused_point_block(x, conv_layers, fc_layers):
    """Fused (per-point MLP -> max over points -> FC tail).

    x: (B, N, Cin) f32 channels-last point features.
    conv_layers: [(W, scale, shift, relu), ...] applied per point;
        W is (Cin, Cout) shared or (B, Cin, Cout) per-batch (folded transform).
    fc_layers:   [(W, scale, shift, relu), ...] applied to the pooled feature.
    Returns (B, C_out) f32 where C_out is the last FC layer's output width.
    """
    B, N, c_in = x.shape
    tile_n = N if N <= 256 else 256          # (8,128)-safe: 256 % 8 == 0 or == N
    num_tiles = pl.cdiv(N, tile_n)

    c_pool = conv_layers[-1][0].shape[-1]
    c_out = fc_layers[-1][0].shape[-1] if fc_layers else c_pool

    in_specs = [pl.BlockSpec((None, tile_n, c_in), lambda b, n: (b, n, 0))]
    args = [x]
    conv_relu, fc_relu = [], []
    flops = 0

    def _add_layer(w, s, sh, per_point):
        nonlocal flops
        if w.ndim == 3:                      # per-batch composed weight
            _, ci, co = w.shape
            in_specs.append(pl.BlockSpec((None, ci, co), lambda b, n: (b, 0, 0)))
        else:                                # shared weight, VMEM-resident
            ci, co = w.shape
            in_specs.append(pl.BlockSpec((ci, co), lambda b, n: (0, 0)))
        in_specs.append(pl.BlockSpec((1, co), lambda b, n: (0, 0)))
        in_specs.append(pl.BlockSpec((1, co), lambda b, n: (0, 0)))
        args.extend([w, s.reshape(1, co), sh.reshape(1, co)])
        flops += 2 * B * (N if per_point else 1) * ci * co

    for (w, s, sh, relu) in conv_layers:
        _add_layer(w, s, sh, per_point=True)
        conv_relu.append(bool(relu))
    for (w, s, sh, relu) in fc_layers:
        _add_layer(w, s, sh, per_point=False)
        fc_relu.append(bool(relu))

    bytes_accessed = int(sum(int(a.size) * a.dtype.itemsize for a in args)
                         + B * c_out * 4)

    kernel = functools.partial(
        _fused_block_kernel,
        n_conv=len(conv_layers), n_fc=len(fc_layers),
        conv_relu=tuple(conv_relu), fc_relu=tuple(fc_relu),
        n_points=N, tile_n=tile_n)

    out = pl.pallas_call(
        kernel,
        out_shape=jax.ShapeDtypeStruct((B, 1, c_out), jnp.float32),
        grid=(B, num_tiles),
        in_specs=in_specs,
        out_specs=pl.BlockSpec((None, 1, c_out), lambda b, n: (b, 0, 0)),
        scratch_shapes=[pltpu.VMEM((1, c_pool), jnp.float32)],
        compiler_params=pltpu.CompilerParams(
            dimension_semantics=("parallel", "arbitrary")),
        cost_estimate=pl.CostEstimate(
            flops=int(flops), transcendentals=0,
            bytes_accessed=bytes_accessed),
    )(*args)
    return out.reshape(B, c_out)


# ----------------------------------------------------------------------------
# Deterministic parameter initialization (synthetic weights, BN pre-folded)
# ----------------------------------------------------------------------------
def _init_linear(key, cin, cout, std=0.05):
    kw, kb = jax.random.split(key)
    w = std * jax.random.normal(kw, (cout, cin), jnp.float32)   # PyTorch (out,in)
    b = std * jax.random.normal(kb, (cout,), jnp.float32)
    return w.T, b                                               # (in, out)


def _init_bn(key, c):
    k1, k2, k3, k4 = jax.random.split(key, 4)
    gamma = 1.0 + 0.1 * jax.random.normal(k1, (c,), jnp.float32)
    beta = 0.1 * jax.random.normal(k2, (c,), jnp.float32)
    mean = 0.1 * jax.random.normal(k3, (c,), jnp.float32)
    var = 1.0 + 0.1 * jax.random.uniform(k4, (c,), jnp.float32)
    return gamma, beta, mean, var


def _fold_bn(bias, gamma, beta, mean, var):
    s = gamma / jnp.sqrt(var + EPS)
    return s, (bias - mean) * s + beta


def _matmul_dtype(cin, cout):
    # bf16 for the real MXU layers; tiny / narrow layers stay f32.
    return jnp.bfloat16 if (cin >= 8 and cout >= 128) or cin >= 128 else jnp.float32


def _bn_layer(kw, kbn, cin, cout, relu):
    w, b = _init_linear(kw, cin, cout)
    s, sh = _fold_bn(b, *_init_bn(kbn, cout))
    return (w.astype(_matmul_dtype(cin, cout)), s, sh, relu)


def init_tnet(key, k):
    ks = jax.random.split(key, 11)
    conv = [_bn_layer(ks[0], ks[1], k, 64, True),
            _bn_layer(ks[2], ks[3], 64, 128, True),
            _bn_layer(ks[4], ks[5], 128, 1024, True)]
    fc = [_bn_layer(ks[6], ks[7], 1024, 512, True),
          _bn_layer(ks[8], ks[9], 512, 256, True)]
    # fc3: plain Linear; the T-Net's "+ eye(k)" is folded into its bias.
    w, b = _init_linear(ks[10], 256, k * k)
    fc.append((w.astype(_matmul_dtype(256, k * k)),
               jnp.ones((k * k,), jnp.float32),
               b + jnp.eye(k, dtype=jnp.float32).reshape(-1),
               False))
    return {"conv": conv, "fc": fc}


def init_transform(key):
    ks = jax.random.split(key, 8)
    p = {"t3": init_tnet(ks[0], 3), "t64": init_tnet(ks[1], 64)}
    # conv1 / conv2 weights stay f32: they get composed with the per-batch
    # transform matrices (m3 @ W1, m64 @ W2) before the kernels see them.
    w1, b1 = _init_linear(ks[2], 3, 64)
    s1, sh1 = _fold_bn(b1, *_init_bn(ks[3], 64))
    p["conv1"] = (w1, s1, sh1)
    w2, b2 = _init_linear(ks[4], 64, 128)
    s2, sh2 = _fold_bn(b2, *_init_bn(ks[5], 128))
    p["conv2"] = (w2, s2, sh2)
    p["conv3"] = _bn_layer(ks[6], ks[7], 128, 1024, relu=False)   # bn3, no ReLU
    return p


def init_pointnet_cls(key):
    k1, k2, k3 = jax.random.split(key, 3)
    return {"transform": init_transform(k1),
            "fc1": _bn_layer(k2, k3, 1024, 512, relu=True)}       # cls fc1 + bn1


# ----------------------------------------------------------------------------
# Forward pass: 3 fused pallas_calls + tiny weight-composition einsums in JAX
# ----------------------------------------------------------------------------
def pointnet_cls_forward(params, x):
    """x: (B, 3, N) f32 (NCL, as in the PyTorch Conv1d reference)."""
    pt = params["transform"]
    B, _, N = x.shape
    x_bnc = jnp.transpose(x, (0, 2, 1))               # (B, N, 3) channels-last

    # --- call 1: T-Net(3): conv chain + max + FC tail fully fused -----------
    t3 = pt["t3"]
    m3 = fused_point_block(x_bnc, t3["conv"], t3["fc"]).reshape(B, 3, 3)

    # bmm(x^T, m3) followed by conv1  ==  x^T @ (m3 @ W1): fold into the weight.
    w1, s1, sh1 = pt["conv1"]
    w_eff1 = jnp.einsum("bij,jk->bik", m3, w1)        # (B, 3, 64) f32
    l_eff1 = (w_eff1, s1, sh1, True)                  # relu(bn1(conv1(bmm(x,m3))))

    # --- call 2: T-Net(64) on the 64-d features (recomputed in-kernel) ------
    t64 = pt["t64"]
    m64 = fused_point_block(x_bnc, [l_eff1] + t64["conv"],
                            t64["fc"]).reshape(B, 64, 64)

    # bmm(h^T, m64) followed by conv2  ==  h^T @ (m64 @ W2): fold into the weight.
    w2, s2, sh2 = pt["conv2"]
    w_eff2 = jnp.einsum("bij,jk->bik", m64, w2).astype(jnp.bfloat16)  # (B,64,128)
    l_eff2 = (w_eff2, s2, sh2, True)

    # --- call 3: main head: conv chain + global max + classification fc1 ----
    out = fused_point_block(x_bnc,
                            [l_eff1, l_eff2, pt["conv3"]],
                            [params["fc1"]])           # (B, 512)
    return out, m3, m64


# ----------------------------------------------------------------------------
if __name__ == "__main__":
    key = jax.random.PRNGKey(0)
    kparam, kx = jax.random.split(key)
    params = init_pointnet_cls(kparam)

    B, N = 2, 64
    x = jax.random.normal(kx, (B, 3, N), jnp.float32)  # NCL, PyTorch Conv1d layout

    forward = jax.jit(lambda inp: pointnet_cls_forward(params, inp))
    out, m3, m64 = forward(x)
    jax.block_until_ready((out, m3, m64))

    assert out.shape == (B, 512) and out.dtype == jnp.float32
    assert m3.shape == (B, 3, 3) and m64.shape == (B, 64, 64)
    print("KERNEL_OK")
</pallas_src>

<mosaic_0001>
module attributes {stable_mosaic.version = 11 : i64} {
  func.func @_fused_block_kernel(%arg0: i32, %arg1: i32, %arg2: memref<1x64x3xf32, #tpu.memory_space<vmem>>, %arg3: memref<1x3x64xf32, #tpu.memory_space<vmem>>, %arg4: memref<1x64xf32, #tpu.memory_space<vmem>>, %arg5: memref<1x64xf32, #tpu.memory_space<vmem>>, %arg6: memref<64x64xf32, #tpu.memory_space<vmem>>, %arg7: memref<1x64xf32, #tpu.memory_space<vmem>>, %arg8: memref<1x64xf32, #tpu.memory_space<vmem>>, %arg9: memref<64x128xbf16, #tpu.memory_space<vmem>>, %arg10: memref<1x128xf32, #tpu.memory_space<vmem>>, %arg11: memref<1x128xf32, #tpu.memory_space<vmem>>, %arg12: memref<128x1024xbf16, #tpu.memory_space<vmem>>, %arg13: memref<1x1024xf32, #tpu.memory_space<vmem>>, %arg14: memref<1x1024xf32, #tpu.memory_space<vmem>>, %arg15: memref<1024x512xbf16, #tpu.memory_space<vmem>>, %arg16: memref<1x512xf32, #tpu.memory_space<vmem>>, %arg17: memref<1x512xf32, #tpu.memory_space<vmem>>, %arg18: memref<512x256xbf16, #tpu.memory_space<vmem>>, %arg19: memref<1x256xf32, #tpu.memory_space<vmem>>, %arg20: memref<1x256xf32, #tpu.memory_space<vmem>>, %arg21: memref<256x4096xbf16, #tpu.memory_space<vmem>>, %arg22: memref<1x4096xf32, #tpu.memory_space<vmem>>, %arg23: memref<1x4096xf32, #tpu.memory_space<vmem>>, %arg24: memref<1x1x4096xf32, #tpu.memory_space<vmem>>, %arg25: memref<1x1024xf32, #tpu.memory_space<vmem>>) attributes {dimension_semantics = [#tpu.dimension_semantics<parallel>, #tpu.dimension_semantics<arbitrary>], iteration_bounds = array<i64: 2, 1>, scalar_prefetch = 0 : i64, scratch_operands = 1 : i64, tpu.core_type = #tpu.core_type<tc>, window_params = [{transform_indices = @transform_0, window_bounds = array<i64: 1, 64, 3>}, {transform_indices = @transform_1, window_bounds = array<i64: 1, 3, 64>}, {pipeline_mode = #tpu.pipeline_mode<synchronous>, transform_indices = @transform_2, window_bounds = array<i64: 1, 64>}, {pipeline_mode = #tpu.pipeline_mode<synchronous>, transform_indices = @transform_3, window_bounds = array<i64: 1, 64>}, {pipeline_mode = #tpu.pipeline_mode<synchronous>, transform_indices = @transform_4, window_bounds = array<i64: 64, 64>}, {pipeline_mode = #tpu.pipeline_mode<synchronous>, transform_indices = @transform_5, window_bounds = array<i64: 1, 64>}, {pipeline_mode = #tpu.pipeline_mode<synchronous>, transform_indices = @transform_6, window_bounds = array<i64: 1, 64>}, {pipeline_mode = #tpu.pipeline_mode<synchronous>, transform_indices = @transform_7, window_bounds = array<i64: 64, 128>}, {pipeline_mode = #tpu.pipeline_mode<synchronous>, transform_indices = @transform_8, window_bounds = array<i64: 1, 128>}, {pipeline_mode = #tpu.pipeline_mode<synchronous>, transform_indices = @transform_9, window_bounds = array<i64: 1, 128>}, {pipeline_mode = #tpu.pipeline_mode<synchronous>, transform_indices = @transform_10, window_bounds = array<i64: 128, 1024>}, {pipeline_mode = #tpu.pipeline_mode<synchronous>, transform_indices = @transform_11, window_bounds = array<i64: 1, 1024>}, {pipeline_mode = #tpu.pipeline_mode<synchronous>, transform_indices = @transform_12, window_bounds = array<i64: 1, 1024>}, {pipeline_mode = #tpu.pipeline_mode<synchronous>, transform_indices = @transform_13, window_bounds = array<i64: 1024, 512>}, {pipeline_mode = #tpu.pipeline_mode<synchronous>, transform_indices = @transform_14, window_bounds = array<i64: 1, 512>}, {pipeline_mode = #tpu.pipeline_mode<synchronous>, transform_indices = @transform_15, window_bounds = array<i64: 1, 512>}, {pipeline_mode = #tpu.pipeline_mode<synchronous>, transform_indices = @transform_16, window_bounds = array<i64: 512, 256>}, {pipeline_mode = #tpu.pipeline_mode<synchronous>, transform_indices = @transform_17, window_bounds = array<i64: 1, 256>}, {pipeline_mode = #tpu.pipeline_mode<synchronous>, transform_indices = @transform_18, window_bounds = array<i64: 1, 256>}, {pipeline_mode = #tpu.pipeline_mode<synchronous>, transform_indices = @transform_19, window_bounds = array<i64: 256, 4096>}, {pipeline_mode = #tpu.pipeline_mode<synchronous>, transform_indices = @transform_20, window_bounds = array<i64: 1, 4096>}, {pipeline_mode = #tpu.pipeline_mode<synchronous>, transform_indices = @transform_21, window_bounds = array<i64: 1, 4096>}, {transform_indices = @transform_22, window_bounds = array<i64: 1, 1, 4096>}]} {
    %c0 = arith.constant 0 : index
    %c0_0 = arith.constant 0 : index
    %c0_1 = arith.constant 0 : index
    %0 = vector.load %arg2[%c0, %c0_0, %c0_1] : memref<1x64x3xf32, #tpu.memory_space<vmem>>, vector<1x64x3xf32>
    %1 = vector.shape_cast %0 : vector<1x64x3xf32> to vector<64x3xf32>
    %c0_2 = arith.constant 0 : index
    %c0_3 = arith.constant 0 : index
    %c0_4 = arith.constant 0 : index
    %2 = vector.load %arg3[%c0_2, %c0_3, %c0_4] : memref<1x3x64xf32, #tpu.memory_space<vmem>>, vector<1x3x64xf32>
    %3 = vector.shape_cast %2 : vector<1x3x64xf32> to vector<3x64xf32>
    %c0_5 = arith.constant 0 : index
    %c0_6 = arith.constant 0 : index
    %4 = vector.load %arg4[%c0_5, %c0_6] : memref<1x64xf32, #tpu.memory_space<vmem>>, vector<1x64xf32>
    %c0_7 = arith.constant 0 : index
    %c0_8 = arith.constant 0 : index
    %5 = vector.load %arg5[%c0_7, %c0_8] : memref<1x64xf32, #tpu.memory_space<vmem>>, vector<1x64xf32>
    %cst = arith.constant dense<0.000000e+00> : vector<64x64xf32>
    %6 = tpu.matmul %1, %3, %cst {dimension_numbers = #tpu.dot_dimension_numbers<[1], [0], [0], [1], [0, 0, 1, 1], [], []>} : vector<64x3xf32>, vector<3x64xf32>, vector<64x64xf32> -> vector<64x64xf32>
    %7 = vector.broadcast %4 : vector<1x64xf32> to vector<64x64xf32>
    %8 = arith.mulf %6, %7 : vector<64x64xf32>
    %9 = vector.broadcast %5 : vector<1x64xf32> to vector<64x64xf32>
    %10 = arith.addf %8, %9 : vector<64x64xf32>
    %cst_9 = arith.constant 0.000000e+00 : f32
    %11 = vector.broadcast %cst_9 : f32 to vector<64x64xf32>
    %12 = arith.maximumf %10, %11 : vector<64x64xf32>
    %c0_10 = arith.constant 0 : index
    %c0_11 = arith.constant 0 : index
    %13 = vector.load %arg6[%c0_10, %c0_11] : memref<64x64xf32, #tpu.memory_space<vmem>>, vector<64x64xf32>
    %c0_12 = arith.constant 0 : index
    %c0_13 = arith.constant 0 : index
    %14 = vector.load %arg7[%c0_12, %c0_13] : memref<1x64xf32, #tpu.memory_space<vmem>>, vector<1x64xf32>
    %c0_14 = arith.constant 0 : index
    %c0_15 = arith.constant 0 : index
    %15 = vector.load %arg8[%c0_14, %c0_15] : memref<1x64xf32, #tpu.memory_space<vmem>>, vector<1x64xf32>
    %cst_16 = arith.constant dense<0.000000e+00> : vector<64x64xf32>
    %16 = tpu.matmul %12, %13, %cst_16 {dimension_numbers = #tpu.dot_dimension_numbers<[1], [0], [0], [1], [0, 0, 1, 1], [], []>} : vector<64x64xf32>, vector<64x64xf32>, vector<64x64xf32> -> vector<64x64xf32>
    %17 = vector.broadcast %14 : vector<1x64xf32> to vector<64x64xf32>
    %18 = arith.mulf %16, %17 : vector<64x64xf32>
    %19 = vector.broadcast %15 : vector<1x64xf32> to vector<64x64xf32>
    %20 = arith.addf %18, %19 : vector<64x64xf32>
    %cst_17 = arith.constant 0.000000e+00 : f32
    %21 = vector.broadcast %cst_17 : f32 to vector<64x64xf32>
    %22 = arith.maximumf %20, %21 : vector<64x64xf32>
    %c0_18 = arith.constant 0 : index
    %c0_19 = arith.constant 0 : index
    %23 = vector.load %arg9[%c0_18, %c0_19] : memref<64x128xbf16, #tpu.memory_space<vmem>>, vector<64x128xbf16>
    %c0_20 = arith.constant 0 : index
    %c0_21 = arith.constant 0 : index
    %24 = vector.load %arg10[%c0_20, %c0_21] : memref<1x128xf32, #tpu.memory_space<vmem>>, vector<1x128xf32>
    %c0_22 = arith.constant 0 : index
    %c0_23 = arith.constant 0 : index
    %25 = vector.load %arg11[%c0_22, %c0_23] : memref<1x128xf32, #tpu.memory_space<vmem>>, vector<1x128xf32>
    %26 = arith.truncf %22 : vector<64x64xf32> to vector<64x64xbf16>
    %cst_24 = arith.constant dense<0.000000e+00> : vector<64x128xf32>
    %27 = tpu.matmul %26, %23, %cst_24 {dimension_numbers = #tpu.dot_dimension_numbers<[1], [0], [0], [1], [0, 0, 1, 1], [], []>} : vector<64x64xbf16>, vector<64x128xbf16>, vector<64x128xf32> -> vector<64x128xf32>
    %28 = vector.broadcast %24 : vector<1x128xf32> to vector<64x128xf32>
    %29 = arith.mulf %27, %28 : vector<64x128xf32>
    %30 = vector.broadcast %25 : vector<1x128xf32> to vector<64x128xf32>
    %31 = arith.addf %29, %30 : vector<64x128xf32>
    %cst_25 = arith.constant 0.000000e+00 : f32
    %32 = vector.broadcast %cst_25 : f32 to vector<64x128xf32>
    %33 = arith.maximumf %31, %32 : vector<64x128xf32>
    %c0_26 = arith.constant 0 : index
    %c0_27 = arith.constant 0 : index
    %34 = vector.load %arg12[%c0_26, %c0_27] : memref<128x1024xbf16, #tpu.memory_space<vmem>>, vector<128x1024xbf16>
    %c0_28 = arith.constant 0 : index
    %c0_29 = arith.constant 0 : index
    %35 = vector.load %arg13[%c0_28, %c0_29] : memref<1x1024xf32, #tpu.memory_space<vmem>>, vector<1x1024xf32>
    %c0_30 = arith.constant 0 : index
    %c0_31 = arith.constant 0 : index
    %36 = vector.load %arg14[%c0_30, %c0_31] : memref<1x1024xf32, #tpu.memory_space<vmem>>, vector<1x1024xf32>
    %37 = arith.truncf %33 : vector<64x128xf32> to vector<64x128xbf16>
    %cst_32 = arith.constant dense<0.000000e+00> : vector<64x1024xf32>
    %38 = tpu.matmul %37, %34, %cst_32 {dimension_numbers = #tpu.dot_dimension_numbers<[1], [0], [0], [1], [0, 0, 1, 1], [], []>} : vector<64x128xbf16>, vector<128x1024xbf16>, vector<64x1024xf32> -> vector<64x1024xf32>
    %39 = vector.broadcast %35 : vector<1x1024xf32> to vector<64x1024xf32>
    %40 = arith.mulf %38, %39 : vector<64x1024xf32>
    %41 = vector.broadcast %36 : vector<1x1024xf32> to vector<64x1024xf32>
    %42 = arith.addf %40, %41 : vector<64x1024xf32>
    %cst_33 = arith.constant 0.000000e+00 : f32
    %43 = vector.broadcast %cst_33 : f32 to vector<64x1024xf32>
    %44 = arith.maximumf %42, %43 : vector<64x1024xf32>
    %c64_i32 = arith.constant 64 : i32
    %45 = arith.muli %arg1, %c64_i32 : i32
    %46 = tpu.iota {dimensions = array<i32: 0>} : vector<64x1xi32>
    %47 = vector.broadcast %45 : i32 to vector<64x1xi32>
    %48 = arith.addi %47, %46 : vector<64x1xi32>
    %c64_i32_34 = arith.constant 64 : i32
    %49 = vector.broadcast %c64_i32_34 : i32 to vector<64x1xi32>
    %50 = arith.cmpi slt, %48, %49 : vector<64x1xi32>
    %cst_35 = arith.constant 0xFF800000 : f32
    %51 = vector.shape_cast %50 : vector<64x1xi1> to vector<64x1xi1>
    %52 = vector.broadcast %51 : vector<64x1xi1> to vector<64x1024xi1>
    %53 = vector.broadcast %cst_35 : f32 to vector<64x1024xf32>
    %54 = arith.select %52, %44, %53 : vector<64x1024xi1>, vector<64x1024xf32>
    %cst_36 = arith.constant dense<0xFF800000> : vector<1024xf32>
    %55 = vector.multi_reduction <maximumf>, %54, %cst_36 [0] : vector<64x1024xf32> to vector<1024xf32>
    %56 = vector.shape_cast %55 : vector<1024xf32> to vector<1x1024xf32>
    %c0_i32 = arith.constant 0 : i32
    %57 = arith.cmpi eq, %arg1, %c0_i32 : i32
    %58 = arith.extui %57 : i1 to i32
    %c0_i32_37 = arith.constant 0 : i32
    %59 = arith.cmpi ne, %58, %c0_i32_37 : i32
    scf.if %59 {
      %cst_44 = arith.constant 0xFF800000 : f32
      %66 = vector.broadcast %cst_44 : f32 to vector<1x1024xf32>
      %c0_45 = arith.constant 0 : index
      %c0_46 = arith.constant 0 : index
      %67 = vector.load %arg25[%c0_45, %c0_46] : memref<1x1024xf32, #tpu.memory_space<vmem>>, vector<1x1024xf32>
      tpu.vector_store %arg25[%c0_45, %c0_46], %66 {strides = array<i32>} : memref<1x1024xf32, #tpu.memory_space<vmem>>, vector<1x1024xf32>,
    } else {
    }
    %c0_38 = arith.constant 0 : index
    %c0_39 = arith.constant 0 : index
    %60 = vector.load %arg25[%c0_38, %c0_39] : memref<1x1024xf32, #tpu.memory_space<vmem>>, vector<1x1024xf32>
    %61 = arith.maximumf %60, %56 : vector<1x1024xf32>
    %c0_40 = arith.constant 0 : index
    %c0_41 = arith.constant 0 : index
    %62 = vector.load %arg25[%c0_40, %c0_41] : memref<1x1024xf32, #tpu.memory_space<vmem>>, vector<1x1024xf32>
    tpu.vector_store %arg25[%c0_40, %c0_41], %61 {strides = array<i32>} : memref<1x1024xf32, #tpu.memory_space<vmem>>, vector<1x1024xf32>,
    %c0_i32_42 = arith.constant 0 : i32
    %63 = arith.cmpi eq, %arg1, %c0_i32_42 : i32
    %64 = arith.extui %63 : i1 to i32
    %c0_i32_43 = arith.constant 0 : i32
    %65 = arith.cmpi ne, %64, %c0_i32_43 : i32
    scf.if %65 {
      %c0_44 = arith.constant 0 : index
      %c0_45 = arith.constant 0 : index
      %66 = vector.load %arg25[%c0_44, %c0_45] : memref<1x1024xf32, #tpu.memory_space<vmem>>, vector<1x1024xf32>
      %c0_46 = arith.constant 0 : index
      %c0_47 = arith.constant 0 : index
      %67 = vector.load %arg15[%c0_46, %c0_47] : memref<1024x512xbf16, #tpu.memory_space<vmem>>, vector<1024x512xbf16>
      %c0_48 = arith.constant 0 : index
      %c0_49 = arith.constant 0 : index
      %68 = vector.load %arg16[%c0_48, %c0_49] : memref<1x512xf32, #tpu.memory_space<vmem>>, vector<1x512xf32>
      %c0_50 = arith.constant 0 : index
      %c0_51 = arith.constant 0 : index
      %69 = vector.load %arg17[%c0_50, %c0_51] : memref<1x512xf32, #tpu.memory_space<vmem>>, vector<1x512xf32>
      %70 = arith.truncf %66 : vector<1x1024xf32> to vector<1x1024xbf16>
      %cst_52 = arith.constant dense<0.000000e+00> : vector<1x512xf32>
      %71 = tpu.matmul %70, %67, %cst_52 {dimension_numbers = #tpu.dot_dimension_numbers<[1], [0], [0], [1], [0, 0, 1, 1], [], []>} : vector<1x1024xbf16>, vector<1024x512xbf16>, vector<1x512xf32> -> vector<1x512xf32>
      %72 = arith.mulf %71, %68 : vector<1x512xf32>
      %73 = arith.addf %72, %69 : vector<1x512xf32>
      %cst_53 = arith.constant 0.000000e+00 : f32
      %74 = vector.broadcast %cst_53 : f32 to vector<1x512xf32>
      %75 = arith.maximumf %73, %74 : vector<1x512xf32>
      %c0_54 = arith.constant 0 : index
      %c0_55 = arith.constant 0 : index
      %76 = vector.load %arg18[%c0_54, %c0_55] : memref<512x256xbf16, #tpu.memory_space<vmem>>, vector<512x256xbf16>
      %c0_56 = arith.constant 0 : index
      %c0_57 = arith.constant 0 : index
      %77 = vector.load %arg19[%c0_56, %c0_57] : memref<1x256xf32, #tpu.memory_space<vmem>>, vector<1x256xf32>
      %c0_58 = arith.constant 0 : index
      %c0_59 = arith.constant 0 : index
      %78 = vector.load %arg20[%c0_58, %c0_59] : memref<1x256xf32, #tpu.memory_space<vmem>>, vector<1x256xf32>
      %79 = arith.truncf %75 : vector<1x512xf32> to vector<1x512xbf16>
      %cst_60 = arith.constant dense<0.000000e+00> : vector<1x256xf32>
      %80 = tpu.matmul %79, %76, %cst_60 {dimension_numbers = #tpu.dot_dimension_numbers<[1], [0], [0], [1], [0, 0, 1, 1], [], []>} : vector<1x512xbf16>, vector<512x256xbf16>, vector<1x256xf32> -> vector<1x256xf32>
      %81 = arith.mulf %80, %77 : vector<1x256xf32>
      %82 = arith.addf %81, %78 : vector<1x256xf32>
      %cst_61 = arith.constant 0.000000e+00 : f32
      %83 = vector.broadcast %cst_61 : f32 to vector<1x256xf32>
      %84 = arith.maximumf %82, %83 : vector<1x256xf32>
      %c0_62 = arith.constant 0 : index
      %c0_63 = arith.constant 0 : index
      %85 = vector.load %arg21[%c0_62, %c0_63] : memref<256x4096xbf16, #tpu.memory_space<vmem>>, vector<256x4096xbf16>
      %c0_64 = arith.constant 0 : index
      %c0_65 = arith.constant 0 : index
      %86 = vector.load %arg22[%c0_64, %c0_65] : memref<1x4096xf32, #tpu.memory_space<vmem>>, vector<1x4096xf32>
      %c0_66 = arith.constant 0 : index
      %c0_67 = arith.constant 0 : index
      %87 = vector.load %arg23[%c0_66, %c0_67] : memref<1x4096xf32, #tpu.memory_space<vmem>>, vector<1x4096xf32>
      %88 = arith.truncf %84 : vector<1x256xf32> to vector<1x256xbf16>
      %cst_68 = arith.constant dense<0.000000e+00> : vector<1x4096xf32>
      %89 = tpu.matmul %88, %85, %cst_68 {dimension_numbers = #tpu.dot_dimension_numbers<[1], [0], [0], [1], [0, 0, 1, 1], [], []>} : vector<1x256xbf16>, vector<256x4096xbf16>, vector<1x4096xf32> -> vector<1x4096xf32>
      %90 = arith.mulf %89, %86 : vector<1x4096xf32>
      %91 = arith.addf %90, %87 : vector<1x4096xf32>
      %c0_69 = arith.constant 0 : index
      %c0_70 = arith.constant 0 : index
      %c0_71 = arith.constant 0 : index
      %92 = vector.load %arg24[%c0_69, %c0_70, %c0_71] : memref<1x1x4096xf32, #tpu.memory_space<vmem>>, vector<1x1x4096xf32>
      %93 = vector.shape_cast %92 : vector<1x1x4096xf32> to vector<1x4096xf32>
      %94 = vector.shape_cast %91 : vector<1x4096xf32> to vector<1x1x4096xf32>
      tpu.vector_store %arg24[%c0_69, %c0_70, %c0_71], %94 {strides = array<i32>} : memref<1x1x4096xf32, #tpu.memory_space<vmem>>, vector<1x1x4096xf32>,
    } else {
    }
    return
  }
  func.func @transform_0(%arg0: i32, %arg1: i32) -> (i32, i32, i32) {
    %c0_i32 = arith.constant 0 : i32
    %c0_i32_0 = arith.constant 0 : i32
    return %arg0, %arg1, %c0_i32 : i32, i32, i32
  }
  func.func @transform_1(%arg0: i32, %arg1: i32) -> (i32, i32, i32) {
    %c0_i32 = arith.constant 0 : i32
    %c0_i32_0 = arith.constant 0 : i32
    %c0_i32_1 = arith.constant 0 : i32
    return %arg0, %c0_i32, %c0_i32_0 : i32, i32, i32
  }
  func.func @transform_2(%arg0: i32, %arg1: i32) -> (i32, i32) {
    %c0_i32 = arith.constant 0 : i32
    %c0_i32_0 = arith.constant 0 : i32
    %c0_i32_1 = arith.constant 0 : i32
    return %c0_i32, %c0_i32_0 : i32, i32
  }
  func.func @transform_3(%arg0: i32, %arg1: i32) -> (i32, i32) {
    %c0_i32 = arith.constant 0 : i32
    %c0_i32_0 = arith.constant 0 : i32
    %c0_i32_1 = arith.constant 0 : i32
    return %c0_i32, %c0_i32_0 : i32, i32
  }
  func.func @transform_4(%arg0: i32, %arg1: i32) -> (i32, i32) {
    %c0_i32 = arith.constant 0 : i32
    %c0_i32_0 = arith.constant 0 : i32
    %c0_i32_1 = arith.constant 0 : i32
    return %c0_i32, %c0_i32_0 : i32, i32
  }
  func.func @transform_5(%arg0: i32, %arg1: i32) -> (i32, i32) {
    %c0_i32 = arith.constant 0 : i32
    %c0_i32_0 = arith.constant 0 : i32
    %c0_i32_1 = arith.constant 0 : i32
    return %c0_i32, %c0_i32_0 : i32, i32
  }
  func.func @transform_6(%arg0: i32, %arg1: i32) -> (i32, i32) {
    %c0_i32 = arith.constant 0 : i32
    %c0_i32_0 = arith.constant 0 : i32
    %c0_i32_1 = arith.constant 0 : i32
    return %c0_i32, %c0_i32_0 : i32, i32
  }
  func.func @transform_7(%arg0: i32, %arg1: i32) -> (i32, i32) {
    %c0_i32 = arith.constant 0 : i32
    %c0_i32_0 = arith.constant 0 : i32
    %c0_i32_1 = arith.constant 0 : i32
    return %c0_i32, %c0_i32_0 : i32, i32
  }
  func.func @transform_8(%arg0: i32, %arg1: i32) -> (i32, i32) {
    %c0_i32 = arith.constant 0 : i32
    %c0_i32_0 = arith.constant 0 : i32
    %c0_i32_1 = arith.constant 0 : i32
    return %c0_i32, %c0_i32_0 : i32, i32
  }
  func.func @transform_9(%arg0: i32, %arg1: i32) -> (i32, i32) {
    %c0_i32 = arith.constant 0 : i32
    %c0_i32_0 = arith.constant 0 : i32
    %c0_i32_1 = arith.constant 0 : i32
    return %c0_i32, %c0_i32_0 : i32, i32
  }
  func.func @transform_10(%arg0: i32, %arg1: i32) -> (i32, i32) {
    %c0_i32 = arith.constant 0 : i32
    %c0_i32_0 = arith.constant 0 : i32
    %c0_i32_1 = arith.constant 0 : i32
    return %c0_i32, %c0_i32_0 : i32, i32
  }
  func.func @transform_11(%arg0: i32, %arg1: i32) -> (i32, i32) {
    %c0_i32 = arith.constant 0 : i32
    %c0_i32_0 = arith.constant 0 : i32
    %c0_i32_1 = arith.constant 0 : i32
    return %c0_i32, %c0_i32_0 : i32, i32
  }
  func.func @transform_12(%arg0: i32, %arg1: i32) -> (i32, i32) {
    %c0_i32 = arith.constant 0 : i32
    %c0_i32_0 = arith.constant 0 : i32
    %c0_i32_1 = arith.constant 0 : i32
    return %c0_i32, %c0_i32_0 : i32, i32
  }
  func.func @transform_13(%arg0: i32, %arg1: i32) -> (i32, i32) {
    %c0_i32 = arith.constant 0 : i32
    %c0_i32_0 = arith.constant 0 : i32
    %c0_i32_1 = arith.constant 0 : i32
    return %c0_i32, %c0_i32_0 : i32, i32
  }
  func.func @transform_14(%arg0: i32, %arg1: i32) -> (i32, i32) {
    %c0_i32 = arith.constant 0 : i32
    %c0_i32_0 = arith.constant 0 : i32
    %c0_i32_1 = arith.constant 0 : i32
    return %c0_i32, %c0_i32_0 : i32, i32
  }
  func.func @transform_15(%arg0: i32, %arg1: i32) -> (i32, i32) {
    %c0_i32 = arith.constant 0 : i32
    %c0_i32_0 = arith.constant 0 : i32
    %c0_i32_1 = arith.constant 0 : i32
    return %c0_i32, %c0_i32_0 : i32, i32
  }
  func.func @transform_16(%arg0: i32, %arg1: i32) -> (i32, i32) {
    %c0_i32 = arith.constant 0 : i32
    %c0_i32_0 = arith.constant 0 : i32
    %c0_i32_1 = arith.constant 0 : i32
    return %c0_i32, %c0_i32_0 : i32, i32
  }
  func.func @transform_17(%arg0: i32, %arg1: i32) -> (i32, i32) {
    %c0_i32 = arith.constant 0 : i32
    %c0_i32_0 = arith.constant 0 : i32
    %c0_i32_1 = arith.constant 0 : i32
    return %c0_i32, %c0_i32_0 : i32, i32
  }
  func.func @transform_18(%arg0: i32, %arg1: i32) -> (i32, i32) {
    %c0_i32 = arith.constant 0 : i32
    %c0_i32_0 = arith.constant 0 : i32
    %c0_i32_1 = arith.constant 0 : i32
    return %c0_i32, %c0_i32_0 : i32, i32
  }
  func.func @transform_19(%arg0: i32, %arg1: i32) -> (i32, i32) {
    %c0_i32 = arith.constant 0 : i32
    %c0_i32_0 = arith.constant 0 : i32
    %c0_i32_1 = arith.constant 0 : i32
    return %c0_i32, %c0_i32_0 : i32, i32
  }
  func.func @transform_20(%arg0: i32, %arg1: i32) -> (i32, i32) {
    %c0_i32 = arith.constant 0 : i32
    %c0_i32_0 = arith.constant 0 : i32
    %c0_i32_1 = arith.constant 0 : i32
    return %c0_i32, %c0_i32_0 : i32, i32
  }
  func.func @transform_21(%arg0: i32, %arg1: i32) -> (i32, i32) {
    %c0_i32 = arith.constant 0 : i32
    %c0_i32_0 = arith.constant 0 : i32
    %c0_i32_1 = arith.constant 0 : i32
    return %c0_i32, %c0_i32_0 : i32, i32
  }
  func.func @transform_22(%arg0: i32, %arg1: i32) -> (i32, i32, i32) {
    %c0_i32 = arith.constant 0 : i32
    %c0_i32_0 = arith.constant 0 : i32
    %c0_i32_1 = arith.constant 0 : i32
    return %arg0, %c0_i32, %c0_i32_0 : i32, i32, i32
  }
}

module attributes {stable_mosaic.version = 11 : i64} {
  func.func @_fused_block_kernel(%arg0: i32, %arg1: i32, %arg2: memref<1x64x3xf32, #tpu.memory_space<vmem>>, %arg3: memref<3x64xf32, #tpu.memory_space<vmem>>, %arg4: memref<1x64xf32, #tpu.memory_space<vmem>>, %arg5: memref<1x64xf32, #tpu.memory_space<vmem>>, %arg6: memref<64x128xbf16, #tpu.memory_space<vmem>>, %arg7: memref<1x128xf32, #tpu.memory_space<vmem>>, %arg8: memref<1x128xf32, #tpu.memory_space<vmem>>, %arg9: memref<128x1024xbf16, #tpu.memory_space<vmem>>, %arg10: memref<1x1024xf32, #tpu.memory_space<vmem>>, %arg11: memref<1x1024xf32, #tpu.memory_space<vmem>>, %arg12: memref<1024x512xbf16, #tpu.memory_space<vmem>>, %arg13: memref<1x512xf32, #tpu.memory_space<vmem>>, %arg14: memref<1x512xf32, #tpu.memory_space<vmem>>, %arg15: memref<512x256xbf16, #tpu.memory_space<vmem>>, %arg16: memref<1x256xf32, #tpu.memory_space<vmem>>, %arg17: memref<1x256xf32, #tpu.memory_space<vmem>>, %arg18: memref<256x9xbf16, #tpu.memory_space<vmem>>, %arg19: memref<1x9xf32, #tpu.memory_space<vmem>>, %arg20: memref<1x9xf32, #tpu.memory_space<vmem>>, %arg21: memref<1x1x9xf32, #tpu.memory_space<vmem>>, %arg22: memref<1x1024xf32, #tpu.memory_space<vmem>>) attributes {dimension_semantics = [#tpu.dimension_semantics<parallel>, #tpu.dimension_semantics<arbitrary>], iteration_bounds = array<i64: 2, 1>, scalar_prefetch = 0 : i64, scratch_operands = 1 : i64, tpu.core_type = #tpu.core_type<tc>, window_params = [{transform_indices = @transform_0, window_bounds = array<i64: 1, 64, 3>}, {pipeline_mode = #tpu.pipeline_mode<synchronous>, transform_indices = @transform_1, window_bounds = array<i64: 3, 64>}, {pipeline_mode = #tpu.pipeline_mode<synchronous>, transform_indices = @transform_2, window_bounds = array<i64: 1, 64>}, {pipeline_mode = #tpu.pipeline_mode<synchronous>, transform_indices = @transform_3, window_bounds = array<i64: 1, 64>}, {pipeline_mode = #tpu.pipeline_mode<synchronous>, transform_indices = @transform_4, window_bounds = array<i64: 64, 128>}, {pipeline_mode = #tpu.pipeline_mode<synchronous>, transform_indices = @transform_5, window_bounds = array<i64: 1, 128>}, {pipeline_mode = #tpu.pipeline_mode<synchronous>, transform_indices = @transform_6, window_bounds = array<i64: 1, 128>}, {pipeline_mode = #tpu.pipeline_mode<synchronous>, transform_indices = @transform_7, window_bounds = array<i64: 128, 1024>}, {pipeline_mode = #tpu.pipeline_mode<synchronous>, transform_indices = @transform_8, window_bounds = array<i64: 1, 1024>}, {pipeline_mode = #tpu.pipeline_mode<synchronous>, transform_indices = @transform_9, window_bounds = array<i64: 1, 1024>}, {pipeline_mode = #tpu.pipeline_mode<synchronous>, transform_indices = @transform_10, window_bounds = array<i64: 1024, 512>}, {pipeline_mode = #tpu.pipeline_mode<synchronous>, transform_indices = @transform_11, window_bounds = array<i64: 1, 512>}, {pipeline_mode = #tpu.pipeline_mode<synchronous>, transform_indices = @transform_12, window_bounds = array<i64: 1, 512>}, {pipeline_mode = #tpu.pipeline_mode<synchronous>, transform_indices = @transform_13, window_bounds = array<i64: 512, 256>}, {pipeline_mode = #tpu.pipeline_mode<synchronous>, transform_indices = @transform_14, window_bounds = array<i64: 1, 256>}, {pipeline_mode = #tpu.pipeline_mode<synchronous>, transform_indices = @transform_15, window_bounds = array<i64: 1, 256>}, {pipeline_mode = #tpu.pipeline_mode<synchronous>, transform_indices = @transform_16, window_bounds = array<i64: 256, 9>}, {pipeline_mode = #tpu.pipeline_mode<synchronous>, transform_indices = @transform_17, window_bounds = array<i64: 1, 9>}, {pipeline_mode = #tpu.pipeline_mode<synchronous>, transform_indices = @transform_18, window_bounds = array<i64: 1, 9>}, {transform_indices = @transform_19, window_bounds = array<i64: 1, 1, 9>}]} {
    %c0 = arith.constant 0 : index
    %c0_0 = arith.constant 0 : index
    %c0_1 = arith.constant 0 : index
    %0 = vector.load %arg2[%c0, %c0_0, %c0_1] : memref<1x64x3xf32, #tpu.memory_space<vmem>>, vector<1x64x3xf32>
    %1 = vector.shape_cast %0 : vector<1x64x3xf32> to vector<64x3xf32>
    %c0_2 = arith.constant 0 : index
    %c0_3 = arith.constant 0 : index
    %2 = vector.load %arg3[%c0_2, %c0_3] : memref<3x64xf32, #tpu.memory_space<vmem>>, vector<3x64xf32>
    %c0_4 = arith.constant 0 : index
    %c0_5 = arith.constant 0 : index
    %3 = vector.load %arg4[%c0_4, %c0_5] : memref<1x64xf32, #tpu.memory_space<vmem>>, vector<1x64xf32>
    %c0_6 = arith.constant 0 : index
    %c0_7 = arith.constant 0 : index
    %4 = vector.load %arg5[%c0_6, %c0_7] : memref<1x64xf32, #tpu.memory_space<vmem>>, vector<1x64xf32>
    %cst = arith.constant dense<0.000000e+00> : vector<64x64xf32>
    %5 = tpu.matmul %1, %2, %cst {dimension_numbers = #tpu.dot_dimension_numbers<[1], [0], [0], [1], [0, 0, 1, 1], [], []>} : vector<64x3xf32>, vector<3x64xf32>, vector<64x64xf32> -> vector<64x64xf32>
    %6 = vector.broadcast %3 : vector<1x64xf32> to vector<64x64xf32>
    %7 = arith.mulf %5, %6 : vector<64x64xf32>
    %8 = vector.broadcast %4 : vector<1x64xf32> to vector<64x64xf32>
    %9 = arith.addf %7, %8 : vector<64x64xf32>
    %cst_8 = arith.constant 0.000000e+00 : f32
    %10 = vector.broadcast %cst_8 : f32 to vector<64x64xf32>
    %11 = arith.maximumf %9, %10 : vector<64x64xf32>
    %c0_9 = arith.constant 0 : index
    %c0_10 = arith.constant 0 : index
    %12 = vector.load %arg6[%c0_9, %c0_10] : memref<64x128xbf16, #tpu.memory_space<vmem>>, vector<64x128xbf16>
    %c0_11 = arith.constant 0 : index
    %c0_12 = arith.constant 0 : index
    %13 = vector.load %arg7[%c0_11, %c0_12] : memref<1x128xf32, #tpu.memory_space<vmem>>, vector<1x128xf32>
    %c0_13 = arith.constant 0 : index
    %c0_14 = arith.constant 0 : index
    %14 = vector.load %arg8[%c0_13, %c0_14] : memref<1x128xf32, #tpu.memory_space<vmem>>, vector<1x128xf32>
    %15 = arith.truncf %11 : vector<64x64xf32> to vector<64x64xbf16>
    %cst_15 = arith.constant dense<0.000000e+00> : vector<64x128xf32>
    %16 = tpu.matmul %15, %12, %cst_15 {dimension_numbers = #tpu.dot_dimension_numbers<[1], [0], [0], [1], [0, 0, 1, 1], [], []>} : vector<64x64xbf16>, vector<64x128xbf16>, vector<64x128xf32> -> vector<64x128xf32>
    %17 = vector.broadcast %13 : vector<1x128xf32> to vector<64x128xf32>
    %18 = arith.mulf %16, %17 : vector<64x128xf32>
    %19 = vector.broadcast %14 : vector<1x128xf32> to vector<64x128xf32>
    %20 = arith.addf %18, %19 : vector<64x128xf32>
    %cst_16 = arith.constant 0.000000e+00 : f32
    %21 = vector.broadcast %cst_16 : f32 to vector<64x128xf32>
    %22 = arith.maximumf %20, %21 : vector<64x128xf32>
    %c0_17 = arith.constant 0 : index
    %c0_18 = arith.constant 0 : index
    %23 = vector.load %arg9[%c0_17, %c0_18] : memref<128x1024xbf16, #tpu.memory_space<vmem>>, vector<128x1024xbf16>
    %c0_19 = arith.constant 0 : index
    %c0_20 = arith.constant 0 : index
    %24 = vector.load %arg10[%c0_19, %c0_20] : memref<1x1024xf32, #tpu.memory_space<vmem>>, vector<1x1024xf32>
    %c0_21 = arith.constant 0 : index
    %c0_22 = arith.constant 0 : index
    %25 = vector.load %arg11[%c0_21, %c0_22] : memref<1x1024xf32, #tpu.memory_space<vmem>>, vector<1x1024xf32>
    %26 = arith.truncf %22 : vector<64x128xf32> to vector<64x128xbf16>
    %cst_23 = arith.constant dense<0.000000e+00> : vector<64x1024xf32>
    %27 = tpu.matmul %26, %23, %cst_23 {dimension_numbers = #tpu.dot_dimension_numbers<[1], [0], [0], [1], [0, 0, 1, 1], [], []>} : vector<64x128xbf16>, vector<128x1024xbf16>, vector<64x1024xf32> -> vector<64x1024xf32>
    %28 = vector.broadcast %24 : vector<1x1024xf32> to vector<64x1024xf32>
    %29 = arith.mulf %27, %28 : vector<64x1024xf32>
    %30 = vector.broadcast %25 : vector<1x1024xf32> to vector<64x1024xf32>
    %31 = arith.addf %29, %30 : vector<64x1024xf32>
    %cst_24 = arith.constant 0.000000e+00 : f32
    %32 = vector.broadcast %cst_24 : f32 to vector<64x1024xf32>
    %33 = arith.maximumf %31, %32 : vector<64x1024xf32>
    %c64_i32 = arith.constant 64 : i32
    %34 = arith.muli %arg1, %c64_i32 : i32
    %35 = tpu.iota {dimensions = array<i32: 0>} : vector<64x1xi32>
    %36 = vector.broadcast %34 : i32 to vector<64x1xi32>
    %37 = arith.addi %36, %35 : vector<64x1xi32>
    %c64_i32_25 = arith.constant 64 : i32
    %38 = vector.broadcast %c64_i32_25 : i32 to vector<64x1xi32>
    %39 = arith.cmpi slt, %37, %38 : vector<64x1xi32>
    %cst_26 = arith.constant 0xFF800000 : f32
    %40 = vector.shape_cast %39 : vector<64x1xi1> to vector<64x1xi1>
    %41 = vector.broadcast %40 : vector<64x1xi1> to vector<64x1024xi1>
    %42 = vector.broadcast %cst_26 : f32 to vector<64x1024xf32>
    %43 = arith.select %41, %33, %42 : vector<64x1024xi1>, vector<64x1024xf32>
    %cst_27 = arith.constant dense<0xFF800000> : vector<1024xf32>
    %44 = vector.multi_reduction <maximumf>, %43, %cst_27 [0] : vector<64x1024xf32> to vector<1024xf32>
    %45 = vector.shape_cast %44 : vector<1024xf32> to vector<1x1024xf32>
    %c0_i32 = arith.constant 0 : i32
    %46 = arith.cmpi eq, %arg1, %c0_i32 : i32
    %47 = arith.extui %46 : i1 to i32
    %c0_i32_28 = arith.constant 0 : i32
    %48 = arith.cmpi ne, %47, %c0_i32_28 : i32
    scf.if %48 {
      %cst_35 = arith.constant 0xFF800000 : f32
      %55 = vector.broadcast %cst_35 : f32 to vector<1x1024xf32>
      %c0_36 = arith.constant 0 : index
      %c0_37 = arith.constant 0 : index
      %56 = vector.load %arg22[%c0_36, %c0_37] : memref<1x1024xf32, #tpu.memory_space<vmem>>, vector<1x1024xf32>
      tpu.vector_store %arg22[%c0_36, %c0_37], %55 {strides = array<i32>} : memref<1x1024xf32, #tpu.memory_space<vmem>>, vector<1x1024xf32>,
    } else {
    }
    %c0_29 = arith.constant 0 : index
    %c0_30 = arith.constant 0 : index
    %49 = vector.load %arg22[%c0_29, %c0_30] : memref<1x1024xf32, #tpu.memory_space<vmem>>, vector<1x1024xf32>
    %50 = arith.maximumf %49, %45 : vector<1x1024xf32>
    %c0_31 = arith.constant 0 : index
    %c0_32 = arith.constant 0 : index
    %51 = vector.load %arg22[%c0_31, %c0_32] : memref<1x1024xf32, #tpu.memory_space<vmem>>, vector<1x1024xf32>
    tpu.vector_store %arg22[%c0_31, %c0_32], %50 {strides = array<i32>} : memref<1x1024xf32, #tpu.memory_space<vmem>>, vector<1x1024xf32>,
    %c0_i32_33 = arith.constant 0 : i32
    %52 = arith.cmpi eq, %arg1, %c0_i32_33 : i32
    %53 = arith.extui %52 : i1 to i32
    %c0_i32_34 = arith.constant 0 : i32
    %54 = arith.cmpi ne, %53, %c0_i32_34 : i32
    scf.if %54 {
      %c0_35 = arith.constant 0 : index
      %c0_36 = arith.constant 0 : index
      %55 = vector.load %arg22[%c0_35, %c0_36] : memref<1x1024xf32, #tpu.memory_space<vmem>>, vector<1x1024xf32>
      %c0_37 = arith.constant 0 : index
      %c0_38 = arith.constant 0 : index
      %56 = vector.load %arg12[%c0_37, %c0_38] : memref<1024x512xbf16, #tpu.memory_space<vmem>>, vector<1024x512xbf16>
      %c0_39 = arith.constant 0 : index
      %c0_40 = arith.constant 0 : index
      %57 = vector.load %arg13[%c0_39, %c0_40] : memref<1x512xf32, #tpu.memory_space<vmem>>, vector<1x512xf32>
      %c0_41 = arith.constant 0 : index
      %c0_42 = arith.constant 0 : index
      %58 = vector.load %arg14[%c0_41, %c0_42] : memref<1x512xf32, #tpu.memory_space<vmem>>, vector<1x512xf32>
      %59 = arith.truncf %55 : vector<1x1024xf32> to vector<1x1024xbf16>
      %cst_43 = arith.constant dense<0.000000e+00> : vector<1x512xf32>
      %60 = tpu.matmul %59, %56, %cst_43 {dimension_numbers = #tpu.dot_dimension_numbers<[1], [0], [0], [1], [0, 0, 1, 1], [], []>} : vector<1x1024xbf16>, vector<1024x512xbf16>, vector<1x512xf32> -> vector<1x512xf32>
      %61 = arith.mulf %60, %57 : vector<1x512xf32>
      %62 = arith.addf %61, %58 : vector<1x512xf32>
      %cst_44 = arith.constant 0.000000e+00 : f32
      %63 = vector.broadcast %cst_44 : f32 to vector<1x512xf32>
      %64 = arith.maximumf %62, %63 : vector<1x512xf32>
      %c0_45 = arith.constant 0 : index
      %c0_46 = arith.constant 0 : index
      %65 = vector.load %arg15[%c0_45, %c0_46] : memref<512x256xbf16, #tpu.memory_space<vmem>>, vector<512x256xbf16>
      %c0_47 = arith.constant 0 : index
      %c0_48 = arith.constant 0 : index
      %66 = vector.load %arg16[%c0_47, %c0_48] : memref<1x256xf32, #tpu.memory_space<vmem>>, vector<1x256xf32>
      %c0_49 = arith.constant 0 : index
      %c0_50 = arith.constant 0 : index
      %67 = vector.load %arg17[%c0_49, %c0_50] : memref<1x256xf32, #tpu.memory_space<vmem>>, vector<1x256xf32>
      %68 = arith.truncf %64 : vector<1x512xf32> to vector<1x512xbf16>
      %cst_51 = arith.constant dense<0.000000e+00> : vector<1x256xf32>
      %69 = tpu.matmul %68, %65, %cst_51 {dimension_numbers = #tpu.dot_dimension_numbers<[1], [0], [0], [1], [0, 0, 1, 1], [], []>} : vector<1x512xbf16>, vector<512x256xbf16>, vector<1x256xf32> -> vector<1x256xf32>
      %70 = arith.mulf %69, %66 : vector<1x256xf32>
      %71 = arith.addf %70, %67 : vector<1x256xf32>
      %cst_52 = arith.constant 0.000000e+00 : f32
      %72 = vector.broadcast %cst_52 : f32 to vector<1x256xf32>
      %73 = arith.maximumf %71, %72 : vector<1x256xf32>
      %c0_53 = arith.constant 0 : index
      %c0_54 = arith.constant 0 : index
      %74 = vector.load %arg18[%c0_53, %c0_54] : memref<256x9xbf16, #tpu.memory_space<vmem>>, vector<256x9xbf16>
      %c0_55 = arith.constant 0 : index
      %c0_56 = arith.constant 0 : index
      %75 = vector.load %arg19[%c0_55, %c0_56] : memref<1x9xf32, #tpu.memory_space<vmem>>, vector<1x9xf32>
      %c0_57 = arith.constant 0 : index
      %c0_58 = arith.constant 0 : index
      %76 = vector.load %arg20[%c0_57, %c0_58] : memref<1x9xf32, #tpu.memory_space<vmem>>, vector<1x9xf32>
      %77 = arith.truncf %73 : vector<1x256xf32> to vector<1x256xbf16>
      %cst_59 = arith.constant dense<0.000000e+00> : vector<1x9xf32>
      %78 = tpu.matmul %77, %74, %cst_59 {dimension_numbers = #tpu.dot_dimension_numbers<[1], [0], [0], [1], [0, 0, 1, 1], [], []>} : vector<1x256xbf16>, vector<256x9xbf16>, vector<1x9xf32> -> vector<1x9xf32>
      %79 = arith.mulf %78, %75 : vector<1x9xf32>
      %80 = arith.addf %79, %76 : vector<1x9xf32>
      %c0_60 = arith.constant 0 : index
      %c0_61 = arith.constant 0 : index
      %c0_62 = arith.constant 0 : index
      %81 = vector.load %arg21[%c0_60, %c0_61, %c0_62] : memref<1x1x9xf32, #tpu.memory_space<vmem>>, vector<1x1x9xf32>
      %82 = vector.shape_cast %81 : vector<1x1x9xf32> to vector<1x9xf32>
      %83 = vector.shape_cast %80 : vector<1x9xf32> to vector<1x1x9xf32>
      tpu.vector_store %arg21[%c0_60, %c0_61, %c0_62], %83 {strides = array<i32>} : memref<1x1x9xf32, #tpu.memory_space<vmem>>, vector<1x1x9xf32>,
    } else {
    }
    return
  }
  func.func @transform_0(%arg0: i32, %arg1: i32) -> (i32, i32, i32) {
    %c0_i32 = arith.constant 0 : i32
    %c0_i32_0 = arith.constant 0 : i32
    return %arg0, %arg1, %c0_i32 : i32, i32, i32
  }
  func.func @transform_1(%arg0: i32, %arg1: i32) -> (i32, i32) {
    %c0_i32 = arith.constant 0 : i32
    %c0_i32_0 = arith.constant 0 : i32
    %c0_i32_1 = arith.constant 0 : i32
    return %c0_i32, %c0_i32_0 : i32, i32
  }
  func.func @transform_2(%arg0: i32, %arg1: i32) -> (i32, i32) {
    %c0_i32 = arith.constant 0 : i32
    %c0_i32_0 = arith.constant 0 : i32
    %c0_i32_1 = arith.constant 0 : i32
    return %c0_i32, %c0_i32_0 : i32, i32
  }
  func.func @transform_3(%arg0: i32, %arg1: i32) -> (i32, i32) {
    %c0_i32 = arith.constant 0 : i32
    %c0_i32_0 = arith.constant 0 : i32
    %c0_i32_1 = arith.constant 0 : i32
    return %c0_i32, %c0_i32_0 : i32, i32
  }
  func.func @transform_4(%arg0: i32, %arg1: i32) -> (i32, i32) {
    %c0_i32 = arith.constant 0 : i32
    %c0_i32_0 = arith.constant 0 : i32
    %c0_i32_1 = arith.constant 0 : i32
    return %c0_i32, %c0_i32_0 : i32, i32
  }
  func.func @transform_5(%arg0: i32, %arg1: i32) -> (i32, i32) {
    %c0_i32 = arith.constant 0 : i32
    %c0_i32_0 = arith.constant 0 : i32
    %c0_i32_1 = arith.constant 0 : i32
    return %c0_i32, %c0_i32_0 : i32, i32
  }
  func.func @transform_6(%arg0: i32, %arg1: i32) -> (i32, i32) {
    %c0_i32 = arith.constant 0 : i32
    %c0_i32_0 = arith.constant 0 : i32
    %c0_i32_1 = arith.constant 0 : i32
    return %c0_i32, %c0_i32_0 : i32, i32
  }
  func.func @transform_7(%arg0: i32, %arg1: i32) -> (i32, i32) {
    %c0_i32 = arith.constant 0 : i32
    %c0_i32_0 = arith.constant 0 : i32
    %c0_i32_1 = arith.constant 0 : i32
    return %c0_i32, %c0_i32_0 : i32, i32
  }
  func.func @transform_8(%arg0: i32, %arg1: i32) -> (i32, i32) {
    %c0_i32 = arith.constant 0 : i32
    %c0_i32_0 = arith.constant 0 : i32
    %c0_i32_1 = arith.constant 0 : i32
    return %c0_i32, %c0_i32_0 : i32, i32
  }
  func.func @transform_9(%arg0: i32, %arg1: i32) -> (i32, i32) {
    %c0_i32 = arith.constant 0 : i32
    %c0_i32_0 = arith.constant 0 : i32
    %c0_i32_1 = arith.constant 0 : i32
    return %c0_i32, %c0_i32_0 : i32, i32
  }
  func.func @transform_10(%arg0: i32, %arg1: i32) -> (i32, i32) {
    %c0_i32 = arith.constant 0 : i32
    %c0_i32_0 = arith.constant 0 : i32
    %c0_i32_1 = arith.constant 0 : i32
    return %c0_i32, %c0_i32_0 : i32, i32
  }
  func.func @transform_11(%arg0: i32, %arg1: i32) -> (i32, i32) {
    %c0_i32 = arith.constant 0 : i32
    %c0_i32_0 = arith.constant 0 : i32
    %c0_i32_1 = arith.constant 0 : i32
    return %c0_i32, %c0_i32_0 : i32, i32
  }
  func.func @transform_12(%arg0: i32, %arg1: i32) -> (i32, i32) {
    %c0_i32 = arith.constant 0 : i32
    %c0_i32_0 = arith.constant 0 : i32
    %c0_i32_1 = arith.constant 0 : i32
    return %c0_i32, %c0_i32_0 : i32, i32
  }
  func.func @transform_13(%arg0: i32, %arg1: i32) -> (i32, i32) {
    %c0_i32 = arith.constant 0 : i32
    %c0_i32_0 = arith.constant 0 : i32
    %c0_i32_1 = arith.constant 0 : i32
    return %c0_i32, %c0_i32_0 : i32, i32
  }
  func.func @transform_14(%arg0: i32, %arg1: i32) -> (i32, i32) {
    %c0_i32 = arith.constant 0 : i32
    %c0_i32_0 = arith.constant 0 : i32
    %c0_i32_1 = arith.constant 0 : i32
    return %c0_i32, %c0_i32_0 : i32, i32
  }
  func.func @transform_15(%arg0: i32, %arg1: i32) -> (i32, i32) {
    %c0_i32 = arith.constant 0 : i32
    %c0_i32_0 = arith.constant 0 : i32
    %c0_i32_1 = arith.constant 0 : i32
    return %c0_i32, %c0_i32_0 : i32, i32
  }
  func.func @transform_16(%arg0: i32, %arg1: i32) -> (i32, i32) {
    %c0_i32 = arith.constant 0 : i32
    %c0_i32_0 = arith.constant 0 : i32
    %c0_i32_1 = arith.constant 0 : i32
    return %c0_i32, %c0_i32_0 : i32, i32
  }
  func.func @transform_17(%arg0: i32, %arg1: i32) -> (i32, i32) {
    %c0_i32 = arith.constant 0 : i32
    %c0_i32_0 = arith.constant 0 : i32
    %c0_i32_1 = arith.constant 0 : i32
    return %c0_i32, %c0_i32_0 : i32, i32
  }
  func.func @transform_18(%arg0: i32, %arg1: i32) -> (i32, i32) {
    %c0_i32 = arith.constant 0 : i32
    %c0_i32_0 = arith.constant 0 : i32
    %c0_i32_1 = arith.constant 0 : i32
    return %c0_i32, %c0_i32_0 : i32, i32
  }
  func.func @transform_19(%arg0: i32, %arg1: i32) -> (i32, i32, i32) {
    %c0_i32 = arith.constant 0 : i32
    %c0_i32_0 = arith.constant 0 : i32
    %c0_i32_1 = arith.constant 0 : i32
    return %arg0, %c0_i32, %c0_i32_0 : i32, i32, i32
  }
}

module attributes {stable_mosaic.version = 11 : i64} {
  func.func @_fused_block_kernel(%arg0: i32, %arg1: i32, %arg2: memref<1x64x3xf32, #tpu.memory_space<vmem>>, %arg3: memref<1x3x64xf32, #tpu.memory_space<vmem>>, %arg4: memref<1x64xf32, #tpu.memory_space<vmem>>, %arg5: memref<1x64xf32, #tpu.memory_space<vmem>>, %arg6: memref<1x64x128xbf16, #tpu.memory_space<vmem>>, %arg7: memref<1x128xf32, #tpu.memory_space<vmem>>, %arg8: memref<1x128xf32, #tpu.memory_space<vmem>>, %arg9: memref<128x1024xbf16, #tpu.memory_space<vmem>>, %arg10: memref<1x1024xf32, #tpu.memory_space<vmem>>, %arg11: memref<1x1024xf32, #tpu.memory_space<vmem>>, %arg12: memref<1024x512xbf16, #tpu.memory_space<vmem>>, %arg13: memref<1x512xf32, #tpu.memory_space<vmem>>, %arg14: memref<1x512xf32, #tpu.memory_space<vmem>>, %arg15: memref<1x1x512xf32, #tpu.memory_space<vmem>>, %arg16: memref<1x1024xf32, #tpu.memory_space<vmem>>) attributes {dimension_semantics = [#tpu.dimension_semantics<parallel>, #tpu.dimension_semantics<arbitrary>], iteration_bounds = array<i64: 2, 1>, scalar_prefetch = 0 : i64, scratch_operands = 1 : i64, tpu.core_type = #tpu.core_type<tc>, window_params = [{transform_indices = @transform_0, window_bounds = array<i64: 1, 64, 3>}, {transform_indices = @transform_1, window_bounds = array<i64: 1, 3, 64>}, {pipeline_mode = #tpu.pipeline_mode<synchronous>, transform_indices = @transform_2, window_bounds = array<i64: 1, 64>}, {pipeline_mode = #tpu.pipeline_mode<synchronous>, transform_indices = @transform_3, window_bounds = array<i64: 1, 64>}, {transform_indices = @transform_4, window_bounds = array<i64: 1, 64, 128>}, {pipeline_mode = #tpu.pipeline_mode<synchronous>, transform_indices = @transform_5, window_bounds = array<i64: 1, 128>}, {pipeline_mode = #tpu.pipeline_mode<synchronous>, transform_indices = @transform_6, window_bounds = array<i64: 1, 128>}, {pipeline_mode = #tpu.pipeline_mode<synchronous>, transform_indices = @transform_7, window_bounds = array<i64: 128, 1024>}, {pipeline_mode = #tpu.pipeline_mode<synchronous>, transform_indices = @transform_8, window_bounds = array<i64: 1, 1024>}, {pipeline_mode = #tpu.pipeline_mode<synchronous>, transform_indices = @transform_9, window_bounds = array<i64: 1, 1024>}, {pipeline_mode = #tpu.pipeline_mode<synchronous>, transform_indices = @transform_10, window_bounds = array<i64: 1024, 512>}, {pipeline_mode = #tpu.pipeline_mode<synchronous>, transform_indices = @transform_11, window_bounds = array<i64: 1, 512>}, {pipeline_mode = #tpu.pipeline_mode<synchronous>, transform_indices = @transform_12, window_bounds = array<i64: 1, 512>}, {transform_indices = @transform_13, window_bounds = array<i64: 1, 1, 512>}]} {
    %c0 = arith.constant 0 : index
    %c0_0 = arith.constant 0 : index
    %c0_1 = arith.constant 0 : index
    %0 = vector.load %arg2[%c0, %c0_0, %c0_1] : memref<1x64x3xf32, #tpu.memory_space<vmem>>, vector<1x64x3xf32>
    %1 = vector.shape_cast %0 : vector<1x64x3xf32> to vector<64x3xf32>
    %c0_2 = arith.constant 0 : index
    %c0_3 = arith.constant 0 : index
    %c0_4 = arith.constant 0 : index
    %2 = vector.load %arg3[%c0_2, %c0_3, %c0_4] : memref<1x3x64xf32, #tpu.memory_space<vmem>>, vector<1x3x64xf32>
    %3 = vector.shape_cast %2 : vector<1x3x64xf32> to vector<3x64xf32>
    %c0_5 = arith.constant 0 : index
    %c0_6 = arith.constant 0 : index
    %4 = vector.load %arg4[%c0_5, %c0_6] : memref<1x64xf32, #tpu.memory_space<vmem>>, vector<1x64xf32>
    %c0_7 = arith.constant 0 : index
    %c0_8 = arith.constant 0 : index
    %5 = vector.load %arg5[%c0_7, %c0_8] : memref<1x64xf32, #tpu.memory_space<vmem>>, vector<1x64xf32>
    %cst = arith.constant dense<0.000000e+00> : vector<64x64xf32>
    %6 = tpu.matmul %1, %3, %cst {dimension_numbers = #tpu.dot_dimension_numbers<[1], [0], [0], [1], [0, 0, 1, 1], [], []>} : vector<64x3xf32>, vector<3x64xf32>, vector<64x64xf32> -> vector<64x64xf32>
    %7 = vector.broadcast %4 : vector<1x64xf32> to vector<64x64xf32>
    %8 = arith.mulf %6, %7 : vector<64x64xf32>
    %9 = vector.broadcast %5 : vector<1x64xf32> to vector<64x64xf32>
    %10 = arith.addf %8, %9 : vector<64x64xf32>
    %cst_9 = arith.constant 0.000000e+00 : f32
    %11 = vector.broadcast %cst_9 : f32 to vector<64x64xf32>
    %12 = arith.maximumf %10, %11 : vector<64x64xf32>
    %c0_10 = arith.constant 0 : index
    %c0_11 = arith.constant 0 : index
    %c0_12 = arith.constant 0 : index
    %13 = vector.load %arg6[%c0_10, %c0_11, %c0_12] : memref<1x64x128xbf16, #tpu.memory_space<vmem>>, vector<1x64x128xbf16>
    %14 = vector.shape_cast %13 : vector<1x64x128xbf16> to vector<64x128xbf16>
    %c0_13 = arith.constant 0 : index
    %c0_14 = arith.constant 0 : index
    %15 = vector.load %arg7[%c0_13, %c0_14] : memref<1x128xf32, #tpu.memory_space<vmem>>, vector<1x128xf32>
    %c0_15 = arith.constant 0 : index
    %c0_16 = arith.constant 0 : index
    %16 = vector.load %arg8[%c0_15, %c0_16] : memref<1x128xf32, #tpu.memory_space<vmem>>, vector<1x128xf32>
    %17 = arith.truncf %12 : vector<64x64xf32> to vector<64x64xbf16>
    %cst_17 = arith.constant dense<0.000000e+00> : vector<64x128xf32>
    %18 = tpu.matmul %17, %14, %cst_17 {dimension_numbers = #tpu.dot_dimension_numbers<[1], [0], [0], [1], [0, 0, 1, 1], [], []>} : vector<64x64xbf16>, vector<64x128xbf16>, vector<64x128xf32> -> vector<64x128xf32>
    %19 = vector.broadcast %15 : vector<1x128xf32> to vector<64x128xf32>
    %20 = arith.mulf %18, %19 : vector<64x128xf32>
    %21 = vector.broadcast %16 : vector<1x128xf32> to vector<64x128xf32>
    %22 = arith.addf %20, %21 : vector<64x128xf32>
    %cst_18 = arith.constant 0.000000e+00 : f32
    %23 = vector.broadcast %cst_18 : f32 to vector<64x128xf32>
    %24 = arith.maximumf %22, %23 : vector<64x128xf32>
    %c0_19 = arith.constant 0 : index
    %c0_20 = arith.constant 0 : index
    %25 = vector.load %arg9[%c0_19, %c0_20] : memref<128x1024xbf16, #tpu.memory_space<vmem>>, vector<128x1024xbf16>
    %c0_21 = arith.constant 0 : index
    %c0_22 = arith.constant 0 : index
    %26 = vector.load %arg10[%c0_21, %c0_22] : memref<1x1024xf32, #tpu.memory_space<vmem>>, vector<1x1024xf32>
    %c0_23 = arith.constant 0 : index
    %c0_24 = arith.constant 0 : index
    %27 = vector.load %arg11[%c0_23, %c0_24] : memref<1x1024xf32, #tpu.memory_space<vmem>>, vector<1x1024xf32>
    %28 = arith.truncf %24 : vector<64x128xf32> to vector<64x128xbf16>
    %cst_25 = arith.constant dense<0.000000e+00> : vector<64x1024xf32>
    %29 = tpu.matmul %28, %25, %cst_25 {dimension_numbers = #tpu.dot_dimension_numbers<[1], [0], [0], [1], [0, 0, 1, 1], [], []>} : vector<64x128xbf16>, vector<128x1024xbf16>, vector<64x1024xf32> -> vector<64x1024xf32>
    %30 = vector.broadcast %26 : vector<1x1024xf32> to vector<64x1024xf32>
    %31 = arith.mulf %29, %30 : vector<64x1024xf32>
    %32 = vector.broadcast %27 : vector<1x1024xf32> to vector<64x1024xf32>
    %33 = arith.addf %31, %32 : vector<64x1024xf32>
    %c64_i32 = arith.constant 64 : i32
    %34 = arith.muli %arg1, %c64_i32 : i32
    %35 = tpu.iota {dimensions = array<i32: 0>} : vector<64x1xi32>
    %36 = vector.broadcast %34 : i32 to vector<64x1xi32>
    %37 = arith.addi %36, %35 : vector<64x1xi32>
    %c64_i32_26 = arith.constant 64 : i32
    %38 = vector.broadcast %c64_i32_26 : i32 to vector<64x1xi32>
    %39 = arith.cmpi slt, %37, %38 : vector<64x1xi32>
    %cst_27 = arith.constant 0xFF800000 : f32
    %40 = vector.shape_cast %39 : vector<64x1xi1> to vector<64x1xi1>
    %41 = vector.broadcast %40 : vector<64x1xi1> to vector<64x1024xi1>
    %42 = vector.broadcast %cst_27 : f32 to vector<64x1024xf32>
    %43 = arith.select %41, %33, %42 : vector<64x1024xi1>, vector<64x1024xf32>
    %cst_28 = arith.constant dense<0xFF800000> : vector<1024xf32>
    %44 = vector.multi_reduction <maximumf>, %43, %cst_28 [0] : vector<64x1024xf32> to vector<1024xf32>
    %45 = vector.shape_cast %44 : vector<1024xf32> to vector<1x1024xf32>
    %c0_i32 = arith.constant 0 : i32
    %46 = arith.cmpi eq, %arg1, %c0_i32 : i32
    %47 = arith.extui %46 : i1 to i32
    %c0_i32_29 = arith.constant 0 : i32
    %48 = arith.cmpi ne, %47, %c0_i32_29 : i32
    scf.if %48 {
      %cst_36 = arith.constant 0xFF800000 : f32
      %55 = vector.broadcast %cst_36 : f32 to vector<1x1024xf32>
      %c0_37 = arith.constant 0 : index
      %c0_38 = arith.constant 0 : index
      %56 = vector.load %arg16[%c0_37, %c0_38] : memref<1x1024xf32, #tpu.memory_space<vmem>>, vector<1x1024xf32>
      tpu.vector_store %arg16[%c0_37, %c0_38], %55 {strides = array<i32>} : memref<1x1024xf32, #tpu.memory_space<vmem>>, vector<1x1024xf32>,
    } else {
    }
    %c0_30 = arith.constant 0 : index
    %c0_31 = arith.constant 0 : index
    %49 = vector.load %arg16[%c0_30, %c0_31] : memref<1x1024xf32, #tpu.memory_space<vmem>>, vector<1x1024xf32>
    %50 = arith.maximumf %49, %45 : vector<1x1024xf32>
    %c0_32 = arith.constant 0 : index
    %c0_33 = arith.constant 0 : index
    %51 = vector.load %arg16[%c0_32, %c0_33] : memref<1x1024xf32, #tpu.memory_space<vmem>>, vector<1x1024xf32>
    tpu.vector_store %arg16[%c0_32, %c0_33], %50 {strides = array<i32>} : memref<1x1024xf32, #tpu.memory_space<vmem>>, vector<1x1024xf32>,
    %c0_i32_34 = arith.constant 0 : i32
    %52 = arith.cmpi eq, %arg1, %c0_i32_34 : i32
    %53 = arith.extui %52 : i1 to i32
    %c0_i32_35 = arith.constant 0 : i32
    %54 = arith.cmpi ne, %53, %c0_i32_35 : i32
    scf.if %54 {
      %c0_36 = arith.constant 0 : index
      %c0_37 = arith.constant 0 : index
      %55 = vector.load %arg16[%c0_36, %c0_37] : memref<1x1024xf32, #tpu.memory_space<vmem>>, vector<1x1024xf32>
      %c0_38 = arith.constant 0 : index
      %c0_39 = arith.constant 0 : index
      %56 = vector.load %arg12[%c0_38, %c0_39] : memref<1024x512xbf16, #tpu.memory_space<vmem>>, vector<1024x512xbf16>
      %c0_40 = arith.constant 0 : index
      %c0_41 = arith.constant 0 : index
      %57 = vector.load %arg13[%c0_40, %c0_41] : memref<1x512xf32, #tpu.memory_space<vmem>>, vector<1x512xf32>
      %c0_42 = arith.constant 0 : index
      %c0_43 = arith.constant 0 : index
      %58 = vector.load %arg14[%c0_42, %c0_43] : memref<1x512xf32, #tpu.memory_space<vmem>>, vector<1x512xf32>
      %59 = arith.truncf %55 : vector<1x1024xf32> to vector<1x1024xbf16>
      %cst_44 = arith.constant dense<0.000000e+00> : vector<1x512xf32>
      %60 = tpu.matmul %59, %56, %cst_44 {dimension_numbers = #tpu.dot_dimension_numbers<[1], [0], [0], [1], [0, 0, 1, 1], [], []>} : vector<1x1024xbf16>, vector<1024x512xbf16>, vector<1x512xf32> -> vector<1x512xf32>
      %61 = arith.mulf %60, %57 : vector<1x512xf32>
      %62 = arith.addf %61, %58 : vector<1x512xf32>
      %cst_45 = arith.constant 0.000000e+00 : f32
      %63 = vector.broadcast %cst_45 : f32 to vector<1x512xf32>
      %64 = arith.maximumf %62, %63 : vector<1x512xf32>
      %c0_46 = arith.constant 0 : index
      %c0_47 = arith.constant 0 : index
      %c0_48 = arith.constant 0 : index
      %65 = vector.load %arg15[%c0_46, %c0_47, %c0_48] : memref<1x1x512xf32, #tpu.memory_space<vmem>>, vector<1x1x512xf32>
      %66 = vector.shape_cast %65 : vector<1x1x512xf32> to vector<1x512xf32>
      %67 = vector.shape_cast %64 : vector<1x512xf32> to vector<1x1x512xf32>
      tpu.vector_store %arg15[%c0_46, %c0_47, %c0_48], %67 {strides = array<i32>} : memref<1x1x512xf32, #tpu.memory_space<vmem>>, vector<1x1x512xf32>,
    } else {
    }
    return
  }
  func.func @transform_0(%arg0: i32, %arg1: i32) -> (i32, i32, i32) {
    %c0_i32 = arith.constant 0 : i32
    %c0_i32_0 = arith.constant 0 : i32
    return %arg0, %arg1, %c0_i32 : i32, i32, i32
  }
  func.func @transform_1(%arg0: i32, %arg1: i32) -> (i32, i32, i32) {
    %c0_i32 = arith.constant 0 : i32
    %c0_i32_0 = arith.constant 0 : i32
    %c0_i32_1 = arith.constant 0 : i32
    return %arg0, %c0_i32, %c0_i32_0 : i32, i32, i32
  }
  func.func @transform_2(%arg0: i32, %arg1: i32) -> (i32, i32) {
    %c0_i32 = arith.constant 0 : i32
    %c0_i32_0 = arith.constant 0 : i32
    %c0_i32_1 = arith.constant 0 : i32
    return %c0_i32, %c0_i32_0 : i32, i32
  }
  func.func @transform_3(%arg0: i32, %arg1: i32) -> (i32, i32) {
    %c0_i32 = arith.constant 0 : i32
    %c0_i32_0 = arith.constant 0 : i32
    %c0_i32_1 = arith.constant 0 : i32
    return %c0_i32, %c0_i32_0 : i32, i32
  }
  func.func @transform_4(%arg0: i32, %arg1: i32) -> (i32, i32, i32) {
    %c0_i32 = arith.constant 0 : i32
    %c0_i32_0 = arith.constant 0 : i32
    %c0_i32_1 = arith.constant 0 : i32
    return %arg0, %c0_i32, %c0_i32_0 : i32, i32, i32
  }
  func.func @transform_5(%arg0: i32, %arg1: i32) -> (i32, i32) {
    %c0_i32 = arith.constant 0 : i32
    %c0_i32_0 = arith.constant 0 : i32
    %c0_i32_1 = arith.constant 0 : i32
    return %c0_i32, %c0_i32_0 : i32, i32
  }
  func.func @transform_6(%arg0: i32, %arg1: i32) -> (i32, i32) {
    %c0_i32 = arith.constant 0 : i32
    %c0_i32_0 = arith.constant 0 : i32
    %c0_i32_1 = arith.constant 0 : i32
    return %c0_i32, %c0_i32_0 : i32, i32
  }
  func.func @transform_7(%arg0: i32, %arg1: i32) -> (i32, i32) {
    %c0_i32 = arith.constant 0 : i32
    %c0_i32_0 = arith.constant 0 : i32
    %c0_i32_1 = arith.constant 0 : i32
    return %c0_i32, %c0_i32_0 : i32, i32
  }
  func.func @transform_8(%arg0: i32, %arg1: i32) -> (i32, i32) {
    %c0_i32 = arith.constant 0 : i32
    %c0_i32_0 = arith.constant 0 : i32
    %c0_i32_1 = arith.constant 0 : i32
    return %c0_i32, %c0_i32_0 : i32, i32
  }
  func.func @transform_9(%arg0: i32, %arg1: i32) -> (i32, i32) {
    %c0_i32 = arith.constant 0 : i32
    %c0_i32_0 = arith.constant 0 : i32
    %c0_i32_1 = arith.constant 0 : i32
    return %c0_i32, %c0_i32_0 : i32, i32
  }
  func.func @transform_10(%arg0: i32, %arg1: i32) -> (i32, i32) {
    %c0_i32 = arith.constant 0 : i32
    %c0_i32_0 = arith.constant 0 : i32
    %c0_i32_1 = arith.constant 0 : i32
    return %c0_i32, %c0_i32_0 : i32, i32
  }
  func.func @transform_11(%arg0: i32, %arg1: i32) -> (i32, i32) {
    %c0_i32 = arith.constant 0 : i32
    %c0_i32_0 = arith.constant 0 : i32
    %c0_i32_1 = arith.constant 0 : i32
    return %c0_i32, %c0_i32_0 : i32, i32
  }
  func.func @transform_12(%arg0: i32, %arg1: i32) -> (i32, i32) {
    %c0_i32 = arith.constant 0 : i32
    %c0_i32_0 = arith.constant 0 : i32
    %c0_i32_1 = arith.constant 0 : i32
    return %c0_i32, %c0_i32_0 : i32, i32
  }
  func.func @transform_13(%arg0: i32, %arg1: i32) -> (i32, i32, i32) {
    %c0_i32 = arith.constant 0 : i32
    %c0_i32_0 = arith.constant 0 : i32
    %c0_i32_1 = arith.constant 0 : i32
    return %arg0, %c0_i32, %c0_i32_0 : i32, i32, i32
  }
}

</mosaic_0001>

<bundles_post_ra>
// kernel: _lambda_.3
= control target key start
LH: loop header
LB: loop body
LE: loop exit
PB: predicated region body
PF: predicated region fallthrough
CT: control target
= control target key end

     0   :  { %s6086_s30 = smov 0   ;;  %s6088_s20 = smov 0   ;;  %s7717_s0 = inlined_call_operand.vmem [shape: f32[2,64,3], index: 0, kind: input, shape index: {}]   ;;  %s7718_s1 = inlined_call_operand.vmem [shape: f32[3,64], index: 1, kind: input, shape index: {}]   ;;  %s7719_s2 = inlined_call_operand.vmem [shape: f32[1,64], index: 2, kind: input, shape index: {}]   ;;  %s7720_s3 = inlined_call_operand.vmem [shape: f32[1,64], index: 3, kind: input, shape index: {}]   ;;  %s7721_s4 = inlined_call_operand.vmem [shape: bf16[64,128], index: 4, kind: input, shape index: {}]   ;;  %s7722_s5 = inlined_call_operand.vmem [shape: f32[1,128], index: 5, kind: input, shape index: {}]   ;;  %s7723_s6 = inlined_call_operand.vmem [shape: f32[1,128], index: 6, kind: input, shape index: {}]   ;;  %s7724_s7 = inlined_call_operand.vmem [shape: bf16[128,1024], index: 7, kind: input, shape index: {}]   ;;  %s7725_s8 = inlined_call_operand.vmem [shape: f32[1,1024], index: 8, kind: input, shape index: {}]   ;;  %s7726_s9 = inlined_call_operand.vmem [shape: f32[1,1024], index: 9, kind: input, shape index: {}]   ;;  %s7727_s10 = inlined_call_operand.vmem [shape: bf16[1024,512], index: 10, kind: input, shape index: {}]   ;;  %s7728_s11 = inlined_call_operand.vmem [shape: f32[1,512], index: 11, kind: input, shape index: {}]   ;;  %s7729_s12 = inlined_call_operand.vmem [shape: f32[1,512], index: 12, kind: input, shape index: {}]   ;;  %s7730_s13 = inlined_call_operand.vmem [shape: bf16[512,256], index: 13, kind: input, shape index: {}]   ;;  %s7731_s14 = inlined_call_operand.vmem [shape: f32[1,256], index: 14, kind: input, shape index: {}]   ;;  %s7732_s15 = inlined_call_operand.vmem [shape: f32[1,256], index: 15, kind: input, shape index: {}]   ;;  %s7733_s16 = inlined_call_operand.vmem [shape: bf16[256,9], index: 16, kind: input, shape index: {}]   ;;  %s7734_s17 = inlined_call_operand.vmem [shape: f32[1,9], index: 17, kind: input, shape index: {}]   ;;  %s7735_s18 = inlined_call_operand.vmem [shape: f32[1,9], index: 18, kind: input, shape index: {}]   ;;  %s7736_s19 = inlined_call_operand.vmem [shape: f32[2,1,9], index: 19, kind: output, shape index: {}]  }
   0x1   :  { %7737 = sst [smem:[#allocation3_spill]] %s7717_s0  ;;  %s6084_s0 = smov 0  }
   0x2   :  { %7738 = sst [smem:[#allocation4_spill]] %s7718_s1 }
   0x3   :  { %7739 = sst [smem:[#allocation5_spill]] %s7719_s2 }
   0x4   :  { %7740 = sst [smem:[#allocation6_spill]] %s7720_s3 }
   0x5 LB: > { %s41_s21 = sadd.s32 1, %s5976_s30  ;;  %p4908_p0 = scmp.ge.s32.totalorder %s5980_s20, 1  ;;  %s5980_s20 = sphi %s6088_s20, %s29_s20   ;;  %s5976_s30 = sphi %s6086_s30, %s7746_s30   ;;  %s5972_s0 = sphi %s6084_s0, %s7745_s0  }
   0x6   : > { %p43_p1 = scmp.ge.s32.totalorder %s41_s21, 2  ;;  %p556_p2 = scmp.lt.s32.totalorder %s5980_s20, 3 }
   0x8   : > { %s7748_s21 = smov (%p43_p1, %s41_s21), 0  ;;  %p557_p3 = pnand %p4908_p0, %p556_p2 }
   0x9   : > { %s7741_s2 = sld [smem:[#allocation4_spill]] (!%p557_p3)  ;;  %vm664_vm0 = vcmask (!%p557_p3), 1042432   ;;  %p615_p4 = scmp.lt.s32.totalorder (!%p557_p3), %s5972_s0, 1  ;;  %v5458_v1 = vld [vmem:[%s7721_s4] sm:$0xff] (!%p557_p3)   ;;  %vm639_vm1 = vcmask (!%p557_p3), 23552   ;;  %v5459_v10 = vld [vmem:[%s7721_s4 + $0x8] sm:$0xff] (!%p557_p3)  }
   0xa   : > { %560 = sbr.rel (%p557_p3) target bundleno = 1728 (0x6c0), region = 96  ;;  %s7742_s27 = sld [smem:[#allocation3_spill]] (!%p557_p3)  ;;  %v5460_v11 = vld [vmem:[%s7721_s4 + $0x10] sm:$0xff] (!%p557_p3)   ;;  %v5461_v12 = vld [vmem:[%s7721_s4 + $0x18] sm:$0xff] (!%p557_p3)   ;;  %v6134_v13 = vld [vmem:[%s7724_s7] sm:$0xff] (!%p557_p3)  ;;  %vm847_vm2 = vcmask (!%p557_p3), 523264  }
   0xb   : > { %v6139_v14 = vld [vmem:[%s7724_s7 + $0x20] sm:$0xff] (!%p557_p3)  ;;  %v963_v15 = vld [vmem:[%s7724_s7 + $0x10] sm:$0xff] (!%p557_p3)  ;;  %s7744_s22 = sld [smem:[#allocation6_spill]] (!%p557_p3)  ;;  %vm4841_vm3 = vcmask (!%p557_p3), 65536  }
   0xc   : > { %v4932_v16 = vcombine.low (!%p557_p3), %v6134_v13, %v6139_v14  ;;  %v4933_v17 = vcombine.high (!%p557_p3), %v6134_v13, %v6139_v14  ;;  %v967_v18 = vld [vmem:[%s7724_s7 + $0x30] sm:$0xff] (!%p557_p3)  ;;  %v969_v58 = vld [vmem:[%s7724_s7 + $0x40] sm:$0xff] (!%p557_p3) }
   0xd   : > { %v4937_v19 = vcombine.high (!%p557_p3), %v963_v15, %v967_v18  ;;  %v4936_v20 = vcombine.low (!%p557_p3), %v963_v15, %v967_v18  ;;  %v971_v21 = vld [vmem:[%s7724_s7 + $0x50] sm:$0xff] (!%p557_p3)  ;;  %v973_v59 = vld [vmem:[%s7724_s7 + $0x60] sm:$0xff] (!%p557_p3) }
   0xe   : > { %v975_v22 = vld [vmem:[%s7724_s7 + $0x70] sm:$0xff] (!%p557_p3) }
   0xf   : > { %v636_v0 = vld [vmem:[%s7741_s2] sm:$0x7] (!%p557_p3)  ;;  %v4945_v23 = vcombine.high (!%p557_p3), %v971_v21, %v975_v22  ;;  %v979_v24 = vld [vmem:[%s7724_s7 + $0x90] sm:$0xff] (!%p557_p3)  ;;  %1497 = vmatprep.subr.bf16.mxu0 (!%p557_p3), %v4937_v19  ;;  %v4944_v26 = vcombine.low (!%p557_p3), %v971_v21, %v975_v22 }
  0x10   : > { %5374 = vmatprep.subr.msk.mxu1 (!%p557_p3), %vm664_vm0, %v636_v0  ;;  %v983_v25 = vld [vmem:[%s7724_s7 + $0xb0] sm:$0xff] (!%p557_p3)  ;;  %1498 = vmatpush1.bf16.msra.mxu0 (!%p557_p3), %v4936_v20  ;;  %v985_v19 = vld [vmem:[%s7724_s7 + $0xc0] sm:$0xff] (!%p557_p3) }
  0x11   : > { %5375 = vmatpush3.msk.msra.mxu1 %vm664_vm0, %v636_v0  ;;  %s7750_s0 = smov (!%p615_p4, %s5972_s0), 1  ;;  %v987_v27 = vld [vmem:[%s7724_s7 + $0xd0] sm:$0xff]  ;;  %1499 = vmatprep.subr.bf16.mxu0 %v4945_v23  ;;  %v4953_v28 = vcombine.high %v979_v24, %v983_v25  ;;  %v4952_v30 = vcombine.low %v979_v24, %v983_v25  ;;  %v4921_v38 = vld [vmem:[%s7744_s22] ss:$0 sm:$0xff] }
  0x12   : > { %5388 = vmatprep.subr.bf16.mxu1 %v5458_v1  ;;  %s5334_s25 = sshll.u32 %s7750_s0, 6  ;;  %v991_v29 = vld [vmem:[%s7724_s7 + $0xf0] sm:$0xff]  ;;  %v989_v20 = vld [vmem:[%s7724_s7 + $0xe0] sm:$0xff] }
  0x13   : > { %s622_s28 = scalar_lea.vmem %s7742_s27, %s5334_s25  ;;  %v4961_v31 = vcombine.high %v987_v27, %v991_v29  ;;  %v995_v32 = vld [vmem:[%s7724_s7 + $0x110] sm:$0xff]  ;;  %v4960_v34 = vcombine.low %v987_v27, %v991_v29  ;;  %v993_v22 = vld [vmem:[%s7724_s7 + $0x100] sm:$0xff]  ;;  %v4956_v24 = vcombine.low %v985_v19, %v989_v20  ;;  %s626_s27 = scalar_lea.vmem %s7736_s19, %s7750_s0 }
  0x14   : > { %v628_v2 = vld [vmem:[%s622_s28] sm:$0xff]  ;;  %v629_v3 = vld [vmem:[%s622_s28 + $0x8] sm:$0xff]  ;;  %v630_v4 = vld [vmem:[%s622_s28 + $0x10] sm:$0xff]  ;;  %1500 = vmatpush1.bf16.msra.mxu0 %v4944_v26 }
  0x15   : > { %5376 = vmatprep.mubr.msk.f32.mxu1 %vm639_vm1, %v628_v2  ;;  %v631_v5 = vld [vmem:[%s622_s28 + $0x18] sm:$0xff]  ;;  %v632_v6 = vld [vmem:[%s622_s28 + $0x20] sm:$0xff]  ;;  %v633_v7 = vld [vmem:[%s622_s28 + $0x28] sm:$0xff]  ;;  %1501 = vmatprep.subr.bf16.mxu0 %v4953_v28  ;;  %v4941_v2 = vcombine.high %v969_v58, %v973_v59 }
  0x16   : > { %5377 = vmatmul.mubr.msk.f32.vlgmr.msra.gmra.mrb[0].mxu1 %vm639_vm1, %v629_v3  ;;  %v634_v8 = vld [vmem:[%s622_s28 + $0x30] sm:$0xff]  ;;  %v635_v9 = vld [vmem:[%s622_s28 + $0x38] sm:$0xff]  ;;  %s7743_s28 = sld [smem:[#allocation5_spill]]  ;;  %v997_v23 = vld [vmem:[%s7724_s7 + $0x120] sm:$0xff] }
  0x17   : > { %5379 = vmatprep.mubr.msk.f32.mxu1 %vm639_vm1, %v630_v4  ;;  %5389 = vmatpush3.bf16.msra.mxu1 %v5458_v1  ;;  %v999_v33 = vld [vmem:[%s7724_s7 + $0x130] sm:$0xff]  ;;  %v4965_v25 = vcombine.high %v993_v22, %v997_v23  ;;  %v1001_v26 = vld [vmem:[%s7724_s7 + $0x140] sm:$0xff]  ;;  %v4964_v28 = vcombine.low %v993_v22, %v997_v23  ;;  %v978_v23 = vld [vmem:[%s7724_s7 + $0x88] sm:$0xff] }
  0x18   : > { %5390 = vmatprep.subr.bf16.mxu1 %v5459_v10  ;;  %1502 = vmatpush1.bf16.msra.mxu0 %v4952_v30  ;;  %v4969_v35 = vcombine.high %v995_v32, %v999_v33  ;;  %v4968_v36 = vcombine.low %v995_v32, %v999_v33  ;;  %v1005_v27 = vld [vmem:[%s7724_s7 + $0x160] sm:$0xff]  ;;  %v1007_v32 = vld [vmem:[%s7724_s7 + $0x170] sm:$0xff] }
  0x19   : > { %1503 = vmatprep.subr.bf16.mxu0 %v4961_v31  ;;  %v4973_v29 = vcombine.high %v1001_v26, %v1005_v27  ;;  %v4972_v30 = vcombine.low %v1001_v26, %v1005_v27  ;;  %v1003_v31 = vld [vmem:[%s7724_s7 + $0x150] sm:$0xff] }
  0x1a   : > { %5380 = vmatmul.mubr.msk.f32.gmra.mrb[2].mxu1 %vm639_vm1, %v631_v5  ;;  %v4977_v33 = vcombine.high %v1003_v31, %v1007_v32 }
  0x1b   : > { %5382 = vmatprep.mubr.msk.f32.mxu1 %vm639_vm1, %v632_v6  ;;  %5391 = vmatpush3.bf16.msra.mxu1 %v5459_v10  ;;  %v977_v6 = vld [vmem:[%s7724_s7 + $0x80] sm:$0xff] }
  0x1c   : > { %5392 = vmatprep.subr.bf16.mxu1 %v5460_v11  ;;  %1504 = vmatpush1.bf16.msra.mxu0 %v4960_v34  ;;  %v4920_v37 = vld [vmem:[%s7743_s28] ss:$0 sm:$0xff]  ;;  %v4976_v34 = vcombine.low %v1003_v31, %v1007_v32 }
  0x1d   : > { %1505 = vmatprep.subr.bf16.mxu0 %v4969_v35  ;;  %v1009_v35 = vld [vmem:[%s7724_s7 + $0x180] sm:$0xff] }
  0x1e   : > { %5383 = vmatmul.mubr.msk.f32.gmra.mrb[4].mxu1 %vm639_vm1, %v633_v7  ;;  %v981_v7 = vld [vmem:[%s7724_s7 + $0xa0] sm:$0xff] }
  0x1f   : > { %5385 = vmatprep.mubr.msk.f32.mxu1 %vm639_vm1, %v634_v8  ;;  %5393 = vmatpush3.bf16.msra.mxu1 %v5460_v11  ;;  %v4940_v11 = vcombine.low %v969_v58, %v973_v59  ;;  %v4948_v13 = vcombine.low %v977_v6, %v981_v7 }
  0x20   : > { %5394 = vmatprep.subr.bf16.mxu1 %v5461_v12  ;;  %1506 = vmatpush1.bf16.msra.mxu0 %v4968_v36  ;;  %v1013_v36 = vld [vmem:[%s7724_s7 + $0x1a0] sm:$0xff] }
  0x21   : > { %1507 = vmatprep.subr.bf16.mxu0 %v4977_v33 }
  0x22   : > { %5386 = vmatmul.mubr.msk.f32.gmra.mrb[6].mxu1 %vm639_vm1, %v635_v9 }
  0x23   : > { %5395 = vmatpush3.bf16.msra.mxu1 %v5461_v12 }
  0x24   : > { %1351 = vmatprep.subr.bf16.mxu1 %v4933_v17  ;;  %v4949_v17 = vcombine.high %v977_v6, %v981_v7  ;;  %1508 = vmatpush1.bf16.msra.mxu0 %v4976_v34  ;;  %v986_v34 = vld [vmem:[%s7724_s7 + $0xc8] sm:$0xff] }
  0xe9   : > { %v5378_v39 = vpop.f32.mrb[0].mxu1 }
  0xea   : > { %v780_v40 = vmul.f32 %v5378_v39, %v4920_v37  ;;  %v734_v41 = vpop.f32.mrb[1].mxu1  ;;  %v1015_v39 = vld [vmem:[%s7724_s7 + $0x1b0] sm:$0xff] }
  0xeb   : > { %v779_v42 = vmul.f32 %v4920_v37, %v734_v41 }
  0xec   : > { %v794_v43 = vadd.f32 %v4921_v38, %v780_v40  ;;  %v4980_v40 = vcombine.low %v1009_v35, %v1013_v36 }
  0xed   : > { %v793_v44 = vadd.f32 %v4921_v38, %v779_v42  ;;  %v5381_v45 = vpop.f32.mrb[2].mxu1 }
  0xee   : > { %v802_v46 = vmax.f32 %v794_v43, 0.0  ;;  %v782_v47 = vmul.f32 %v5381_v45, %v4920_v37  ;;  %v744_v48 = vpop.f32.mrb[3].mxu1  ;;  %v1017_v43 = vld [vmem:[%s7724_s7 + $0x1c0] sm:$0xff]  ;;  %v1019_v45 = vld [vmem:[%s7724_s7 + $0x1d0] sm:$0xff] }
  0xef   : > { %v801_v49 = vmax.f32 %v793_v44, 0.0  ;;  %v781_v50 = vmul.f32 %v4920_v37, %v744_v48  ;;  %v1021_v44 = vld [vmem:[%s7724_s7 + $0x1e0] sm:$0xff] }
  0xf0   : > { %v796_v51 = vadd.f32 %v4921_v38, %v782_v47  ;;  %v1023_v47 = vld [vmem:[%s7724_s7 + $0x1f0] sm:$0xff]  ;;  %v4988_v48 = vcombine.low %v1017_v43, %v1021_v44 }
  0xf1   : > { %v819_v52 = vpack.c.bf16 %v802_v46, %v801_v49  ;;  %v795_v53 = vadd.f32 %v4921_v38, %v781_v50  ;;  %v5384_v54 = vpop.f32.mrb[4].mxu1  ;;  %v4989_v46 = vcombine.high %v1017_v43, %v1021_v44  ;;  %v4993_v49 = vcombine.high %v1019_v45, %v1023_v47 }
  0xf2   : > { %v804_v55 = vmax.f32 %v796_v51, 0.0  ;;  %v784_v56 = vmul.f32 %v5384_v54, %v4920_v37  ;;  %v754_v57 = vpop.f32.mrb[5].mxu1  ;;  %v4992_v50 = vcombine.low %v1019_v45, %v1023_v47  ;;  %v962_v51 = vld [vmem:[%s7724_s7 + $0x8] sm:$0xff] }
  0xf3   : > { %v803_v60 = vmax.f32 %v795_v53, 0.0  ;;  %5396 = vmatprep.mubr.msk.bf16.mxu1 %vm847_vm2, %v819_v52  ;;  %v783_v61 = vmul.f32 %v4920_v37, %v754_v57  ;;  %v966_v52 = vld [vmem:[%s7724_s7 + $0x28] sm:$0xff]  ;;  %v4931_v57 = vld [vmem:[%s7723_s6] ss:$0 sm:$0xff] }
  0xf4   : > { %v798_v62 = vadd.f32 %v4921_v38, %v784_v56  ;;  %v4934_v53 = vcombine.low %v962_v51, %v966_v52  ;;  %v4935_v54 = vcombine.high %v962_v51, %v966_v52  ;;  %v4930_v56 = vld [vmem:[%s7722_s5] ss:$0 sm:$0xff]  ;;  %v1002_v45 = vld [vmem:[%s7724_s7 + $0x148] sm:$0xff] }
  0xf5   : > { %v820_v63 = vpack.c.bf16 %v804_v55, %v803_v60  ;;  %v797_v0 = vadd.f32 %v4921_v38, %v783_v61  ;;  %v5387_v1 = vpop.f32.mrb[6].mxu1  ;;  %v5982_v55 = vmov 0  }
  0xf6   : > { %v806_v3 = vmax.f32 %v798_v62, 0.0  ;;  %v786_v4 = vmul.f32 %v5387_v1, %v4920_v37  ;;  %v764_v5 = vpop.f32.mrb[7].mxu1  ;;  %1529 = vmatprep.mubr.bf16.mxu0 %v5982_v55 }
  0xf7   : > { %5397 = vmatmul.mubr.msk.bf16.vlgmr.msra.gmra.mrb[8].mxu1 %vm847_vm2, %v820_v63  ;;  %v805_v8 = vmax.f32 %v797_v0, 0.0  ;;  %v785_v9 = vmul.f32 %v4920_v37, %v764_v5  ;;  %v1011_v37 = vld [vmem:[%s7724_s7 + $0x190] sm:$0xff] }
  0xf8   : > { %v800_v10 = vadd.f32 %v4921_v38, %v786_v4  ;;  %1352 = vmatpush1.bf16.msra.mxu1 %v4932_v16  ;;  %v4957_v16 = vcombine.high %v985_v19, %v989_v20  ;;  %v4985_v41 = vcombine.high %v1011_v37, %v1015_v39  ;;  %v4984_v42 = vcombine.low %v1011_v37, %v1015_v39 }
  0xf9   : > { %v821_v12 = vpack.c.bf16 %v806_v3, %v805_v8  ;;  %v799_v15 = vadd.f32 %v4921_v38, %v785_v9  ;;  %1353 = vmatprep.subr.bf16.mxu1 %v4941_v2  ;;  %v4981_v38 = vcombine.high %v1009_v35, %v1013_v36  ;;  %v970_v8 = vld [vmem:[%s7724_s7 + $0x48] sm:$0xff] }
  0xfa   : > { %v808_v18 = vmax.f32 %v800_v10, 0.0  ;;  %1509 = vmatprep.subr.bf16.mxu0 %v4985_v41  ;;  %v974_v9 = vld [vmem:[%s7724_s7 + $0x68] sm:$0xff] }
  0xfb   : > { %v807_v21 = vmax.f32 %v799_v15, 0.0  ;;  %5400 = vmatprep.mubr.msk.bf16.mxu1 %vm847_vm2, %v821_v12  ;;  %1510 = vmatpush1.bf16.msra.mxu0 %v4984_v42  ;;  %v990_v35 = vld [vmem:[%s7724_s7 + $0xe8] sm:$0xff] }
  0xfc   : > { %1354 = vmatpush1.bf16.msra.mxu1 %v4940_v11  ;;  %1511 = vmatprep.subr.bf16.mxu0 %v4993_v49  ;;  %v994_v41 = vld [vmem:[%s7724_s7 + $0x108] sm:$0xff]  ;;  %v4958_v43 = vcombine.low %v986_v34, %v990_v35 }
  0xfd   : > { %v822_v14 = vpack.c.bf16 %v808_v18, %v807_v21  ;;  %1355 = vmatprep.subr.bf16.mxu1 %v4949_v17  ;;  %v998_v42 = vld [vmem:[%s7724_s7 + $0x128] sm:$0xff] }
  0xfe   : > { %v4967_v44 = vcombine.high %v994_v41, %v998_v42  ;;  %v4966_v47 = vcombine.low %v994_v41, %v998_v42  ;;  %v1010_v49 = vld [vmem:[%s7724_s7 + $0x188] sm:$0xff]  ;;  %v5488_v42 = vld [vmem:[%s7727_s10 + $0x84] ss:$16 sps:$4 sm:$0xff]  }
  0xff   : > { %5401 = vmatmul.mubr.msk.bf16.gmra.mrb[12].mxu1 %vm847_vm2, %v822_v14  ;;  %1512 = vmatpush1.bf16.msra.mxu0 %v4992_v50  ;;  %v1014_v50 = vld [vmem:[%s7724_s7 + $0x1a8] sm:$0xff] }
 0x100   : > { %1356 = vmatpush1.bf16.msra.mxu1 %v4948_v13  ;;  %1383 = vmatprep.mubr.bf16.mxu1 %v5982_v55  ;;  %v4943_v13 = vcombine.high %v970_v8, %v974_v9  ;;  %v4983_v52 = vcombine.high %v1010_v49, %v1014_v50  ;;  %v5483_v41 = vld [vmem:[%s7727_s10 + $0x68] ss:$16 sps:$4 sm:$0xff]  }
 0x101   : > { %1357 = vmatprep.subr.bf16.mxu1 %v4957_v16 }
 0x104   : > { %1358 = vmatpush1.bf16.msra.mxu1 %v4956_v24  ;;  %v982_v24 = vld [vmem:[%s7724_s7 + $0xa8] sm:$0xff] }
 0x105   : > { %1359 = vmatprep.subr.bf16.mxu1 %v4965_v25  ;;  %v4951_v32 = vcombine.high %v978_v23, %v982_v24 }
 0x108   : > { %1360 = vmatpush1.bf16.msra.mxu1 %v4964_v28 }
 0x109   : > { %1361 = vmatprep.subr.bf16.mxu1 %v4973_v29  ;;  %v4942_v29 = vcombine.low %v970_v8, %v974_v9 }
 0x10c   : > { %1362 = vmatpush1.bf16.msra.mxu1 %v4972_v30 }
 0x10d   : > { %1363 = vmatprep.subr.bf16.mxu1 %v4981_v38  ;;  %v4950_v38 = vcombine.low %v978_v23, %v982_v24  ;;  %v1020_v24 = vld [vmem:[%s7724_s7 + $0x1d8] sm:$0xff] }
 0x110   : > { %1364 = vmatpush1.bf16.msra.mxu1 %v4980_v40  ;;  %v4959_v40 = vcombine.high %v986_v34, %v990_v35  ;;  %v5476_v34 = vld [vmem:[%s7727_s10 + $0x44] ss:$16 sps:$4 sm:$0xff]   ;;  %v5479_v35 = vld [vmem:[%s7727_s10 + $0x4c] ss:$16 sps:$4 sm:$0xff]  }
 0x111   : > { %1365 = vmatprep.subr.bf16.mxu1 %v4989_v46  ;;  %v1006_v46 = vld [vmem:[%s7724_s7 + $0x168] sm:$0xff] }
 0x112   : > { %v4974_v51 = vcombine.low %v1002_v45, %v1006_v46 }
 0x114   : > { %1366 = vmatpush1.bf16.msra.mxu1 %v4988_v48  ;;  %v4975_v48 = vcombine.high %v1002_v45, %v1006_v46  ;;  %v5489_v45 = vld [vmem:[%s7727_s10 + $0x88] ss:$16 sps:$4 sm:$0xff]   ;;  %v5494_v46 = vld [vmem:[%s7727_s10 + $0xa4] ss:$16 sps:$4 sm:$0xff]  }
 0x115   : > { %1424 = vmatprep.subr.bf16.mxu1 %v4935_v54  ;;  %v1022_v54 = vld [vmem:[%s7724_s7 + $0x1e8] sm:$0xff] }
 0x1ca   : > { %v5398_v58 = vpop.f32.mrb[8].mxu1 }
 0x1cb   : > { %v933_v59 = vmul.f32 %v5398_v58, %v4930_v56  ;;  %v894_v60 = vpop.f32.mrb[9].mxu1  ;;  %v964_v58 = vld [vmem:[%s7724_s7 + $0x18] sm:$0xff] }
 0x1cc   : > { %v931_v61 = vmul.f32 %v4930_v56, %v894_v60  ;;  %v5399_v62 = vpop.f32.mrb[10].mxu1 }
 0x1cd   : > { %v947_v63 = vadd.f32 %v4931_v57, %v933_v59  ;;  %v934_v0 = vmul.f32 %v5399_v62, %v4930_v56  ;;  %v897_v1 = vpop.f32.mrb[11].mxu1  ;;  %v968_v59 = vld [vmem:[%s7724_s7 + $0x38] sm:$0xff] }
 0x1ce   : > { %v945_v2 = vadd.f32 %v4931_v57, %v931_v61  ;;  %v932_v3 = vmul.f32 %v4930_v56, %v897_v1  ;;  %v4939_v61 = vcombine.high %v964_v58, %v968_v59  ;;  %v972_v62 = vld [vmem:[%s7724_s7 + $0x58] sm:$0xff] }
 0x1cf   : > { %v948_v4 = vadd.f32 %v4931_v57, %v934_v0  ;;  %v955_v6 = vmax.f32 %v947_v63, 0.0  ;;  %v976_v63 = vld [vmem:[%s7724_s7 + $0x78] sm:$0xff]  ;;  %v4938_v0 = vcombine.low %v964_v58, %v968_v59  ;;  %v5512_v59 = vld [vmem:[%s7727_s10 + $0x104] ss:$16 sps:$4 sm:$0xff]  }
 0x1d0   : > { %v946_v5 = vadd.f32 %v4931_v57, %v932_v3  ;;  %v953_v10 = vmax.f32 %v945_v2, 0.0  ;;  %v4947_v1 = vcombine.high %v972_v62, %v976_v63  ;;  %v980_v2 = vld [vmem:[%s7724_s7 + $0x98] sm:$0xff] }
 0x1d1   : > { %v956_v7 = vmax.f32 %v948_v4, 0.0  ;;  %v984_v3 = vld [vmem:[%s7724_s7 + $0xb8] sm:$0xff]  ;;  %v4946_v4 = vcombine.low %v972_v62, %v976_v63  ;;  %v5518_v63 = vld [vmem:[%s7727_s10 + $0x124] ss:$16 sps:$4 sm:$0xff]  }
 0x1d2   : > { %v954_v11 = vmax.f32 %v946_v5, 0.0  ;;  %v5402_v12 = vpop.f32.mrb[12].mxu1  ;;  %v4955_v5 = vcombine.high %v980_v2, %v984_v3  ;;  %v4954_v8 = vcombine.low %v980_v2, %v984_v3  ;;  %v5507_v58 = vld [vmem:[%s7727_s10 + $0xe8] ss:$16 sps:$4 sm:$0xff]   ;;  %v5524_v3 = vld [vmem:[%s7727_s10 + $0x144] ss:$16 sps:$4 sm:$0xff]  }
 0x1d3   : > { %v6268_v15 = vpack.c.bf16 %v956_v7, %v955_v6  ;;  %v937_v17 = vmul.f32 %v5402_v12, %v4930_v56  ;;  %v910_v18 = vpop.f32.mrb[13].mxu1  ;;  %v988_v6 = vld [vmem:[%s7724_s7 + $0xd8] sm:$0xff] }
 0x1d4   : > { %v6270_v19 = vpack.c.bf16 %v954_v11, %v953_v10  ;;  %v935_v20 = vmul.f32 %v4930_v56, %v910_v18  ;;  %v5403_v21 = vpop.f32.mrb[14].mxu1  ;;  %v992_v7 = vld [vmem:[%s7724_s7 + $0xf8] sm:$0xff] }
 0x1d5   : > { %v951_v14 = vadd.f32 %v4931_v57, %v937_v17  ;;  %v938_v16 = vmul.f32 %v5403_v21, %v4930_v56  ;;  %v913_v22 = vpop.f32.mrb[15].mxu1  ;;  %v4963_v9 = vcombine.high %v988_v6, %v992_v7  ;;  %v996_v10 = vld [vmem:[%s7724_s7 + $0x118] sm:$0xff]  ;;  %v4962_v12 = vcombine.low %v988_v6, %v992_v7  ;;  %v5530_v7 = vld [vmem:[%s7727_s10 + $0x164] ss:$16 sps:$4 sm:$0xff]  }
 0x1d6   : > { %1384 = vmatmul.mubr.bf16.vlgmr.msra.gmra.mrb[16].mxu1 %v6270_v19  ;;  %1530 = vmatmul.mubr.bf16.vlgmr.msra.gmra.mrb[0].mxu0 %v6270_v19  ;;  %v949_v25 = vadd.f32 %v4931_v57, %v935_v20  ;;  %v936_v26 = vmul.f32 %v4930_v56, %v913_v22  ;;  %v4982_v56 = vcombine.low %v1010_v49, %v1014_v50  ;;  %v1000_v11 = vld [vmem:[%s7724_s7 + $0x138] sm:$0xff]  ;;  %v5500_v50 = vld [vmem:[%s7727_s10 + $0xc4] ss:$16 sps:$4 sm:$0xff]  }
 0x1d7   : > { %v959_v27 = vmax.f32 %v951_v14, 0.0  ;;  %1425 = vmatpush1.bf16.msra.mxu1 %v4934_v53  ;;  %v952_v28 = vadd.f32 %v4931_v57, %v938_v16  ;;  %1393 = vmatprep.mubr.bf16.mxu1 %v5982_v55  ;;  %v1018_v53 = vld [vmem:[%s7724_s7 + $0x1c8] sm:$0xff]  ;;  %v4971_v17 = vcombine.high %v996_v10, %v1000_v11  ;;  %v1004_v18 = vld [vmem:[%s7724_s7 + $0x158] sm:$0xff]  ;;  %v4970_v21 = vcombine.low %v996_v10, %v1000_v11  ;;  %v5536_v11 = vld [vmem:[%s7727_s10 + $0x184] ss:$16 sps:$4 sm:$0xff]  }
 0x1d8   : > { %v957_v30 = vmax.f32 %v949_v25, 0.0  ;;  %v950_v31 = vadd.f32 %v4931_v57, %v936_v26  ;;  %1426 = vmatprep.subr.bf16.mxu1 %v4943_v13  ;;  %1539 = vmatprep.mubr.bf16.mxu0 %v5982_v55  ;;  %v4991_v57 = vcombine.high %v1018_v53, %v1022_v54  ;;  %v4990_v60 = vcombine.low %v1018_v53, %v1022_v54  ;;  %v1008_v20 = vld [vmem:[%s7724_s7 + $0x178] sm:$0xff]  ;;  %v5506_v54 = vld [vmem:[%s7727_s10 + $0xe4] ss:$16 sps:$4 sm:$0xff]  }
 0x1d9   : > { %v960_v33 = vmax.f32 %v952_v28, 0.0  ;;  %v4979_v13 = vcombine.high %v1004_v18, %v1008_v20  ;;  %v1012_v14 = vld [vmem:[%s7724_s7 + $0x198] sm:$0xff]  ;;  %v4978_v22 = vcombine.low %v1004_v18, %v1008_v20  ;;  %v5542_v20 = vld [vmem:[%s7727_s10 + $0x1a4] ss:$16 sps:$4 sm:$0xff]  }
 0x1da   : > { %v958_v36 = vmax.f32 %v950_v31, 0.0  ;;  %v1016_v16 = vld [vmem:[%s7724_s7 + $0x1b8] sm:$0xff] }
 0x1db   : > { %v6288_v37 = vpack.c.bf16 %v960_v33, %v959_v27  ;;  %1427 = vmatpush1.bf16.msra.mxu1 %v4942_v29  ;;  %v4987_v23 = vcombine.high %v1012_v14, %v1016_v16  ;;  %v1024_v25 = vld [vmem:[%s7724_s7 + $0x1f8] sm:$0xff]  ;;  %v4986_v26 = vcombine.low %v1012_v14, %v1016_v16  ;;  %v5464_v29 = vld [vmem:[%s7727_s10 + $0x4] ss:$16 sps:$4 sm:$0xff]   ;;  %v5540_v14 = vld [vmem:[%s7727_s10 + $0x1a0] ss:$16 sps:$4 sm:$0xff]  }
 0x1dc   : > { %v6290_v39 = vpack.c.bf16 %v958_v36, %v957_v30  ;;  %1428 = vmatprep.subr.bf16.mxu1 %v4951_v32  ;;  %v4995_v27 = vcombine.high %v1020_v24, %v1024_v25  ;;  %v4994_v28 = vcombine.low %v1020_v24, %v1024_v25  ;;  %v5465_v30 = vld [vmem:[%s7727_s10 + $0x8] ss:$16 sps:$4 sm:$0xff]   ;;  %3785 = vmatprep.subr.bf16.mxu0 %v5464_v29  ;;  %v5473_v31 = vld [vmem:[%s7727_s10 + $0x2c] ss:$16 sps:$4 sm:$0xff]   ;;  %v5468_v32 = vld [vmem:[%s7727_s10 + $0x20] ss:$16 sps:$4 sm:$0xff]  }
 0x1dd   : > { %v5471_v33 = vld [vmem:[%s7727_s10 + $0x28] ss:$16 sps:$4 sm:$0xff]   ;;  %v5474_v36 = vld [vmem:[%s7727_s10 + $0x40] ss:$16 sps:$4 sm:$0xff]  }
 0x1de   : > { %1394 = vmatmul.mubr.bf16.gmra.mrb[20].mxu1 %v6268_v15  ;;  %1540 = vmatmul.mubr.bf16.gmra.mrb[4].mxu0 %v6268_v15  ;;  %v5495_v49 = vld [vmem:[%s7727_s10 + $0xa8] ss:$16 sps:$4 sm:$0xff]   ;;  %v5546_v25 = vld [vmem:[%s7727_s10 + $0x1c0] ss:$16 sps:$4 sm:$0xff]  }
 0x1df   : > { %1429 = vmatpush1.bf16.msra.mxu1 %v4950_v38  ;;  %1403 = vmatprep.mubr.bf16.mxu1 %v5982_v55  ;;  %v5482_v38 = vld [vmem:[%s7727_s10 + $0x64] ss:$16 sps:$4 sm:$0xff]   ;;  %v5501_v53 = vld [vmem:[%s7727_s10 + $0xc8] ss:$16 sps:$4 sm:$0xff]  }
 0x1e0   : > { %1430 = vmatprep.subr.bf16.mxu1 %v4959_v40  ;;  %1549 = vmatprep.mubr.bf16.mxu0 %v5982_v55  ;;  %v5480_v40 = vld [vmem:[%s7727_s10 + $0x60] ss:$16 sps:$4 sm:$0xff]   ;;  %v5513_v62 = vld [vmem:[%s7727_s10 + $0x108] ss:$16 sps:$4 sm:$0xff]  }
 0x1e1   : > { %v5519_v2 = vld [vmem:[%s7727_s10 + $0x128] ss:$16 sps:$4 sm:$0xff]  }
 0x1e2   : > { %v5525_v6 = vld [vmem:[%s7727_s10 + $0x148] ss:$16 sps:$4 sm:$0xff]  }
 0x1e3   : > { %1431 = vmatpush1.bf16.msra.mxu1 %v4958_v43  ;;  %v5491_v43 = vld [vmem:[%s7727_s10 + $0x8c] ss:$16 sps:$4 sm:$0xff]   ;;  %v5531_v10 = vld [vmem:[%s7727_s10 + $0x168] ss:$16 sps:$4 sm:$0xff]  }
 0x1e4   : > { %1432 = vmatprep.subr.bf16.mxu1 %v4967_v44  ;;  %v5486_v44 = vld [vmem:[%s7727_s10 + $0x80] ss:$16 sps:$4 sm:$0xff]   ;;  %v5537_v18 = vld [vmem:[%s7727_s10 + $0x188] ss:$16 sps:$4 sm:$0xff]  }
 0x1e5   : > { %v5543_v16 = vld [vmem:[%s7727_s10 + $0x1a8] ss:$16 sps:$4 sm:$0xff]  }
 0x1e6   : > { %1404 = vmatmul.mubr.bf16.gmra.mrb[24].mxu1 %v6290_v39  ;;  %1550 = vmatmul.mubr.bf16.gmra.mrb[8].mxu0 %v6290_v39  ;;  %v5555_v29 = vld [vmem:[%s7727_s10 + $0x1e8] ss:$16 sps:$4 sm:$0xff]  }
 0x1e7   : > { %1433 = vmatpush1.bf16.msra.mxu1 %v4966_v47  ;;  %1413 = vmatprep.mubr.bf16.mxu1 %v5982_v55  ;;  %v5497_v47 = vld [vmem:[%s7727_s10 + $0xac] ss:$16 sps:$4 sm:$0xff]  }
 0x1e8   : > { %1434 = vmatprep.subr.bf16.mxu1 %v4975_v48  ;;  %1559 = vmatprep.mubr.bf16.mxu0 %v5982_v55  ;;  %v5492_v48 = vld [vmem:[%s7727_s10 + $0xa0] ss:$16 sps:$4 sm:$0xff]  }
 0x1eb   : > { %1435 = vmatpush1.bf16.msra.mxu1 %v4974_v51  ;;  %v5503_v51 = vld [vmem:[%s7727_s10 + $0xcc] ss:$16 sps:$4 sm:$0xff]  }
 0x1ec   : > { %1436 = vmatprep.subr.bf16.mxu1 %v4983_v52  ;;  %v5498_v52 = vld [vmem:[%s7727_s10 + $0xc0] ss:$16 sps:$4 sm:$0xff]  }
 0x1ee   : > { %1414 = vmatmul.mubr.bf16.gmra.mrb[28].mxu1 %v6288_v37  ;;  %1560 = vmatmul.mubr.bf16.gmra.mrb[12].mxu0 %v6288_v37 }
 0x1ef   : > { %1437 = vmatpush1.bf16.msra.mxu1 %v4982_v56  ;;  %1456 = vmatprep.mubr.bf16.mxu1 %v5982_v55  ;;  %v5509_v56 = vld [vmem:[%s7727_s10 + $0xec] ss:$16 sps:$4 sm:$0xff]  }
 0x1f0   : > { %1438 = vmatprep.subr.bf16.mxu1 %v4991_v57  ;;  %v5504_v57 = vld [vmem:[%s7727_s10 + $0xe0] ss:$16 sps:$4 sm:$0xff]  }
 0x1f3   : > { %1439 = vmatpush1.bf16.msra.mxu1 %v4990_v60  ;;  %v5515_v60 = vld [vmem:[%s7727_s10 + $0x10c] ss:$16 sps:$4 sm:$0xff]  }
 0x1f4   : > { %1570 = vmatprep.subr.bf16.mxu1 %v4939_v61  ;;  %v5510_v61 = vld [vmem:[%s7727_s10 + $0x100] ss:$16 sps:$4 sm:$0xff]  }
 0x1f6   : > { %1457 = vmatmul.mubr.bf16.vlgmr.msra.gmra.mrb[32].mxu1 %v6270_v19 }
 0x1f7   : > { %1571 = vmatpush1.bf16.msra.mxu1 %v4938_v0  ;;  %1466 = vmatprep.mubr.bf16.mxu1 %v5982_v55  ;;  %v5521_v0 = vld [vmem:[%s7727_s10 + $0x12c] ss:$16 sps:$4 sm:$0xff]  }
 0x1f8   : > { %1572 = vmatprep.subr.bf16.mxu1 %v4947_v1  ;;  %v5516_v1 = vld [vmem:[%s7727_s10 + $0x120] ss:$16 sps:$4 sm:$0xff]  }
 0x1fb   : > { %1573 = vmatpush1.bf16.msra.mxu1 %v4946_v4  ;;  %v5527_v4 = vld [vmem:[%s7727_s10 + $0x14c] ss:$16 sps:$4 sm:$0xff]  }
 0x1fc   : > { %1574 = vmatprep.subr.bf16.mxu1 %v4955_v5  ;;  %v5522_v5 = vld [vmem:[%s7727_s10 + $0x140] ss:$16 sps:$4 sm:$0xff]  }
 0x1fe   : > { %1467 = vmatmul.mubr.bf16.gmra.mrb[36].mxu1 %v6268_v15 }
 0x1ff   : > { %1575 = vmatpush1.bf16.msra.mxu1 %v4954_v8  ;;  %1476 = vmatprep.mubr.bf16.mxu1 %v5982_v55  ;;  %v5533_v8 = vld [vmem:[%s7727_s10 + $0x16c] ss:$16 sps:$4 sm:$0xff]  }
 0x200   : > { %1576 = vmatprep.subr.bf16.mxu1 %v4963_v9  ;;  %v5528_v9 = vld [vmem:[%s7727_s10 + $0x160] ss:$16 sps:$4 sm:$0xff]  }
 0x203   : > { %1577 = vmatpush1.bf16.msra.mxu1 %v4962_v12  ;;  %v5539_v12 = vld [vmem:[%s7727_s10 + $0x18c] ss:$16 sps:$4 sm:$0xff]  }
 0x204   : > { %1578 = vmatprep.subr.bf16.mxu1 %v4971_v17  ;;  %v5534_v17 = vld [vmem:[%s7727_s10 + $0x180] ss:$16 sps:$4 sm:$0xff]  }
 0x206   : > { %1477 = vmatmul.mubr.bf16.gmra.mrb[40].mxu1 %v6290_v39 }
 0x207   : > { %1579 = vmatpush1.bf16.msra.mxu1 %v4970_v21  ;;  %1486 = vmatprep.mubr.bf16.mxu1 %v5982_v55  ;;  %v5545_v21 = vld [vmem:[%s7727_s10 + $0x1ac] ss:$16 sps:$4 sm:$0xff]  }
 0x208   : > { %1580 = vmatprep.subr.bf16.mxu1 %v4979_v13  ;;  %v1644_v13 = vlaneseq }
 0x20a   : > { %v6564_v24 = vshrl.u32 %v1644_v13, 7 }
 0x20b   : > { %1581 = vmatpush1.bf16.msra.mxu1 %v4978_v22  ;;  %v5548_v22 = vld [vmem:[%s7727_s10 + $0x1c4] ss:$16 sps:$4 sm:$0xff]  }
 0x20c   : > { %1582 = vmatprep.subr.bf16.mxu1 %v4987_v23  ;;  %v5551_v23 = vld [vmem:[%s7727_s10 + $0x1cc] ss:$16 sps:$4 sm:$0xff]  }
 0x20e   : > { %1487 = vmatmul.mubr.bf16.gmra.mrb[44].mxu1 %v6288_v37 }
 0x20f   : > { %1583 = vmatpush1.bf16.msra.mxu1 %v4986_v26  ;;  %1602 = vmatprep.mubr.bf16.mxu1 %v5982_v55  ;;  %v5549_v26 = vld [vmem:[%s7727_s10 + $0x1c8] ss:$16 sps:$4 sm:$0xff]  }
 0x210   : > { %1584 = vmatprep.subr.bf16.mxu1 %v4995_v27  ;;  %v5552_v27 = vld [vmem:[%s7727_s10 + $0x1e0] ss:$16 sps:$4 sm:$0xff]  }
 0x213   : > { %1585 = vmatpush1.bf16.msra.mxu1 %v4994_v28  ;;  %v5554_v28 = vld [vmem:[%s7727_s10 + $0x1e4] ss:$16 sps:$4 sm:$0xff]  }
 0x216   : > { %1603 = vmatmul.mubr.bf16.vlgmr.msra.gmra.mrb[48].mxu1 %v6270_v19  ;;  %v5467_v19 = vld [vmem:[%s7727_s10 + $0xc] ss:$16 sps:$4 sm:$0xff]  }
 0x217   : > { %1612 = vmatprep.mubr.bf16.mxu1 %v5982_v55  ;;  %3949 = vmatprep.subr.bf16.mxu1 %v5467_v19  ;;  %v6582_v19 = vsub.s32 0, %v6564_v24 }
 0x218   : > { %3950 = vmatpush1.bf16.msra.mxu1 %v5465_v30  ;;  %v5557_v30 = vld [vmem:[%s7727_s10 + $0x1ec] ss:$16 sps:$4 sm:$0xff]  }
 0x219   : > { %3951 = vmatprep.subr.bf16.mxu1 %v5473_v31  ;;  %v6596_v31 = vsub.s32 1, %v6564_v24 }
 0x21c   : > { %3952 = vmatpush1.bf16.msra.mxu1 %v5471_v33  ;;  %v6604_v33 = vld [vmem:[%s7726_s9] sm:$0xff] }
 0x21d   : > { %3953 = vmatprep.subr.bf16.mxu1 %v5479_v35  ;;  %v5563_v35 = vld [vmem:[%s7727_s10 + $0x20c] ss:$16 sps:$4 sm:$0xff]  }
 0x21e   : > { %1613 = vmatmul.mubr.bf16.gmra.mrb[52].mxu1 %v6268_v15  ;;  %v5462_v15 = vld [vmem:[%s7727_s10] ss:$16 sps:$4 sm:$0xff]  }
 0x21f   : > { %1622 = vmatprep.mubr.bf16.mxu1 %v5982_v55  ;;  %3786 = vmatpush1.bf16.msra.mxu0 %v5462_v15  ;;  %v6585_v15 = vsub.s32 4, %v6564_v24 }
 0x226   : > { %1623 = vmatmul.mubr.bf16.gmra.mrb[56].mxu1 %v6290_v39  ;;  %v5485_v39 = vld [vmem:[%s7727_s10 + $0x6c] ss:$16 sps:$4 sm:$0xff]  }
 0x227   : > { %1632 = vmatprep.mubr.bf16.mxu1 %v5982_v55  ;;  %v5470_v55 = vld [vmem:[%s7727_s10 + $0x24] ss:$16 sps:$4 sm:$0xff]  }
 0x228   : > { %3787 = vmatprep.subr.bf16.mxu0 %v5470_v55  ;;  %v6593_v55 = vld [vmem:[%s7725_s8] sm:$0xff] }
 0x229   : > { %3788 = vmatpush1.bf16.msra.mxu0 %v5468_v32  ;;  %v6599_v32 = vsub.s32 5, %v6564_v24 }
 0x22a   : > { %3789 = vmatprep.subr.bf16.mxu0 %v5476_v34  ;;  %v5560_v34 = vld [vmem:[%s7727_s10 + $0x204] ss:$16 sps:$4 sm:$0xff]  }
 0x22d   : > { %3790 = vmatpush1.bf16.msra.mxu0 %v5474_v36  ;;  %v6614_v36 = vrot.slane %v6593_v55, %v6582_v19 }
 0x22e   : > { %1633 = vmatmul.mubr.bf16.gmra.mrb[60].mxu1 %v6288_v37  ;;  %v5477_v37 = vld [vmem:[%s7727_s10 + $0x48] ss:$16 sps:$4 sm:$0xff]   ;;  %3791 = vmatprep.subr.bf16.mxu0 %v5482_v38  ;;  %v6622_v38 = vrot.slane %v6593_v55, %v6596_v31 }
 0x22f   : > { %3954 = vmatpush1.bf16.msra.mxu1 %v5477_v37  ;;  %v6618_v37 = vrot.slane %v6593_v55, %v6585_v15 }
 0x230   : > { %3955 = vmatprep.subr.bf16.mxu1 %v5485_v39  ;;  %v6626_v39 = vrot.slane %v6593_v55, %v6599_v32 }
 0x231   : > { %3792 = vmatpush1.bf16.msra.mxu0 %v5480_v40  ;;  %v6630_v40 = vrot.slane %v6604_v33, %v6582_v19 }
 0x232   : > { %3793 = vmatprep.subr.bf16.mxu0 %v5488_v42 }
 0x233   : > { %3956 = vmatpush1.bf16.msra.mxu1 %v5483_v41  ;;  %v6634_v41 = vrot.slane %v6604_v33, %v6585_v15 }
 0x234   : > { %3957 = vmatprep.subr.bf16.mxu1 %v5491_v43 }
 0x235   : > { %3794 = vmatpush1.bf16.msra.mxu0 %v5486_v44  ;;  %v6638_v44 = vrot.slane %v6604_v33, %v6596_v31 }
 0x236   : > { %3795 = vmatprep.subr.bf16.mxu0 %v5494_v46 }
 0x237   : > { %3958 = vmatpush1.bf16.msra.mxu1 %v5489_v45  ;;  %v6642_v45 = vrot.slane %v6604_v33, %v6599_v32 }
 0x238   : > { %3959 = vmatprep.subr.bf16.mxu1 %v5497_v47 }
 0x239   : > { %3796 = vmatpush1.bf16.msra.mxu0 %v5492_v48 }
 0x23a   : > { %3797 = vmatprep.subr.bf16.mxu0 %v5500_v50  ;;  %v6647_v50 = vsub.s32 2, %v6564_v24 }
 0x23b   : > { %3960 = vmatpush1.bf16.msra.mxu1 %v5495_v49 }
 0x23c   : > { %3961 = vmatprep.subr.bf16.mxu1 %v5503_v51  ;;  %v6650_v51 = vsub.s32 3, %v6564_v24 }
 0x23d   : > { %3798 = vmatpush1.bf16.msra.mxu0 %v5498_v52 }
 0x23e   : > { %3799 = vmatprep.subr.bf16.mxu0 %v5506_v54 }
 0x23f   : > { %3962 = vmatpush1.bf16.msra.mxu1 %v5501_v53 }
 0x240   : > { %3963 = vmatprep.subr.bf16.mxu1 %v5509_v56 }
 0x241   : > { %3800 = vmatpush1.bf16.msra.mxu0 %v5504_v57 }
 0x242   : > { %3801 = vmatprep.subr.bf16.mxu0 %v5512_v59 }
 0x243   : > { %3964 = vmatpush1.bf16.msra.mxu1 %v5507_v58 }
 0x244   : > { %3965 = vmatprep.subr.bf16.mxu1 %v5515_v60 }
 0x245   : > { %3802 = vmatpush1.bf16.msra.mxu0 %v5510_v61 }
 0x246   : > { %3803 = vmatprep.subr.bf16.mxu0 %v5518_v63 }
 0x247   : > { %3966 = vmatpush1.bf16.msra.mxu1 %v5513_v62 }
 0x248   : > { %3967 = vmatprep.subr.bf16.mxu1 %v5521_v0 }
 0x249   : > { %3804 = vmatpush1.bf16.msra.mxu0 %v5516_v1 }
 0x24a   : > { %3805 = vmatprep.subr.bf16.mxu0 %v5524_v3 }
 0x24b   : > { %3968 = vmatpush1.bf16.msra.mxu1 %v5519_v2 }
 0x24c   : > { %3969 = vmatprep.subr.bf16.mxu1 %v5527_v4 }
 0x24d   : > { %3806 = vmatpush1.bf16.msra.mxu0 %v5522_v5  ;;  %v6666_v5 = vrot.slane %v6593_v55, %v6647_v50 }
 0x24e   : > { %3807 = vmatprep.subr.bf16.mxu0 %v5530_v7 }
 0x24f   : > { %3970 = vmatpush1.bf16.msra.mxu1 %v5525_v6  ;;  %v6670_v6 = vrot.slane %v6593_v55, %v6650_v51 }
 0x250   : > { %3971 = vmatprep.subr.bf16.mxu1 %v5533_v8 }
 0x251   : > { %3808 = vmatpush1.bf16.msra.mxu0 %v5528_v9  ;;  %v6676_v9 = vrot.slane %v6604_v33, %v6647_v50 }
 0x252   : > { %3809 = vmatprep.subr.bf16.mxu0 %v5536_v11 }
 0x253   : > { %3972 = vmatpush1.bf16.msra.mxu1 %v5531_v10  ;;  %v6680_v10 = vrot.slane %v6604_v33, %v6650_v51 }
 0x254   : > { %3973 = vmatprep.subr.bf16.mxu1 %v5539_v12 }
 0x255   : > { %3810 = vmatpush1.bf16.msra.mxu0 %v5534_v17 }
 0x256   : > { %3811 = vmatprep.subr.bf16.mxu0 %v5542_v20 }
 0x257   : > { %3974 = vmatpush1.bf16.msra.mxu1 %v5537_v18 }
 0x258   : > { %3975 = vmatprep.subr.bf16.mxu1 %v5545_v21 }
 0x259   : > { %3812 = vmatpush1.bf16.msra.mxu0 %v5540_v14 }
 0x25a   : > { %3813 = vmatprep.subr.bf16.mxu0 %v5548_v22 }
 0x25b   : > { %3976 = vmatpush1.bf16.msra.mxu1 %v5543_v16 }
 0x25c   : > { %3977 = vmatprep.subr.bf16.mxu1 %v5551_v23 }
 0x25d   : > { %3814 = vmatpush1.bf16.msra.mxu0 %v5546_v25 }
 0x25e   : > { %3815 = vmatprep.subr.bf16.mxu0 %v5554_v28 }
 0x25f   : > { %3978 = vmatpush1.bf16.msra.mxu1 %v5549_v26 }
 0x260   : > { %3979 = vmatprep.subr.bf16.mxu1 %v5557_v30 }
 0x261   : > { %3816 = vmatpush1.bf16.msra.mxu0 %v5552_v27 }
 0x262   : > { %3826 = vmatprep.subr.bf16.mxu0 %v5560_v34 }
 0x263   : > { %3980 = vmatpush1.bf16.msra.mxu1 %v5555_v29 }
 0x264   : > { %3990 = vmatprep.subr.bf16.mxu1 %v5563_v35 }
 0x2a9   : > { %v1385_v42 = vpop.f32.mrb[16].mxu1  ;;  %v1531_v43 = vpop.f32.mrb[0].mxu0 }
 0x2aa   : > { %v1684_v46 = vmul.f32 %v6614_v36, %v1385_v42  ;;  %v1688_v47 = vmul.f32 %v6618_v37, %v1531_v43  ;;  %v1387_v48 = vpop.f32.mrb[17].mxu1  ;;  %v1533_v49 = vpop.f32.mrb[1].mxu0 }
 0x2ab   : > { %v1685_v52 = vmul.f32 %v6622_v38, %v1387_v48  ;;  %v1689_v53 = vmul.f32 %v6626_v39, %v1533_v49  ;;  %v1389_v54 = vpop.f32.mrb[18].mxu1  ;;  %v1535_v56 = vpop.f32.mrb[2].mxu0 }
 0x2ac   : > { %v1789_v57 = vadd.f32 %v6630_v40, %v1684_v46  ;;  %v1793_v58 = vadd.f32 %v6634_v41, %v1688_v47  ;;  %v1692_v59 = vmul.f32 %v6614_v36, %v1389_v54  ;;  %v1696_v60 = vmul.f32 %v6618_v37, %v1535_v56  ;;  %v1391_v61 = vpop.f32.mrb[19].mxu1  ;;  %v1537_v62 = vpop.f32.mrb[3].mxu0 }
 0x2ad   : > { %v1790_v63 = vadd.f32 %v6638_v44, %v1685_v52  ;;  %v1794_v0 = vadd.f32 %v6642_v45, %v1689_v53  ;;  %v1693_v1 = vmul.f32 %v6622_v38, %v1391_v61  ;;  %v1697_v2 = vmul.f32 %v6626_v39, %v1537_v62 }
 0x2ae   : > { %v1797_v3 = vadd.f32 %v6630_v40, %v1692_v59  ;;  %v1801_v4 = vadd.f32 %v6634_v41, %v1696_v60  ;;  %v1853_v11 = vmax.f32 %v1789_v57, 0.0  ;;  %v1857_v12 = vmax.f32 %v1793_v58, 0.0 }
 0x2af   : > { %v1798_v7 = vadd.f32 %v6638_v44, %v1693_v1  ;;  %v1802_v8 = vadd.f32 %v6642_v45, %v1697_v2  ;;  %v1854_v20 = vmax.f32 %v1790_v63, 0.0  ;;  %v1858_v21 = vmax.f32 %v1794_v0, 0.0 }
 0x2b0   : > { %v1861_v17 = vmax.f32 %v1797_v3, 0.0  ;;  %v1865_v18 = vmax.f32 %v1801_v4, 0.0 }
 0x2b1   : > { %v1862_v13 = vmax.f32 %v1798_v7, 0.0  ;;  %v1866_v14 = vmax.f32 %v1802_v8, 0.0  ;;  %v1395_v16 = vpop.f32.mrb[20].mxu1  ;;  %v1541_v22 = vpop.f32.mrb[4].mxu0 }
 0x2b2   : > { %v2024_v23 = vmax.f32 %v1853_v11, %v1861_v17  ;;  %v2076_v25 = vmax.f32 %v1857_v12, %v1865_v18  ;;  %v1700_v26 = vmul.f32 %v6614_v36, %v1395_v16  ;;  %v1704_v27 = vmul.f32 %v6618_v37, %v1541_v22  ;;  %v1397_v28 = vpop.f32.mrb[21].mxu1  ;;  %v1543_v29 = vpop.f32.mrb[5].mxu0 }
 0x2b3   : > { %v2037_v30 = vmax.f32 %v1854_v20, %v1862_v13  ;;  %v2089_v34 = vmax.f32 %v1858_v21, %v1866_v14  ;;  %v1701_v35 = vmul.f32 %v6622_v38, %v1397_v28  ;;  %v1705_v42 = vmul.f32 %v6626_v39, %v1543_v29  ;;  %v1399_v43 = vpop.f32.mrb[22].mxu1  ;;  %v1545_v46 = vpop.f32.mrb[6].mxu0 }
 0x2b4   : > { %v1805_v47 = vadd.f32 %v6630_v40, %v1700_v26  ;;  %v1809_v48 = vadd.f32 %v6634_v41, %v1704_v27  ;;  %v1708_v49 = vmul.f32 %v6614_v36, %v1399_v43  ;;  %v1712_v52 = vmul.f32 %v6618_v37, %v1545_v46  ;;  %v1401_v53 = vpop.f32.mrb[23].mxu1  ;;  %v1547_v54 = vpop.f32.mrb[7].mxu0 }
 0x2b5   : > { %v1806_v56 = vadd.f32 %v6638_v44, %v1701_v35  ;;  %v1810_v57 = vadd.f32 %v6642_v45, %v1705_v42  ;;  %v1709_v58 = vmul.f32 %v6622_v38, %v1401_v53  ;;  %v1713_v59 = vmul.f32 %v6626_v39, %v1547_v54 }
 0x2b6   : > { %v1869_v60 = vmax.f32 %v1805_v47, 0.0  ;;  %v1873_v61 = vmax.f32 %v1809_v48, 0.0  ;;  %v1813_v62 = vadd.f32 %v6630_v40, %v1708_v49  ;;  %v1817_v63 = vadd.f32 %v6634_v41, %v1712_v52 }
 0x2b7   : > { %v1870_v0 = vmax.f32 %v1806_v56, 0.0  ;;  %v1874_v1 = vmax.f32 %v1810_v57, 0.0  ;;  %v1814_v2 = vadd.f32 %v6638_v44, %v1709_v58  ;;  %v1818_v3 = vadd.f32 %v6642_v45, %v1713_v59 }
 0x2b8   : > { %v2025_v4 = vmax.f32 %v2024_v23, %v1869_v60  ;;  %v2077_v7 = vmax.f32 %v2076_v25, %v1873_v61  ;;  %v1877_v8 = vmax.f32 %v1813_v62, 0.0  ;;  %v1881_v11 = vmax.f32 %v1817_v63, 0.0 }
 0x2b9   : > { %v2038_v12 = vmax.f32 %v2037_v30, %v1870_v0  ;;  %v2090_v17 = vmax.f32 %v2089_v34, %v1874_v1  ;;  %v1878_v18 = vmax.f32 %v1814_v2, 0.0  ;;  %v1882_v20 = vmax.f32 %v1818_v3, 0.0  ;;  %v1405_v21 = vpop.f32.mrb[24].mxu1  ;;  %v1551_v13 = vpop.f32.mrb[8].mxu0 }
 0x2ba   : > { %v2026_v14 = vmax.f32 %v2025_v4, %v1877_v8  ;;  %v2078_v16 = vmax.f32 %v2077_v7, %v1881_v11  ;;  %v1716_v22 = vmul.f32 %v6614_v36, %v1405_v21  ;;  %v1720_v26 = vmul.f32 %v6618_v37, %v1551_v13  ;;  %v1407_v27 = vpop.f32.mrb[25].mxu1  ;;  %v1553_v28 = vpop.f32.mrb[9].mxu0 }
 0x2bb   : > { %v2039_v29 = vmax.f32 %v2038_v12, %v1878_v18  ;;  %v2091_v35 = vmax.f32 %v2090_v17, %v1882_v20  ;;  %v1717_v23 = vmul.f32 %v6622_v38, %v1407_v27  ;;  %v1721_v25 = vmul.f32 %v6626_v39, %v1553_v28  ;;  %v1409_v30 = vpop.f32.mrb[26].mxu1  ;;  %v1555_v34 = vpop.f32.mrb[10].mxu0 }
 0x2bc   : > { %v1821_v42 = vadd.f32 %v6630_v40, %v1716_v22  ;;  %v1825_v43 = vadd.f32 %v6634_v41, %v1720_v26  ;;  %v1724_v46 = vmul.f32 %v6614_v36, %v1409_v30  ;;  %v1728_v47 = vmul.f32 %v6618_v37, %v1555_v34  ;;  %v1411_v48 = vpop.f32.mrb[27].mxu1  ;;  %v1557_v49 = vpop.f32.mrb[11].mxu0 }
 0x2bd   : > { %v1822_v52 = vadd.f32 %v6638_v44, %v1717_v23  ;;  %v1826_v53 = vadd.f32 %v6642_v45, %v1721_v25  ;;  %v1725_v54 = vmul.f32 %v6622_v38, %v1411_v48  ;;  %v1729_v56 = vmul.f32 %v6626_v39, %v1557_v49 }
 0x2be   : > { %v1885_v57 = vmax.f32 %v1821_v42, 0.0  ;;  %v1889_v58 = vmax.f32 %v1825_v43, 0.0  ;;  %v1829_v59 = vadd.f32 %v6630_v40, %v1724_v46  ;;  %v1833_v60 = vadd.f32 %v6634_v41, %v1728_v47 }
 0x2bf   : > { %v1886_v61 = vmax.f32 %v1822_v52, 0.0  ;;  %v1890_v62 = vmax.f32 %v1826_v53, 0.0  ;;  %v1830_v63 = vadd.f32 %v6638_v44, %v1725_v54  ;;  %v1834_v0 = vadd.f32 %v6642_v45, %v1729_v56 }
 0x2c0   : > { %v2027_v1 = vmax.f32 %v2026_v14, %v1885_v57  ;;  %v2079_v2 = vmax.f32 %v2078_v16, %v1889_v58  ;;  %v1893_v3 = vmax.f32 %v1829_v59, 0.0  ;;  %v1897_v4 = vmax.f32 %v1833_v60, 0.0 }
 0x2c1   : > { %v2040_v7 = vmax.f32 %v2039_v29, %v1886_v61  ;;  %v2092_v8 = vmax.f32 %v2091_v35, %v1890_v62  ;;  %v1894_v11 = vmax.f32 %v1830_v63, 0.0  ;;  %v1898_v12 = vmax.f32 %v1834_v0, 0.0  ;;  %v1415_v17 = vpop.f32.mrb[28].mxu1  ;;  %v1561_v18 = vpop.f32.mrb[12].mxu0 }
 0x2c2   : > { %v2028_v20 = vmax.f32 %v2027_v1, %v1893_v3  ;;  %v2080_v21 = vmax.f32 %v2079_v2, %v1897_v4  ;;  %v1732_v13 = vmul.f32 %v6614_v36, %v1415_v17  ;;  %v1736_v22 = vmul.f32 %v6618_v37, %v1561_v18  ;;  %v1417_v26 = vpop.f32.mrb[29].mxu1  ;;  %v1563_v27 = vpop.f32.mrb[13].mxu0 }
 0x2c3   : > { %v2041_v28 = vmax.f32 %v2040_v7, %v1894_v11  ;;  %v2093_v23 = vmax.f32 %v2092_v8, %v1898_v12  ;;  %v1733_v14 = vmul.f32 %v6622_v38, %v1417_v26  ;;  %v1737_v16 = vmul.f32 %v6626_v39, %v1563_v27  ;;  %v1419_v29 = vpop.f32.mrb[30].mxu1  ;;  %v1565_v35 = vpop.f32.mrb[14].mxu0 }
 0x2c4   : > { %v1837_v25 = vadd.f32 %v6630_v40, %v1732_v13  ;;  %v1841_v30 = vadd.f32 %v6634_v41, %v1736_v22  ;;  %v1740_v34 = vmul.f32 %v6614_v36, %v1419_v29  ;;  %v1744_v42 = vmul.f32 %v6618_v37, %v1565_v35  ;;  %v1421_v43 = vpop.f32.mrb[31].mxu1  ;;  %v1567_v46 = vpop.f32.mrb[15].mxu0 }
 0x2c5   : > { %v1838_v47 = vadd.f32 %v6638_v44, %v1733_v14  ;;  %v1842_v48 = vadd.f32 %v6642_v45, %v1737_v16  ;;  %v1741_v49 = vmul.f32 %v6622_v38, %v1421_v43  ;;  %v1745_v52 = vmul.f32 %v6626_v39, %v1567_v46 }
 0x2c6   : > { %v1901_v53 = vmax.f32 %v1837_v25, 0.0  ;;  %v1905_v54 = vmax.f32 %v1841_v30, 0.0  ;;  %v1845_v56 = vadd.f32 %v6630_v40, %v1740_v34  ;;  %v1849_v57 = vadd.f32 %v6634_v41, %v1744_v42 }
 0x2c7   : > { %v1902_v58 = vmax.f32 %v1838_v47, 0.0  ;;  %v1906_v36 = vmax.f32 %v1842_v48, 0.0  ;;  %v1846_v37 = vadd.f32 %v6638_v44, %v1741_v49  ;;  %v1850_v59 = vadd.f32 %v6642_v45, %v1745_v52 }
 0x2c8   : > { %v2029_v60 = vmax.f32 %v2028_v20, %v1901_v53  ;;  %v2081_v61 = vmax.f32 %v2080_v21, %v1905_v54  ;;  %v1909_v62 = vmax.f32 %v1845_v56, 0.0  ;;  %v1913_v63 = vmax.f32 %v1849_v57, 0.0 }
 0x2c9   : > { %v2042_v0 = vmax.f32 %v2041_v28, %v1902_v58  ;;  %v2094_v38 = vmax.f32 %v2093_v23, %v1906_v36  ;;  %v1910_v1 = vmax.f32 %v1846_v37, 0.0  ;;  %v1914_v39 = vmax.f32 %v1850_v59, 0.0  ;;  %v1458_v2 = vpop.f32.mrb[32].mxu1 }
 0x2ca   : > { %v2030_v3 = vmax.f32 %v2029_v60, %v1909_v62  ;;  %v2082_v4 = vmax.f32 %v2081_v61, %v1913_v63  ;;  %v1686_v40 = vmul.f32 %v6666_v5, %v1458_v2  ;;  %v1460_v41 = vpop.f32.mrb[33].mxu1 }
 0x2cb   : > { %v2043_v7 = vmax.f32 %v2042_v0, %v1910_v1  ;;  %v2095_v8 = vmax.f32 %v2094_v38, %v1914_v39  ;;  %v1687_v44 = vmul.f32 %v6670_v6, %v1460_v41  ;;  %v1462_v11 = vpop.f32.mrb[34].mxu1 }
 0x2cc   : > { %v2031_v45 = vrot.slane %v2030_v3, 4  ;;  %v2083_v12 = vrot.slane %v2082_v4, 4  ;;  %v1791_v17 = vadd.f32 %v6676_v9, %v1686_v40  ;;  %v1694_v18 = vmul.f32 %v6666_v5, %v1462_v11  ;;  %v1464_v20 = vpop.f32.mrb[35].mxu1 }
 0x2cd   : > { %v2044_v21 = vrot.slane %v2043_v7, 4  ;;  %v2096_v13 = vrot.slane %v2095_v8, 4  ;;  %v1792_v22 = vadd.f32 %v6680_v10, %v1687_v44  ;;  %v1695_v26 = vmul.f32 %v6670_v6, %v1464_v20 }
 0x2ce   : > { %v2032_v27 = vmax.f32 %v2030_v3, %v2031_v45  ;;  %v2084_v28 = vmax.f32 %v2082_v4, %v2083_v12  ;;  %v1799_v23 = vadd.f32 %v6676_v9, %v1694_v18  ;;  %v1855_v30 = vmax.f32 %v1791_v17, 0.0 }
 0x2cf   : > { %v2045_v14 = vmax.f32 %v2043_v7, %v2044_v21  ;;  %v2097_v16 = vmax.f32 %v2095_v8, %v2096_v13  ;;  %v1800_v29 = vadd.f32 %v6680_v10, %v1695_v26  ;;  %v1856_v46 = vmax.f32 %v1792_v22, 0.0 }
 0x2d0   : > { %v2033_v35 = vrot.slane %v2032_v27, 2  ;;  %v2085_v25 = vrot.slane %v2084_v28, 2  ;;  %v1863_v34 = vmax.f32 %v1799_v23, 0.0 }
 0x2d1   : > { %v2046_v42 = vrot.slane %v2045_v14, 2  ;;  %v2098_v43 = vrot.slane %v2097_v16, 2  ;;  %v1864_v47 = vmax.f32 %v1800_v29, 0.0  ;;  %v1468_v48 = vpop.f32.mrb[36].mxu1 }
 0x2d2   : > { %v2034_v49 = vmax.f32 %v2032_v27, %v2033_v35  ;;  %v2086_v52 = vmax.f32 %v2084_v28, %v2085_v25  ;;  %v2050_v53 = vmax.f32 %v1855_v30, %v1863_v34  ;;  %v1702_v54 = vmul.f32 %v6666_v5, %v1468_v48  ;;  %v1470_v56 = vpop.f32.mrb[37].mxu1 }
 0x2d3   : > { %v2047_v57 = vmax.f32 %v2045_v14, %v2046_v42  ;;  %v2099_v58 = vmax.f32 %v2097_v16, %v2098_v43  ;;  %v2063_v36 = vmax.f32 %v1856_v46, %v1864_v47  ;;  %v1703_v37 = vmul.f32 %v6670_v6, %v1470_v56  ;;  %v1472_v59 = vpop.f32.mrb[38].mxu1 }
 0x2d4   : > { %v2035_v60 = vrot.slane %v2034_v49, 1  ;;  %v2087_v61 = vrot.slane %v2086_v52, 1  ;;  %v1807_v62 = vadd.f32 %v6676_v9, %v1702_v54  ;;  %v1710_v63 = vmul.f32 %v6666_v5, %v1472_v59  ;;  %v1474_v0 = vpop.f32.mrb[39].mxu1 }
 0x2d5   : > { %v2048_v38 = vrot.slane %v2047_v57, 1  ;;  %v2100_v1 = vrot.slane %v2099_v58, 1  ;;  %v1808_v39 = vadd.f32 %v6680_v10, %v1703_v37  ;;  %v1711_v2 = vmul.f32 %v6670_v6, %v1474_v0 }
 0x2d6   : > { %v6744_v3 = vmax.f32 %v2034_v49, %v2035_v60  ;;  %v6746_v4 = vmax.f32 %v2086_v52, %v2087_v61  ;;  %v1871_v40 = vmax.f32 %v1807_v62, 0.0  ;;  %v1815_v41 = vadd.f32 %v6676_v9, %v1710_v63 }
 0x2d7   : > { %v6749_v7 = vmax.f32 %v2047_v57, %v2048_v38  ;;  %v6751_v8 = vmax.f32 %v2099_v58, %v2100_v1  ;;  %v1872_v44 = vmax.f32 %v1808_v39, 0.0  ;;  %v1816_v11 = vadd.f32 %v6680_v10, %v1711_v2 }
 0x2d8   : > { %v2051_v45 = vmax.f32 %v2050_v53, %v1871_v40  ;;  %v1879_v12 = vmax.f32 %v1815_v41, 0.0  ;;  %v6768_v58 = vsub.s32 6, %v6564_v24  ;;  %v6772_v60 = vsub.s32 7, %v6564_v24 }
 0x2d9   : > { %v2142_v17 = vcombine.low %v6744_v3, %v6749_v7  ;;  %v2144_v18 = vcombine.low %v6746_v4, %v6751_v8  ;;  %v2064_v20 = vmax.f32 %v2063_v36, %v1872_v44  ;;  %v1880_v21 = vmax.f32 %v1816_v11, 0.0  ;;  %v1478_v13 = vpop.f32.mrb[40].mxu1  ;;  %v5558_v8 = vld [vmem:[%s7727_s10 + $0x200] ss:$16 sps:$4 sm:$0xff]  }
 0x2da   : > { %v2052_v22 = vmax.f32 %v2051_v45, %v1879_v12  ;;  %v1718_v26 = vmul.f32 %v6666_v5, %v1478_v13  ;;  %v1480_v27 = vpop.f32.mrb[41].mxu1  ;;  %v6781_v2 = vrot.slane %v6593_v55, %v6768_v58  ;;  %v6786_v44 = vrot.slane %v6593_v55, %v6772_v60 }
 0x2db   : > { %v2065_v28 = vmax.f32 %v2064_v20, %v1880_v21  ;;  %v1719_v23 = vmul.f32 %v6670_v6, %v1480_v27  ;;  %v1482_v14 = vpop.f32.mrb[42].mxu1  ;;  %v6790_v45 = vrot.slane %v6604_v33, %v6768_v58  ;;  %v6794_v20 = vrot.slane %v6604_v33, %v6772_v60 }
 0x2dc   : > { %v1823_v16 = vadd.f32 %v6676_v9, %v1718_v26  ;;  %v1726_v29 = vmul.f32 %v6666_v5, %v1482_v14  ;;  %v1484_v35 = vpop.f32.mrb[43].mxu1 }
 0x2dd   : > { %v1824_v25 = vadd.f32 %v6680_v10, %v1719_v23  ;;  %v1727_v30 = vmul.f32 %v6670_v6, %v1484_v35 }
 0x2de   : > { %v1887_v34 = vmax.f32 %v1823_v16, 0.0  ;;  %v1831_v42 = vadd.f32 %v6676_v9, %v1726_v29 }
 0x2df   : > { %v1888_v43 = vmax.f32 %v1824_v25, 0.0  ;;  %v1832_v46 = vadd.f32 %v6680_v10, %v1727_v30  ;;  %v5983_v30 = vmov 1966171168  }
 0x2e0   : > { %v2053_v47 = vmax.f32 %v2052_v22, %v1887_v34  ;;  %v1895_v48 = vmax.f32 %v1831_v42, 0.0  ;;  %v2147_v34 = vunpack.c.l.s4 %v5983_v30 }
 0x2e1   : > { %v2066_v49 = vmax.f32 %v2065_v28, %v1888_v43  ;;  %v1896_v52 = vmax.f32 %v1832_v46, 0.0  ;;  %v1488_v53 = vpop.f32.mrb[44].mxu1 }
 0x2e2   : > { %v2054_v54 = vmax.f32 %v2053_v47, %v1895_v48  ;;  %v1734_v56 = vmul.f32 %v6666_v5, %v1488_v53  ;;  %v1490_v57 = vpop.f32.mrb[45].mxu1 }
 0x2e3   : > { %v2067_v36 = vmax.f32 %v2066_v49, %v1896_v52  ;;  %v1735_v37 = vmul.f32 %v6670_v6, %v1490_v57  ;;  %v1492_v59 = vpop.f32.mrb[46].mxu1 }
 0x2e4   : > { %v1839_v61 = vadd.f32 %v6676_v9, %v1734_v56  ;;  %v1742_v62 = vmul.f32 %v6666_v5, %v1492_v59  ;;  %v1494_v63 = vpop.f32.mrb[47].mxu1  ;;  %v2148_v59 = vunpack.c.0.s8 %v2147_v34 }
 0x2e5   : > { %v1840_v0 = vadd.f32 %v6680_v10, %v1735_v37  ;;  %v1743_v38 = vmul.f32 %v6670_v6, %v1494_v63 }
 0x2e6   : > { %v1903_v1 = vmax.f32 %v1839_v61, 0.0  ;;  %v1847_v39 = vadd.f32 %v6676_v9, %v1742_v62 }
 0x2e7   : > { %v1904_v40 = vmax.f32 %v1840_v0, 0.0  ;;  %v1848_v41 = vadd.f32 %v6680_v10, %v1743_v38 }
 0x2e8   : > { %v2055_v5 = vmax.f32 %v2054_v54, %v1903_v1  ;;  %v1911_v11 = vmax.f32 %v1847_v39, 0.0 }
 0x2e9   : > { %v2068_v6 = vmax.f32 %v2067_v36, %v1904_v40  ;;  %v1912_v12 = vmax.f32 %v1848_v41, 0.0  ;;  %v1604_v9 = vpop.f32.mrb[48].mxu1 }
 0x2ea   : > { %v2056_v21 = vmax.f32 %v2055_v5, %v1911_v11  ;;  %v1690_v10 = vmul.f32 %v6781_v2, %v1604_v9  ;;  %v1606_v13 = vpop.f32.mrb[49].mxu1 }
 0x2eb   : > { %v2069_v22 = vmax.f32 %v2068_v6, %v1912_v12  ;;  %v1691_v55 = vmul.f32 %v6786_v44, %v1606_v13  ;;  %v1608_v26 = vpop.f32.mrb[50].mxu1 }
 0x2ec   : > { %v2057_v27 = vrot.slane %v2056_v21, 4  ;;  %v1795_v28 = vadd.f32 %v6790_v45, %v1690_v10  ;;  %v1698_v23 = vmul.f32 %v6781_v2, %v1608_v26  ;;  %v1610_v14 = vpop.f32.mrb[51].mxu1 }
 0x2ed   : > { %v2070_v16 = vrot.slane %v2069_v22, 4  ;;  %v1796_v29 = vadd.f32 %v6794_v20, %v1691_v55  ;;  %v1699_v33 = vmul.f32 %v6786_v44, %v1610_v14 }
 0x2ee   : > { %v2058_v35 = vmax.f32 %v2056_v21, %v2057_v27  ;;  %v1803_v25 = vadd.f32 %v6790_v45, %v1698_v23  ;;  %v1859_v47 = vmax.f32 %v1795_v28, 0.0  ;;  %v6812_v21 = vsub.s32 %v2148_v59, %v6564_v24 }
 0x2ef   : > { %v2071_v42 = vmax.f32 %v2069_v22, %v2070_v16  ;;  %v1804_v43 = vadd.f32 %v6794_v20, %v1699_v33  ;;  %v1860_v52 = vmax.f32 %v1796_v29, 0.0 }
 0x2f0   : > { %v2059_v46 = vrot.slane %v2058_v35, 2  ;;  %v1867_v48 = vmax.f32 %v1803_v25, 0.0  ;;  %v2152_v24 = vrot.slane %v2142_v17, %v6812_v21 }
 0x2f1   : > { %v2072_v49 = vrot.slane %v2071_v42, 2  ;;  %v1868_v53 = vmax.f32 %v1804_v43, 0.0  ;;  %v1614_v54 = vpop.f32.mrb[52].mxu1 }
 0x2f2   : > { %v2060_v56 = vmax.f32 %v2058_v35, %v2059_v46  ;;  %v2102_v57 = vmax.f32 %v1859_v47, %v1867_v48  ;;  %v1706_v36 = vmul.f32 %v6781_v2, %v1614_v54  ;;  %v1616_v37 = vpop.f32.mrb[53].mxu1 }
 0x2f3   : > { %v2073_v61 = vmax.f32 %v2071_v42, %v2072_v49  ;;  %v2115_v62 = vmax.f32 %v1860_v52, %v1868_v53  ;;  %v1707_v63 = vmul.f32 %v6786_v44, %v1616_v37  ;;  %v1618_v0 = vpop.f32.mrb[54].mxu1 }
 0x2f4   : > { %v2061_v38 = vrot.slane %v2060_v56, 1  ;;  %v1811_v1 = vadd.f32 %v6790_v45, %v1706_v36  ;;  %v1714_v39 = vmul.f32 %v6781_v2, %v1618_v0  ;;  %v1620_v40 = vpop.f32.mrb[55].mxu1 }
 0x2f5   : > { %v2074_v41 = vrot.slane %v2073_v61, 1  ;;  %v1812_v5 = vadd.f32 %v6794_v20, %v1707_v63  ;;  %v1715_v11 = vmul.f32 %v6786_v44, %v1620_v40 }
 0x2f6   : > { %v2062_v6 = vmax.f32 %v2060_v56, %v2061_v38  ;;  %v1875_v12 = vmax.f32 %v1811_v1, 0.0  ;;  %v1819_v9 = vadd.f32 %v6790_v45, %v1714_v39 }
 0x2f7   : > { %v2075_v10 = vmax.f32 %v2073_v61, %v2074_v41  ;;  %v1876_v13 = vmax.f32 %v1812_v5, 0.0  ;;  %v1820_v22 = vadd.f32 %v6794_v20, %v1715_v11 }
 0x2f8   : > { %v2103_v55 = vmax.f32 %v2102_v57, %v1875_v12  ;;  %v1883_v26 = vmax.f32 %v1819_v9, 0.0 }
 0x2f9   : > { %v2143_v27 = vcombine.low %v2062_v6, %v2075_v10  ;;  %v2116_v28 = vmax.f32 %v2115_v62, %v1876_v13  ;;  %v1884_v23 = vmax.f32 %v1820_v22, 0.0  ;;  %v1624_v14 = vpop.f32.mrb[56].mxu1 }
 0x2fa   : > { %v2104_v16 = vmax.f32 %v2103_v55, %v1883_v26  ;;  %v1722_v29 = vmul.f32 %v6781_v2, %v1624_v14  ;;  %v1626_v33 = vpop.f32.mrb[57].mxu1 }
 0x2fb   : > { %v2159_v35 = vrot.slane %v2143_v27, %v6812_v21  ;;  %v2117_v25 = vmax.f32 %v2116_v28, %v1884_v23  ;;  %v1723_v30 = vmul.f32 %v6786_v44, %v1626_v33  ;;  %v1628_v34 = vpop.f32.mrb[58].mxu1 }
 0x2fc   : > { %v1827_v42 = vadd.f32 %v6790_v45, %v1722_v29  ;;  %v1730_v43 = vmul.f32 %v6781_v2, %v1628_v34  ;;  %v1630_v46 = vpop.f32.mrb[59].mxu1 }
 0x2fd   : > { %v2174_v47 = vcombine.low %v2152_v24, %v2159_v35  ;;  %v1828_v48 = vadd.f32 %v6794_v20, %v1723_v30  ;;  %v1731_v49 = vmul.f32 %v6786_v44, %v1630_v46 }
 0x2fe   : > { %v1891_v52 = vmax.f32 %v1827_v42, 0.0  ;;  %v1835_v3 = vadd.f32 %v6790_v45, %v1730_v43 }
 0x2ff   : > { %v1892_v7 = vmax.f32 %v1828_v48, 0.0  ;;  %v1836_v17 = vadd.f32 %v6794_v20, %v1731_v49  ;;  %v2182_v42 = vrot.slane %v2174_v47, %v6812_v21  ;;  %v5566_v47 = vld [vmem:[%s7727_s10 + $0x224] ss:$16 sps:$4 sm:$0xff]  }
 0x300   : > { %v2105_v53 = vmax.f32 %v2104_v16, %v1891_v52  ;;  %v1899_v54 = vmax.f32 %v1835_v3, 0.0  ;;  %v5569_v3 = vld [vmem:[%s7727_s10 + $0x22c] ss:$16 sps:$4 sm:$0xff]  }
 0x301   : > { %v2118_v56 = vmax.f32 %v2117_v25, %v1892_v7  ;;  %v1900_v57 = vmax.f32 %v1836_v17, 0.0  ;;  %v1634_v36 = vpop.f32.mrb[60].mxu1  ;;  %v5564_v17 = vld [vmem:[%s7727_s10 + $0x220] ss:$16 sps:$4 sm:$0xff]  }
 0x302   : > { %v2106_v37 = vmax.f32 %v2105_v53, %v1899_v54  ;;  %v1738_v59 = vmul.f32 %v6781_v2, %v1634_v36  ;;  %v1636_v61 = vpop.f32.mrb[61].mxu1  ;;  %v5567_v53 = vld [vmem:[%s7727_s10 + $0x228] ss:$16 sps:$4 sm:$0xff]   ;;  %v5572_v54 = vld [vmem:[%s7727_s10 + $0x244] ss:$16 sps:$4 sm:$0xff]  }
 0x303   : > { %v2119_v62 = vmax.f32 %v2118_v56, %v1900_v57  ;;  %v1739_v63 = vmul.f32 %v6786_v44, %v1636_v61  ;;  %v1638_v0 = vpop.f32.mrb[62].mxu1  ;;  %v5575_v56 = vld [vmem:[%s7727_s10 + $0x24c] ss:$16 sps:$4 sm:$0xff]   ;;  %v5570_v57 = vld [vmem:[%s7727_s10 + $0x240] ss:$16 sps:$4 sm:$0xff]  }
 0x304   : > { %v1843_v38 = vadd.f32 %v6790_v45, %v1738_v59  ;;  %v1746_v1 = vmul.f32 %v6781_v2, %v1638_v0  ;;  %v1640_v39 = vpop.f32.mrb[63].mxu1  ;;  %v5573_v36 = vld [vmem:[%s7727_s10 + $0x248] ss:$16 sps:$4 sm:$0xff]   ;;  %v5581_v59 = vld [vmem:[%s7727_s10 + $0x26c] ss:$16 sps:$4 sm:$0xff]  }
 0x305   : > { %v1844_v40 = vadd.f32 %v6794_v20, %v1739_v63  ;;  %v1747_v41 = vmul.f32 %v6786_v44, %v1640_v39  ;;  %v5576_v61 = vld [vmem:[%s7727_s10 + $0x260] ss:$16 sps:$4 sm:$0xff]   ;;  %v5584_v63 = vld [vmem:[%s7727_s10 + $0x284] ss:$16 sps:$4 sm:$0xff]   ;;  %v5587_v0 = vld [vmem:[%s7727_s10 + $0x28c] ss:$16 sps:$4 sm:$0xff]  }
 0x306   : > { %v1907_v5 = vmax.f32 %v1843_v38, 0.0  ;;  %v1851_v11 = vadd.f32 %v6790_v45, %v1746_v1  ;;  %v5582_v38 = vld [vmem:[%s7727_s10 + $0x280] ss:$16 sps:$4 sm:$0xff]   ;;  %v5585_v1 = vld [vmem:[%s7727_s10 + $0x288] ss:$16 sps:$4 sm:$0xff]  }
 0x307   : > { %v1908_v6 = vmax.f32 %v1844_v40, 0.0  ;;  %v1852_v12 = vadd.f32 %v6794_v20, %v1747_v41  ;;  %v2166_v20 = vrot.slane %v2144_v18, %v6812_v21  ;;  %v5561_v18 = vld [vmem:[%s7727_s10 + $0x208] ss:$16 sps:$4 sm:$0xff]   ;;  %v5590_v39 = vld [vmem:[%s7727_s10 + $0x2a4] ss:$16 sps:$4 sm:$0xff]  }
 0x308   : > { %v2107_v9 = vmax.f32 %v2106_v37, %v1907_v5  ;;  %v1915_v10 = vmax.f32 %v1851_v11, 0.0  ;;  %v5578_v37 = vld [vmem:[%s7727_s10 + $0x264] ss:$16 sps:$4 sm:$0xff]   ;;  %v5593_v40 = vld [vmem:[%s7727_s10 + $0x2ac] ss:$16 sps:$4 sm:$0xff]  }
 0x309   : > { %v2120_v13 = vmax.f32 %v2119_v62, %v1908_v6  ;;  %v1916_v22 = vmax.f32 %v1852_v12, 0.0  ;;  %v5579_v62 = vld [vmem:[%s7727_s10 + $0x268] ss:$16 sps:$4 sm:$0xff]   ;;  %v5588_v41 = vld [vmem:[%s7727_s10 + $0x2a0] ss:$16 sps:$4 sm:$0xff]  }
 0x30a   : > { %v2108_v55 = vmax.f32 %v2107_v9, %v1915_v10  ;;  %v5591_v5 = vld [vmem:[%s7727_s10 + $0x2a8] ss:$16 sps:$4 sm:$0xff]   ;;  %v5596_v11 = vld [vmem:[%s7727_s10 + $0x2c4] ss:$16 sps:$4 sm:$0xff]   ;;  %v5599_v6 = vld [vmem:[%s7727_s10 + $0x2cc] ss:$16 sps:$4 sm:$0xff]  }
 0x30b   : > { %v2121_v26 = vmax.f32 %v2120_v13, %v1916_v22  ;;  %v5594_v12 = vld [vmem:[%s7727_s10 + $0x2c0] ss:$16 sps:$4 sm:$0xff]   ;;  %v5597_v9 = vld [vmem:[%s7727_s10 + $0x2c8] ss:$16 sps:$4 sm:$0xff]   ;;  %v5602_v10 = vld [vmem:[%s7727_s10 + $0x2e4] ss:$16 sps:$4 sm:$0xff]  }
 0x30c   : > { %v2109_v27 = vrot.slane %v2108_v55, 4  ;;  %v5605_v13 = vld [vmem:[%s7727_s10 + $0x2ec] ss:$16 sps:$4 sm:$0xff]   ;;  %v5600_v22 = vld [vmem:[%s7727_s10 + $0x2e0] ss:$16 sps:$4 sm:$0xff]  }
 0x30d   : > { %v2122_v28 = vrot.slane %v2121_v26, 4 }
 0x30e   : > { %v2110_v2 = vmax.f32 %v2108_v55, %v2109_v27  ;;  %v5603_v55 = vld [vmem:[%s7727_s10 + $0x2e8] ss:$16 sps:$4 sm:$0xff]   ;;  %v5611_v27 = vld [vmem:[%s7727_s10 + $0x30c] ss:$16 sps:$4 sm:$0xff]  }
 0x30f   : > { %v2123_v23 = vmax.f32 %v2121_v26, %v2122_v28  ;;  %v5608_v26 = vld [vmem:[%s7727_s10 + $0x304] ss:$16 sps:$4 sm:$0xff]   ;;  %v5606_v28 = vld [vmem:[%s7727_s10 + $0x300] ss:$16 sps:$4 sm:$0xff]  }
 0x310   : > { %v2111_v14 = vrot.slane %v2110_v2, 2 }
 0x311   : > { %v2124_v16 = vrot.slane %v2123_v23, 2 }
 0x312   : > { %v2112_v29 = vmax.f32 %v2110_v2, %v2111_v14  ;;  %v5609_v2 = vld [vmem:[%s7727_s10 + $0x308] ss:$16 sps:$4 sm:$0xff]   ;;  %v5617_v14 = vld [vmem:[%s7727_s10 + $0x32c] ss:$16 sps:$4 sm:$0xff]  }
 0x313   : > { %v2125_v44 = vmax.f32 %v2123_v23, %v2124_v16  ;;  %v5614_v23 = vld [vmem:[%s7727_s10 + $0x324] ss:$16 sps:$4 sm:$0xff]   ;;  %v5612_v16 = vld [vmem:[%s7727_s10 + $0x320] ss:$16 sps:$4 sm:$0xff]  }
 0x314   : > { %v2113_v33 = vrot.slane %v2112_v29, 1 }
 0x315   : > { %v2126_v24 = vrot.slane %v2125_v44, 1 }
 0x316   : > { %v2114_v45 = vmax.f32 %v2112_v29, %v2113_v33  ;;  %v5615_v29 = vld [vmem:[%s7727_s10 + $0x328] ss:$16 sps:$4 sm:$0xff]   ;;  %v5623_v33 = vld [vmem:[%s7727_s10 + $0x34c] ss:$16 sps:$4 sm:$0xff]  }
 0x317   : > { %v2127_v35 = vmax.f32 %v2125_v44, %v2126_v24  ;;  %v5620_v44 = vld [vmem:[%s7727_s10 + $0x344] ss:$16 sps:$4 sm:$0xff]   ;;  %v5618_v24 = vld [vmem:[%s7727_s10 + $0x340] ss:$16 sps:$4 sm:$0xff]  }
 0x319   : > { %v2145_v25 = vcombine.low %v2114_v45, %v2127_v35  ;;  %v5621_v45 = vld [vmem:[%s7727_s10 + $0x348] ss:$16 sps:$4 sm:$0xff]   ;;  %v5626_v35 = vld [vmem:[%s7727_s10 + $0x364] ss:$16 sps:$4 sm:$0xff]  }
 0x31b   : > { %v2173_v30 = vrot.slane %v2145_v25, %v6812_v21  ;;  %v5629_v25 = vld [vmem:[%s7727_s10 + $0x36c] ss:$16 sps:$4 sm:$0xff]  }
 0x31d   : > { %v2175_v34 = vcombine.low %v2166_v20, %v2173_v30  ;;  %v5624_v20 = vld [vmem:[%s7727_s10 + $0x360] ss:$16 sps:$4 sm:$0xff]   ;;  %v5627_v30 = vld [vmem:[%s7727_s10 + $0x368] ss:$16 sps:$4 sm:$0xff]  }
 0x31f   : > { %v2189_v43 = vrot.slane %v2175_v34, %v6812_v21  ;;  %v5632_v34 = vld [vmem:[%s7727_s10 + $0x384] ss:$16 sps:$4 sm:$0xff]  }
 0x321   : > { %v6843_v46 = vcombine.low %v2182_v42, %v2189_v43  ;;  %v5635_v42 = vld [vmem:[%s7727_s10 + $0x38c] ss:$16 sps:$4 sm:$0xff]   ;;  %v5630_v43 = vld [vmem:[%s7727_s10 + $0x380] ss:$16 sps:$4 sm:$0xff]  }
 0x323   : > { %v2464_v48 = vrot.slane %v6843_v46, %v6596_v31  ;;  %v2460_v49 = vrot.slane %v6843_v46, %v6582_v19  ;;  %v2472_v52 = vrot.slane %v6843_v46, %v6650_v51 }
 0x325   : > { %v2498_v4 = vpack.c.bf16 %v2464_v48, %v2464_v48  ;;  %v2497_v21 = vpack.c.bf16 %v2460_v49, %v2460_v49  ;;  %v2500_v7 = vpack.c.bf16 %v2472_v52, %v2472_v52  ;;  %v5633_v48 = vld [vmem:[%s7727_s10 + $0x388] ss:$16 sps:$4 sm:$0xff]   ;;  %v5638_v49 = vld [vmem:[%s7727_s10 + $0x3a4] ss:$16 sps:$4 sm:$0xff]   ;;  %v5641_v52 = vld [vmem:[%s7727_s10 + $0x3ac] ss:$16 sps:$4 sm:$0xff]  }
 0x327   : > { %3817 = vmatprep.mubr.bf16.mxu0 %v2498_v4  ;;  %3981 = vmatprep.mubr.bf16.mxu1 %v2498_v4  ;;  %v5636_v4 = vld [vmem:[%s7727_s10 + $0x3a0] ss:$16 sps:$4 sm:$0xff]  }
 0x328   : > { %3818 = vmatmul.mubr.bf16.vlgmr.msra.gmra.mrb[16].mxu0 %v2497_v21  ;;  %3982 = vmatmul.mubr.bf16.vlgmr.msra.gmra.mrb[64].mxu1 %v2497_v21  ;;  %v5647_v21 = vld [vmem:[%s7727_s10 + $0x3cc] ss:$16 sps:$4 sm:$0xff]  }
 0x329   : > { %3827 = vmatpush1.bf16.msra.mxu0 %v5558_v8  ;;  %3991 = vmatpush1.bf16.msra.mxu1 %v5561_v18  ;;  %v5639_v8 = vld [vmem:[%s7727_s10 + $0x3a8] ss:$16 sps:$4 sm:$0xff]   ;;  %v5644_v18 = vld [vmem:[%s7727_s10 + $0x3c4] ss:$16 sps:$4 sm:$0xff]  }
 0x32a   : > { %3858 = vmatprep.mubr.bf16.mxu0 %v2500_v7  ;;  %4022 = vmatprep.mubr.bf16.mxu1 %v2500_v7  ;;  %v5650_v7 = vld [vmem:[%s7727_s10 + $0x3e4] ss:$16 sps:$4 sm:$0xff]  }
 0x32b   : > { %3828 = vmatprep.subr.bf16.mxu0 %v5566_v47  ;;  %3992 = vmatprep.subr.bf16.mxu1 %v5569_v3  ;;  %v5642_v47 = vld [vmem:[%s7727_s10 + $0x3c0] ss:$16 sps:$4 sm:$0xff]   ;;  %v5645_v3 = vld [vmem:[%s7727_s10 + $0x3c8] ss:$16 sps:$4 sm:$0xff]  }
 0x32d   : > { %3829 = vmatpush1.bf16.msra.mxu0 %v5564_v17  ;;  %3993 = vmatpush1.bf16.msra.mxu1 %v5567_v53  ;;  %v5653_v17 = vld [vmem:[%s7727_s10 + $0x3ec] ss:$16 sps:$4 sm:$0xff]   ;;  %v5648_v53 = vld [vmem:[%s7727_s10 + $0x3e0] ss:$16 sps:$4 sm:$0xff]  }
 0x32e   : > { %3830 = vmatprep.subr.bf16.mxu0 %v5572_v54  ;;  %3994 = vmatprep.subr.bf16.mxu1 %v5575_v56  ;;  %v5651_v54 = vld [vmem:[%s7727_s10 + $0x3e8] ss:$16 sps:$4 sm:$0xff]   ;;  %v2468_v56 = vrot.slane %v6843_v46, %v6647_v50 }
 0x331   : > { %3831 = vmatpush1.bf16.msra.mxu0 %v5570_v57  ;;  %3995 = vmatpush1.bf16.msra.mxu1 %v5573_v36  ;;  %v5656_v57 = vld [vmem:[%s7727_s10 + $0x404] ss:$16 sps:$4 sm:$0xff]   ;;  %v5659_v36 = vld [vmem:[%s7727_s10 + $0x40c] ss:$16 sps:$4 sm:$0xff]  }
 0x332   : > { %3832 = vmatprep.subr.bf16.mxu0 %v5578_v37  ;;  %3996 = vmatprep.subr.bf16.mxu1 %v5581_v59  ;;  %v2480_v37 = vrot.slane %v6843_v46, %v6599_v32  ;;  %v5654_v59 = vld [vmem:[%s7727_s10 + $0x400] ss:$16 sps:$4 sm:$0xff]   ;;  %v5665_v32 = vld [vmem:[%s7727_s10 + $0x42c] ss:$16 sps:$4 sm:$0xff]  }
 0x335   : > { %3833 = vmatpush1.bf16.msra.mxu0 %v5576_v61  ;;  %3997 = vmatpush1.bf16.msra.mxu1 %v5579_v62  ;;  %v2499_v61 = vpack.c.bf16 %v2468_v56, %v2468_v56  ;;  %v5657_v62 = vld [vmem:[%s7727_s10 + $0x408] ss:$16 sps:$4 sm:$0xff]   ;;  %v5734_v56 = vld [vmem:[%s7727_s10 + $0x5a4] ss:$16 sps:$4 sm:$0xff]  }
 0x336   : > { %3834 = vmatprep.subr.bf16.mxu0 %v5584_v63  ;;  %3998 = vmatprep.subr.bf16.mxu1 %v5587_v0  ;;  %v2502_v63 = vpack.c.bf16 %v2480_v37, %v2480_v37  ;;  %v5662_v0 = vld [vmem:[%s7727_s10 + $0x424] ss:$16 sps:$4 sm:$0xff]   ;;  %v5735_v37 = vld [vmem:[%s7727_s10 + $0x5a8] ss:$16 sps:$4 sm:$0xff]  }
 0x339   : > { %3835 = vmatpush1.bf16.msra.mxu0 %v5582_v38  ;;  %3999 = vmatpush1.bf16.msra.mxu1 %v5585_v1  ;;  %v5660_v38 = vld [vmem:[%s7727_s10 + $0x420] ss:$16 sps:$4 sm:$0xff]   ;;  %v5663_v1 = vld [vmem:[%s7727_s10 + $0x428] ss:$16 sps:$4 sm:$0xff]  }
 0x33a   : > { %3836 = vmatprep.subr.bf16.mxu0 %v5590_v39  ;;  %4000 = vmatprep.subr.bf16.mxu1 %v5593_v40  ;;  %v5668_v39 = vld [vmem:[%s7727_s10 + $0x444] ss:$16 sps:$4 sm:$0xff]   ;;  %v5671_v40 = vld [vmem:[%s7727_s10 + $0x44c] ss:$16 sps:$4 sm:$0xff]  }
 0x33d   : > { %3837 = vmatpush1.bf16.msra.mxu0 %v5588_v41  ;;  %4001 = vmatpush1.bf16.msra.mxu1 %v5591_v5  ;;  %v5666_v41 = vld [vmem:[%s7727_s10 + $0x440] ss:$16 sps:$4 sm:$0xff]   ;;  %v5669_v5 = vld [vmem:[%s7727_s10 + $0x448] ss:$16 sps:$4 sm:$0xff]  }
 0x33e   : > { %3838 = vmatprep.subr.bf16.mxu0 %v5596_v11  ;;  %4002 = vmatprep.subr.bf16.mxu1 %v5599_v6  ;;  %v5674_v11 = vld [vmem:[%s7727_s10 + $0x464] ss:$16 sps:$4 sm:$0xff]   ;;  %v5677_v6 = vld [vmem:[%s7727_s10 + $0x46c] ss:$16 sps:$4 sm:$0xff]  }
 0x341   : > { %3839 = vmatpush1.bf16.msra.mxu0 %v5594_v12  ;;  %4003 = vmatpush1.bf16.msra.mxu1 %v5597_v9  ;;  %v5672_v12 = vld [vmem:[%s7727_s10 + $0x460] ss:$16 sps:$4 sm:$0xff]   ;;  %v5675_v9 = vld [vmem:[%s7727_s10 + $0x468] ss:$16 sps:$4 sm:$0xff]  }
 0x342   : > { %3840 = vmatprep.subr.bf16.mxu0 %v5602_v10  ;;  %4004 = vmatprep.subr.bf16.mxu1 %v5605_v13  ;;  %v5680_v10 = vld [vmem:[%s7727_s10 + $0x484] ss:$16 sps:$4 sm:$0xff]   ;;  %v5683_v13 = vld [vmem:[%s7727_s10 + $0x48c] ss:$16 sps:$4 sm:$0xff]  }
 0x345   : > { %3841 = vmatpush1.bf16.msra.mxu0 %v5600_v22  ;;  %4005 = vmatpush1.bf16.msra.mxu1 %v5603_v55  ;;  %v5678_v22 = vld [vmem:[%s7727_s10 + $0x480] ss:$16 sps:$4 sm:$0xff]   ;;  %v5681_v55 = vld [vmem:[%s7727_s10 + $0x488] ss:$16 sps:$4 sm:$0xff]  }
 0x346   : > { %3842 = vmatprep.subr.bf16.mxu0 %v5608_v26  ;;  %4006 = vmatprep.subr.bf16.mxu1 %v5611_v27  ;;  %v5686_v26 = vld [vmem:[%s7727_s10 + $0x4a4] ss:$16 sps:$4 sm:$0xff]   ;;  %v5689_v27 = vld [vmem:[%s7727_s10 + $0x4ac] ss:$16 sps:$4 sm:$0xff]  }
 0x349   : > { %3843 = vmatpush1.bf16.msra.mxu0 %v5606_v28  ;;  %4007 = vmatpush1.bf16.msra.mxu1 %v5609_v2  ;;  %v5684_v28 = vld [vmem:[%s7727_s10 + $0x4a0] ss:$16 sps:$4 sm:$0xff]   ;;  %v5687_v2 = vld [vmem:[%s7727_s10 + $0x4a8] ss:$16 sps:$4 sm:$0xff]  }
 0x34a   : > { %3844 = vmatprep.subr.bf16.mxu0 %v5614_v23  ;;  %4008 = vmatprep.subr.bf16.mxu1 %v5617_v14  ;;  %v5692_v23 = vld [vmem:[%s7727_s10 + $0x4c4] ss:$16 sps:$4 sm:$0xff]   ;;  %v5695_v14 = vld [vmem:[%s7727_s10 + $0x4cc] ss:$16 sps:$4 sm:$0xff]  }
 0x34d   : > { %3845 = vmatpush1.bf16.msra.mxu0 %v5612_v16  ;;  %4009 = vmatpush1.bf16.msra.mxu1 %v5615_v29  ;;  %v5690_v16 = vld [vmem:[%s7727_s10 + $0x4c0] ss:$16 sps:$4 sm:$0xff]   ;;  %v5693_v29 = vld [vmem:[%s7727_s10 + $0x4c8] ss:$16 sps:$4 sm:$0xff]  }
 0x34e   : > { %3846 = vmatprep.subr.bf16.mxu0 %v5620_v44  ;;  %4010 = vmatprep.subr.bf16.mxu1 %v5623_v33  ;;  %v5698_v44 = vld [vmem:[%s7727_s10 + $0x4e4] ss:$16 sps:$4 sm:$0xff]   ;;  %v5701_v33 = vld [vmem:[%s7727_s10 + $0x4ec] ss:$16 sps:$4 sm:$0xff]  }
 0x351   : > { %3847 = vmatpush1.bf16.msra.mxu0 %v5618_v24  ;;  %4011 = vmatpush1.bf16.msra.mxu1 %v5621_v45  ;;  %v5696_v24 = vld [vmem:[%s7727_s10 + $0x4e0] ss:$16 sps:$4 sm:$0xff]   ;;  %v5699_v45 = vld [vmem:[%s7727_s10 + $0x4e8] ss:$16 sps:$4 sm:$0xff]  }
 0x352   : > { %3848 = vmatprep.subr.bf16.mxu0 %v5626_v35  ;;  %4012 = vmatprep.subr.bf16.mxu1 %v5629_v25  ;;  %v5704_v35 = vld [vmem:[%s7727_s10 + $0x504] ss:$16 sps:$4 sm:$0xff]   ;;  %v5707_v25 = vld [vmem:[%s7727_s10 + $0x50c] ss:$16 sps:$4 sm:$0xff]  }
 0x355   : > { %3849 = vmatpush1.bf16.msra.mxu0 %v5624_v20  ;;  %4013 = vmatpush1.bf16.msra.mxu1 %v5627_v30  ;;  %v5702_v20 = vld [vmem:[%s7727_s10 + $0x500] ss:$16 sps:$4 sm:$0xff]   ;;  %v5705_v30 = vld [vmem:[%s7727_s10 + $0x508] ss:$16 sps:$4 sm:$0xff]  }
 0x356   : > { %3850 = vmatprep.subr.bf16.mxu0 %v5632_v34  ;;  %4014 = vmatprep.subr.bf16.mxu1 %v5635_v42  ;;  %v5710_v34 = vld [vmem:[%s7727_s10 + $0x524] ss:$16 sps:$4 sm:$0xff]   ;;  %v5713_v42 = vld [vmem:[%s7727_s10 + $0x52c] ss:$16 sps:$4 sm:$0xff]  }
 0x359   : > { %3851 = vmatpush1.bf16.msra.mxu0 %v5630_v43  ;;  %4015 = vmatpush1.bf16.msra.mxu1 %v5633_v48  ;;  %v5708_v43 = vld [vmem:[%s7727_s10 + $0x520] ss:$16 sps:$4 sm:$0xff]   ;;  %v5711_v48 = vld [vmem:[%s7727_s10 + $0x528] ss:$16 sps:$4 sm:$0xff]  }
 0x35a   : > { %3852 = vmatprep.subr.bf16.mxu0 %v5638_v49  ;;  %4016 = vmatprep.subr.bf16.mxu1 %v5641_v52  ;;  %v5716_v49 = vld [vmem:[%s7727_s10 + $0x544] ss:$16 sps:$4 sm:$0xff]   ;;  %v5719_v52 = vld [vmem:[%s7727_s10 + $0x54c] ss:$16 sps:$4 sm:$0xff]  }
 0x35d   : > { %3853 = vmatpush1.bf16.msra.mxu0 %v5636_v4  ;;  %4017 = vmatpush1.bf16.msra.mxu1 %v5639_v8  ;;  %v5714_v4 = vld [vmem:[%s7727_s10 + $0x540] ss:$16 sps:$4 sm:$0xff]   ;;  %v5717_v8 = vld [vmem:[%s7727_s10 + $0x548] ss:$16 sps:$4 sm:$0xff]  }
 0x35e   : > { %3854 = vmatprep.subr.bf16.mxu0 %v5644_v18  ;;  %4018 = vmatprep.subr.bf16.mxu1 %v5647_v21  ;;  %v5722_v18 = vld [vmem:[%s7727_s10 + $0x564] ss:$16 sps:$4 sm:$0xff]   ;;  %v5725_v21 = vld [vmem:[%s7727_s10 + $0x56c] ss:$16 sps:$4 sm:$0xff]  }
 0x361   : > { %3855 = vmatpush1.bf16.msra.mxu0 %v5642_v47  ;;  %4019 = vmatpush1.bf16.msra.mxu1 %v5645_v3  ;;  %v5720_v47 = vld [vmem:[%s7727_s10 + $0x560] ss:$16 sps:$4 sm:$0xff]   ;;  %v5723_v3 = vld [vmem:[%s7727_s10 + $0x568] ss:$16 sps:$4 sm:$0xff]  }
 0x362   : > { %3856 = vmatprep.subr.bf16.mxu0 %v5650_v7  ;;  %4020 = vmatprep.subr.bf16.mxu1 %v5653_v17  ;;  %v5728_v7 = vld [vmem:[%s7727_s10 + $0x584] ss:$16 sps:$4 sm:$0xff]   ;;  %v5731_v17 = vld [vmem:[%s7727_s10 + $0x58c] ss:$16 sps:$4 sm:$0xff]  }
 0x365   : > { %3857 = vmatpush1.bf16.msra.mxu0 %v5648_v53  ;;  %4021 = vmatpush1.bf16.msra.mxu1 %v5651_v54  ;;  %v5726_v53 = vld [vmem:[%s7727_s10 + $0x580] ss:$16 sps:$4 sm:$0xff]   ;;  %v5729_v54 = vld [vmem:[%s7727_s10 + $0x588] ss:$16 sps:$4 sm:$0xff]  }
 0x366   : > { %3867 = vmatprep.subr.bf16.mxu0 %v5656_v57  ;;  %4031 = vmatprep.subr.bf16.mxu1 %v5659_v36  ;;  %v5737_v57 = vld [vmem:[%s7727_s10 + $0x5ac] ss:$16 sps:$4 sm:$0xff]   ;;  %v5732_v36 = vld [vmem:[%s7727_s10 + $0x5a0] ss:$16 sps:$4 sm:$0xff]  }
 0x368   : > { %3859 = vmatmul.mubr.bf16.vlgmr.msra.gmra.mrb[16].mxu0 %v2499_v61  ;;  %4023 = vmatmul.mubr.bf16.vlgmr.msra.gmra.mrb[64].mxu1 %v2499_v61  ;;  %v5743_v61 = vld [vmem:[%s7727_s10 + $0x5cc] ss:$16 sps:$4 sm:$0xff]  }
 0x369   : > { %3868 = vmatpush1.bf16.msra.mxu0 %v5654_v59  ;;  %3899 = vmatprep.mubr.bf16.mxu0 %v2502_v63  ;;  %v5740_v59 = vld [vmem:[%s7727_s10 + $0x5c4] ss:$16 sps:$4 sm:$0xff]  }
 0x36a   : > { %4032 = vmatpush1.bf16.msra.mxu1 %v5657_v62  ;;  %4063 = vmatprep.mubr.bf16.mxu1 %v2502_v63  ;;  %v5738_v62 = vld [vmem:[%s7727_s10 + $0x5c0] ss:$16 sps:$4 sm:$0xff]   ;;  %v5741_v63 = vld [vmem:[%s7727_s10 + $0x5c8] ss:$16 sps:$4 sm:$0xff]  }
 0x36b   : > { %3869 = vmatprep.subr.bf16.mxu0 %v5662_v0  ;;  %4033 = vmatprep.subr.bf16.mxu1 %v5665_v32  ;;  %v5746_v0 = vld [vmem:[%s7727_s10 + $0x5e4] ss:$16 sps:$4 sm:$0xff]   ;;  %v5749_v32 = vld [vmem:[%s7727_s10 + $0x5ec] ss:$16 sps:$4 sm:$0xff]  }
 0x36d   : > { %3870 = vmatpush1.bf16.msra.mxu0 %v5660_v38  ;;  %v5744_v38 = vld [vmem:[%s7727_s10 + $0x5e0] ss:$16 sps:$4 sm:$0xff]  }
 0x36e   : > { %4034 = vmatpush1.bf16.msra.mxu1 %v5663_v1  ;;  %3871 = vmatprep.subr.bf16.mxu0 %v5668_v39  ;;  %v5747_v1 = vld [vmem:[%s7727_s10 + $0x5e8] ss:$16 sps:$4 sm:$0xff]   ;;  %v2476_v39 = vrot.slane %v6843_v46, %v6585_v15 }
 0x36f   : > { %4035 = vmatprep.subr.bf16.mxu1 %v5671_v40  ;;  %v5752_v40 = vld [vmem:[%s7727_s10 + $0x604] ss:$16 sps:$4 sm:$0xff]   ;;  %v5753_v15 = vld [vmem:[%s7727_s10 + $0x608] ss:$16 sps:$4 sm:$0xff]  }
 0x371   : > { %3872 = vmatpush1.bf16.msra.mxu0 %v5666_v41  ;;  %v5755_v41 = vld [vmem:[%s7727_s10 + $0x60c] ss:$16 sps:$4 sm:$0xff]  }
 0x372   : > { %4036 = vmatpush1.bf16.msra.mxu1 %v5669_v5  ;;  %3873 = vmatprep.subr.bf16.mxu0 %v5674_v11  ;;  %v2488_v5 = vrot.slane %v6843_v46, %v6772_v60  ;;  %v5750_v11 = vld [vmem:[%s7727_s10 + $0x600] ss:$16 sps:$4 sm:$0xff]   ;;  %v5761_v60 = vld [vmem:[%s7727_s10 + $0x62c] ss:$16 sps:$4 sm:$0xff]  }
 0x373   : > { %4037 = vmatprep.subr.bf16.mxu1 %v5677_v6  ;;  %v2501_v6 = vpack.c.bf16 %v2476_v39, %v2476_v39  ;;  %v5828_v39 = vld [vmem:[%s7727_s10 + $0x7a0] ss:$16 sps:$4 sm:$0xff]  }
 0x375   : > { %3874 = vmatpush1.bf16.msra.mxu0 %v5672_v12  ;;  %v5758_v12 = vld [vmem:[%s7727_s10 + $0x624] ss:$16 sps:$4 sm:$0xff]  }
 0x376   : > { %4038 = vmatpush1.bf16.msra.mxu1 %v5675_v9  ;;  %3875 = vmatprep.subr.bf16.mxu0 %v5680_v10  ;;  %v2504_v9 = vpack.c.bf16 %v2488_v5, %v2488_v5  ;;  %v5756_v10 = vld [vmem:[%s7727_s10 + $0x620] ss:$16 sps:$4 sm:$0xff]   ;;  %v5839_v5 = vld [vmem:[%s7727_s10 + $0x7cc] ss:$16 sps:$4 sm:$0xff]  }
 0x377   : > { %4039 = vmatprep.subr.bf16.mxu1 %v5683_v13  ;;  %v5759_v13 = vld [vmem:[%s7727_s10 + $0x628] ss:$16 sps:$4 sm:$0xff]  }
 0x379   : > { %3876 = vmatpush1.bf16.msra.mxu0 %v5678_v22  ;;  %v5764_v22 = vld [vmem:[%s7727_s10 + $0x644] ss:$16 sps:$4 sm:$0xff]  }
 0x37a   : > { %4040 = vmatpush1.bf16.msra.mxu1 %v5681_v55  ;;  %3877 = vmatprep.subr.bf16.mxu0 %v5686_v26  ;;  %v5767_v55 = vld [vmem:[%s7727_s10 + $0x64c] ss:$16 sps:$4 sm:$0xff]   ;;  %v5762_v26 = vld [vmem:[%s7727_s10 + $0x640] ss:$16 sps:$4 sm:$0xff]  }
 0x37b   : > { %4041 = vmatprep.subr.bf16.mxu1 %v5689_v27  ;;  %v5765_v27 = vld [vmem:[%s7727_s10 + $0x648] ss:$16 sps:$4 sm:$0xff]  }
 0x37d   : > { %3878 = vmatpush1.bf16.msra.mxu0 %v5684_v28  ;;  %v5770_v28 = vld [vmem:[%s7727_s10 + $0x664] ss:$16 sps:$4 sm:$0xff]  }
 0x37e   : > { %4042 = vmatpush1.bf16.msra.mxu1 %v5687_v2  ;;  %3879 = vmatprep.subr.bf16.mxu0 %v5692_v23  ;;  %v5773_v2 = vld [vmem:[%s7727_s10 + $0x66c] ss:$16 sps:$4 sm:$0xff]   ;;  %v5768_v23 = vld [vmem:[%s7727_s10 + $0x660] ss:$16 sps:$4 sm:$0xff]  }
 0x37f   : > { %4043 = vmatprep.subr.bf16.mxu1 %v5695_v14  ;;  %v5771_v14 = vld [vmem:[%s7727_s10 + $0x668] ss:$16 sps:$4 sm:$0xff]  }
 0x381   : > { %3880 = vmatpush1.bf16.msra.mxu0 %v5690_v16  ;;  %v5776_v16 = vld [vmem:[%s7727_s10 + $0x684] ss:$16 sps:$4 sm:$0xff]  }
 0x382   : > { %4044 = vmatpush1.bf16.msra.mxu1 %v5693_v29  ;;  %3881 = vmatprep.subr.bf16.mxu0 %v5698_v44  ;;  %v5779_v29 = vld [vmem:[%s7727_s10 + $0x68c] ss:$16 sps:$4 sm:$0xff]   ;;  %v5774_v44 = vld [vmem:[%s7727_s10 + $0x680] ss:$16 sps:$4 sm:$0xff]  }
 0x383   : > { %4045 = vmatprep.subr.bf16.mxu1 %v5701_v33  ;;  %v5777_v33 = vld [vmem:[%s7727_s10 + $0x688] ss:$16 sps:$4 sm:$0xff]  }
 0x385   : > { %3882 = vmatpush1.bf16.msra.mxu0 %v5696_v24  ;;  %v5782_v24 = vld [vmem:[%s7727_s10 + $0x6a4] ss:$16 sps:$4 sm:$0xff]  }
 0x386   : > { %4046 = vmatpush1.bf16.msra.mxu1 %v5699_v45  ;;  %3883 = vmatprep.subr.bf16.mxu0 %v5704_v35  ;;  %v5785_v45 = vld [vmem:[%s7727_s10 + $0x6ac] ss:$16 sps:$4 sm:$0xff]   ;;  %v5780_v35 = vld [vmem:[%s7727_s10 + $0x6a0] ss:$16 sps:$4 sm:$0xff]  }
 0x387   : > { %4047 = vmatprep.subr.bf16.mxu1 %v5707_v25  ;;  %v5783_v25 = vld [vmem:[%s7727_s10 + $0x6a8] ss:$16 sps:$4 sm:$0xff]  }
 0x389   : > { %3884 = vmatpush1.bf16.msra.mxu0 %v5702_v20  ;;  %v5788_v20 = vld [vmem:[%s7727_s10 + $0x6c4] ss:$16 sps:$4 sm:$0xff]  }
 0x38a   : > { %4048 = vmatpush1.bf16.msra.mxu1 %v5705_v30  ;;  %3885 = vmatprep.subr.bf16.mxu0 %v5710_v34  ;;  %v5791_v30 = vld [vmem:[%s7727_s10 + $0x6cc] ss:$16 sps:$4 sm:$0xff]   ;;  %v5786_v34 = vld [vmem:[%s7727_s10 + $0x6c0] ss:$16 sps:$4 sm:$0xff]  }
 0x38b   : > { %4049 = vmatprep.subr.bf16.mxu1 %v5713_v42  ;;  %v5789_v42 = vld [vmem:[%s7727_s10 + $0x6c8] ss:$16 sps:$4 sm:$0xff]  }
 0x38d   : > { %3886 = vmatpush1.bf16.msra.mxu0 %v5708_v43  ;;  %v5794_v43 = vld [vmem:[%s7727_s10 + $0x6e4] ss:$16 sps:$4 sm:$0xff]  }
 0x38e   : > { %4050 = vmatpush1.bf16.msra.mxu1 %v5711_v48  ;;  %3887 = vmatprep.subr.bf16.mxu0 %v5716_v49  ;;  %v5797_v48 = vld [vmem:[%s7727_s10 + $0x6ec] ss:$16 sps:$4 sm:$0xff]   ;;  %v5792_v49 = vld [vmem:[%s7727_s10 + $0x6e0] ss:$16 sps:$4 sm:$0xff]  }
 0x38f   : > { %4051 = vmatprep.subr.bf16.mxu1 %v5719_v52  ;;  %v5795_v52 = vld [vmem:[%s7727_s10 + $0x6e8] ss:$16 sps:$4 sm:$0xff]  }
 0x391   : > { %3888 = vmatpush1.bf16.msra.mxu0 %v5714_v4  ;;  %v5800_v4 = vld [vmem:[%s7727_s10 + $0x704] ss:$16 sps:$4 sm:$0xff]  }
 0x392   : > { %4052 = vmatpush1.bf16.msra.mxu1 %v5717_v8  ;;  %3889 = vmatprep.subr.bf16.mxu0 %v5722_v18  ;;  %v5803_v8 = vld [vmem:[%s7727_s10 + $0x70c] ss:$16 sps:$4 sm:$0xff]   ;;  %v5798_v18 = vld [vmem:[%s7727_s10 + $0x700] ss:$16 sps:$4 sm:$0xff]  }
 0x393   : > { %4053 = vmatprep.subr.bf16.mxu1 %v5725_v21  ;;  %v5801_v21 = vld [vmem:[%s7727_s10 + $0x708] ss:$16 sps:$4 sm:$0xff]  }
 0x395   : > { %3890 = vmatpush1.bf16.msra.mxu0 %v5720_v47  ;;  %v5806_v47 = vld [vmem:[%s7727_s10 + $0x724] ss:$16 sps:$4 sm:$0xff]  }
 0x396   : > { %4054 = vmatpush1.bf16.msra.mxu1 %v5723_v3  ;;  %3891 = vmatprep.subr.bf16.mxu0 %v5728_v7  ;;  %v5809_v3 = vld [vmem:[%s7727_s10 + $0x72c] ss:$16 sps:$4 sm:$0xff]   ;;  %v5804_v7 = vld [vmem:[%s7727_s10 + $0x720] ss:$16 sps:$4 sm:$0xff]  }
 0x397   : > { %4055 = vmatprep.subr.bf16.mxu1 %v5731_v17  ;;  %v5807_v17 = vld [vmem:[%s7727_s10 + $0x728] ss:$16 sps:$4 sm:$0xff]  }
 0x399   : > { %3892 = vmatpush1.bf16.msra.mxu0 %v5726_v53  ;;  %v5812_v53 = vld [vmem:[%s7727_s10 + $0x744] ss:$16 sps:$4 sm:$0xff]  }
 0x39a   : > { %4056 = vmatpush1.bf16.msra.mxu1 %v5729_v54  ;;  %3893 = vmatprep.subr.bf16.mxu0 %v5734_v56  ;;  %v5815_v54 = vld [vmem:[%s7727_s10 + $0x74c] ss:$16 sps:$4 sm:$0xff]   ;;  %v5810_v56 = vld [vmem:[%s7727_s10 + $0x740] ss:$16 sps:$4 sm:$0xff]  }
 0x39b   : > { %4057 = vmatprep.subr.bf16.mxu1 %v5737_v57  ;;  %v5813_v57 = vld [vmem:[%s7727_s10 + $0x748] ss:$16 sps:$4 sm:$0xff]  }
 0x39d   : > { %3894 = vmatpush1.bf16.msra.mxu0 %v5732_v36  ;;  %v5818_v36 = vld [vmem:[%s7727_s10 + $0x764] ss:$16 sps:$4 sm:$0xff]  }
 0x39e   : > { %4058 = vmatpush1.bf16.msra.mxu1 %v5735_v37  ;;  %3895 = vmatprep.subr.bf16.mxu0 %v5740_v59  ;;  %v5821_v37 = vld [vmem:[%s7727_s10 + $0x76c] ss:$16 sps:$4 sm:$0xff]   ;;  %v5816_v59 = vld [vmem:[%s7727_s10 + $0x760] ss:$16 sps:$4 sm:$0xff]  }
 0x39f   : > { %4059 = vmatprep.subr.bf16.mxu1 %v5743_v61  ;;  %v5819_v61 = vld [vmem:[%s7727_s10 + $0x768] ss:$16 sps:$4 sm:$0xff]  }
 0x3a1   : > { %3896 = vmatpush1.bf16.msra.mxu0 %v5738_v62  ;;  %v5824_v62 = vld [vmem:[%s7727_s10 + $0x784] ss:$16 sps:$4 sm:$0xff]  }
 0x3a2   : > { %4060 = vmatpush1.bf16.msra.mxu1 %v5741_v63  ;;  %3897 = vmatprep.subr.bf16.mxu0 %v5746_v0  ;;  %v5827_v63 = vld [vmem:[%s7727_s10 + $0x78c] ss:$16 sps:$4 sm:$0xff]   ;;  %v5822_v0 = vld [vmem:[%s7727_s10 + $0x780] ss:$16 sps:$4 sm:$0xff]  }
 0x3a3   : > { %4061 = vmatprep.subr.bf16.mxu1 %v5749_v32  ;;  %v5825_v32 = vld [vmem:[%s7727_s10 + $0x788] ss:$16 sps:$4 sm:$0xff]  }
 0x3a5   : > { %3898 = vmatpush1.bf16.msra.mxu0 %v5744_v38  ;;  %v5830_v38 = vld [vmem:[%s7727_s10 + $0x7a4] ss:$16 sps:$4 sm:$0xff]  }
 0x3a6   : > { %4062 = vmatpush1.bf16.msra.mxu1 %v5747_v1  ;;  %3908 = vmatprep.subr.bf16.mxu0 %v5752_v40  ;;  %v5833_v1 = vld [vmem:[%s7727_s10 + $0x7ac] ss:$16 sps:$4 sm:$0xff]   ;;  %v5831_v40 = vld [vmem:[%s7727_s10 + $0x7a8] ss:$16 sps:$4 sm:$0xff]  }
 0x3a7   : > { %4072 = vmatprep.subr.bf16.mxu1 %v5755_v41  ;;  %v5836_v41 = vld [vmem:[%s7727_s10 + $0x7c4] ss:$16 sps:$4 sm:$0xff]  }
 0x3a8   : > { %3900 = vmatmul.mubr.bf16.vlgmr.msra.gmra.mrb[16].mxu0 %v2501_v6 }
 0x3a9   : > { %4064 = vmatmul.mubr.bf16.vlgmr.msra.gmra.mrb[64].mxu1 %v2501_v6  ;;  %3909 = vmatpush1.bf16.msra.mxu0 %v5750_v11  ;;  %v5834_v11 = vld [vmem:[%s7727_s10 + $0x7c0] ss:$16 sps:$4 sm:$0xff]   ;;  %v5837_v6 = vld [vmem:[%s7727_s10 + $0x7c8] ss:$16 sps:$4 sm:$0xff]  }
 0x3aa   : > { %3940 = vmatprep.mubr.bf16.mxu0 %v2504_v9  ;;  %4073 = vmatpush1.bf16.msra.mxu1 %v5753_v15  ;;  %v5842_v15 = vld [vmem:[%s7727_s10 + $0x7e4] ss:$16 sps:$4 sm:$0xff]  }
 0x3ab   : > { %4104 = vmatprep.mubr.bf16.mxu1 %v2504_v9  ;;  %3910 = vmatprep.subr.bf16.mxu0 %v5758_v12  ;;  %v5845_v12 = vld [vmem:[%s7727_s10 + $0x7ec] ss:$16 sps:$4 sm:$0xff]   ;;  %v5840_v9 = vld [vmem:[%s7727_s10 + $0x7e0] ss:$16 sps:$4 sm:$0xff]  }
 0x3ac   : > { %4074 = vmatprep.subr.bf16.mxu1 %v5761_v60  ;;  %v5843_v60 = vld [vmem:[%s7727_s10 + $0x7e8] ss:$16 sps:$4 sm:$0xff]  }
 0x3ad   : > { %3911 = vmatpush1.bf16.msra.mxu0 %v5756_v10  ;;  %v2484_v10 = vrot.slane %v6843_v46, %v6768_v58  ;;  %v5849_v58 = vld [vmem:[%s7730_s13 + $0x10] ss:$8 sps:$4 sm:$0xff]   ;;  %v5854_v46 = vld [vmem:[%s7730_s13 + $0x24] ss:$8 sps:$4 sm:$0xff]  }
 0x3ae   : > { %4075 = vmatpush1.bf16.msra.mxu1 %v5759_v13  ;;  %3912 = vmatprep.subr.bf16.mxu0 %v5764_v22  ;;  %v5848_v13 = vld [vmem:[%s7730_s13 + $0x4] ss:$8 sps:$4 sm:$0xff]   ;;  %v5846_v22 = vld [vmem:[%s7730_s13] ss:$8 sps:$4 sm:$0xff]  }
 0x3af   : > { %4076 = vmatprep.subr.bf16.mxu1 %v5767_v55  ;;  %v2503_v55 = vpack.c.bf16 %v2484_v10, %v2484_v10 }
 0x3b1   : > { %3913 = vmatpush1.bf16.msra.mxu0 %v5762_v26  ;;  %v5851_v26 = vld [vmem:[%s7730_s13 + $0x14] ss:$8 sps:$4 sm:$0xff]  }
 0x3b2   : > { %4077 = vmatpush1.bf16.msra.mxu1 %v5765_v27  ;;  %3914 = vmatprep.subr.bf16.mxu0 %v5770_v28  ;;  %v5852_v27 = vld [vmem:[%s7730_s13 + $0x20] ss:$8 sps:$4 sm:$0xff]   ;;  %v5857_v28 = vld [vmem:[%s7730_s13 + $0x34] ss:$8 sps:$4 sm:$0xff]  }
 0x3b3   : > { %4078 = vmatprep.subr.bf16.mxu1 %v5773_v2  ;;  %v5855_v2 = vld [vmem:[%s7730_s13 + $0x30] ss:$8 sps:$4 sm:$0xff]  }
 0x3b5   : > { %3915 = vmatpush1.bf16.msra.mxu0 %v5768_v23  ;;  %v5860_v23 = vld [vmem:[%s7730_s13 + $0x44] ss:$8 sps:$4 sm:$0xff]  }
 0x3b6   : > { %4079 = vmatpush1.bf16.msra.mxu1 %v5771_v14  ;;  %3916 = vmatprep.subr.bf16.mxu0 %v5776_v16  ;;  %v5858_v14 = vld [vmem:[%s7730_s13 + $0x40] ss:$8 sps:$4 sm:$0xff]   ;;  %v5863_v16 = vld [vmem:[%s7730_s13 + $0x54] ss:$8 sps:$4 sm:$0xff]  }
 0x3b7   : > { %4080 = vmatprep.subr.bf16.mxu1 %v5779_v29  ;;  %v5861_v29 = vld [vmem:[%s7730_s13 + $0x50] ss:$8 sps:$4 sm:$0xff]  }
 0x3b9   : > { %3917 = vmatpush1.bf16.msra.mxu0 %v5774_v44  ;;  %v5866_v44 = vld [vmem:[%s7730_s13 + $0x64] ss:$8 sps:$4 sm:$0xff]  }
 0x3ba   : > { %4081 = vmatpush1.bf16.msra.mxu1 %v5777_v33  ;;  %3918 = vmatprep.subr.bf16.mxu0 %v5782_v24  ;;  %v5864_v33 = vld [vmem:[%s7730_s13 + $0x60] ss:$8 sps:$4 sm:$0xff]   ;;  %v5869_v24 = vld [vmem:[%s7730_s13 + $0x74] ss:$8 sps:$4 sm:$0xff]  }
 0x3bb   : > { %4082 = vmatprep.subr.bf16.mxu1 %v5785_v45  ;;  %v5867_v45 = vld [vmem:[%s7730_s13 + $0x70] ss:$8 sps:$4 sm:$0xff]  }
 0x3bd   : > { %3919 = vmatpush1.bf16.msra.mxu0 %v5780_v35  ;;  %v5872_v35 = vld [vmem:[%s7730_s13 + $0x84] ss:$8 sps:$4 sm:$0xff]  }
 0x3be   : > { %4083 = vmatpush1.bf16.msra.mxu1 %v5783_v25  ;;  %3920 = vmatprep.subr.bf16.mxu0 %v5788_v20  ;;  %v5870_v25 = vld [vmem:[%s7730_s13 + $0x80] ss:$8 sps:$4 sm:$0xff]   ;;  %v5875_v20 = vld [vmem:[%s7730_s13 + $0x94] ss:$8 sps:$4 sm:$0xff]  }
 0x3bf   : > { %4084 = vmatprep.subr.bf16.mxu1 %v5791_v30  ;;  %v5873_v30 = vld [vmem:[%s7730_s13 + $0x90] ss:$8 sps:$4 sm:$0xff]  }
 0x3c1   : > { %3921 = vmatpush1.bf16.msra.mxu0 %v5786_v34  ;;  %v5878_v34 = vld [vmem:[%s7730_s13 + $0xa4] ss:$8 sps:$4 sm:$0xff]  }
 0x3c2   : > { %4085 = vmatpush1.bf16.msra.mxu1 %v5789_v42  ;;  %3922 = vmatprep.subr.bf16.mxu0 %v5794_v43  ;;  %v5876_v42 = vld [vmem:[%s7730_s13 + $0xa0] ss:$8 sps:$4 sm:$0xff]   ;;  %v5881_v43 = vld [vmem:[%s7730_s13 + $0xb4] ss:$8 sps:$4 sm:$0xff]  }
 0x3c3   : > { %4086 = vmatprep.subr.bf16.mxu1 %v5797_v48  ;;  %v5879_v48 = vld [vmem:[%s7730_s13 + $0xb0] ss:$8 sps:$4 sm:$0xff]  }
 0x3c5   : > { %3923 = vmatpush1.bf16.msra.mxu0 %v5792_v49  ;;  %v5884_v49 = vld [vmem:[%s7730_s13 + $0xc4] ss:$8 sps:$4 sm:$0xff]  }
 0x3c6   : > { %4087 = vmatpush1.bf16.msra.mxu1 %v5795_v52  ;;  %3924 = vmatprep.subr.bf16.mxu0 %v5800_v4  ;;  %v5882_v52 = vld [vmem:[%s7730_s13 + $0xc0] ss:$8 sps:$4 sm:$0xff]   ;;  %v5887_v4 = vld [vmem:[%s7730_s13 + $0xd4] ss:$8 sps:$4 sm:$0xff]  }
 0x3c7   : > { %4088 = vmatprep.subr.bf16.mxu1 %v5803_v8  ;;  %v5885_v8 = vld [vmem:[%s7730_s13 + $0xd0] ss:$8 sps:$4 sm:$0xff]  }
 0x3c9   : > { %3925 = vmatpush1.bf16.msra.mxu0 %v5798_v18  ;;  %v5890_v18 = vld [vmem:[%s7730_s13 + $0xe4] ss:$8 sps:$4 sm:$0xff]  }
 0x3ca   : > { %4089 = vmatpush1.bf16.msra.mxu1 %v5801_v21  ;;  %3926 = vmatprep.subr.bf16.mxu0 %v5806_v47  ;;  %v5888_v21 = vld [vmem:[%s7730_s13 + $0xe0] ss:$8 sps:$4 sm:$0xff]   ;;  %v5893_v47 = vld [vmem:[%s7730_s13 + $0xf4] ss:$8 sps:$4 sm:$0xff]  }
 0x3cb   : > { %4090 = vmatprep.subr.bf16.mxu1 %v5809_v3  ;;  %v5891_v3 = vld [vmem:[%s7730_s13 + $0xf0] ss:$8 sps:$4 sm:$0xff]  }
 0x3cd   : > { %3927 = vmatpush1.bf16.msra.mxu0 %v5804_v7  ;;  %v5896_v7 = vld [vmem:[%s7730_s13 + $0x104] ss:$8 sps:$4 sm:$0xff]  }
 0x3ce   : > { %4091 = vmatpush1.bf16.msra.mxu1 %v5807_v17  ;;  %3928 = vmatprep.subr.bf16.mxu0 %v5812_v53  ;;  %v5942_v17 = vld [vmem:[%s7733_s16 + $0x40] sm:$0xff]  }
 0x3cf   : > { %4092 = vmatprep.subr.bf16.mxu1 %v5815_v54  ;;  %v5943_v53 = vld [vmem:[%s7733_s16] sm:$0xff]   ;;  %v5944_v54 = vld [vmem:[%s7733_s16 + $0x48] sm:$0xff]  }
 0x3d1   : > { %3929 = vmatpush1.bf16.msra.mxu0 %v5810_v56  ;;  %v5945_v56 = vld [vmem:[%s7733_s16 + $0x8] sm:$0xff]  }
 0x3d2   : > { %4093 = vmatpush1.bf16.msra.mxu1 %v5813_v57  ;;  %3930 = vmatprep.subr.bf16.mxu0 %v5818_v36  ;;  %v5946_v57 = vld [vmem:[%s7733_s16 + $0x50] sm:$0xff]  }
 0x3d3   : > { %4094 = vmatprep.subr.bf16.mxu1 %v5821_v37  ;;  %v5947_v36 = vld [vmem:[%s7733_s16 + $0x10] sm:$0xff]   ;;  %v5948_v37 = vld [vmem:[%s7733_s16 + $0x58] sm:$0xff]  }
 0x3d5   : > { %3931 = vmatpush1.bf16.msra.mxu0 %v5816_v59  ;;  %v5949_v59 = vld [vmem:[%s7733_s16 + $0x18] sm:$0xff]  }
 0x3d6   : > { %4095 = vmatpush1.bf16.msra.mxu1 %v5819_v61  ;;  %3932 = vmatprep.subr.bf16.mxu0 %v5824_v62  ;;  %v5950_v61 = vld [vmem:[%s7733_s16 + $0x60] sm:$0xff]  }
 0x3d7   : > { %4096 = vmatprep.subr.bf16.mxu1 %v5827_v63  ;;  %v5951_v62 = vld [vmem:[%s7733_s16 + $0x20] sm:$0xff]   ;;  %v5952_v63 = vld [vmem:[%s7733_s16 + $0x68] sm:$0xff]  }
 0x3d9   : > { %3933 = vmatpush1.bf16.msra.mxu0 %v5822_v0  ;;  %v2454_v0 = vld [vmem:[%s7728_s11] sm:$0xf] }
 0x3da   : > { %4097 = vmatpush1.bf16.msra.mxu1 %v5825_v32  ;;  %3934 = vmatprep.subr.bf16.mxu0 %v5830_v38  ;;  %v2455_v32 = vld [vmem:[%s7729_s12] sm:$0xf]  ;;  %v4117_v38 = vrot.slane %v2454_v0, %v6582_v19 }
 0x3db   : > { %4098 = vmatprep.subr.bf16.mxu1 %v5833_v1  ;;  %v4125_v1 = vrot.slane %v2454_v0, %v6647_v50 }
 0x3dd   : > { %3935 = vmatpush1.bf16.msra.mxu0 %v5828_v39  ;;  %v4121_v39 = vrot.slane %v2454_v0, %v6596_v31 }
 0x3de   : > { %4099 = vmatpush1.bf16.msra.mxu1 %v5831_v40  ;;  %3936 = vmatprep.subr.bf16.mxu0 %v5836_v41  ;;  %v4142_v40 = vrot.slane %v2455_v32, %v6582_v19  ;;  %v4129_v41 = vrot.slane %v2454_v0, %v6650_v51  ;;  %v5939_v0 = vld [vmem:[%s7730_s13 + $0x1f0] ss:$8 sps:$4 sm:$0xff]  }
 0x3df   : > { %4100 = vmatprep.subr.bf16.mxu1 %v5839_v5 }
 0x3e1   : > { %3937 = vmatpush1.bf16.msra.mxu0 %v5834_v11  ;;  %v4150_v11 = vrot.slane %v2455_v32, %v6647_v50 }
 0x3e2   : > { %4101 = vmatpush1.bf16.msra.mxu1 %v5837_v6  ;;  %3938 = vmatprep.subr.bf16.mxu0 %v5842_v15  ;;  %v4146_v6 = vrot.slane %v2455_v32, %v6596_v31 }
 0x3e3   : > { %4102 = vmatprep.subr.bf16.mxu1 %v5845_v12 }
 0x3e5   : > { %3939 = vmatpush1.bf16.msra.mxu0 %v5840_v9 }
 0x3e6   : > { %4103 = vmatpush1.bf16.msra.mxu1 %v5843_v60  ;;  %4557 = vmatprep.subr.bf16.mxu0 %v5848_v13  ;;  %v4154_v60 = vrot.slane %v2455_v32, %v6650_v51  ;;  %v5894_v51 = vld [vmem:[%s7730_s13 + $0x100] ss:$8 sps:$4 sm:$0xff]  }
 0x3e7   : > { %5352 = vmatprep.subr.bf16.mxu1 %v5942_v17  ;;  %v5926_v17 = vld [vmem:[%s7730_s13 + $0x1a4] ss:$8 sps:$4 sm:$0xff]  }
 0x3e8   : > { %3941 = vmatmul.mubr.bf16.vlgmr.msra.gmra.mrb[16].mxu0 %v2503_v55 }
 0x3e9   : > { %4105 = vmatmul.mubr.bf16.vlgmr.msra.gmra.mrb[64].mxu1 %v2503_v55  ;;  %4558 = vmatpush1.bf16.msra.mxu0 %v5846_v22 }
 0x3ea   : > { %4559 = vmatprep.subr.bf16.mxu0 %v5851_v26  ;;  %5353 = vmatpush3.bf16.msra.mxu1 %v5943_v53  ;;  %v5924_v53 = vld [vmem:[%s7730_s13 + $0x1a0] ss:$8 sps:$4 sm:$0xff]  }
 0x3eb   : > { %5354 = vmatprep.subr.bf16.mxu1 %v5944_v54  ;;  %v5929_v54 = vld [vmem:[%s7730_s13 + $0x1b4] ss:$8 sps:$4 sm:$0xff]  }
 0x3ed   : > { %4560 = vmatpush1.bf16.msra.mxu0 %v5849_v58 }
 0x3ee   : > { %4561 = vmatprep.subr.bf16.mxu0 %v5854_v46  ;;  %5355 = vmatpush3.bf16.msra.mxu1 %v5945_v56  ;;  %v5927_v56 = vld [vmem:[%s7730_s13 + $0x1b0] ss:$8 sps:$4 sm:$0xff]  }
 0x3ef   : > { %5356 = vmatprep.subr.bf16.mxu1 %v5946_v57  ;;  %v5932_v57 = vld [vmem:[%s7730_s13 + $0x1c4] ss:$8 sps:$4 sm:$0xff]  }
 0x3f1   : > { %4562 = vmatpush1.bf16.msra.mxu0 %v5852_v27 }
 0x3f2   : > { %4563 = vmatprep.subr.bf16.mxu0 %v5857_v28  ;;  %5357 = vmatpush3.bf16.msra.mxu1 %v5947_v36  ;;  %v5930_v36 = vld [vmem:[%s7730_s13 + $0x1c0] ss:$8 sps:$4 sm:$0xff]  }
 0x3f3   : > { %5358 = vmatprep.subr.bf16.mxu1 %v5948_v37  ;;  %v5935_v37 = vld [vmem:[%s7730_s13 + $0x1d4] ss:$8 sps:$4 sm:$0xff]  }
 0x3f5   : > { %4564 = vmatpush1.bf16.msra.mxu0 %v5855_v2 }
 0x3f6   : > { %4565 = vmatprep.subr.bf16.mxu0 %v5860_v23  ;;  %5359 = vmatpush3.bf16.msra.mxu1 %v5949_v59  ;;  %v5933_v59 = vld [vmem:[%s7730_s13 + $0x1d0] ss:$8 sps:$4 sm:$0xff]  }
 0x3f7   : > { %5360 = vmatprep.subr.bf16.mxu1 %v5950_v61  ;;  %v5938_v61 = vld [vmem:[%s7730_s13 + $0x1e4] ss:$8 sps:$4 sm:$0xff]  }
 0x3f9   : > { %4566 = vmatpush1.bf16.msra.mxu0 %v5858_v14 }
 0x3fa   : > { %4567 = vmatprep.subr.bf16.mxu0 %v5863_v16  ;;  %5361 = vmatpush3.bf16.msra.mxu1 %v5951_v62  ;;  %v5936_v62 = vld [vmem:[%s7730_s13 + $0x1e0] ss:$8 sps:$4 sm:$0xff]  }
 0x3fb   : > { %5362 = vmatprep.subr.bf16.mxu1 %v5952_v63  ;;  %v5941_v63 = vld [vmem:[%s7730_s13 + $0x1f4] ss:$8 sps:$4 sm:$0xff]  }
 0x3fd   : > { %4568 = vmatpush1.bf16.msra.mxu0 %v5861_v29 }
 0x3fe   : > { %4569 = vmatprep.subr.bf16.mxu0 %v5866_v44 }
 0x401   : > { %4570 = vmatpush1.bf16.msra.mxu0 %v5864_v33 }
 0x402   : > { %4571 = vmatprep.subr.bf16.mxu0 %v5869_v24  ;;  %v5899_v24 = vld [vmem:[%s7730_s13 + $0x114] ss:$8 sps:$4 sm:$0xff]  }
 0x405   : > { %4572 = vmatpush1.bf16.msra.mxu0 %v5867_v45 }
 0x406   : > { %4573 = vmatprep.subr.bf16.mxu0 %v5872_v35  ;;  %v5897_v35 = vld [vmem:[%s7730_s13 + $0x110] ss:$8 sps:$4 sm:$0xff]  }
 0x409   : > { %4574 = vmatpush1.bf16.msra.mxu0 %v5870_v25  ;;  %v5902_v25 = vld [vmem:[%s7730_s13 + $0x124] ss:$8 sps:$4 sm:$0xff]  }
 0x40a   : > { %4575 = vmatprep.subr.bf16.mxu0 %v5875_v20  ;;  %v5900_v20 = vld [vmem:[%s7730_s13 + $0x120] ss:$8 sps:$4 sm:$0xff]  }
 0x40d   : > { %4576 = vmatpush1.bf16.msra.mxu0 %v5873_v30  ;;  %v5905_v30 = vld [vmem:[%s7730_s13 + $0x134] ss:$8 sps:$4 sm:$0xff]  }
 0x40e   : > { %4577 = vmatprep.subr.bf16.mxu0 %v5878_v34  ;;  %v5903_v34 = vld [vmem:[%s7730_s13 + $0x130] ss:$8 sps:$4 sm:$0xff]  }
 0x411   : > { %4578 = vmatpush1.bf16.msra.mxu0 %v5876_v42  ;;  %v5908_v42 = vld [vmem:[%s7730_s13 + $0x144] ss:$8 sps:$4 sm:$0xff]  }
 0x412   : > { %4579 = vmatprep.subr.bf16.mxu0 %v5881_v43  ;;  %v5906_v43 = vld [vmem:[%s7730_s13 + $0x140] ss:$8 sps:$4 sm:$0xff]  }
 0x415   : > { %4580 = vmatpush1.bf16.msra.mxu0 %v5879_v48  ;;  %v5911_v48 = vld [vmem:[%s7730_s13 + $0x154] ss:$8 sps:$4 sm:$0xff]  }
 0x416   : > { %4581 = vmatprep.subr.bf16.mxu0 %v5884_v49  ;;  %v5909_v49 = vld [vmem:[%s7730_s13 + $0x150] ss:$8 sps:$4 sm:$0xff]  }
 0x419   : > { %4582 = vmatpush1.bf16.msra.mxu0 %v5882_v52  ;;  %v5914_v52 = vld [vmem:[%s7730_s13 + $0x164] ss:$8 sps:$4 sm:$0xff]  }
 0x41a   : > { %4583 = vmatprep.subr.bf16.mxu0 %v5887_v4  ;;  %v5912_v4 = vld [vmem:[%s7730_s13 + $0x160] ss:$8 sps:$4 sm:$0xff]  }
 0x41d   : > { %4584 = vmatpush1.bf16.msra.mxu0 %v5885_v8  ;;  %v5917_v8 = vld [vmem:[%s7730_s13 + $0x174] ss:$8 sps:$4 sm:$0xff]  }
 0x41e   : > { %4585 = vmatprep.subr.bf16.mxu0 %v5890_v18  ;;  %v5915_v18 = vld [vmem:[%s7730_s13 + $0x170] ss:$8 sps:$4 sm:$0xff]  }
 0x421   : > { %4586 = vmatpush1.bf16.msra.mxu0 %v5888_v21  ;;  %v5920_v21 = vld [vmem:[%s7730_s13 + $0x184] ss:$8 sps:$4 sm:$0xff]  }
 0x422   : > { %4587 = vmatprep.subr.bf16.mxu0 %v5893_v47  ;;  %v5918_v47 = vld [vmem:[%s7730_s13 + $0x180] ss:$8 sps:$4 sm:$0xff]  }
 0x425   : > { %4588 = vmatpush1.bf16.msra.mxu0 %v5891_v3  ;;  %v5923_v3 = vld [vmem:[%s7730_s13 + $0x194] ss:$8 sps:$4 sm:$0xff]  }
 0x426   : > { %4598 = vmatprep.subr.bf16.mxu0 %v5896_v7  ;;  %v5921_v7 = vld [vmem:[%s7730_s13 + $0x190] ss:$8 sps:$4 sm:$0xff]  }
 0x4bb   : > { %v3942_v5 = vpop.f32.mrb[16].mxu0 }
 0x4bc   : > { %v4134_v15 = vmul.f32 %v4117_v38, %v3942_v5  ;;  %v4106_v12 = vpop.f32.mrb[64].mxu1  ;;  %v3944_v9 = vpop.f32.mrb[17].mxu0  ;;  %v5957_v5 = vld [vmem:[%s7733_s16 + $0x38] sm:$0xff]  }
 0x4bd   : > { %v4136_v10 = vmul.f32 %v4125_v1, %v4106_v12  ;;  %v4135_v13 = vmul.f32 %v4121_v39, %v3944_v9  ;;  %v4108_v22 = vpop.f32.mrb[65].mxu1  ;;  %v3946_v55 = vpop.f32.mrb[18].mxu0  ;;  %v5953_v1 = vld [vmem:[%s7733_s16 + $0x28] sm:$0xff]   ;;  %v5954_v39 = vld [vmem:[%s7733_s16 + $0x70] sm:$0xff]  }
 0x4be   : > { %v4159_v26 = vadd.f32 %v4142_v40, %v4134_v15  ;;  %v4137_v58 = vmul.f32 %v4129_v41, %v4108_v22  ;;  %v4110_v46 = vpop.f32.mrb[66].mxu1  ;;  %v3947_v27 = vpop.f32.mrb[19].mxu0  ;;  %5363 = vmatpush3.bf16.msra.mxu1 %v5953_v1  ;;  %v5955_v40 = vld [vmem:[%s7733_s16 + $0x30] sm:$0xff]   ;;  %v5956_v41 = vld [vmem:[%s7733_s16 + $0x78] sm:$0xff]  }
 0x4bf   : > { %v7577_v28 = vadd.f32 %v4150_v11, %v4136_v10  ;;  %v4160_v2 = vadd.f32 %v4146_v6, %v4135_v13  ;;  %v4111_v23 = vpop.f32.mrb[67].mxu1  ;;  %5364 = vmatprep.subr.bf16.mxu1 %v5954_v39  ;;  %v4231_v11 = vld [vmem:[%s7731_s14] sm:$0x3] }
 0x4c0   : > { %v4163_v50 = vmax.f32 %v4159_v26, 0.0  ;;  %v4162_v14 = vadd.f32 %v4154_v60, %v4137_v58  ;;  %v4232_v6 = vld [vmem:[%s7732_s15] sm:$0x3]  ;;  %v4643_v15 = vrot.slane %v4231_v11, %v6582_v19  ;;  %v4647_v12 = vrot.slane %v4231_v11, %v6596_v31 }
 0x4c1   : > { %v4164_v16 = vmax.f32 %v4160_v2, 0.0  ;;  %v4165_v32 = vmax.f32 %v7577_v28, 0.0  ;;  %v4656_v9 = vrot.slane %v4232_v6, %v6582_v19  ;;  %v4660_v10 = vrot.slane %v4232_v6, %v6596_v31  ;;  %v4699_v19 = vld [vmem:[%s7734_s17] sm:$0x1] }
 0x4c2   : > { %v4166_v29 = vmax.f32 %v4162_v14, 0.0  ;;  %v4233_v33 = vpack.c.bf16 %v4163_v50, %v4163_v50  ;;  %5365 = vmatpush3.bf16.msra.mxu1 %v5955_v40 }
 0x4c3   : > { %v4234_v44 = vpack.c.bf16 %v4164_v16, %v4164_v16  ;;  %v4235_v38 = vpack.c.bf16 %v4165_v32, %v4165_v32  ;;  %5366 = vmatprep.subr.bf16.mxu1 %v5956_v41 }
 0x4c4   : > { %v4236_v45 = vpack.c.bf16 %v4166_v29, %v4166_v29 }
 0x4c5   : > { %4589 = vmatprep.mubr.bf16.mxu0 %v4234_v44  ;;  %v4700_v44 = vld [vmem:[%s7735_s18] sm:$0x1] }
 0x4c6   : > { %4590 = vmatmul.mubr.bf16.vlgmr.msra.gmra.mrb[20].mxu0 %v4233_v33  ;;  %5367 = vmatpush3.bf16.msra.mxu1 %v5957_v5 }
 0x4c7   : > { %4599 = vmatpush1.bf16.msra.mxu0 %v5894_v51  ;;  %4630 = vmatprep.mubr.bf16.mxu0 %v4236_v45 }
 0x4c8   : > { %4600 = vmatprep.subr.bf16.mxu0 %v5899_v24 }
 0x4cb   : > { %4601 = vmatpush1.bf16.msra.mxu0 %v5897_v35 }
 0x4cc   : > { %4602 = vmatprep.subr.bf16.mxu0 %v5902_v25 }
 0x4cf   : > { %4603 = vmatpush1.bf16.msra.mxu0 %v5900_v20 }
 0x4d0   : > { %4604 = vmatprep.subr.bf16.mxu0 %v5905_v30 }
 0x4d3   : > { %4605 = vmatpush1.bf16.msra.mxu0 %v5903_v34 }
 0x4d4   : > { %4606 = vmatprep.subr.bf16.mxu0 %v5908_v42 }
 0x4d7   : > { %4607 = vmatpush1.bf16.msra.mxu0 %v5906_v43 }
 0x4d8   : > { %4608 = vmatprep.subr.bf16.mxu0 %v5911_v48 }
 0x4db   : > { %4609 = vmatpush1.bf16.msra.mxu0 %v5909_v49 }
 0x4dc   : > { %4610 = vmatprep.subr.bf16.mxu0 %v5914_v52 }
 0x4df   : > { %4611 = vmatpush1.bf16.msra.mxu0 %v5912_v4 }
 0x4e0   : > { %4612 = vmatprep.subr.bf16.mxu0 %v5917_v8 }
 0x4e3   : > { %4613 = vmatpush1.bf16.msra.mxu0 %v5915_v18 }
 0x4e4   : > { %4614 = vmatprep.subr.bf16.mxu0 %v5920_v21 }
 0x4e7   : > { %4615 = vmatpush1.bf16.msra.mxu0 %v5918_v47 }
 0x4e8   : > { %4616 = vmatprep.subr.bf16.mxu0 %v5923_v3 }
 0x4eb   : > { %4617 = vmatpush1.bf16.msra.mxu0 %v5921_v7 }
 0x4ec   : > { %4618 = vmatprep.subr.bf16.mxu0 %v5926_v17 }
 0x4ef   : > { %4619 = vmatpush1.bf16.msra.mxu0 %v5924_v53 }
 0x4f0   : > { %4620 = vmatprep.subr.bf16.mxu0 %v5929_v54 }
 0x4f3   : > { %4621 = vmatpush1.bf16.msra.mxu0 %v5927_v56 }
 0x4f4   : > { %4622 = vmatprep.subr.bf16.mxu0 %v5932_v57 }
 0x4f7   : > { %4623 = vmatpush1.bf16.msra.mxu0 %v5930_v36 }
 0x4f8   : > { %4624 = vmatprep.subr.bf16.mxu0 %v5935_v37 }
 0x4fb   : > { %4625 = vmatpush1.bf16.msra.mxu0 %v5933_v59 }
 0x4fc   : > { %4626 = vmatprep.subr.bf16.mxu0 %v5938_v61 }
 0x4ff   : > { %4627 = vmatpush1.bf16.msra.mxu0 %v5936_v62 }
 0x500   : > { %4628 = vmatprep.subr.bf16.mxu0 %v5941_v63 }
 0x503   : > { %4629 = vmatpush1.bf16.msra.mxu0 %v5939_v0 }
 0x506   : > { %4631 = vmatmul.mubr.bf16.vlgmr.msra.gmra.mrb[20].mxu0 %v4235_v38 }
 0x5d9   : > { %v4632_v60 = vpop.f32.mrb[20].mxu0 }
 0x5da   : > { %v4650_v13 = vmul.f32 %v4643_v15, %v4632_v60  ;;  %v4634_v22 = vpop.f32.mrb[21].mxu0 }
 0x5db   : > { %v4651_v55 = vmul.f32 %v4647_v12, %v4634_v22  ;;  %v4636_v26 = vpop.f32.mrb[22].mxu0 }
 0x5dc   : > { %v4663_v58 = vadd.f32 %v4656_v9, %v4650_v13  ;;  %v4637_v46 = vpop.f32.mrb[23].mxu0 }
 0x5dd   : > { %v4664_v27 = vadd.f32 %v4660_v10, %v4651_v55 }
 0x5de   : > { %v4665_v28 = vmax.f32 %v4663_v58, 0.0 }
 0x5df   : > { %v4666_v2 = vmax.f32 %v4664_v27, 0.0 }
 0x5e0   : > { %v4701_v50 = vpack.c.bf16 %v4665_v28, %v4665_v28 }
 0x5e1   : > { %v4702_v23 = vpack.c.bf16 %v4666_v2, %v4666_v2 }
 0x5e3   : > { %4831 = vmatprep.mubr.bf16.mxu1 %v4702_v23 }
 0x5e4   : > { %4832 = vmatmul.mubr.bf16.vlgmr.msra.gmra.mrb[68].mxu1 %v4701_v50 }
 0x6b7   : > { %v5368_v14 = vpop.f32.mrb[68].mxu1 }
 0x6b8   : > { %v5369_v31 = vpop.f32.mrb[69].mxu1 }
 0x6b9   : > { %v5370_v16 = vadd.f32 %v5369_v31, %v5368_v14  ;;  %v5371_v29 = vpop.f32.mrb[70].mxu1 }
 0x6ba   : > { %v5372_v51 = vpop.f32.mrb[71].mxu1 }
 0x6bb   : > { %v4839_v33 = vmul.f32 %v5370_v16, %v4699_v19 }
 0x6bd   : > { %v4840_v24 = vadd.f32 %v4839_v33, %v4700_v44 }
 0x6bf   : > { %4842 = vst.msk [vmem:[%s626_s27] sm:$0x1] %vm4841_vm3, %v4840_v24 }
 0x6c0 PF: > { %s29_s20 = sadd.s32 1, %s5980_s20   ;;  %s7745_s0 = smov %s5976_s30 }
 0x6c1   : > { %p26_p5 = scmp.ge.s32.totalorder %s29_s20, 4   ;;  %s7746_s30 = smov %s7748_s21 }
 0x6c3   :  { %28 = sbr.rel (!%p26_p5) target bundleno = 5 (0x5), region = 134 }

// kernel: _lambda_.5
= control target key start
LH: loop header
LB: loop body
LE: loop exit
PB: predicated region body
PF: predicated region fallthrough
CT: control target
= control target key end

     0   :  { %s5042_s25 = smov 0   ;;  %s5044_s26 = smov 0   ;;  %s6411_s0 = inlined_call_operand.vmem [shape: f32[2,64,3], index: 0, kind: input, shape index: {}]   ;;  %s6412_s1 = inlined_call_operand.vmem [shape: f32[2,3,64], index: 1, kind: input, shape index: {}]   ;;  %s6413_s2 = inlined_call_operand.vmem [shape: f32[1,64], index: 2, kind: input, shape index: {}]   ;;  %s6414_s3 = inlined_call_operand.vmem [shape: f32[1,64], index: 3, kind: input, shape index: {}]   ;;  %s6415_s4 = inlined_call_operand.vmem [shape: bf16[2,64,128], index: 4, kind: input, shape index: {}]   ;;  %s6416_s5 = inlined_call_operand.vmem [shape: f32[1,128], index: 5, kind: input, shape index: {}]   ;;  %s6417_s6 = inlined_call_operand.vmem [shape: f32[1,128], index: 6, kind: input, shape index: {}]   ;;  %s6418_s7 = inlined_call_operand.vmem [shape: bf16[128,1024], index: 7, kind: input, shape index: {}]   ;;  %s6419_s8 = inlined_call_operand.vmem [shape: f32[1,1024], index: 8, kind: input, shape index: {}]   ;;  %s6420_s9 = inlined_call_operand.vmem [shape: f32[1,1024], index: 9, kind: input, shape index: {}]   ;;  %s6421_s10 = inlined_call_operand.vmem [shape: bf16[1024,512], index: 10, kind: input, shape index: {}]   ;;  %s6422_s11 = inlined_call_operand.vmem [shape: f32[1,512], index: 11, kind: input, shape index: {}]   ;;  %s6423_s12 = inlined_call_operand.vmem [shape: f32[1,512], index: 12, kind: input, shape index: {}]   ;;  %s6424_s13 = inlined_call_operand.vmem [shape: f32[2,1,512], index: 13, kind: output, shape index: {}]  }
   0x1   :  { %s5046_s27 = smov 0  }
   0x2 LB: > { %s35_s28 = sadd.s32 1, %s4964_s26  ;;  %p4109_p0 = scmp.ge.s32.totalorder %s4968_s27, 1  ;;  %s4968_s27 = sphi %s5046_s27, %s23_s27   ;;  %s4964_s26 = sphi %s5044_s26, %s6426_s26   ;;  %s4960_s25 = sphi %s5042_s25, %s6425_s25  }
   0x3   : > { %p37_p1 = scmp.ge.s32.totalorder %s35_s28, 2  ;;  %p425_p2 = scmp.lt.s32.totalorder %s4968_s27, 3 }
   0x5   : > { %s6428_s28 = smov (%p37_p1, %s35_s28), 0  ;;  %p426_p3 = pnand %p4109_p0, %p425_p2 }
   0x6   : > { %p482_p4 = scmp.lt.s32.totalorder (!%p426_p3), %s4960_s25, 1  ;;  %vm541_vm0 = vcmask (!%p426_p3), 1042432   ;;  %vm516_vm1 = vcmask (!%p426_p3), 23552   ;;  %v838_v13 = vld [vmem:[%s6418_s7] sm:$0xff] (!%p426_p3)  ;;  %v5093_v15 = vld [vmem:[%s6418_s7 + $0x8] sm:$0xff] (!%p426_p3)  ;;  %vm724_vm2 = vcmask (!%p426_p3), 523264  }
   0x7   : > { %429 = sbr.rel (%p426_p3) target bundleno = 1193 (0x4a9), region = 72  ;;  %v842_v14 = vld [vmem:[%s6418_s7 + $0x20] sm:$0xff] (!%p426_p3)  ;;  %v5098_v18 = vld [vmem:[%s6418_s7 + $0x28] sm:$0xff] (!%p426_p3) }
   0x8   : > { %v4137_v16 = vcombine.low (!%p426_p3), %v838_v13, %v842_v14  ;;  %v4138_v17 = vcombine.high (!%p426_p3), %v838_v13, %v842_v14  ;;  %v846_v19 = vld [vmem:[%s6418_s7 + $0x40] sm:$0xff] (!%p426_p3)  ;;  %v4139_v21 = vcombine.low (!%p426_p3), %v5093_v15, %v5098_v18  ;;  %v4140_v22 = vcombine.high (!%p426_p3), %v5093_v15, %v5098_v18  ;;  %v847_v62 = vld [vmem:[%s6418_s7 + $0x48] sm:$0xff] (!%p426_p3) }
   0x9   : > { %v850_v20 = vld [vmem:[%s6418_s7 + $0x60] sm:$0xff] (!%p426_p3)  ;;  %v851_v63 = vld [vmem:[%s6418_s7 + $0x68] sm:$0xff] (!%p426_p3) }
   0xa   : > { %v4146_v23 = vcombine.high (!%p426_p3), %v846_v19, %v850_v20  ;;  %v854_v24 = vld [vmem:[%s6418_s7 + $0x80] sm:$0xff] (!%p426_p3)  ;;  %v4145_v26 = vcombine.low (!%p426_p3), %v846_v19, %v850_v20 }
   0xb   : > { %v858_v25 = vld [vmem:[%s6418_s7 + $0xa0] sm:$0xff] (!%p426_p3) }
   0xc   : > { %v4154_v27 = vcombine.high (!%p426_p3), %v854_v24, %v858_v25  ;;  %v862_v28 = vld [vmem:[%s6418_s7 + $0xc0] sm:$0xff] (!%p426_p3)  ;;  %v4153_v30 = vcombine.low (!%p426_p3), %v854_v24, %v858_v25  ;;  %v867_v24 = vld [vmem:[%s6418_s7 + $0xe8] sm:$0xff] (!%p426_p3) }
   0xd   : > { %v866_v29 = vld [vmem:[%s6418_s7 + $0xe0] sm:$0xff] (!%p426_p3) }
   0xe   : > { %s6430_s25 = smov (!%p482_p4, %s4960_s25), 1  ;;  %v4162_v31 = vcombine.high %v862_v28, %v866_v29  ;;  %v870_v32 = vld [vmem:[%s6418_s7 + $0x100] sm:$0xff]  ;;  %v4161_v34 = vcombine.low %v862_v28, %v866_v29 }
   0xf   : > { %s4459_s29 = sshll.u32 %s6430_s25, 6  ;;  %s4112_s30 = sshll.u32 %s6430_s25, 2  ;;  %v874_v33 = vld [vmem:[%s6418_s7 + $0x120] sm:$0xff] }
  0x10   : > { %s489_s16 = scalar_lea.vmem %s6411_s0, %s4459_s29  ;;  %s494_s19 = scalar_lea.vmem %s6412_s1, %s4112_s30  ;;  %v4170_v35 = vcombine.high %v870_v32, %v874_v33  ;;  %v878_v36 = vld [vmem:[%s6418_s7 + $0x140] sm:$0xff]  ;;  %v4169_v38 = vcombine.low %v870_v32, %v874_v33 }
  0x11   : > { %s4460_s20 = sshll.u32 %s6430_s25, 5  ;;  %v513_v0 = vld [vmem:[%s494_s19] sm:$0x7]  ;;  %v506_v2 = vld [vmem:[%s489_s16 + $0x8] sm:$0xff]  ;;  %v507_v3 = vld [vmem:[%s489_s16 + $0x10] sm:$0xff]  ;;  %s503_s22 = scalar_lea.vmem %s6424_s13, %s4112_s30 }
  0x12   : > { %v505_v1 = vld [vmem:[%s489_s16] sm:$0xff]  ;;  %s499_s23 = scalar_lea.vmem %s6415_s4, %s4460_s20  ;;  %4478 = vmatprep.subr.msk.mxu0 %vm541_vm0, %v513_v0  ;;  %v508_v4 = vld [vmem:[%s489_s16 + $0x18] sm:$0xff]  ;;  %v510_v7 = vld [vmem:[%s489_s16 + $0x28] sm:$0xff] }
  0x13   : > { %4480 = vmatprep.mubr.msk.f32.mxu0 %vm516_vm1, %v505_v1  ;;  %4479 = vmatpush3.msk.msra.mxu0 %vm541_vm0, %v513_v0  ;;  %v509_v5 = vld [vmem:[%s489_s16 + $0x20] sm:$0xff]  ;;  %v511_v8 = vld [vmem:[%s489_s16 + $0x30] sm:$0xff]  ;;  %v512_v9 = vld [vmem:[%s489_s16 + $0x38] sm:$0xff] }
  0x14   : > { %4481 = vmatmul.mubr.msk.f32.vlgmr.msra.gmra.mrb[0].mxu0 %vm516_vm1, %v506_v2  ;;  %v4558_v6 = vld [vmem:[%s499_s23] sm:$0xff]   ;;  %v4559_v10 = vld [vmem:[%s499_s23 + $0x8] sm:$0xff]   ;;  %v4560_v11 = vld [vmem:[%s499_s23 + $0x10] sm:$0xff]   ;;  %1228 = vmatprep.subr.bf16.mxu0 %v4138_v17 }
  0x15   : > { %4483 = vmatprep.mubr.msk.f32.mxu0 %vm516_vm1, %v507_v3  ;;  %4492 = vmatprep.subr.bf16.mxu1 %v4558_v6  ;;  %v4561_v12 = vld [vmem:[%s499_s23 + $0x18] sm:$0xff]   ;;  %v882_v37 = vld [vmem:[%s6418_s7 + $0x160] sm:$0xff] }
  0x16   : > { %4493 = vmatpush3.bf16.msra.mxu1 %v4558_v6  ;;  %1229 = vmatpush1.bf16.msra.mxu0 %v4137_v16  ;;  %v4178_v39 = vcombine.high %v878_v36, %v882_v37  ;;  %v4177_v40 = vcombine.low %v878_v36, %v882_v37  ;;  %v4125_v41 = vld [vmem:[%s6413_s2] ss:$0 sm:$0xff]  ;;  %v4148_v6 = vcombine.high %v847_v62, %v851_v63  ;;  %v887_v37 = vld [vmem:[%s6418_s7 + $0x188] sm:$0xff] }
  0x17   : > { %4494 = vmatprep.subr.bf16.mxu1 %v4559_v10  ;;  %1230 = vmatprep.subr.bf16.mxu0 %v4146_v23  ;;  %v4126_v42 = vld [vmem:[%s6414_s3] ss:$0 sm:$0xff]  ;;  %v4147_v16 = vcombine.low %v847_v62, %v851_v63  ;;  %v863_v23 = vld [vmem:[%s6418_s7 + $0xc8] sm:$0xff] }
  0x18   : > { %4484 = vmatmul.mubr.msk.f32.gmra.mrb[2].mxu0 %vm516_vm1, %v508_v4  ;;  %v4163_v28 = vcombine.low %v863_v23, %v867_v24  ;;  %v890_v36 = vld [vmem:[%s6418_s7 + $0x1a0] sm:$0xff] }
  0x19   : > { %4486 = vmatprep.mubr.msk.f32.mxu0 %vm516_vm1, %v509_v5 }
  0x1a   : > { %4495 = vmatpush3.bf16.msra.mxu1 %v4559_v10  ;;  %1231 = vmatpush1.bf16.msra.mxu0 %v4145_v26  ;;  %v855_v10 = vld [vmem:[%s6418_s7 + $0x88] sm:$0xff] }
  0x1b   : > { %4496 = vmatprep.subr.bf16.mxu1 %v4560_v11  ;;  %1232 = vmatprep.subr.bf16.mxu0 %v4154_v27  ;;  %v871_v26 = vld [vmem:[%s6418_s7 + $0x108] sm:$0xff] }
  0x1c   : > { %4487 = vmatmul.mubr.msk.f32.gmra.mrb[4].mxu0 %vm516_vm1, %v510_v7  ;;  %v875_v27 = vld [vmem:[%s6418_s7 + $0x128] sm:$0xff] }
  0x1d   : > { %4489 = vmatprep.mubr.msk.f32.mxu0 %vm516_vm1, %v511_v8  ;;  %v4172_v29 = vcombine.high %v871_v26, %v875_v27  ;;  %v4171_v32 = vcombine.low %v871_v26, %v875_v27  ;;  %v856_v27 = vld [vmem:[%s6418_s7 + $0x90] sm:$0xff] }
  0x1e   : > { %4497 = vmatpush3.bf16.msra.mxu1 %v4560_v11  ;;  %1233 = vmatpush1.bf16.msra.mxu0 %v4153_v30  ;;  %v859_v11 = vld [vmem:[%s6418_s7 + $0xa8] sm:$0xff] }
  0x1f   : > { %4498 = vmatprep.subr.bf16.mxu1 %v4561_v12  ;;  %1234 = vmatprep.subr.bf16.mxu0 %v4162_v31  ;;  %v4156_v20 = vcombine.high %v855_v10, %v859_v11  ;;  %v4155_v15 = vcombine.low %v855_v10, %v859_v11  ;;  %v879_v30 = vld [vmem:[%s6418_s7 + $0x148] sm:$0xff]  ;;  %v848_v10 = vld [vmem:[%s6418_s7 + $0x50] sm:$0xff] }
  0x20   : > { %4490 = vmatmul.mubr.msk.f32.gmra.mrb[6].mxu0 %vm516_vm1, %v512_v9  ;;  %v883_v31 = vld [vmem:[%s6418_s7 + $0x168] sm:$0xff] }
  0x21   : > { %v4180_v33 = vcombine.high %v879_v30, %v883_v31 }
  0x22   : > { %4499 = vmatpush3.bf16.msra.mxu1 %v4561_v12  ;;  %1235 = vmatpush1.bf16.msra.mxu0 %v4161_v34  ;;  %v4179_v34 = vcombine.low %v879_v30, %v883_v31  ;;  %v860_v31 = vld [vmem:[%s6418_s7 + $0xb0] sm:$0xff] }
  0x23   : > { %1301 = vmatprep.subr.bf16.mxu1 %v4140_v22  ;;  %1236 = vmatprep.subr.bf16.mxu0 %v4170_v35  ;;  %v886_v35 = vld [vmem:[%s6418_s7 + $0x180] sm:$0xff] }
  0x26   : > { %1237 = vmatpush1.bf16.msra.mxu0 %v4169_v38  ;;  %v4186_v38 = vcombine.high %v886_v35, %v890_v36 }
  0x27   : > { %1238 = vmatprep.subr.bf16.mxu0 %v4178_v39  ;;  %v891_v39 = vld [vmem:[%s6418_s7 + $0x1a8] sm:$0xff] }
  0x2a   : > { %1239 = vmatpush1.bf16.msra.mxu0 %v4177_v40  ;;  %v4185_v40 = vcombine.low %v886_v35, %v890_v36 }
  0x2b   : > { %1240 = vmatprep.subr.bf16.mxu0 %v4186_v38 }
  0x2e   : > { %1241 = vmatpush1.bf16.msra.mxu0 %v4185_v40 }
  0xe7   : > { %v4482_v43 = vpop.f32.mrb[0].mxu0 }
  0xe8   : > { %v657_v44 = vmul.f32 %v4482_v43, %v4125_v41  ;;  %v611_v45 = vpop.f32.mrb[1].mxu0  ;;  %v894_v43 = vld [vmem:[%s6418_s7 + $0x1c0] sm:$0xff] }
  0xe9   : > { %v656_v46 = vmul.f32 %v4125_v41, %v611_v45  ;;  %v895_v45 = vld [vmem:[%s6418_s7 + $0x1c8] sm:$0xff] }
  0xea   : > { %v671_v47 = vadd.f32 %v4126_v42, %v657_v44  ;;  %v898_v44 = vld [vmem:[%s6418_s7 + $0x1e0] sm:$0xff] }
  0xeb   : > { %v670_v48 = vadd.f32 %v4126_v42, %v656_v46  ;;  %v4485_v49 = vpop.f32.mrb[2].mxu0  ;;  %v4194_v46 = vcombine.high %v894_v43, %v898_v44 }
  0xec   : > { %v679_v50 = vmax.f32 %v671_v47, 0.0  ;;  %v659_v51 = vmul.f32 %v4485_v49, %v4125_v41  ;;  %v621_v52 = vpop.f32.mrb[3].mxu0  ;;  %v899_v47 = vld [vmem:[%s6418_s7 + $0x1e8] sm:$0xff] }
  0xed   : > { %v678_v53 = vmax.f32 %v670_v48, 0.0  ;;  %v658_v54 = vmul.f32 %v4125_v41, %v621_v52  ;;  %v4193_v48 = vcombine.low %v894_v43, %v898_v44  ;;  %v4195_v49 = vcombine.low %v895_v45, %v899_v47  ;;  %1242 = vmatprep.subr.bf16.mxu0 %v4194_v46  ;;  %v844_v52 = vld [vmem:[%s6418_s7 + $0x30] sm:$0xff] }
  0xee   : > { %v673_v55 = vadd.f32 %v4126_v42, %v659_v51  ;;  %v840_v51 = vld [vmem:[%s6418_s7 + $0x10] sm:$0xff] }
  0xef   : > { %v672_v56 = vadd.f32 %v4126_v42, %v658_v54  ;;  %v696_v57 = vpack.c.bf16 %v679_v50, %v678_v53  ;;  %v4488_v58 = vpop.f32.mrb[4].mxu0  ;;  %v4196_v50 = vcombine.high %v895_v45, %v899_v47  ;;  %1243 = vmatpush1.bf16.msra.mxu0 %v4193_v48  ;;  %v841_v53 = vld [vmem:[%s6418_s7 + $0x18] sm:$0xff]  ;;  %v4141_v54 = vcombine.low %v840_v51, %v844_v52  ;;  %v864_v44 = vld [vmem:[%s6418_s7 + $0xd0] sm:$0xff] }
  0xf0   : > { %v681_v59 = vmax.f32 %v673_v55, 0.0  ;;  %v661_v60 = vmul.f32 %v4488_v58, %v4125_v41  ;;  %v631_v61 = vpop.f32.mrb[5].mxu0  ;;  %v4142_v55 = vcombine.high %v840_v51, %v844_v52  ;;  %v868_v46 = vld [vmem:[%s6418_s7 + $0xf0] sm:$0xff]  ;;  %v865_v47 = vld [vmem:[%s6418_s7 + $0xd8] sm:$0xff]  ;;  %v4157_v51 = vcombine.low %v856_v27, %v860_v31 }
  0xf1   : > { %v680_v0 = vmax.f32 %v672_v56, 0.0  ;;  %4500 = vmatprep.mubr.msk.bf16.mxu1 %vm724_vm2, %v696_v57  ;;  %v660_v1 = vmul.f32 %v4125_v41, %v631_v61  ;;  %v845_v56 = vld [vmem:[%s6418_s7 + $0x38] sm:$0xff]  ;;  %v4970_v57 = vmov 0   ;;  %v4136_v61 = vld [vmem:[%s6417_s6] ss:$0 sm:$0xff] }
  0xf2   : > { %v675_v2 = vadd.f32 %v4126_v42, %v661_v60  ;;  %1260 = vmatprep.mubr.bf16.mxu0 %v4970_v57  ;;  %v4143_v58 = vcombine.low %v841_v53, %v845_v56  ;;  %1374 = vmatprep.subr.bf16.mxu0 %v4142_v55  ;;  %v4135_v60 = vld [vmem:[%s6416_s5] ss:$0 sm:$0xff]  ;;  %v869_v48 = vld [vmem:[%s6418_s7 + $0xf8] sm:$0xff] }
  0xf3   : > { %v697_v3 = vpack.c.bf16 %v681_v59, %v680_v0  ;;  %v674_v4 = vadd.f32 %v4126_v42, %v660_v1  ;;  %v4491_v5 = vpop.f32.mrb[6].mxu0  ;;  %v4144_v59 = vcombine.high %v841_v53, %v845_v56  ;;  %v4168_v55 = vcombine.high %v865_v47, %v869_v48  ;;  %v872_v56 = vld [vmem:[%s6418_s7 + $0x110] sm:$0xff] }
  0xf4   : > { %v683_v7 = vmax.f32 %v675_v2, 0.0  ;;  %v663_v8 = vmul.f32 %v4491_v5, %v4125_v41  ;;  %v641_v9 = vpop.f32.mrb[7].mxu0 }
  0xf5   : > { %4501 = vmatmul.mubr.msk.bf16.vlgmr.msra.gmra.mrb[0].mxu1 %vm724_vm2, %v697_v3  ;;  %v682_v12 = vmax.f32 %v674_v4, 0.0  ;;  %v662_v13 = vmul.f32 %v4125_v41, %v641_v9  ;;  %v4187_v41 = vcombine.low %v887_v37, %v891_v39 }
  0xf6   : > { %v677_v14 = vadd.f32 %v4126_v42, %v663_v8  ;;  %1302 = vmatpush1.bf16.msra.mxu1 %v4139_v21  ;;  %v4164_v21 = vcombine.high %v863_v23, %v867_v24 }
  0xf7   : > { %v698_v17 = vpack.c.bf16 %v683_v7, %v682_v12  ;;  %v676_v19 = vadd.f32 %v4126_v42, %v662_v13  ;;  %1303 = vmatprep.subr.bf16.mxu1 %v4148_v6  ;;  %v4188_v42 = vcombine.high %v887_v37, %v891_v39  ;;  %v852_v13 = vld [vmem:[%s6418_s7 + $0x70] sm:$0xff] }
  0xf8   : > { %v685_v22 = vmax.f32 %v677_v14, 0.0  ;;  %v849_v14 = vld [vmem:[%s6418_s7 + $0x58] sm:$0xff]  ;;  %v4149_v38 = vcombine.low %v848_v10, %v852_v13 }
  0xf9   : > { %v684_v25 = vmax.f32 %v676_v19, 0.0  ;;  %4504 = vmatprep.mubr.msk.bf16.mxu1 %vm724_vm2, %v698_v17 }
  0xfa   : > { %1304 = vmatpush1.bf16.msra.mxu1 %v4147_v16  ;;  %v853_v16 = vld [vmem:[%s6418_s7 + $0x78] sm:$0xff] }
  0xfb   : > { %v699_v18 = vpack.c.bf16 %v685_v22, %v684_v25  ;;  %1305 = vmatprep.subr.bf16.mxu1 %v4156_v20  ;;  %v4152_v26 = vcombine.high %v849_v14, %v853_v16  ;;  %v4151_v39 = vcombine.low %v849_v14, %v853_v16 }
  0xfd   : > { %4505 = vmatmul.mubr.msk.bf16.gmra.mrb[4].mxu1 %vm724_vm2, %v699_v18 }
  0xfe   : > { %1306 = vmatpush1.bf16.msra.mxu1 %v4155_v15  ;;  %1333 = vmatprep.mubr.bf16.mxu1 %v4970_v57 }
  0xff   : > { %1307 = vmatprep.subr.bf16.mxu1 %v4164_v21  ;;  %v4150_v21 = vcombine.high %v848_v10, %v852_v13  ;;  %v892_v10 = vld [vmem:[%s6418_s7 + $0x1b0] sm:$0xff] }
 0x102   : > { %1308 = vmatpush1.bf16.msra.mxu1 %v4163_v28 }
 0x103   : > { %1309 = vmatprep.subr.bf16.mxu1 %v4172_v29 }
 0x106   : > { %1310 = vmatpush1.bf16.msra.mxu1 %v4171_v32  ;;  %v857_v32 = vld [vmem:[%s6418_s7 + $0x98] sm:$0xff] }
 0x107   : > { %1311 = vmatprep.subr.bf16.mxu1 %v4180_v33  ;;  %v861_v33 = vld [vmem:[%s6418_s7 + $0xb8] sm:$0xff] }
 0x108   : > { %v4160_v43 = vcombine.high %v857_v32, %v861_v33  ;;  %v4159_v52 = vcombine.low %v857_v32, %v861_v33  ;;  %v4568_v32 = vld [vmem:[%s6421_s10 + $0x20] ss:$16 sps:$4 sm:$0xff]   ;;  %v4571_v33 = vld [vmem:[%s6421_s10 + $0x28] ss:$16 sps:$4 sm:$0xff]  }
 0x10a   : > { %1312 = vmatpush1.bf16.msra.mxu1 %v4179_v34 }
 0x10b   : > { %1313 = vmatprep.subr.bf16.mxu1 %v4188_v42  ;;  %v4158_v42 = vcombine.high %v856_v27, %v860_v31  ;;  %v4573_v31 = vld [vmem:[%s6421_s10 + $0x2c] ss:$16 sps:$4 sm:$0xff]  }
 0x10e   : > { %1314 = vmatpush1.bf16.msra.mxu1 %v4187_v41 }
 0x10f   : > { %1315 = vmatprep.subr.bf16.mxu1 %v4196_v50 }
 0x112   : > { %1316 = vmatpush1.bf16.msra.mxu1 %v4195_v49 }
 0x113   : > { %1447 = vmatprep.subr.bf16.mxu1 %v4144_v59  ;;  %v873_v59 = vld [vmem:[%s6418_s7 + $0x118] sm:$0xff] }
 0x1c8   : > { %v4502_v62 = vpop.f32.mrb[0].mxu1 }
 0x1c9   : > { %v810_v63 = vmul.f32 %v4502_v62, %v4135_v60  ;;  %v771_v0 = vpop.f32.mrb[1].mxu1  ;;  %v4167_v62 = vcombine.low %v865_v47, %v869_v48  ;;  %v4597_v47 = vld [vmem:[%s6421_s10 + $0xac] ss:$16 sps:$4 sm:$0xff]   ;;  %v4592_v48 = vld [vmem:[%s6421_s10 + $0xa0] ss:$16 sps:$4 sm:$0xff]  }
 0x1ca   : > { %v808_v1 = vmul.f32 %v4135_v60, %v771_v0  ;;  %v4503_v2 = vpop.f32.mrb[2].mxu1 }
 0x1cb   : > { %v824_v3 = vadd.f32 %v4136_v61, %v810_v63  ;;  %v811_v4 = vmul.f32 %v4503_v2, %v4135_v60  ;;  %v774_v5 = vpop.f32.mrb[3].mxu1  ;;  %v884_v2 = vld [vmem:[%s6418_s7 + $0x170] sm:$0xff] }
 0x1cc   : > { %v822_v6 = vadd.f32 %v4136_v61, %v808_v1  ;;  %v809_v7 = vmul.f32 %v4135_v60, %v774_v5  ;;  %v880_v1 = vld [vmem:[%s6418_s7 + $0x150] sm:$0xff] }
 0x1cd   : > { %v825_v8 = vadd.f32 %v4136_v61, %v811_v4  ;;  %v832_v11 = vmax.f32 %v824_v3, 0.0  ;;  %v881_v3 = vld [vmem:[%s6418_s7 + $0x158] sm:$0xff]  ;;  %v4181_v13 = vcombine.low %v880_v1, %v884_v2 }
 0x1ce   : > { %v823_v9 = vadd.f32 %v4136_v61, %v809_v7  ;;  %v830_v17 = vmax.f32 %v822_v6, 0.0  ;;  %v885_v4 = vld [vmem:[%s6418_s7 + $0x178] sm:$0xff]  ;;  %v4182_v7 = vcombine.high %v880_v1, %v884_v2  ;;  %v4616_v1 = vld [vmem:[%s6421_s10 + $0x120] ss:$16 sps:$4 sm:$0xff]  }
 0x1cf   : > { %v833_v12 = vmax.f32 %v825_v8, 0.0  ;;  %v4184_v8 = vcombine.high %v881_v3, %v885_v4  ;;  %v4183_v14 = vcombine.low %v881_v3, %v885_v4  ;;  %v4619_v2 = vld [vmem:[%s6421_s10 + $0x128] ss:$16 sps:$4 sm:$0xff]   ;;  %v4624_v3 = vld [vmem:[%s6421_s10 + $0x144] ss:$16 sps:$4 sm:$0xff]  }
 0x1d0   : > { %v831_v19 = vmax.f32 %v823_v9, 0.0  ;;  %v4506_v20 = vpop.f32.mrb[4].mxu1  ;;  %v888_v9 = vld [vmem:[%s6418_s7 + $0x190] sm:$0xff]  ;;  %v4627_v4 = vld [vmem:[%s6421_s10 + $0x14c] ss:$16 sps:$4 sm:$0xff]  }
 0x1d1   : > { %v5233_v22 = vpack.c.bf16 %v833_v12, %v832_v11  ;;  %v814_v23 = vmul.f32 %v4506_v20, %v4135_v60  ;;  %v787_v24 = vpop.f32.mrb[5].mxu1  ;;  %v889_v11 = vld [vmem:[%s6418_s7 + $0x198] sm:$0xff]  ;;  %v4190_v16 = vcombine.high %v888_v9, %v892_v10  ;;  %v900_v20 = vld [vmem:[%s6418_s7 + $0x1f0] sm:$0xff] }
 0x1d2   : > { %v5235_v25 = vpack.c.bf16 %v831_v19, %v830_v17  ;;  %v812_v15 = vmul.f32 %v4135_v60, %v787_v24  ;;  %v4507_v18 = vpop.f32.mrb[6].mxu1  ;;  %v893_v12 = vld [vmem:[%s6418_s7 + $0x1b8] sm:$0xff]  ;;  %v896_v19 = vld [vmem:[%s6418_s7 + $0x1d0] sm:$0xff] }
 0x1d3   : > { %v828_v28 = vadd.f32 %v4136_v61, %v814_v23  ;;  %v815_v29 = vmul.f32 %v4507_v18, %v4135_v60  ;;  %v790_v30 = vpop.f32.mrb[7].mxu1  ;;  %v4192_v17 = vcombine.high %v889_v11, %v893_v12  ;;  %v897_v23 = vld [vmem:[%s6418_s7 + $0x1d8] sm:$0xff]  ;;  %v4191_v18 = vcombine.low %v889_v11, %v893_v12  ;;  %v4636_v11 = vld [vmem:[%s6421_s10 + $0x184] ss:$16 sps:$4 sm:$0xff]  }
 0x1d4   : > { %1261 = vmatmul.mubr.bf16.vlgmr.msra.gmra.mrb[8].mxu0 %v5235_v25  ;;  %1334 = vmatmul.mubr.bf16.vlgmr.msra.gmra.mrb[8].mxu1 %v5235_v25  ;;  %v826_v34 = vadd.f32 %v4136_v61, %v812_v15  ;;  %v813_v35 = vmul.f32 %v4135_v60, %v790_v30  ;;  %v877_v60 = vld [vmem:[%s6418_s7 + $0x138] sm:$0xff]  ;;  %v4189_v15 = vcombine.low %v888_v9, %v892_v10  ;;  %v4570_v30 = vld [vmem:[%s6421_s10 + $0x24] ss:$16 sps:$4 sm:$0xff]   ;;  %v4628_v9 = vld [vmem:[%s6421_s10 + $0x160] ss:$16 sps:$4 sm:$0xff]  }
 0x1d5   : > { %v836_v36 = vmax.f32 %v828_v28, 0.0  ;;  %1375 = vmatpush1.bf16.msra.mxu0 %v4141_v54  ;;  %1448 = vmatpush1.bf16.msra.mxu1 %v4143_v58  ;;  %v829_v37 = vadd.f32 %v4136_v61, %v815_v29  ;;  %v4166_v54 = vcombine.high %v864_v44, %v868_v46  ;;  %v876_v58 = vld [vmem:[%s6418_s7 + $0x130] sm:$0xff]  ;;  %v4176_v0 = vcombine.high %v873_v59, %v877_v60  ;;  %v901_v24 = vld [vmem:[%s6418_s7 + $0x1f8] sm:$0xff] }
 0x1d6   : > { %v834_v40 = vmax.f32 %v826_v34, 0.0  ;;  %v827_v41 = vadd.f32 %v4136_v61, %v813_v35  ;;  %1376 = vmatprep.subr.bf16.mxu0 %v4150_v21  ;;  %1449 = vmatprep.subr.bf16.mxu1 %v4152_v26  ;;  %v4165_v61 = vcombine.low %v864_v44, %v868_v46  ;;  %v4174_v63 = vcombine.high %v872_v56, %v876_v58  ;;  %v4562_v29 = vld [vmem:[%s6421_s10] ss:$16 sps:$4 sm:$0xff]   ;;  %v4576_v34 = vld [vmem:[%s6421_s10 + $0x44] ss:$16 sps:$4 sm:$0xff]  }
 0x1d7   : > { %v837_v45 = vmax.f32 %v829_v37, 0.0  ;;  %1270 = vmatprep.mubr.bf16.mxu0 %v4970_v57  ;;  %1343 = vmatprep.mubr.bf16.mxu1 %v4970_v57  ;;  %v4173_v5 = vcombine.low %v872_v56, %v876_v58  ;;  %v4175_v6 = vcombine.low %v873_v59, %v877_v60  ;;  %v4198_v21 = vcombine.high %v896_v19, %v900_v20  ;;  %v4579_v35 = vld [vmem:[%s6421_s10 + $0x4c] ss:$16 sps:$4 sm:$0xff]   ;;  %v4577_v37 = vld [vmem:[%s6421_s10 + $0x48] ss:$16 sps:$4 sm:$0xff]  }
 0x1d8   : > { %v835_v49 = vmax.f32 %v827_v41, 0.0  ;;  %v4200_v26 = vcombine.high %v897_v23, %v901_v24  ;;  %v4197_v27 = vcombine.low %v896_v19, %v900_v20  ;;  %v4199_v28 = vcombine.low %v897_v23, %v901_v24  ;;  %v4583_v41 = vld [vmem:[%s6421_s10 + $0x68] ss:$16 sps:$4 sm:$0xff]   ;;  %v4586_v44 = vld [vmem:[%s6421_s10 + $0x80] ss:$16 sps:$4 sm:$0xff]  }
 0x1d9   : > { %v5265_v50 = vpack.c.bf16 %v837_v45, %v836_v36  ;;  %1377 = vmatpush1.bf16.msra.mxu0 %v4149_v38  ;;  %1450 = vmatpush1.bf16.msra.mxu1 %v4151_v39  ;;  %v4574_v36 = vld [vmem:[%s6421_s10 + $0x40] ss:$16 sps:$4 sm:$0xff]   ;;  %v4582_v38 = vld [vmem:[%s6421_s10 + $0x64] ss:$16 sps:$4 sm:$0xff]   ;;  %v4585_v39 = vld [vmem:[%s6421_s10 + $0x6c] ss:$16 sps:$4 sm:$0xff]  }
 0x1da   : > { %v5267_v53 = vpack.c.bf16 %v835_v49, %v834_v40  ;;  %1378 = vmatprep.subr.bf16.mxu0 %v4158_v42  ;;  %1451 = vmatprep.subr.bf16.mxu1 %v4160_v43  ;;  %v4580_v40 = vld [vmem:[%s6421_s10 + $0x60] ss:$16 sps:$4 sm:$0xff]   ;;  %v4588_v42 = vld [vmem:[%s6421_s10 + $0x84] ss:$16 sps:$4 sm:$0xff]   ;;  %v4591_v43 = vld [vmem:[%s6421_s10 + $0x8c] ss:$16 sps:$4 sm:$0xff]  }
 0x1db   : > { %v4589_v45 = vld [vmem:[%s6421_s10 + $0x88] ss:$16 sps:$4 sm:$0xff]   ;;  %v4594_v46 = vld [vmem:[%s6421_s10 + $0xa4] ss:$16 sps:$4 sm:$0xff]   ;;  %v4604_v56 = vld [vmem:[%s6421_s10 + $0xe0] ss:$16 sps:$4 sm:$0xff]  }
 0x1dc   : > { %1271 = vmatmul.mubr.bf16.gmra.mrb[12].mxu0 %v5233_v22  ;;  %1344 = vmatmul.mubr.bf16.gmra.mrb[12].mxu1 %v5233_v22  ;;  %v4595_v49 = vld [vmem:[%s6421_s10 + $0xa8] ss:$16 sps:$4 sm:$0xff]   ;;  %v4612_v59 = vld [vmem:[%s6421_s10 + $0x104] ss:$16 sps:$4 sm:$0xff]   ;;  %v4615_v60 = vld [vmem:[%s6421_s10 + $0x10c] ss:$16 sps:$4 sm:$0xff]  }
 0x1dd   : > { %1379 = vmatpush1.bf16.msra.mxu0 %v4157_v51  ;;  %1452 = vmatpush1.bf16.msra.mxu1 %v4159_v52  ;;  %v4603_v51 = vld [vmem:[%s6421_s10 + $0xcc] ss:$16 sps:$4 sm:$0xff]   ;;  %v4598_v52 = vld [vmem:[%s6421_s10 + $0xc0] ss:$16 sps:$4 sm:$0xff]   ;;  %v4607_v58 = vld [vmem:[%s6421_s10 + $0xe8] ss:$16 sps:$4 sm:$0xff]  }
 0x1de   : > { %1380 = vmatprep.subr.bf16.mxu0 %v4166_v54  ;;  %1453 = vmatprep.subr.bf16.mxu1 %v4168_v55  ;;  %v4606_v54 = vld [vmem:[%s6421_s10 + $0xe4] ss:$16 sps:$4 sm:$0xff]   ;;  %v4609_v55 = vld [vmem:[%s6421_s10 + $0xec] ss:$16 sps:$4 sm:$0xff]   ;;  %v4631_v10 = vld [vmem:[%s6421_s10 + $0x168] ss:$16 sps:$4 sm:$0xff]  }
 0x1df   : > { %1280 = vmatprep.mubr.bf16.mxu0 %v4970_v57  ;;  %1353 = vmatprep.mubr.bf16.mxu1 %v4970_v57  ;;  %v4639_v12 = vld [vmem:[%s6421_s10 + $0x18c] ss:$16 sps:$4 sm:$0xff]   ;;  %v4640_v19 = vld [vmem:[%s6421_s10 + $0x1a0] ss:$16 sps:$4 sm:$0xff]   ;;  %v4643_v20 = vld [vmem:[%s6421_s10 + $0x1a8] ss:$16 sps:$4 sm:$0xff]  }
 0x1e0   : > { %v4646_v23 = vld [vmem:[%s6421_s10 + $0x1c0] ss:$16 sps:$4 sm:$0xff]   ;;  %v4648_v24 = vld [vmem:[%s6421_s10 + $0x1c4] ss:$16 sps:$4 sm:$0xff]  }
 0x1e1   : > { %1381 = vmatpush1.bf16.msra.mxu0 %v4165_v61  ;;  %1454 = vmatpush1.bf16.msra.mxu1 %v4167_v62  ;;  %v4610_v61 = vld [vmem:[%s6421_s10 + $0x100] ss:$16 sps:$4 sm:$0xff]   ;;  %v4613_v62 = vld [vmem:[%s6421_s10 + $0x108] ss:$16 sps:$4 sm:$0xff]  }
 0x1e2   : > { %1382 = vmatprep.subr.bf16.mxu0 %v4174_v63  ;;  %1455 = vmatprep.subr.bf16.mxu1 %v4176_v0  ;;  %v4618_v63 = vld [vmem:[%s6421_s10 + $0x124] ss:$16 sps:$4 sm:$0xff]   ;;  %v4621_v0 = vld [vmem:[%s6421_s10 + $0x12c] ss:$16 sps:$4 sm:$0xff]  }
 0x1e4   : > { %1281 = vmatmul.mubr.bf16.gmra.mrb[16].mxu0 %v5267_v53  ;;  %1354 = vmatmul.mubr.bf16.gmra.mrb[16].mxu1 %v5267_v53 }
 0x1e5   : > { %1383 = vmatpush1.bf16.msra.mxu0 %v4173_v5  ;;  %1456 = vmatpush1.bf16.msra.mxu1 %v4175_v6  ;;  %v4622_v5 = vld [vmem:[%s6421_s10 + $0x140] ss:$16 sps:$4 sm:$0xff]   ;;  %v4625_v6 = vld [vmem:[%s6421_s10 + $0x148] ss:$16 sps:$4 sm:$0xff]  }
 0x1e6   : > { %1384 = vmatprep.subr.bf16.mxu0 %v4182_v7  ;;  %1457 = vmatprep.subr.bf16.mxu1 %v4184_v8  ;;  %v4630_v7 = vld [vmem:[%s6421_s10 + $0x164] ss:$16 sps:$4 sm:$0xff]   ;;  %v4633_v8 = vld [vmem:[%s6421_s10 + $0x16c] ss:$16 sps:$4 sm:$0xff]  }
 0x1e7   : > { %1290 = vmatprep.mubr.bf16.mxu0 %v4970_v57  ;;  %1363 = vmatprep.mubr.bf16.mxu1 %v4970_v57 }
 0x1e9   : > { %1385 = vmatpush1.bf16.msra.mxu0 %v4181_v13  ;;  %1458 = vmatpush1.bf16.msra.mxu1 %v4183_v14  ;;  %v4634_v13 = vld [vmem:[%s6421_s10 + $0x180] ss:$16 sps:$4 sm:$0xff]   ;;  %v4637_v14 = vld [vmem:[%s6421_s10 + $0x188] ss:$16 sps:$4 sm:$0xff]  }
 0x1ea   : > { %1386 = vmatprep.subr.bf16.mxu0 %v4190_v16  ;;  %1459 = vmatprep.subr.bf16.mxu1 %v4192_v17  ;;  %v4642_v16 = vld [vmem:[%s6421_s10 + $0x1a4] ss:$16 sps:$4 sm:$0xff]   ;;  %v4645_v17 = vld [vmem:[%s6421_s10 + $0x1ac] ss:$16 sps:$4 sm:$0xff]  }
 0x1ec   : > { %1291 = vmatmul.mubr.bf16.gmra.mrb[20].mxu0 %v5265_v50  ;;  %1364 = vmatmul.mubr.bf16.gmra.mrb[20].mxu1 %v5265_v50 }
 0x1ed   : > { %1387 = vmatpush1.bf16.msra.mxu0 %v4189_v15  ;;  %1460 = vmatpush1.bf16.msra.mxu1 %v4191_v18  ;;  %v4649_v15 = vld [vmem:[%s6421_s10 + $0x1c8] ss:$16 sps:$4 sm:$0xff]   ;;  %v4651_v18 = vld [vmem:[%s6421_s10 + $0x1cc] ss:$16 sps:$4 sm:$0xff]  }
 0x1ee   : > { %1388 = vmatprep.subr.bf16.mxu0 %v4198_v21  ;;  %1461 = vmatprep.subr.bf16.mxu1 %v4200_v26  ;;  %v4654_v21 = vld [vmem:[%s6421_s10 + $0x1e4] ss:$16 sps:$4 sm:$0xff]   ;;  %v4657_v26 = vld [vmem:[%s6421_s10 + $0x1ec] ss:$16 sps:$4 sm:$0xff]  }
 0x1ef   : > { %1406 = vmatprep.mubr.bf16.mxu0 %v4970_v57  ;;  %1479 = vmatprep.mubr.bf16.mxu1 %v4970_v57 }
 0x1f1   : > { %1389 = vmatpush1.bf16.msra.mxu0 %v4197_v27  ;;  %1462 = vmatpush1.bf16.msra.mxu1 %v4199_v28  ;;  %v4652_v27 = vld [vmem:[%s6421_s10 + $0x1e0] ss:$16 sps:$4 sm:$0xff]   ;;  %v4655_v28 = vld [vmem:[%s6421_s10 + $0x1e8] ss:$16 sps:$4 sm:$0xff]  }
 0x1f4   : > { %1407 = vmatmul.mubr.bf16.vlgmr.msra.gmra.mrb[24].mxu0 %v5235_v25  ;;  %1480 = vmatmul.mubr.bf16.vlgmr.msra.gmra.mrb[24].mxu1 %v5235_v25  ;;  %v4567_v25 = vld [vmem:[%s6421_s10 + $0xc] ss:$16 sps:$4 sm:$0xff]  }
 0x1f5   : > { %1416 = vmatprep.mubr.bf16.mxu0 %v4970_v57  ;;  %1489 = vmatprep.mubr.bf16.mxu1 %v4970_v57 }
 0x1f6   : > { %3762 = vmatprep.subr.bf16.mxu1 %v4567_v25  ;;  %v4663_v25 = vld [vmem:[%s6421_s10 + $0x20c] ss:$16 sps:$4 sm:$0xff]  }
 0x1fc   : > { %1417 = vmatmul.mubr.bf16.gmra.mrb[28].mxu0 %v5233_v22  ;;  %1490 = vmatmul.mubr.bf16.gmra.mrb[28].mxu1 %v5233_v22  ;;  %v4564_v22 = vld [vmem:[%s6421_s10 + $0x4] ss:$16 sps:$4 sm:$0xff]  }
 0x1fd   : > { %1426 = vmatprep.mubr.bf16.mxu0 %v4970_v57  ;;  %1499 = vmatprep.mubr.bf16.mxu1 %v4970_v57 }
 0x1fe   : > { %3598 = vmatprep.subr.bf16.mxu0 %v4564_v22  ;;  %v4660_v22 = vld [vmem:[%s6421_s10 + $0x204] ss:$16 sps:$4 sm:$0xff]  }
 0x1ff   : > { %3599 = vmatpush1.bf16.msra.mxu0 %v4562_v29  ;;  %v1521_v29 = vlaneseq }
 0x200   : > { %3600 = vmatprep.subr.bf16.mxu0 %v4570_v30 }
 0x201   : > { %vm4011_vm3 = vcmp.lt.s32.totalorder %v1521_v29, 512 }
 0x203   : > { %3601 = vmatpush1.bf16.msra.mxu0 %v4568_v32  ;;  %v5553_v32 = vld [vmem:[%s6419_s8] sm:$0xff] }
 0x204   : > { %1427 = vmatmul.mubr.bf16.gmra.mrb[32].mxu0 %v5267_v53  ;;  %1500 = vmatmul.mubr.bf16.gmra.mrb[32].mxu1 %v5267_v53  ;;  %v4601_v53 = vld [vmem:[%s6421_s10 + $0xc8] ss:$16 sps:$4 sm:$0xff]  }
 0x205   : > { %1436 = vmatprep.mubr.bf16.mxu0 %v4970_v57  ;;  %1509 = vmatprep.mubr.bf16.mxu1 %v4970_v57  ;;  %v4565_v57 = vld [vmem:[%s6421_s10 + $0x8] ss:$16 sps:$4 sm:$0xff]  }
 0x206   : > { %3763 = vmatpush1.bf16.msra.mxu1 %v4565_v57  ;;  %3602 = vmatprep.subr.bf16.mxu0 %v4576_v34  ;;  %v5542_v57 = vshrl.u32 %v1521_v29, 7 }
 0x207   : > { %3764 = vmatprep.subr.bf16.mxu1 %v4573_v31  ;;  %3603 = vmatpush1.bf16.msra.mxu0 %v4574_v36 }
 0x208   : > { %3604 = vmatprep.subr.bf16.mxu0 %v4582_v38  ;;  %v5545_v30 = vsub.s32 0, %v5542_v57  ;;  %v5548_v31 = vsub.s32 2, %v5542_v57  ;;  %v5559_v34 = vsub.s32 3, %v5542_v57 }
 0x20a   : > { %3765 = vmatpush1.bf16.msra.mxu1 %v4571_v33  ;;  %v5556_v33 = vsub.s32 1, %v5542_v57  ;;  %v5567_v36 = vrot.slane %v5553_v32, %v5548_v31 }
 0x20b   : > { %3766 = vmatprep.subr.bf16.mxu1 %v4579_v35  ;;  %3605 = vmatpush1.bf16.msra.mxu0 %v4580_v40  ;;  %v5563_v35 = vrot.slane %v5553_v32, %v5545_v30 }
 0x20c   : > { %1437 = vmatmul.mubr.bf16.gmra.mrb[36].mxu0 %v5265_v50  ;;  %1510 = vmatmul.mubr.bf16.gmra.mrb[36].mxu1 %v5265_v50  ;;  %v4600_v50 = vld [vmem:[%s6421_s10 + $0xc4] ss:$16 sps:$4 sm:$0xff]   ;;  %v5576_v38 = vrot.slane %v5553_v32, %v5556_v33 }
 0x20d   : > { %3606 = vmatprep.subr.bf16.mxu0 %v4588_v42 }
 0x20e   : > { %3767 = vmatpush1.bf16.msra.mxu1 %v4577_v37  ;;  %v5572_v37 = vld [vmem:[%s6420_s9] sm:$0xff] }
 0x20f   : > { %3768 = vmatprep.subr.bf16.mxu1 %v4585_v39  ;;  %3607 = vmatpush1.bf16.msra.mxu0 %v4586_v44  ;;  %v5580_v39 = vrot.slane %v5553_v32, %v5559_v34 }
 0x210   : > { %3608 = vmatprep.subr.bf16.mxu0 %v4594_v46 }
 0x212   : > { %3769 = vmatpush1.bf16.msra.mxu1 %v4583_v41 }
 0x213   : > { %3770 = vmatprep.subr.bf16.mxu1 %v4591_v43  ;;  %3609 = vmatpush1.bf16.msra.mxu0 %v4592_v48  ;;  %v5585_v43 = vrot.slane %v5572_v37, %v5545_v30 }
 0x214   : > { %3610 = vmatprep.subr.bf16.mxu0 %v4600_v50 }
 0x216   : > { %3771 = vmatpush1.bf16.msra.mxu1 %v4589_v45  ;;  %v5590_v45 = vrot.slane %v5572_v37, %v5548_v31 }
 0x217   : > { %3772 = vmatprep.subr.bf16.mxu1 %v4597_v47  ;;  %3611 = vmatpush1.bf16.msra.mxu0 %v4598_v52 }
 0x218   : > { %3612 = vmatprep.subr.bf16.mxu0 %v4606_v54 }
 0x21a   : > { %3773 = vmatpush1.bf16.msra.mxu1 %v4595_v49  ;;  %v5595_v49 = vrot.slane %v5572_v37, %v5556_v33 }
 0x21b   : > { %3774 = vmatprep.subr.bf16.mxu1 %v4603_v51  ;;  %3613 = vmatpush1.bf16.msra.mxu0 %v4604_v56  ;;  %v5600_v51 = vrot.slane %v5572_v37, %v5559_v34 }
 0x21c   : > { %3614 = vmatprep.subr.bf16.mxu0 %v4612_v59 }
 0x21e   : > { %3775 = vmatpush1.bf16.msra.mxu1 %v4601_v53 }
 0x21f   : > { %3776 = vmatprep.subr.bf16.mxu1 %v4609_v55  ;;  %3615 = vmatpush1.bf16.msra.mxu0 %v4610_v61 }
 0x220   : > { %3616 = vmatprep.subr.bf16.mxu0 %v4618_v63 }
 0x222   : > { %3777 = vmatpush1.bf16.msra.mxu1 %v4607_v58 }
 0x223   : > { %3778 = vmatprep.subr.bf16.mxu1 %v4615_v60  ;;  %3617 = vmatpush1.bf16.msra.mxu0 %v4616_v1 }
 0x224   : > { %3618 = vmatprep.subr.bf16.mxu0 %v4624_v3 }
 0x226   : > { %3779 = vmatpush1.bf16.msra.mxu1 %v4613_v62 }
 0x227   : > { %3780 = vmatprep.subr.bf16.mxu1 %v4621_v0  ;;  %3619 = vmatpush1.bf16.msra.mxu0 %v4622_v5 }
 0x228   : > { %3620 = vmatprep.subr.bf16.mxu0 %v4630_v7 }
 0x22a   : > { %3781 = vmatpush1.bf16.msra.mxu1 %v4619_v2 }
 0x22b   : > { %3782 = vmatprep.subr.bf16.mxu1 %v4627_v4  ;;  %3621 = vmatpush1.bf16.msra.mxu0 %v4628_v9 }
 0x22c   : > { %3622 = vmatprep.subr.bf16.mxu0 %v4636_v11 }
 0x22e   : > { %3783 = vmatpush1.bf16.msra.mxu1 %v4625_v6 }
 0x22f   : > { %3784 = vmatprep.subr.bf16.mxu1 %v4633_v8  ;;  %3623 = vmatpush1.bf16.msra.mxu0 %v4634_v13 }
 0x230   : > { %3624 = vmatprep.subr.bf16.mxu0 %v4642_v16 }
 0x232   : > { %3785 = vmatpush1.bf16.msra.mxu1 %v4631_v10 }
 0x233   : > { %3786 = vmatprep.subr.bf16.mxu1 %v4639_v12  ;;  %3625 = vmatpush1.bf16.msra.mxu0 %v4640_v19 }
 0x234   : > { %3626 = vmatprep.subr.bf16.mxu0 %v4648_v24 }
 0x236   : > { %3787 = vmatpush1.bf16.msra.mxu1 %v4637_v14 }
 0x237   : > { %3788 = vmatprep.subr.bf16.mxu1 %v4645_v17  ;;  %3627 = vmatpush1.bf16.msra.mxu0 %v4646_v23 }
 0x238   : > { %3628 = vmatprep.subr.bf16.mxu0 %v4654_v21 }
 0x23a   : > { %3789 = vmatpush1.bf16.msra.mxu1 %v4643_v20 }
 0x23b   : > { %3790 = vmatprep.subr.bf16.mxu1 %v4651_v18  ;;  %3629 = vmatpush1.bf16.msra.mxu0 %v4652_v27 }
 0x23c   : > { %3639 = vmatprep.subr.bf16.mxu0 %v4660_v22 }
 0x23e   : > { %3791 = vmatpush1.bf16.msra.mxu1 %v4649_v15 }
 0x23f   : > { %3792 = vmatprep.subr.bf16.mxu1 %v4657_v26 }
 0x242   : > { %3793 = vmatpush1.bf16.msra.mxu1 %v4655_v28 }
 0x243   : > { %3803 = vmatprep.subr.bf16.mxu1 %v4663_v25 }
 0x2a7   : > { %v1262_v40 = vpop.f32.mrb[8].mxu0  ;;  %v1335_v41 = vpop.f32.mrb[8].mxu1 }
 0x2a8   : > { %v1561_v42 = vmul.f32 %v5563_v35, %v1262_v40  ;;  %v1563_v44 = vmul.f32 %v5567_v36, %v1335_v41  ;;  %v1264_v46 = vpop.f32.mrb[9].mxu0  ;;  %v1337_v47 = vpop.f32.mrb[9].mxu1 }
 0x2a9   : > { %v1562_v48 = vmul.f32 %v5576_v38, %v1264_v46  ;;  %v1564_v50 = vmul.f32 %v5580_v39, %v1337_v47  ;;  %v1266_v52 = vpop.f32.mrb[10].mxu0  ;;  %v1339_v53 = vpop.f32.mrb[10].mxu1 }
 0x2aa   : > { %v1569_v54 = vmul.f32 %v5563_v35, %v1266_v52  ;;  %v1571_v55 = vmul.f32 %v5567_v36, %v1339_v53  ;;  %v1268_v56 = vpop.f32.mrb[11].mxu0  ;;  %v1341_v58 = vpop.f32.mrb[11].mxu1  ;;  %v1666_v61 = vadd.f32 %v5585_v43, %v1561_v42  ;;  %v1668_v62 = vadd.f32 %v5590_v45, %v1563_v44 }
 0x2ab   : > { %v1570_v59 = vmul.f32 %v5576_v38, %v1268_v56  ;;  %v1572_v60 = vmul.f32 %v5580_v39, %v1341_v58  ;;  %v1667_v1 = vadd.f32 %v5595_v49, %v1562_v48  ;;  %v1669_v2 = vadd.f32 %v5600_v51, %v1564_v50 }
 0x2ac   : > { %v1674_v63 = vadd.f32 %v5585_v43, %v1569_v54  ;;  %v1676_v0 = vadd.f32 %v5590_v45, %v1571_v55 }
 0x2ad   : > { %v1675_v3 = vadd.f32 %v5595_v49, %v1570_v59  ;;  %v1677_v4 = vadd.f32 %v5600_v51, %v1572_v60  ;;  %v5631_v59 = vsub.s32 4, %v5542_v57 }
 0x2ae   : > { %v1837_v5 = vmax.f32 %v1666_v61, %v1674_v63  ;;  %v1863_v6 = vmax.f32 %v1668_v62, %v1676_v0  ;;  %v5636_v0 = vsub.s32 6, %v5542_v57 }
 0x2af   : > { %v1850_v7 = vmax.f32 %v1667_v1, %v1675_v3  ;;  %v1876_v8 = vmax.f32 %v1669_v2, %v1677_v4  ;;  %v1272_v9 = vpop.f32.mrb[12].mxu0  ;;  %v1345_v10 = vpop.f32.mrb[12].mxu1  ;;  %v5639_v1 = vsub.s32 5, %v5542_v57 }
 0x2b0   : > { %v1577_v11 = vmul.f32 %v5563_v35, %v1272_v9  ;;  %v1579_v12 = vmul.f32 %v5567_v36, %v1345_v10  ;;  %v1274_v13 = vpop.f32.mrb[13].mxu0  ;;  %v1347_v14 = vpop.f32.mrb[13].mxu1 }
 0x2b1   : > { %v1578_v16 = vmul.f32 %v5576_v38, %v1274_v13  ;;  %v1580_v17 = vmul.f32 %v5580_v39, %v1347_v14  ;;  %v1276_v19 = vpop.f32.mrb[14].mxu0  ;;  %v1349_v20 = vpop.f32.mrb[14].mxu1 }
 0x2b2   : > { %v1682_v23 = vadd.f32 %v5585_v43, %v1577_v11  ;;  %v1684_v24 = vadd.f32 %v5590_v45, %v1579_v12  ;;  %v1585_v15 = vmul.f32 %v5563_v35, %v1276_v19  ;;  %v1587_v18 = vmul.f32 %v5567_v36, %v1349_v20  ;;  %v1278_v21 = vpop.f32.mrb[15].mxu0  ;;  %v1351_v26 = vpop.f32.mrb[15].mxu1 }
 0x2b3   : > { %v1683_v27 = vadd.f32 %v5595_v49, %v1578_v16  ;;  %v1685_v28 = vadd.f32 %v5600_v51, %v1580_v17  ;;  %v1586_v22 = vmul.f32 %v5576_v38, %v1278_v21  ;;  %v1588_v25 = vmul.f32 %v5580_v39, %v1351_v26 }
 0x2b4   : > { %v1838_v40 = vmax.f32 %v1837_v5, %v1682_v23  ;;  %v1864_v41 = vmax.f32 %v1863_v6, %v1684_v24  ;;  %v1690_v42 = vadd.f32 %v5585_v43, %v1585_v15  ;;  %v1692_v44 = vadd.f32 %v5590_v45, %v1587_v18 }
 0x2b5   : > { %v1851_v46 = vmax.f32 %v1850_v7, %v1683_v27  ;;  %v1877_v47 = vmax.f32 %v1876_v8, %v1685_v28  ;;  %v1691_v48 = vadd.f32 %v5595_v49, %v1586_v22  ;;  %v1693_v50 = vadd.f32 %v5600_v51, %v1588_v25 }
 0x2b6   : > { %v1839_v52 = vmax.f32 %v1838_v40, %v1690_v42  ;;  %v1865_v53 = vmax.f32 %v1864_v41, %v1692_v44  ;;  %v4971_v6 = vmov 1966171168   ;;  %v5646_v8 = vsub.s32 7, %v5542_v57 }
 0x2b7   : > { %v1852_v54 = vmax.f32 %v1851_v46, %v1691_v48  ;;  %v1878_v55 = vmax.f32 %v1877_v47, %v1693_v50  ;;  %v1282_v56 = vpop.f32.mrb[16].mxu0  ;;  %v1355_v58 = vpop.f32.mrb[16].mxu1  ;;  %v5643_v7 = vunpack.c.l.s4 %v4971_v6  ;;  %v5662_v46 = vrot.slane %v5553_v32, %v5631_v59 }
 0x2b8   : > { %v1593_v60 = vmul.f32 %v5563_v35, %v1282_v56  ;;  %v1595_v61 = vmul.f32 %v5567_v36, %v1355_v58  ;;  %v1284_v62 = vpop.f32.mrb[17].mxu0  ;;  %v1357_v63 = vpop.f32.mrb[17].mxu1  ;;  %v5666_v47 = vrot.slane %v5553_v32, %v5636_v0 }
 0x2b9   : > { %v1594_v2 = vmul.f32 %v5576_v38, %v1284_v62  ;;  %v1596_v3 = vmul.f32 %v5580_v39, %v1357_v63  ;;  %v1286_v4 = vpop.f32.mrb[18].mxu0  ;;  %v1359_v5 = vpop.f32.mrb[18].mxu1  ;;  %v1961_v62 = vunpack.c.0.s8 %v5643_v7  ;;  %v5683_v63 = vrot.slane %v5572_v37, %v5631_v59 }
 0x2ba   : > { %v1698_v9 = vadd.f32 %v5585_v43, %v1593_v60  ;;  %v1700_v10 = vadd.f32 %v5590_v45, %v1595_v61  ;;  %v1601_v11 = vmul.f32 %v5563_v35, %v1286_v4  ;;  %v1603_v12 = vmul.f32 %v5567_v36, %v1359_v5  ;;  %v1288_v13 = vpop.f32.mrb[19].mxu0  ;;  %v1361_v14 = vpop.f32.mrb[19].mxu1 }
 0x2bb   : > { %v1699_v16 = vadd.f32 %v5595_v49, %v1594_v2  ;;  %v1701_v17 = vadd.f32 %v5600_v51, %v1596_v3  ;;  %v1602_v19 = vmul.f32 %v5576_v38, %v1288_v13  ;;  %v1604_v20 = vmul.f32 %v5580_v39, %v1361_v14 }
 0x2bc   : > { %v1840_v23 = vmax.f32 %v1839_v52, %v1698_v9  ;;  %v1866_v24 = vmax.f32 %v1865_v53, %v1700_v10  ;;  %v1706_v15 = vadd.f32 %v5585_v43, %v1601_v11  ;;  %v1708_v18 = vadd.f32 %v5590_v45, %v1603_v12 }
 0x2bd   : > { %v1853_v21 = vmax.f32 %v1852_v54, %v1699_v16  ;;  %v1879_v26 = vmax.f32 %v1878_v55, %v1701_v17  ;;  %v1707_v27 = vadd.f32 %v5595_v49, %v1602_v19  ;;  %v1709_v28 = vadd.f32 %v5600_v51, %v1604_v20 }
 0x2be   : > { %v1841_v22 = vmax.f32 %v1840_v23, %v1706_v15  ;;  %v1867_v25 = vmax.f32 %v1866_v24, %v1708_v18  ;;  %v5672_v54 = vrot.slane %v5553_v32, %v5639_v1  ;;  %v5676_v55 = vrot.slane %v5553_v32, %v5646_v8 }
 0x2bf   : > { %v1854_v40 = vmax.f32 %v1853_v21, %v1707_v27  ;;  %v1880_v41 = vmax.f32 %v1879_v26, %v1709_v28  ;;  %v1292_v42 = vpop.f32.mrb[20].mxu0  ;;  %v1365_v44 = vpop.f32.mrb[20].mxu1  ;;  %v5699_v24 = vrot.slane %v5572_v37, %v5636_v0 }
 0x2c0   : > { %v1609_v48 = vmul.f32 %v5563_v35, %v1292_v42  ;;  %v1611_v50 = vmul.f32 %v5567_v36, %v1365_v44  ;;  %v1294_v52 = vpop.f32.mrb[21].mxu0  ;;  %v1367_v53 = vpop.f32.mrb[21].mxu1 }
 0x2c1   : > { %v1610_v56 = vmul.f32 %v5576_v38, %v1294_v52  ;;  %v1612_v58 = vmul.f32 %v5580_v39, %v1367_v53  ;;  %v1296_v60 = vpop.f32.mrb[22].mxu0  ;;  %v1369_v61 = vpop.f32.mrb[22].mxu1 }
 0x2c2   : > { %v1714_v2 = vadd.f32 %v5585_v43, %v1609_v48  ;;  %v1716_v3 = vadd.f32 %v5590_v45, %v1611_v50  ;;  %v1617_v4 = vmul.f32 %v5563_v35, %v1296_v60  ;;  %v1619_v32 = vmul.f32 %v5567_v36, %v1369_v61  ;;  %v1298_v5 = vpop.f32.mrb[23].mxu0  ;;  %v1371_v6 = vpop.f32.mrb[23].mxu1 }
 0x2c3   : > { %v1715_v9 = vadd.f32 %v5595_v49, %v1610_v56  ;;  %v1717_v10 = vadd.f32 %v5600_v51, %v1612_v58  ;;  %v1618_v7 = vmul.f32 %v5576_v38, %v1298_v5  ;;  %v1620_v11 = vmul.f32 %v5580_v39, %v1371_v6 }
 0x2c4   : > { %v1842_v12 = vmax.f32 %v1841_v22, %v1714_v2  ;;  %v1868_v13 = vmax.f32 %v1867_v25, %v1716_v3  ;;  %v1722_v14 = vadd.f32 %v5585_v43, %v1617_v4  ;;  %v1724_v16 = vadd.f32 %v5590_v45, %v1619_v32 }
 0x2c5   : > { %v1855_v17 = vmax.f32 %v1854_v40, %v1715_v9  ;;  %v1881_v35 = vmax.f32 %v1880_v41, %v1717_v10  ;;  %v1723_v36 = vadd.f32 %v5595_v49, %v1618_v7  ;;  %v1725_v19 = vadd.f32 %v5600_v51, %v1620_v11 }
 0x2c6   : > { %v1843_v20 = vmax.f32 %v1842_v12, %v1722_v14  ;;  %v1869_v23 = vmax.f32 %v1868_v13, %v1724_v16  ;;  %v5703_v38 = vrot.slane %v5572_v37, %v5639_v1  ;;  %v5706_v43 = vsub.s32 %v1961_v62, %v5542_v57 }
 0x2c7   : > { %v1856_v39 = vmax.f32 %v1855_v17, %v1723_v36  ;;  %v1882_v45 = vmax.f32 %v1881_v35, %v1725_v19  ;;  %v1408_v15 = vpop.f32.mrb[24].mxu0  ;;  %v1481_v18 = vpop.f32.mrb[24].mxu1  ;;  %v5710_v49 = vrot.slane %v5572_v37, %v5646_v8 }
 0x2c8   : > { %v1844_v51 = vrot.slane %v1843_v20, 4  ;;  %v1870_v21 = vrot.slane %v1869_v23, 4  ;;  %v1565_v26 = vmul.f32 %v5662_v46, %v1408_v15  ;;  %v1567_v27 = vmul.f32 %v5666_v47, %v1481_v18  ;;  %v1410_v28 = vpop.f32.mrb[25].mxu0  ;;  %v1483_v22 = vpop.f32.mrb[25].mxu1 }
 0x2c9   : > { %v1857_v25 = vrot.slane %v1856_v39, 4  ;;  %v1883_v40 = vrot.slane %v1882_v45, 4  ;;  %v1566_v57 = vmul.f32 %v5672_v54, %v1410_v28  ;;  %v1568_v41 = vmul.f32 %v5676_v55, %v1483_v22  ;;  %v1412_v42 = vpop.f32.mrb[26].mxu0  ;;  %v1485_v44 = vpop.f32.mrb[26].mxu1 }
 0x2ca   : > { %v1845_v48 = vmax.f32 %v1843_v20, %v1844_v51  ;;  %v1871_v50 = vmax.f32 %v1869_v23, %v1870_v21  ;;  %v1670_v37 = vadd.f32 %v5683_v63, %v1565_v26  ;;  %v1672_v52 = vadd.f32 %v5699_v24, %v1567_v27  ;;  %v1414_v53 = vpop.f32.mrb[27].mxu0  ;;  %v1487_v56 = vpop.f32.mrb[27].mxu1 }
 0x2cb   : > { %v1858_v58 = vmax.f32 %v1856_v39, %v1857_v25  ;;  %v1884_v60 = vmax.f32 %v1882_v45, %v1883_v40  ;;  %v1671_v61 = vadd.f32 %v5703_v38, %v1566_v57  ;;  %v1673_v62 = vadd.f32 %v5710_v49, %v1568_v41 }
 0x2cc   : > { %v1846_v2 = vrot.slane %v1845_v48, 2  ;;  %v1872_v3 = vrot.slane %v1871_v50, 2  ;;  %v1573_v4 = vmul.f32 %v5662_v46, %v1412_v42  ;;  %v1575_v32 = vmul.f32 %v5666_v47, %v1485_v44 }
 0x2cd   : > { %v1859_v5 = vrot.slane %v1858_v58, 2  ;;  %v1885_v6 = vrot.slane %v1884_v60, 2  ;;  %v1574_v9 = vmul.f32 %v5672_v54, %v1414_v53  ;;  %v1576_v10 = vmul.f32 %v5676_v55, %v1487_v56 }
 0x2ce   : > { %v1847_v7 = vmax.f32 %v1845_v48, %v1846_v2  ;;  %v1873_v11 = vmax.f32 %v1871_v50, %v1872_v3  ;;  %v1678_v12 = vadd.f32 %v5683_v63, %v1573_v4  ;;  %v1680_v13 = vadd.f32 %v5699_v24, %v1575_v32 }
 0x2cf   : > { %v1860_v14 = vmax.f32 %v1858_v58, %v1859_v5  ;;  %v1886_v16 = vmax.f32 %v1884_v60, %v1885_v6  ;;  %v1679_v17 = vadd.f32 %v5703_v38, %v1574_v9  ;;  %v1681_v35 = vadd.f32 %v5710_v49, %v1576_v10  ;;  %v1418_v36 = vpop.f32.mrb[28].mxu0  ;;  %v1491_v19 = vpop.f32.mrb[28].mxu1 }
 0x2d0   : > { %v1848_v20 = vrot.slane %v1847_v7, 1  ;;  %v1874_v23 = vrot.slane %v1873_v11, 1  ;;  %v1889_v39 = vmax.f32 %v1670_v37, %v1678_v12  ;;  %v1915_v45 = vmax.f32 %v1672_v52, %v1680_v13  ;;  %v1420_v15 = vpop.f32.mrb[29].mxu0  ;;  %v1493_v18 = vpop.f32.mrb[29].mxu1 }
 0x2d1   : > { %v1861_v51 = vrot.slane %v1860_v14, 1  ;;  %v1887_v21 = vrot.slane %v1886_v16, 1  ;;  %v1902_v26 = vmax.f32 %v1671_v61, %v1679_v17  ;;  %v1928_v27 = vmax.f32 %v1673_v62, %v1681_v35  ;;  %v1422_v28 = vpop.f32.mrb[30].mxu0  ;;  %v1495_v22 = vpop.f32.mrb[30].mxu1 }
 0x2d2   : > { %v1849_v25 = vmax.f32 %v1847_v7, %v1848_v20  ;;  %v1875_v40 = vmax.f32 %v1873_v11, %v1874_v23  ;;  %v1581_v57 = vmul.f32 %v5662_v46, %v1418_v36  ;;  %v1583_v41 = vmul.f32 %v5666_v47, %v1491_v19  ;;  %v1424_v42 = vpop.f32.mrb[31].mxu0  ;;  %v1497_v44 = vpop.f32.mrb[31].mxu1 }
 0x2d3   : > { %v1862_v48 = vmax.f32 %v1860_v14, %v1861_v51  ;;  %v1888_v50 = vmax.f32 %v1886_v16, %v1887_v21  ;;  %v1582_v37 = vmul.f32 %v5672_v54, %v1420_v15  ;;  %v1584_v52 = vmul.f32 %v5676_v55, %v1493_v18 }
 0x2d4   : > { %v1686_v53 = vadd.f32 %v5683_v63, %v1581_v57  ;;  %v1688_v56 = vadd.f32 %v5699_v24, %v1583_v41  ;;  %v1589_v58 = vmul.f32 %v5662_v46, %v1422_v28  ;;  %v1591_v60 = vmul.f32 %v5666_v47, %v1495_v22 }
 0x2d5   : > { %v1955_v61 = vcombine.low %v1849_v25, %v1862_v48  ;;  %v1956_v62 = vcombine.low %v1875_v40, %v1888_v50  ;;  %v1687_v2 = vadd.f32 %v5703_v38, %v1582_v37  ;;  %v1689_v3 = vadd.f32 %v5710_v49, %v1584_v52 }
 0x2d6   : > { %v1890_v4 = vmax.f32 %v1889_v39, %v1686_v53  ;;  %v1916_v32 = vmax.f32 %v1915_v45, %v1688_v56  ;;  %v1694_v5 = vadd.f32 %v5683_v63, %v1589_v58  ;;  %v1696_v6 = vadd.f32 %v5699_v24, %v1591_v60 }
 0x2d7   : > { %v5741_v9 = vrot.slane %v1955_v61, %v5706_v43  ;;  %v5744_v10 = vrot.slane %v1956_v62, %v5706_v43  ;;  %v1903_v7 = vmax.f32 %v1902_v26, %v1687_v2  ;;  %v1929_v11 = vmax.f32 %v1928_v27, %v1689_v3  ;;  %v1428_v12 = vpop.f32.mrb[32].mxu0  ;;  %v1501_v13 = vpop.f32.mrb[32].mxu1 }
 0x2d8   : > { %v1891_v14 = vmax.f32 %v1890_v4, %v1694_v5  ;;  %v1917_v16 = vmax.f32 %v1916_v32, %v1696_v6  ;;  %v1590_v17 = vmul.f32 %v5672_v54, %v1424_v42  ;;  %v1592_v35 = vmul.f32 %v5676_v55, %v1497_v44  ;;  %v1430_v36 = vpop.f32.mrb[33].mxu0  ;;  %v1503_v19 = vpop.f32.mrb[33].mxu1 }
 0x2d9   : > { %v1987_v20 = vcombine.low %v5741_v9, %v5744_v10  ;;  %v1597_v23 = vmul.f32 %v5662_v46, %v1428_v12  ;;  %v1599_v39 = vmul.f32 %v5666_v47, %v1501_v13  ;;  %v1598_v45 = vmul.f32 %v5672_v54, %v1430_v36  ;;  %v1432_v15 = vpop.f32.mrb[34].mxu0  ;;  %v1505_v18 = vpop.f32.mrb[34].mxu1  ;;  %v4661_v9 = vld [vmem:[%s6421_s10 + $0x208] ss:$16 sps:$4 sm:$0xff]  }
 0x2da   : > { %v1695_v51 = vadd.f32 %v5703_v38, %v1590_v17  ;;  %v1697_v21 = vadd.f32 %v5710_v49, %v1592_v35  ;;  %v1600_v26 = vmul.f32 %v5676_v55, %v1503_v19  ;;  %v1605_v27 = vmul.f32 %v5662_v46, %v1432_v15  ;;  %v1434_v28 = vpop.f32.mrb[35].mxu0  ;;  %v1507_v22 = vpop.f32.mrb[35].mxu1 }
 0x2db   : > { %v1702_v25 = vadd.f32 %v5683_v63, %v1597_v23  ;;  %v1704_v40 = vadd.f32 %v5699_v24, %v1599_v39  ;;  %v1703_v57 = vadd.f32 %v5703_v38, %v1598_v45  ;;  %v1607_v52 = vmul.f32 %v5666_v47, %v1505_v18 }
 0x2dc   : > { %v1904_v41 = vmax.f32 %v1903_v7, %v1695_v51  ;;  %v1930_v42 = vmax.f32 %v1929_v11, %v1697_v21  ;;  %v1705_v44 = vadd.f32 %v5710_v49, %v1600_v26  ;;  %v1710_v48 = vadd.f32 %v5683_v63, %v1605_v27 }
 0x2dd   : > { %v1892_v50 = vmax.f32 %v1891_v14, %v1702_v25  ;;  %v1918_v37 = vmax.f32 %v1917_v16, %v1704_v40  ;;  %v1606_v53 = vmul.f32 %v5672_v54, %v1434_v28  ;;  %v1608_v60 = vmul.f32 %v5676_v55, %v1507_v22 }
 0x2de   : > { %v1905_v56 = vmax.f32 %v1904_v41, %v1703_v57  ;;  %v1931_v58 = vmax.f32 %v1930_v42, %v1705_v44  ;;  %v1712_v62 = vadd.f32 %v5699_v24, %v1607_v52 }
 0x2df   : > { %v1893_v61 = vmax.f32 %v1892_v50, %v1710_v48  ;;  %v1711_v2 = vadd.f32 %v5703_v38, %v1606_v53  ;;  %v1438_v3 = vpop.f32.mrb[36].mxu0  ;;  %v1511_v4 = vpop.f32.mrb[36].mxu1  ;;  %v1713_v32 = vadd.f32 %v5710_v49, %v1608_v60 }
 0x2e0   : > { %v1613_v5 = vmul.f32 %v5662_v46, %v1438_v3  ;;  %v1615_v6 = vmul.f32 %v5666_v47, %v1511_v4  ;;  %v1440_v7 = vpop.f32.mrb[37].mxu0  ;;  %v1513_v11 = vpop.f32.mrb[37].mxu1  ;;  %v1919_v12 = vmax.f32 %v1918_v37, %v1712_v62 }
 0x2e1   : > { %v1906_v13 = vmax.f32 %v1905_v56, %v1711_v2  ;;  %v1614_v14 = vmul.f32 %v5672_v54, %v1440_v7  ;;  %v1616_v16 = vmul.f32 %v5676_v55, %v1513_v11  ;;  %v1442_v17 = vpop.f32.mrb[38].mxu0  ;;  %v1515_v35 = vpop.f32.mrb[38].mxu1  ;;  %v1932_v36 = vmax.f32 %v1931_v58, %v1713_v32 }
 0x2e2   : > { %v1718_v19 = vadd.f32 %v5683_v63, %v1613_v5  ;;  %v1720_v23 = vadd.f32 %v5699_v24, %v1615_v6  ;;  %v1621_v39 = vmul.f32 %v5662_v46, %v1442_v17  ;;  %v1444_v45 = vpop.f32.mrb[39].mxu0  ;;  %v1517_v15 = vpop.f32.mrb[39].mxu1  ;;  %v1623_v21 = vmul.f32 %v5666_v47, %v1515_v35 }
 0x2e3   : > { %v1719_v18 = vadd.f32 %v5703_v38, %v1614_v14  ;;  %v1721_v51 = vadd.f32 %v5710_v49, %v1616_v16  ;;  %v1622_v26 = vmul.f32 %v5672_v54, %v1444_v45  ;;  %v1624_v25 = vmul.f32 %v5676_v55, %v1517_v15 }
 0x2e4   : > { %v1894_v27 = vmax.f32 %v1893_v61, %v1718_v19  ;;  %v1920_v28 = vmax.f32 %v1919_v12, %v1720_v23  ;;  %v1726_v22 = vadd.f32 %v5683_v63, %v1621_v39  ;;  %v1728_v46 = vadd.f32 %v5699_v24, %v1623_v21  ;;  %v4658_v21 = vld [vmem:[%s6421_s10 + $0x200] ss:$16 sps:$4 sm:$0xff]  }
 0x2e5   : > { %v1907_v40 = vmax.f32 %v1906_v13, %v1719_v18  ;;  %v1933_v57 = vmax.f32 %v1932_v36, %v1721_v51  ;;  %v1727_v41 = vadd.f32 %v5703_v38, %v1622_v26  ;;  %v1729_v44 = vadd.f32 %v5710_v49, %v1624_v25  ;;  %v4669_v26 = vld [vmem:[%s6421_s10 + $0x22c] ss:$16 sps:$4 sm:$0xff]   ;;  %v4672_v25 = vld [vmem:[%s6421_s10 + $0x244] ss:$16 sps:$4 sm:$0xff]  }
 0x2e6   : > { %v1895_v42 = vmax.f32 %v1894_v27, %v1726_v22  ;;  %v1921_v48 = vmax.f32 %v1920_v28, %v1728_v46  ;;  %v1995_v19 = vrot.slane %v1987_v20, %v5706_v43  ;;  %v4666_v20 = vld [vmem:[%s6421_s10 + $0x224] ss:$16 sps:$4 sm:$0xff]   ;;  %v4664_v28 = vld [vmem:[%s6421_s10 + $0x220] ss:$16 sps:$4 sm:$0xff]   ;;  %v4667_v22 = vld [vmem:[%s6421_s10 + $0x228] ss:$16 sps:$4 sm:$0xff]  }
 0x2e7   : > { %v1908_v50 = vmax.f32 %v1907_v40, %v1727_v41  ;;  %v1934_v37 = vmax.f32 %v1933_v57, %v1729_v44  ;;  %v4675_v40 = vld [vmem:[%s6421_s10 + $0x24c] ss:$16 sps:$4 sm:$0xff]   ;;  %v4670_v57 = vld [vmem:[%s6421_s10 + $0x240] ss:$16 sps:$4 sm:$0xff]   ;;  %v4673_v46 = vld [vmem:[%s6421_s10 + $0x248] ss:$16 sps:$4 sm:$0xff]  }
 0x2e8   : > { %v1896_v47 = vrot.slane %v1895_v42, 4  ;;  %v1922_v54 = vrot.slane %v1921_v48, 4  ;;  %v4678_v41 = vld [vmem:[%s6421_s10 + $0x264] ss:$16 sps:$4 sm:$0xff]   ;;  %v4676_v44 = vld [vmem:[%s6421_s10 + $0x260] ss:$16 sps:$4 sm:$0xff]  }
 0x2e9   : > { %v1909_v52 = vrot.slane %v1908_v50, 4  ;;  %v1935_v56 = vrot.slane %v1934_v37, 4 }
 0x2ea   : > { %v1897_v53 = vmax.f32 %v1895_v42, %v1896_v47  ;;  %v1923_v63 = vmax.f32 %v1921_v48, %v1922_v54  ;;  %v4681_v42 = vld [vmem:[%s6421_s10 + $0x26c] ss:$16 sps:$4 sm:$0xff]   ;;  %v4679_v48 = vld [vmem:[%s6421_s10 + $0x268] ss:$16 sps:$4 sm:$0xff]  }
 0x2eb   : > { %v1910_v58 = vmax.f32 %v1908_v50, %v1909_v52  ;;  %v1936_v60 = vmax.f32 %v1934_v37, %v1935_v56  ;;  %v4684_v50 = vld [vmem:[%s6421_s10 + $0x284] ss:$16 sps:$4 sm:$0xff]   ;;  %v4687_v47 = vld [vmem:[%s6421_s10 + $0x28c] ss:$16 sps:$4 sm:$0xff]   ;;  %v4682_v37 = vld [vmem:[%s6421_s10 + $0x280] ss:$16 sps:$4 sm:$0xff]  }
 0x2ec   : > { %v1898_v55 = vrot.slane %v1897_v53, 2  ;;  %v1924_v61 = vrot.slane %v1923_v63, 2  ;;  %v4685_v54 = vld [vmem:[%s6421_s10 + $0x288] ss:$16 sps:$4 sm:$0xff]   ;;  %v4690_v52 = vld [vmem:[%s6421_s10 + $0x2a4] ss:$16 sps:$4 sm:$0xff]  }
 0x2ed   : > { %v1911_v62 = vrot.slane %v1910_v58, 2  ;;  %v1937_v2 = vrot.slane %v1936_v60, 2  ;;  %v4688_v56 = vld [vmem:[%s6421_s10 + $0x2a0] ss:$16 sps:$4 sm:$0xff]  }
 0x2ee   : > { %v1899_v24 = vmax.f32 %v1897_v53, %v1898_v55  ;;  %v1925_v38 = vmax.f32 %v1923_v63, %v1924_v61  ;;  %v4693_v53 = vld [vmem:[%s6421_s10 + $0x2ac] ss:$16 sps:$4 sm:$0xff]   ;;  %v4691_v63 = vld [vmem:[%s6421_s10 + $0x2a8] ss:$16 sps:$4 sm:$0xff]  }
 0x2ef   : > { %v1912_v3 = vmax.f32 %v1910_v58, %v1911_v62  ;;  %v1938_v49 = vmax.f32 %v1936_v60, %v1937_v2  ;;  %v4696_v58 = vld [vmem:[%s6421_s10 + $0x2c4] ss:$16 sps:$4 sm:$0xff]   ;;  %v4699_v55 = vld [vmem:[%s6421_s10 + $0x2cc] ss:$16 sps:$4 sm:$0xff]   ;;  %v4694_v60 = vld [vmem:[%s6421_s10 + $0x2c0] ss:$16 sps:$4 sm:$0xff]  }
 0x2f0   : > { %v1900_v4 = vrot.slane %v1899_v24, 1  ;;  %v1926_v32 = vrot.slane %v1925_v38, 1  ;;  %v4697_v61 = vld [vmem:[%s6421_s10 + $0x2c8] ss:$16 sps:$4 sm:$0xff]   ;;  %v4702_v62 = vld [vmem:[%s6421_s10 + $0x2e4] ss:$16 sps:$4 sm:$0xff]  }
 0x2f1   : > { %v1913_v5 = vrot.slane %v1912_v3, 1  ;;  %v1939_v7 = vrot.slane %v1938_v49, 1  ;;  %v4700_v2 = vld [vmem:[%s6421_s10 + $0x2e0] ss:$16 sps:$4 sm:$0xff]  }
 0x2f2   : > { %v1901_v6 = vmax.f32 %v1899_v24, %v1900_v4  ;;  %v1927_v11 = vmax.f32 %v1925_v38, %v1926_v32  ;;  %v4705_v24 = vld [vmem:[%s6421_s10 + $0x2ec] ss:$16 sps:$4 sm:$0xff]   ;;  %v4703_v38 = vld [vmem:[%s6421_s10 + $0x2e8] ss:$16 sps:$4 sm:$0xff]  }
 0x2f3   : > { %v1914_v12 = vmax.f32 %v1912_v3, %v1913_v5  ;;  %v1940_v13 = vmax.f32 %v1938_v49, %v1939_v7  ;;  %v4708_v3 = vld [vmem:[%s6421_s10 + $0x304] ss:$16 sps:$4 sm:$0xff]   ;;  %v4711_v4 = vld [vmem:[%s6421_s10 + $0x30c] ss:$16 sps:$4 sm:$0xff]   ;;  %v4706_v49 = vld [vmem:[%s6421_s10 + $0x300] ss:$16 sps:$4 sm:$0xff]  }
 0x2f4   : > { %v4709_v32 = vld [vmem:[%s6421_s10 + $0x308] ss:$16 sps:$4 sm:$0xff]   ;;  %v4714_v5 = vld [vmem:[%s6421_s10 + $0x324] ss:$16 sps:$4 sm:$0xff]   ;;  %v4712_v7 = vld [vmem:[%s6421_s10 + $0x320] ss:$16 sps:$4 sm:$0xff]  }
 0x2f5   : > { %v1957_v14 = vcombine.low %v1901_v6, %v1914_v12  ;;  %v1958_v16 = vcombine.low %v1927_v11, %v1940_v13  ;;  %v4717_v6 = vld [vmem:[%s6421_s10 + $0x32c] ss:$16 sps:$4 sm:$0xff]   ;;  %v4715_v11 = vld [vmem:[%s6421_s10 + $0x328] ss:$16 sps:$4 sm:$0xff]   ;;  %v4720_v12 = vld [vmem:[%s6421_s10 + $0x344] ss:$16 sps:$4 sm:$0xff]  }
 0x2f6   : > { %v4723_v13 = vld [vmem:[%s6421_s10 + $0x34c] ss:$16 sps:$4 sm:$0xff]  }
 0x2f7   : > { %v1979_v17 = vrot.slane %v1957_v14, %v5706_v43  ;;  %v1986_v35 = vrot.slane %v1958_v16, %v5706_v43  ;;  %v4718_v14 = vld [vmem:[%s6421_s10 + $0x340] ss:$16 sps:$4 sm:$0xff]   ;;  %v4721_v16 = vld [vmem:[%s6421_s10 + $0x348] ss:$16 sps:$4 sm:$0xff]  }
 0x2f9   : > { %v1988_v36 = vcombine.low %v1979_v17, %v1986_v35  ;;  %v4726_v17 = vld [vmem:[%s6421_s10 + $0x364] ss:$16 sps:$4 sm:$0xff]   ;;  %v4729_v35 = vld [vmem:[%s6421_s10 + $0x36c] ss:$16 sps:$4 sm:$0xff]  }
 0x2fb   : > { %v2002_v23 = vrot.slane %v1988_v36, %v5706_v43  ;;  %v4724_v36 = vld [vmem:[%s6421_s10 + $0x360] ss:$16 sps:$4 sm:$0xff]  }
 0x2fd   : > { %v5791_v39 = vcombine.low %v1995_v19, %v2002_v23  ;;  %v4727_v19 = vld [vmem:[%s6421_s10 + $0x368] ss:$16 sps:$4 sm:$0xff]   ;;  %v4732_v23 = vld [vmem:[%s6421_s10 + $0x384] ss:$16 sps:$4 sm:$0xff]  }
 0x2ff   : > { %v2277_v45 = vrot.slane %v5791_v39, %v5556_v33  ;;  %v2273_v15 = vrot.slane %v5791_v39, %v5545_v30  ;;  %v2285_v18 = vrot.slane %v5791_v39, %v5559_v34 }
 0x301   : > { %v2311_v51 = vpack.c.bf16 %v2277_v45, %v2277_v45  ;;  %v2310_v10 = vpack.c.bf16 %v2273_v15, %v2273_v15  ;;  %v2313_v27 = vpack.c.bf16 %v2285_v18, %v2285_v18  ;;  %v4735_v45 = vld [vmem:[%s6421_s10 + $0x38c] ss:$16 sps:$4 sm:$0xff]   ;;  %v4730_v15 = vld [vmem:[%s6421_s10 + $0x380] ss:$16 sps:$4 sm:$0xff]   ;;  %v4733_v18 = vld [vmem:[%s6421_s10 + $0x388] ss:$16 sps:$4 sm:$0xff]  }
 0x303   : > { %3630 = vmatprep.mubr.bf16.mxu0 %v2311_v51  ;;  %3794 = vmatprep.mubr.bf16.mxu1 %v2311_v51  ;;  %v4738_v51 = vld [vmem:[%s6421_s10 + $0x3a4] ss:$16 sps:$4 sm:$0xff]  }
 0x304   : > { %3631 = vmatmul.mubr.bf16.vlgmr.msra.gmra.mrb[40].mxu0 %v2310_v10  ;;  %3795 = vmatmul.mubr.bf16.vlgmr.msra.gmra.mrb[40].mxu1 %v2310_v10  ;;  %v4739_v10 = vld [vmem:[%s6421_s10 + $0x3a8] ss:$16 sps:$4 sm:$0xff]  }
 0x305   : > { %3640 = vmatpush1.bf16.msra.mxu0 %v4658_v21  ;;  %3804 = vmatpush1.bf16.msra.mxu1 %v4661_v9  ;;  %v4741_v21 = vld [vmem:[%s6421_s10 + $0x3ac] ss:$16 sps:$4 sm:$0xff]   ;;  %v4736_v9 = vld [vmem:[%s6421_s10 + $0x3a0] ss:$16 sps:$4 sm:$0xff]  }
 0x306   : > { %3671 = vmatprep.mubr.bf16.mxu0 %v2313_v27  ;;  %3835 = vmatprep.mubr.bf16.mxu1 %v2313_v27  ;;  %v4742_v27 = vld [vmem:[%s6421_s10 + $0x3c0] ss:$16 sps:$4 sm:$0xff]  }
 0x307   : > { %3641 = vmatprep.subr.bf16.mxu0 %v4666_v20  ;;  %3805 = vmatprep.subr.bf16.mxu1 %v4669_v26  ;;  %v4744_v20 = vld [vmem:[%s6421_s10 + $0x3c4] ss:$16 sps:$4 sm:$0xff]   ;;  %v4747_v26 = vld [vmem:[%s6421_s10 + $0x3cc] ss:$16 sps:$4 sm:$0xff]  }
 0x309   : > { %3642 = vmatpush1.bf16.msra.mxu0 %v4664_v28  ;;  %3806 = vmatpush1.bf16.msra.mxu1 %v4667_v22  ;;  %v4745_v28 = vld [vmem:[%s6421_s10 + $0x3c8] ss:$16 sps:$4 sm:$0xff]   ;;  %v4750_v22 = vld [vmem:[%s6421_s10 + $0x3e4] ss:$16 sps:$4 sm:$0xff]  }
 0x30a   : > { %3643 = vmatprep.subr.bf16.mxu0 %v4672_v25  ;;  %3807 = vmatprep.subr.bf16.mxu1 %v4675_v40  ;;  %v4753_v25 = vld [vmem:[%s6421_s10 + $0x3ec] ss:$16 sps:$4 sm:$0xff]   ;;  %v4748_v40 = vld [vmem:[%s6421_s10 + $0x3e0] ss:$16 sps:$4 sm:$0xff]  }
 0x30d   : > { %3644 = vmatpush1.bf16.msra.mxu0 %v4670_v57  ;;  %3808 = vmatpush1.bf16.msra.mxu1 %v4673_v46  ;;  %v4751_v57 = vld [vmem:[%s6421_s10 + $0x3e8] ss:$16 sps:$4 sm:$0xff]   ;;  %v2281_v46 = vrot.slane %v5791_v39, %v5548_v31 }
 0x30e   : > { %3645 = vmatprep.subr.bf16.mxu0 %v4678_v41  ;;  %3809 = vmatprep.subr.bf16.mxu1 %v4681_v42  ;;  %v4756_v41 = vld [vmem:[%s6421_s10 + $0x404] ss:$16 sps:$4 sm:$0xff]   ;;  %v4759_v42 = vld [vmem:[%s6421_s10 + $0x40c] ss:$16 sps:$4 sm:$0xff]  }
 0x311   : > { %3646 = vmatpush1.bf16.msra.mxu0 %v4676_v44  ;;  %3810 = vmatpush1.bf16.msra.mxu1 %v4679_v48  ;;  %v2293_v44 = vrot.slane %v5791_v39, %v5639_v1  ;;  %v4754_v48 = vld [vmem:[%s6421_s10 + $0x400] ss:$16 sps:$4 sm:$0xff]   ;;  %v4765_v1 = vld [vmem:[%s6421_s10 + $0x42c] ss:$16 sps:$4 sm:$0xff]  }
 0x312   : > { %3647 = vmatprep.subr.bf16.mxu0 %v4684_v50  ;;  %3811 = vmatprep.subr.bf16.mxu1 %v4687_v47  ;;  %v2312_v50 = vpack.c.bf16 %v2281_v46, %v2281_v46  ;;  %v4757_v47 = vld [vmem:[%s6421_s10 + $0x408] ss:$16 sps:$4 sm:$0xff]   ;;  %v4826_v46 = vld [vmem:[%s6421_s10 + $0x580] ss:$16 sps:$4 sm:$0xff]  }
 0x315   : > { %3648 = vmatpush1.bf16.msra.mxu0 %v4682_v37  ;;  %3812 = vmatpush1.bf16.msra.mxu1 %v4685_v54  ;;  %v2315_v37 = vpack.c.bf16 %v2293_v44, %v2293_v44  ;;  %v4762_v54 = vld [vmem:[%s6421_s10 + $0x424] ss:$16 sps:$4 sm:$0xff]   ;;  %v4837_v44 = vld [vmem:[%s6421_s10 + $0x5ac] ss:$16 sps:$4 sm:$0xff]  }
 0x316   : > { %3649 = vmatprep.subr.bf16.mxu0 %v4690_v52  ;;  %3813 = vmatprep.subr.bf16.mxu1 %v4693_v53  ;;  %v4760_v52 = vld [vmem:[%s6421_s10 + $0x420] ss:$16 sps:$4 sm:$0xff]   ;;  %v4763_v53 = vld [vmem:[%s6421_s10 + $0x428] ss:$16 sps:$4 sm:$0xff]  }
 0x319   : > { %3650 = vmatpush1.bf16.msra.mxu0 %v4688_v56  ;;  %3814 = vmatpush1.bf16.msra.mxu1 %v4691_v63  ;;  %v4768_v56 = vld [vmem:[%s6421_s10 + $0x444] ss:$16 sps:$4 sm:$0xff]   ;;  %v4771_v63 = vld [vmem:[%s6421_s10 + $0x44c] ss:$16 sps:$4 sm:$0xff]  }
 0x31a   : > { %3651 = vmatprep.subr.bf16.mxu0 %v4696_v58  ;;  %3815 = vmatprep.subr.bf16.mxu1 %v4699_v55  ;;  %v4766_v58 = vld [vmem:[%s6421_s10 + $0x440] ss:$16 sps:$4 sm:$0xff]   ;;  %v4769_v55 = vld [vmem:[%s6421_s10 + $0x448] ss:$16 sps:$4 sm:$0xff]  }
 0x31d   : > { %3652 = vmatpush1.bf16.msra.mxu0 %v4694_v60  ;;  %3816 = vmatpush1.bf16.msra.mxu1 %v4697_v61  ;;  %v4774_v60 = vld [vmem:[%s6421_s10 + $0x464] ss:$16 sps:$4 sm:$0xff]   ;;  %v4777_v61 = vld [vmem:[%s6421_s10 + $0x46c] ss:$16 sps:$4 sm:$0xff]  }
 0x31e   : > { %3653 = vmatprep.subr.bf16.mxu0 %v4702_v62  ;;  %3817 = vmatprep.subr.bf16.mxu1 %v4705_v24  ;;  %v4772_v62 = vld [vmem:[%s6421_s10 + $0x460] ss:$16 sps:$4 sm:$0xff]   ;;  %v4775_v24 = vld [vmem:[%s6421_s10 + $0x468] ss:$16 sps:$4 sm:$0xff]  }
 0x321   : > { %3654 = vmatpush1.bf16.msra.mxu0 %v4700_v2  ;;  %3818 = vmatpush1.bf16.msra.mxu1 %v4703_v38  ;;  %v4780_v2 = vld [vmem:[%s6421_s10 + $0x484] ss:$16 sps:$4 sm:$0xff]   ;;  %v4783_v38 = vld [vmem:[%s6421_s10 + $0x48c] ss:$16 sps:$4 sm:$0xff]  }
 0x322   : > { %3655 = vmatprep.subr.bf16.mxu0 %v4708_v3  ;;  %3819 = vmatprep.subr.bf16.mxu1 %v4711_v4  ;;  %v4778_v3 = vld [vmem:[%s6421_s10 + $0x480] ss:$16 sps:$4 sm:$0xff]   ;;  %v4781_v4 = vld [vmem:[%s6421_s10 + $0x488] ss:$16 sps:$4 sm:$0xff]  }
 0x325   : > { %3656 = vmatpush1.bf16.msra.mxu0 %v4706_v49  ;;  %3820 = vmatpush1.bf16.msra.mxu1 %v4709_v32  ;;  %v4786_v49 = vld [vmem:[%s6421_s10 + $0x4a4] ss:$16 sps:$4 sm:$0xff]   ;;  %v4789_v32 = vld [vmem:[%s6421_s10 + $0x4ac] ss:$16 sps:$4 sm:$0xff]  }
 0x326   : > { %3657 = vmatprep.subr.bf16.mxu0 %v4714_v5  ;;  %3821 = vmatprep.subr.bf16.mxu1 %v4717_v6  ;;  %v4784_v5 = vld [vmem:[%s6421_s10 + $0x4a0] ss:$16 sps:$4 sm:$0xff]   ;;  %v4787_v6 = vld [vmem:[%s6421_s10 + $0x4a8] ss:$16 sps:$4 sm:$0xff]  }
 0x329   : > { %3658 = vmatpush1.bf16.msra.mxu0 %v4712_v7  ;;  %3822 = vmatpush1.bf16.msra.mxu1 %v4715_v11  ;;  %v4792_v7 = vld [vmem:[%s6421_s10 + $0x4c4] ss:$16 sps:$4 sm:$0xff]   ;;  %v4795_v11 = vld [vmem:[%s6421_s10 + $0x4cc] ss:$16 sps:$4 sm:$0xff]  }
 0x32a   : > { %3659 = vmatprep.subr.bf16.mxu0 %v4720_v12  ;;  %3823 = vmatprep.subr.bf16.mxu1 %v4723_v13  ;;  %v4790_v12 = vld [vmem:[%s6421_s10 + $0x4c0] ss:$16 sps:$4 sm:$0xff]   ;;  %v4793_v13 = vld [vmem:[%s6421_s10 + $0x4c8] ss:$16 sps:$4 sm:$0xff]  }
 0x32d   : > { %3660 = vmatpush1.bf16.msra.mxu0 %v4718_v14  ;;  %3824 = vmatpush1.bf16.msra.mxu1 %v4721_v16  ;;  %v4798_v14 = vld [vmem:[%s6421_s10 + $0x4e4] ss:$16 sps:$4 sm:$0xff]   ;;  %v4801_v16 = vld [vmem:[%s6421_s10 + $0x4ec] ss:$16 sps:$4 sm:$0xff]  }
 0x32e   : > { %3661 = vmatprep.subr.bf16.mxu0 %v4726_v17  ;;  %3825 = vmatprep.subr.bf16.mxu1 %v4729_v35  ;;  %v4796_v17 = vld [vmem:[%s6421_s10 + $0x4e0] ss:$16 sps:$4 sm:$0xff]   ;;  %v4799_v35 = vld [vmem:[%s6421_s10 + $0x4e8] ss:$16 sps:$4 sm:$0xff]  }
 0x331   : > { %3662 = vmatpush1.bf16.msra.mxu0 %v4724_v36  ;;  %3826 = vmatpush1.bf16.msra.mxu1 %v4727_v19  ;;  %v4804_v36 = vld [vmem:[%s6421_s10 + $0x504] ss:$16 sps:$4 sm:$0xff]   ;;  %v4807_v19 = vld [vmem:[%s6421_s10 + $0x50c] ss:$16 sps:$4 sm:$0xff]  }
 0x332   : > { %3663 = vmatprep.subr.bf16.mxu0 %v4732_v23  ;;  %3827 = vmatprep.subr.bf16.mxu1 %v4735_v45  ;;  %v4802_v23 = vld [vmem:[%s6421_s10 + $0x500] ss:$16 sps:$4 sm:$0xff]   ;;  %v4805_v45 = vld [vmem:[%s6421_s10 + $0x508] ss:$16 sps:$4 sm:$0xff]  }
 0x335   : > { %3664 = vmatpush1.bf16.msra.mxu0 %v4730_v15  ;;  %3828 = vmatpush1.bf16.msra.mxu1 %v4733_v18  ;;  %v4810_v15 = vld [vmem:[%s6421_s10 + $0x524] ss:$16 sps:$4 sm:$0xff]   ;;  %v4813_v18 = vld [vmem:[%s6421_s10 + $0x52c] ss:$16 sps:$4 sm:$0xff]  }
 0x336   : > { %3665 = vmatprep.subr.bf16.mxu0 %v4738_v51  ;;  %3829 = vmatprep.subr.bf16.mxu1 %v4741_v21  ;;  %v4808_v51 = vld [vmem:[%s6421_s10 + $0x520] ss:$16 sps:$4 sm:$0xff]   ;;  %v4811_v21 = vld [vmem:[%s6421_s10 + $0x528] ss:$16 sps:$4 sm:$0xff]  }
 0x339   : > { %3666 = vmatpush1.bf16.msra.mxu0 %v4736_v9  ;;  %3830 = vmatpush1.bf16.msra.mxu1 %v4739_v10  ;;  %v4816_v9 = vld [vmem:[%s6421_s10 + $0x544] ss:$16 sps:$4 sm:$0xff]   ;;  %v4819_v10 = vld [vmem:[%s6421_s10 + $0x54c] ss:$16 sps:$4 sm:$0xff]  }
 0x33a   : > { %3667 = vmatprep.subr.bf16.mxu0 %v4744_v20  ;;  %3831 = vmatprep.subr.bf16.mxu1 %v4747_v26  ;;  %v4814_v20 = vld [vmem:[%s6421_s10 + $0x540] ss:$16 sps:$4 sm:$0xff]   ;;  %v4817_v26 = vld [vmem:[%s6421_s10 + $0x548] ss:$16 sps:$4 sm:$0xff]  }
 0x33d   : > { %3668 = vmatpush1.bf16.msra.mxu0 %v4742_v27  ;;  %3832 = vmatpush1.bf16.msra.mxu1 %v4745_v28  ;;  %v4822_v27 = vld [vmem:[%s6421_s10 + $0x564] ss:$16 sps:$4 sm:$0xff]   ;;  %v4825_v28 = vld [vmem:[%s6421_s10 + $0x56c] ss:$16 sps:$4 sm:$0xff]  }
 0x33e   : > { %3669 = vmatprep.subr.bf16.mxu0 %v4750_v22  ;;  %3833 = vmatprep.subr.bf16.mxu1 %v4753_v25  ;;  %v4820_v22 = vld [vmem:[%s6421_s10 + $0x560] ss:$16 sps:$4 sm:$0xff]   ;;  %v4823_v25 = vld [vmem:[%s6421_s10 + $0x568] ss:$16 sps:$4 sm:$0xff]  }
 0x341   : > { %3670 = vmatpush1.bf16.msra.mxu0 %v4748_v40  ;;  %3834 = vmatpush1.bf16.msra.mxu1 %v4751_v57  ;;  %v4828_v40 = vld [vmem:[%s6421_s10 + $0x584] ss:$16 sps:$4 sm:$0xff]   ;;  %v4831_v57 = vld [vmem:[%s6421_s10 + $0x58c] ss:$16 sps:$4 sm:$0xff]  }
 0x342   : > { %3680 = vmatprep.subr.bf16.mxu0 %v4756_v41  ;;  %3844 = vmatprep.subr.bf16.mxu1 %v4759_v42  ;;  %v4829_v41 = vld [vmem:[%s6421_s10 + $0x588] ss:$16 sps:$4 sm:$0xff]   ;;  %v4834_v42 = vld [vmem:[%s6421_s10 + $0x5a4] ss:$16 sps:$4 sm:$0xff]  }
 0x344   : > { %3672 = vmatmul.mubr.bf16.vlgmr.msra.gmra.mrb[40].mxu0 %v2312_v50  ;;  %3836 = vmatmul.mubr.bf16.vlgmr.msra.gmra.mrb[40].mxu1 %v2312_v50  ;;  %v4835_v50 = vld [vmem:[%s6421_s10 + $0x5a8] ss:$16 sps:$4 sm:$0xff]  }
 0x345   : > { %3681 = vmatpush1.bf16.msra.mxu0 %v4754_v48  ;;  %3712 = vmatprep.mubr.bf16.mxu0 %v2315_v37  ;;  %v4832_v48 = vld [vmem:[%s6421_s10 + $0x5a0] ss:$16 sps:$4 sm:$0xff]  }
 0x346   : > { %3845 = vmatpush1.bf16.msra.mxu1 %v4757_v47  ;;  %3876 = vmatprep.mubr.bf16.mxu1 %v2315_v37  ;;  %v4840_v47 = vld [vmem:[%s6421_s10 + $0x5c4] ss:$16 sps:$4 sm:$0xff]   ;;  %v4843_v37 = vld [vmem:[%s6421_s10 + $0x5cc] ss:$16 sps:$4 sm:$0xff]  }
 0x347   : > { %3682 = vmatprep.subr.bf16.mxu0 %v4762_v54  ;;  %3846 = vmatprep.subr.bf16.mxu1 %v4765_v1  ;;  %v4838_v54 = vld [vmem:[%s6421_s10 + $0x5c0] ss:$16 sps:$4 sm:$0xff]   ;;  %v4841_v1 = vld [vmem:[%s6421_s10 + $0x5c8] ss:$16 sps:$4 sm:$0xff]  }
 0x349   : > { %3683 = vmatpush1.bf16.msra.mxu0 %v4760_v52  ;;  %v4846_v52 = vld [vmem:[%s6421_s10 + $0x5e4] ss:$16 sps:$4 sm:$0xff]  }
 0x34a   : > { %3847 = vmatpush1.bf16.msra.mxu1 %v4763_v53  ;;  %3684 = vmatprep.subr.bf16.mxu0 %v4768_v56  ;;  %v4849_v53 = vld [vmem:[%s6421_s10 + $0x5ec] ss:$16 sps:$4 sm:$0xff]   ;;  %v4844_v56 = vld [vmem:[%s6421_s10 + $0x5e0] ss:$16 sps:$4 sm:$0xff]  }
 0x34b   : > { %3848 = vmatprep.subr.bf16.mxu1 %v4771_v63  ;;  %v4847_v63 = vld [vmem:[%s6421_s10 + $0x5e8] ss:$16 sps:$4 sm:$0xff]  }
 0x34d   : > { %3685 = vmatpush1.bf16.msra.mxu0 %v4766_v58  ;;  %v2289_v58 = vrot.slane %v5791_v39, %v5631_v59  ;;  %v4853_v59 = vld [vmem:[%s6421_s10 + $0x608] ss:$16 sps:$4 sm:$0xff]  }
 0x34e   : > { %3849 = vmatpush1.bf16.msra.mxu1 %v4769_v55  ;;  %3686 = vmatprep.subr.bf16.mxu0 %v4774_v60  ;;  %v4852_v55 = vld [vmem:[%s6421_s10 + $0x604] ss:$16 sps:$4 sm:$0xff]   ;;  %v4855_v60 = vld [vmem:[%s6421_s10 + $0x60c] ss:$16 sps:$4 sm:$0xff]  }
 0x34f   : > { %3850 = vmatprep.subr.bf16.mxu1 %v4777_v61  ;;  %v2301_v61 = vrot.slane %v5791_v39, %v5646_v8  ;;  %v4861_v8 = vld [vmem:[%s6421_s10 + $0x62c] ss:$16 sps:$4 sm:$0xff]  }
 0x351   : > { %3687 = vmatpush1.bf16.msra.mxu0 %v4772_v62  ;;  %v4850_v62 = vld [vmem:[%s6421_s10 + $0x600] ss:$16 sps:$4 sm:$0xff]  }
 0x352   : > { %3851 = vmatpush1.bf16.msra.mxu1 %v4775_v24  ;;  %3688 = vmatprep.subr.bf16.mxu0 %v4780_v2  ;;  %v2314_v24 = vpack.c.bf16 %v2289_v58, %v2289_v58  ;;  %v4858_v2 = vld [vmem:[%s6421_s10 + $0x624] ss:$16 sps:$4 sm:$0xff]  }
 0x353   : > { %3852 = vmatprep.subr.bf16.mxu1 %v4783_v38  ;;  %v2317_v38 = vpack.c.bf16 %v2301_v61, %v2301_v61  ;;  %v4930_v58 = vld [vmem:[%s6421_s10 + $0x7a4] ss:$16 sps:$4 sm:$0xff]   ;;  %v4931_v61 = vld [vmem:[%s6421_s10 + $0x7a8] ss:$16 sps:$4 sm:$0xff]  }
 0x355   : > { %3689 = vmatpush1.bf16.msra.mxu0 %v4778_v3  ;;  %v4856_v3 = vld [vmem:[%s6421_s10 + $0x620] ss:$16 sps:$4 sm:$0xff]  }
 0x356   : > { %3853 = vmatpush1.bf16.msra.mxu1 %v4781_v4  ;;  %3690 = vmatprep.subr.bf16.mxu0 %v4786_v49  ;;  %v4859_v4 = vld [vmem:[%s6421_s10 + $0x628] ss:$16 sps:$4 sm:$0xff]   ;;  %v4864_v49 = vld [vmem:[%s6421_s10 + $0x644] ss:$16 sps:$4 sm:$0xff]  }
 0x357   : > { %3854 = vmatprep.subr.bf16.mxu1 %v4789_v32  ;;  %v4867_v32 = vld [vmem:[%s6421_s10 + $0x64c] ss:$16 sps:$4 sm:$0xff]  }
 0x359   : > { %3691 = vmatpush1.bf16.msra.mxu0 %v4784_v5  ;;  %v4862_v5 = vld [vmem:[%s6421_s10 + $0x640] ss:$16 sps:$4 sm:$0xff]  }
 0x35a   : > { %3855 = vmatpush1.bf16.msra.mxu1 %v4787_v6  ;;  %3692 = vmatprep.subr.bf16.mxu0 %v4792_v7  ;;  %v4865_v6 = vld [vmem:[%s6421_s10 + $0x648] ss:$16 sps:$4 sm:$0xff]   ;;  %v4870_v7 = vld [vmem:[%s6421_s10 + $0x664] ss:$16 sps:$4 sm:$0xff]  }
 0x35b   : > { %3856 = vmatprep.subr.bf16.mxu1 %v4795_v11  ;;  %v4873_v11 = vld [vmem:[%s6421_s10 + $0x66c] ss:$16 sps:$4 sm:$0xff]  }
 0x35d   : > { %3693 = vmatpush1.bf16.msra.mxu0 %v4790_v12  ;;  %v4868_v12 = vld [vmem:[%s6421_s10 + $0x660] ss:$16 sps:$4 sm:$0xff]  }
 0x35e   : > { %3857 = vmatpush1.bf16.msra.mxu1 %v4793_v13  ;;  %3694 = vmatprep.subr.bf16.mxu0 %v4798_v14  ;;  %v4871_v13 = vld [vmem:[%s6421_s10 + $0x668] ss:$16 sps:$4 sm:$0xff]   ;;  %v4876_v14 = vld [vmem:[%s6421_s10 + $0x684] ss:$16 sps:$4 sm:$0xff]  }
 0x35f   : > { %3858 = vmatprep.subr.bf16.mxu1 %v4801_v16  ;;  %v4879_v16 = vld [vmem:[%s6421_s10 + $0x68c] ss:$16 sps:$4 sm:$0xff]  }
 0x361   : > { %3695 = vmatpush1.bf16.msra.mxu0 %v4796_v17  ;;  %v4874_v17 = vld [vmem:[%s6421_s10 + $0x680] ss:$16 sps:$4 sm:$0xff]  }
 0x362   : > { %3859 = vmatpush1.bf16.msra.mxu1 %v4799_v35  ;;  %3696 = vmatprep.subr.bf16.mxu0 %v4804_v36  ;;  %v4877_v35 = vld [vmem:[%s6421_s10 + $0x688] ss:$16 sps:$4 sm:$0xff]   ;;  %v4882_v36 = vld [vmem:[%s6421_s10 + $0x6a4] ss:$16 sps:$4 sm:$0xff]  }
 0x363   : > { %3860 = vmatprep.subr.bf16.mxu1 %v4807_v19  ;;  %v4885_v19 = vld [vmem:[%s6421_s10 + $0x6ac] ss:$16 sps:$4 sm:$0xff]  }
 0x365   : > { %3697 = vmatpush1.bf16.msra.mxu0 %v4802_v23  ;;  %v4880_v23 = vld [vmem:[%s6421_s10 + $0x6a0] ss:$16 sps:$4 sm:$0xff]  }
 0x366   : > { %3861 = vmatpush1.bf16.msra.mxu1 %v4805_v45  ;;  %3698 = vmatprep.subr.bf16.mxu0 %v4810_v15  ;;  %v4883_v45 = vld [vmem:[%s6421_s10 + $0x6a8] ss:$16 sps:$4 sm:$0xff]   ;;  %v4888_v15 = vld [vmem:[%s6421_s10 + $0x6c4] ss:$16 sps:$4 sm:$0xff]  }
 0x367   : > { %3862 = vmatprep.subr.bf16.mxu1 %v4813_v18  ;;  %v4891_v18 = vld [vmem:[%s6421_s10 + $0x6cc] ss:$16 sps:$4 sm:$0xff]  }
 0x369   : > { %3699 = vmatpush1.bf16.msra.mxu0 %v4808_v51  ;;  %v4886_v51 = vld [vmem:[%s6421_s10 + $0x6c0] ss:$16 sps:$4 sm:$0xff]  }
 0x36a   : > { %3863 = vmatpush1.bf16.msra.mxu1 %v4811_v21  ;;  %3700 = vmatprep.subr.bf16.mxu0 %v4816_v9  ;;  %v4889_v21 = vld [vmem:[%s6421_s10 + $0x6c8] ss:$16 sps:$4 sm:$0xff]   ;;  %v4894_v9 = vld [vmem:[%s6421_s10 + $0x6e4] ss:$16 sps:$4 sm:$0xff]  }
 0x36b   : > { %3864 = vmatprep.subr.bf16.mxu1 %v4819_v10  ;;  %v4897_v10 = vld [vmem:[%s6421_s10 + $0x6ec] ss:$16 sps:$4 sm:$0xff]  }
 0x36d   : > { %3701 = vmatpush1.bf16.msra.mxu0 %v4814_v20  ;;  %v4892_v20 = vld [vmem:[%s6421_s10 + $0x6e0] ss:$16 sps:$4 sm:$0xff]  }
 0x36e   : > { %3865 = vmatpush1.bf16.msra.mxu1 %v4817_v26  ;;  %3702 = vmatprep.subr.bf16.mxu0 %v4822_v27  ;;  %v4895_v26 = vld [vmem:[%s6421_s10 + $0x6e8] ss:$16 sps:$4 sm:$0xff]   ;;  %v4900_v27 = vld [vmem:[%s6421_s10 + $0x704] ss:$16 sps:$4 sm:$0xff]  }
 0x36f   : > { %3866 = vmatprep.subr.bf16.mxu1 %v4825_v28  ;;  %v4903_v28 = vld [vmem:[%s6421_s10 + $0x70c] ss:$16 sps:$4 sm:$0xff]  }
 0x371   : > { %3703 = vmatpush1.bf16.msra.mxu0 %v4820_v22  ;;  %v4898_v22 = vld [vmem:[%s6421_s10 + $0x700] ss:$16 sps:$4 sm:$0xff]  }
 0x372   : > { %3867 = vmatpush1.bf16.msra.mxu1 %v4823_v25  ;;  %3704 = vmatprep.subr.bf16.mxu0 %v4828_v40  ;;  %v4901_v25 = vld [vmem:[%s6421_s10 + $0x708] ss:$16 sps:$4 sm:$0xff]   ;;  %v4906_v40 = vld [vmem:[%s6421_s10 + $0x724] ss:$16 sps:$4 sm:$0xff]  }
 0x373   : > { %3868 = vmatprep.subr.bf16.mxu1 %v4831_v57  ;;  %v4909_v57 = vld [vmem:[%s6421_s10 + $0x72c] ss:$16 sps:$4 sm:$0xff]  }
 0x375   : > { %3705 = vmatpush1.bf16.msra.mxu0 %v4826_v46  ;;  %v4904_v46 = vld [vmem:[%s6421_s10 + $0x720] ss:$16 sps:$4 sm:$0xff]  }
 0x376   : > { %3869 = vmatpush1.bf16.msra.mxu1 %v4829_v41  ;;  %3706 = vmatprep.subr.bf16.mxu0 %v4834_v42  ;;  %v4907_v41 = vld [vmem:[%s6421_s10 + $0x728] ss:$16 sps:$4 sm:$0xff]   ;;  %v4912_v42 = vld [vmem:[%s6421_s10 + $0x744] ss:$16 sps:$4 sm:$0xff]  }
 0x377   : > { %3870 = vmatprep.subr.bf16.mxu1 %v4837_v44  ;;  %v4915_v44 = vld [vmem:[%s6421_s10 + $0x74c] ss:$16 sps:$4 sm:$0xff]  }
 0x379   : > { %3707 = vmatpush1.bf16.msra.mxu0 %v4832_v48  ;;  %v4910_v48 = vld [vmem:[%s6421_s10 + $0x740] ss:$16 sps:$4 sm:$0xff]  }
 0x37a   : > { %3871 = vmatpush1.bf16.msra.mxu1 %v4835_v50  ;;  %3708 = vmatprep.subr.bf16.mxu0 %v4840_v47  ;;  %v4913_v50 = vld [vmem:[%s6421_s10 + $0x748] ss:$16 sps:$4 sm:$0xff]   ;;  %v4918_v47 = vld [vmem:[%s6421_s10 + $0x764] ss:$16 sps:$4 sm:$0xff]  }
 0x37b   : > { %3872 = vmatprep.subr.bf16.mxu1 %v4843_v37  ;;  %v4921_v37 = vld [vmem:[%s6421_s10 + $0x76c] ss:$16 sps:$4 sm:$0xff]  }
 0x37d   : > { %3709 = vmatpush1.bf16.msra.mxu0 %v4838_v54  ;;  %v4916_v54 = vld [vmem:[%s6421_s10 + $0x760] ss:$16 sps:$4 sm:$0xff]  }
 0x37e   : > { %3873 = vmatpush1.bf16.msra.mxu1 %v4841_v1  ;;  %3710 = vmatprep.subr.bf16.mxu0 %v4846_v52  ;;  %v4919_v1 = vld [vmem:[%s6421_s10 + $0x768] ss:$16 sps:$4 sm:$0xff]   ;;  %v4924_v52 = vld [vmem:[%s6421_s10 + $0x784] ss:$16 sps:$4 sm:$0xff]  }
 0x37f   : > { %3874 = vmatprep.subr.bf16.mxu1 %v4849_v53  ;;  %v4927_v53 = vld [vmem:[%s6421_s10 + $0x78c] ss:$16 sps:$4 sm:$0xff]  }
 0x381   : > { %3711 = vmatpush1.bf16.msra.mxu0 %v4844_v56  ;;  %v4922_v56 = vld [vmem:[%s6421_s10 + $0x780] ss:$16 sps:$4 sm:$0xff]  }
 0x382   : > { %3875 = vmatpush1.bf16.msra.mxu1 %v4847_v63  ;;  %3721 = vmatprep.subr.bf16.mxu0 %v4852_v55  ;;  %v4925_v63 = vld [vmem:[%s6421_s10 + $0x788] ss:$16 sps:$4 sm:$0xff]   ;;  %v4933_v55 = vld [vmem:[%s6421_s10 + $0x7ac] ss:$16 sps:$4 sm:$0xff]  }
 0x383   : > { %3885 = vmatprep.subr.bf16.mxu1 %v4855_v60  ;;  %v4928_v60 = vld [vmem:[%s6421_s10 + $0x7a0] ss:$16 sps:$4 sm:$0xff]  }
 0x384   : > { %3713 = vmatmul.mubr.bf16.vlgmr.msra.gmra.mrb[40].mxu0 %v2314_v24 }
 0x385   : > { %3877 = vmatmul.mubr.bf16.vlgmr.msra.gmra.mrb[40].mxu1 %v2314_v24  ;;  %3722 = vmatpush1.bf16.msra.mxu0 %v4850_v62  ;;  %v4936_v62 = vld [vmem:[%s6421_s10 + $0x7c4] ss:$16 sps:$4 sm:$0xff]   ;;  %v4939_v24 = vld [vmem:[%s6421_s10 + $0x7cc] ss:$16 sps:$4 sm:$0xff]  }
 0x386   : > { %3753 = vmatprep.mubr.bf16.mxu0 %v2317_v38  ;;  %3886 = vmatpush1.bf16.msra.mxu1 %v4853_v59  ;;  %v4934_v59 = vld [vmem:[%s6421_s10 + $0x7c0] ss:$16 sps:$4 sm:$0xff]  }
 0x387   : > { %3917 = vmatprep.mubr.bf16.mxu1 %v2317_v38  ;;  %3723 = vmatprep.subr.bf16.mxu0 %v4858_v2  ;;  %v4937_v2 = vld [vmem:[%s6421_s10 + $0x7c8] ss:$16 sps:$4 sm:$0xff]   ;;  %v4942_v38 = vld [vmem:[%s6421_s10 + $0x7e4] ss:$16 sps:$4 sm:$0xff]  }
 0x388   : > { %3887 = vmatprep.subr.bf16.mxu1 %v4861_v8  ;;  %v4945_v8 = vld [vmem:[%s6421_s10 + $0x7ec] ss:$16 sps:$4 sm:$0xff]  }
 0x389   : > { %3724 = vmatpush1.bf16.msra.mxu0 %v4856_v3  ;;  %v4940_v3 = vld [vmem:[%s6421_s10 + $0x7e0] ss:$16 sps:$4 sm:$0xff]  }
 0x38a   : > { %3888 = vmatpush1.bf16.msra.mxu1 %v4859_v4  ;;  %3725 = vmatprep.subr.bf16.mxu0 %v4864_v49  ;;  %v4943_v4 = vld [vmem:[%s6421_s10 + $0x7e8] ss:$16 sps:$4 sm:$0xff]   ;;  %v2297_v49 = vrot.slane %v5791_v39, %v5636_v0 }
 0x38b   : > { %3889 = vmatprep.subr.bf16.mxu1 %v4867_v32 }
 0x38c   : > { %v2316_v32 = vpack.c.bf16 %v2297_v49, %v2297_v49 }
 0x38d   : > { %3726 = vmatpush1.bf16.msra.mxu0 %v4862_v5  ;;  %v2267_v5 = vld [vmem:[%s6422_s11] sm:$0xf] }
 0x38e   : > { %3890 = vmatpush1.bf16.msra.mxu1 %v4865_v6  ;;  %3727 = vmatprep.subr.bf16.mxu0 %v4870_v7  ;;  %v2268_v6 = vld [vmem:[%s6423_s12] sm:$0xf]  ;;  %v3930_v7 = vrot.slane %v2267_v5, %v5545_v30  ;;  %v3934_v0 = vrot.slane %v2267_v5, %v5556_v33 }
 0x38f   : > { %3891 = vmatprep.subr.bf16.mxu1 %v4873_v11  ;;  %v3938_v11 = vrot.slane %v2267_v5, %v5548_v31  ;;  %v3955_v39 = vrot.slane %v2268_v6, %v5545_v30 }
 0x391   : > { %3728 = vmatpush1.bf16.msra.mxu0 %v4868_v12  ;;  %v3942_v12 = vrot.slane %v2267_v5, %v5559_v34 }
 0x392   : > { %3892 = vmatpush1.bf16.msra.mxu1 %v4871_v13  ;;  %3729 = vmatprep.subr.bf16.mxu0 %v4876_v14  ;;  %v3963_v14 = vrot.slane %v2268_v6, %v5548_v31 }
 0x393   : > { %3893 = vmatprep.subr.bf16.mxu1 %v4879_v16  ;;  %v3959_v16 = vrot.slane %v2268_v6, %v5556_v33 }
 0x395   : > { %3730 = vmatpush1.bf16.msra.mxu0 %v4874_v17 }
 0x396   : > { %3894 = vmatpush1.bf16.msra.mxu1 %v4877_v35  ;;  %3731 = vmatprep.subr.bf16.mxu0 %v4882_v36 }
 0x397   : > { %3895 = vmatprep.subr.bf16.mxu1 %v4885_v19  ;;  %v3967_v19 = vrot.slane %v2268_v6, %v5559_v34 }
 0x399   : > { %3732 = vmatpush1.bf16.msra.mxu0 %v4880_v23 }
 0x39a   : > { %3896 = vmatpush1.bf16.msra.mxu1 %v4883_v45  ;;  %3733 = vmatprep.subr.bf16.mxu0 %v4888_v15 }
 0x39b   : > { %3897 = vmatprep.subr.bf16.mxu1 %v4891_v18 }
 0x39d   : > { %3734 = vmatpush1.bf16.msra.mxu0 %v4886_v51 }
 0x39e   : > { %3898 = vmatpush1.bf16.msra.mxu1 %v4889_v21  ;;  %3735 = vmatprep.subr.bf16.mxu0 %v4894_v9 }
 0x39f   : > { %3899 = vmatprep.subr.bf16.mxu1 %v4897_v10 }
 0x3a1   : > { %3736 = vmatpush1.bf16.msra.mxu0 %v4892_v20 }
 0x3a2   : > { %3900 = vmatpush1.bf16.msra.mxu1 %v4895_v26  ;;  %3737 = vmatprep.subr.bf16.mxu0 %v4900_v27 }
 0x3a3   : > { %3901 = vmatprep.subr.bf16.mxu1 %v4903_v28 }
 0x3a5   : > { %3738 = vmatpush1.bf16.msra.mxu0 %v4898_v22 }
 0x3a6   : > { %3902 = vmatpush1.bf16.msra.mxu1 %v4901_v25  ;;  %3739 = vmatprep.subr.bf16.mxu0 %v4906_v40 }
 0x3a7   : > { %3903 = vmatprep.subr.bf16.mxu1 %v4909_v57 }
 0x3a9   : > { %3740 = vmatpush1.bf16.msra.mxu0 %v4904_v46 }
 0x3aa   : > { %3904 = vmatpush1.bf16.msra.mxu1 %v4907_v41  ;;  %3741 = vmatprep.subr.bf16.mxu0 %v4912_v42 }
 0x3ab   : > { %3905 = vmatprep.subr.bf16.mxu1 %v4915_v44 }
 0x3ad   : > { %3742 = vmatpush1.bf16.msra.mxu0 %v4910_v48 }
 0x3ae   : > { %3906 = vmatpush1.bf16.msra.mxu1 %v4913_v50  ;;  %3743 = vmatprep.subr.bf16.mxu0 %v4918_v47 }
 0x3af   : > { %3907 = vmatprep.subr.bf16.mxu1 %v4921_v37 }
 0x3b1   : > { %3744 = vmatpush1.bf16.msra.mxu0 %v4916_v54 }
 0x3b2   : > { %3908 = vmatpush1.bf16.msra.mxu1 %v4919_v1  ;;  %3745 = vmatprep.subr.bf16.mxu0 %v4924_v52 }
 0x3b3   : > { %3909 = vmatprep.subr.bf16.mxu1 %v4927_v53 }
 0x3b5   : > { %3746 = vmatpush1.bf16.msra.mxu0 %v4922_v56 }
 0x3b6   : > { %3910 = vmatpush1.bf16.msra.mxu1 %v4925_v63  ;;  %3747 = vmatprep.subr.bf16.mxu0 %v4930_v58 }
 0x3b7   : > { %3911 = vmatprep.subr.bf16.mxu1 %v4933_v55 }
 0x3b9   : > { %3748 = vmatpush1.bf16.msra.mxu0 %v4928_v60 }
 0x3ba   : > { %3912 = vmatpush1.bf16.msra.mxu1 %v4931_v61  ;;  %3749 = vmatprep.subr.bf16.mxu0 %v4936_v62 }
 0x3bb   : > { %3913 = vmatprep.subr.bf16.mxu1 %v4939_v24 }
 0x3bd   : > { %3750 = vmatpush1.bf16.msra.mxu0 %v4934_v59 }
 0x3be   : > { %3914 = vmatpush1.bf16.msra.mxu1 %v4937_v2  ;;  %3751 = vmatprep.subr.bf16.mxu0 %v4942_v38 }
 0x3bf   : > { %3915 = vmatprep.subr.bf16.mxu1 %v4945_v8 }
 0x3c1   : > { %3752 = vmatpush1.bf16.msra.mxu0 %v4940_v3 }
 0x3c2   : > { %3916 = vmatpush1.bf16.msra.mxu1 %v4943_v4 }
 0x3c4   : > { %3754 = vmatmul.mubr.bf16.vlgmr.msra.gmra.mrb[40].mxu0 %v2316_v32 }
 0x3c5   : > { %3918 = vmatmul.mubr.bf16.vlgmr.msra.gmra.mrb[40].mxu1 %v2316_v32 }
 0x497   : > { %v3755_v13 = vpop.f32.mrb[40].mxu0 }
 0x498   : > { %v3947_v17 = vmul.f32 %v3930_v7, %v3755_v13  ;;  %v3919_v35 = vpop.f32.mrb[40].mxu1  ;;  %v3757_v36 = vpop.f32.mrb[41].mxu0 }
 0x499   : > { %v3949_v23 = vmul.f32 %v3938_v11, %v3919_v35  ;;  %v3948_v45 = vmul.f32 %v3934_v0, %v3757_v36  ;;  %v3921_v15 = vpop.f32.mrb[41].mxu1  ;;  %v3759_v18 = vpop.f32.mrb[42].mxu0 }
 0x49a   : > { %v3972_v51 = vadd.f32 %v3955_v39, %v3947_v17  ;;  %v3950_v21 = vmul.f32 %v3942_v12, %v3921_v15  ;;  %v3923_v30 = vpop.f32.mrb[42].mxu1  ;;  %v3760_v9 = vpop.f32.mrb[43].mxu0 }
 0x49b   : > { %v3974_v10 = vadd.f32 %v3963_v14, %v3949_v23  ;;  %v3973_v20 = vadd.f32 %v3959_v16, %v3948_v45  ;;  %v3924_v26 = vpop.f32.mrb[43].mxu1 }
 0x49c   : > { %v3976_v31 = vmax.f32 %v3972_v51, 0.0  ;;  %v3975_v27 = vadd.f32 %v3967_v19, %v3950_v21 }
 0x49d   : > { %v3978_v33 = vmax.f32 %v3974_v10, 0.0  ;;  %v3977_v28 = vmax.f32 %v3973_v20, 0.0 }
 0x49e   : > { %v3979_v22 = vmax.f32 %v3975_v27, 0.0 }
 0x49f   : > { %v3984_v25 = vcombine.low %v3976_v31, %v3977_v28 }
 0x4a0   : > { %v3985_v40 = vcombine.low %v3978_v33, %v3979_v22 }
 0x4a1   : > { %v3992_v34 = vrot.slane %v3984_v25, %v5706_v43 }
 0x4a2   : > { %v3999_v57 = vrot.slane %v3985_v40, %v5706_v43 }
 0x4a4   : > { %v4000_v46 = vcombine.low %v3992_v34, %v3999_v57 }
 0x4a6   : > { %v4007_v41 = vrot.slane %v4000_v46, %v5706_v43 }
 0x4a8   : > { %4013 = vst.msk [vmem:[%s503_s22] sm:$0xf] %vm4011_vm3, %v4007_v41 }
 0x4a9 PF: > { %s23_s27 = sadd.s32 1, %s4968_s27   ;;  %s6425_s25 = smov %s4964_s26 }
 0x4aa   : > { %p20_p5 = scmp.ge.s32.totalorder %s23_s27, 4   ;;  %s6426_s26 = smov %s6428_s28 }
 0x4ac   :  { %22 = sbr.rel (!%p20_p5) target bundleno = 2 (0x2), region = 116 }

// kernel: _lambda_.4
= control target key start
LH: loop header
LB: loop body
LE: loop exit
PB: predicated region body
PF: predicated region fallthrough
CT: control target
= control target key end

     0   :  { %s11116_s28 = smov 0   ;;  %s11118_s29 = smov 0   ;;  %s14538_s0 = inlined_call_operand.vmem [shape: f32[2,64,3], index: 0, kind: input, shape index: {}]   ;;  %s14539_s1 = inlined_call_operand.vmem [shape: f32[2,3,64], index: 1, kind: input, shape index: {}]   ;;  %s14540_s2 = inlined_call_operand.vmem [shape: f32[1,64], index: 2, kind: input, shape index: {}]   ;;  %s14541_s3 = inlined_call_operand.vmem [shape: f32[1,64], index: 3, kind: input, shape index: {}]   ;;  %s14542_s4 = inlined_call_operand.vmem [shape: f32[64,64], index: 4, kind: input, shape index: {}]   ;;  %s14543_s5 = inlined_call_operand.vmem [shape: f32[1,64], index: 5, kind: input, shape index: {}]   ;;  %s14544_s6 = inlined_call_operand.vmem [shape: f32[1,64], index: 6, kind: input, shape index: {}]   ;;  %s14545_s7 = inlined_call_operand.vmem [shape: bf16[64,128], index: 7, kind: input, shape index: {}]   ;;  %s14546_s8 = inlined_call_operand.vmem [shape: f32[1,128], index: 8, kind: input, shape index: {}]   ;;  %s14547_s9 = inlined_call_operand.vmem [shape: f32[1,128], index: 9, kind: input, shape index: {}]   ;;  %s14548_s10 = inlined_call_operand.vmem [shape: bf16[128,1024], index: 10, kind: input, shape index: {}]   ;;  %s14549_s11 = inlined_call_operand.vmem [shape: f32[1,1024], index: 11, kind: input, shape index: {}]   ;;  %s14550_s12 = inlined_call_operand.vmem [shape: f32[1,1024], index: 12, kind: input, shape index: {}]   ;;  %s14551_s13 = inlined_call_operand.vmem [shape: bf16[1024,512], index: 13, kind: input, shape index: {}]   ;;  %s14552_s14 = inlined_call_operand.vmem [shape: f32[1,512], index: 14, kind: input, shape index: {}]   ;;  %s14553_s15 = inlined_call_operand.vmem [shape: f32[1,512], index: 15, kind: input, shape index: {}]   ;;  %s14554_s16 = inlined_call_operand.vmem [shape: bf16[512,256], index: 16, kind: input, shape index: {}]   ;;  %s14555_s17 = inlined_call_operand.vmem [shape: f32[1,256], index: 17, kind: input, shape index: {}]   ;;  %s14556_s18 = inlined_call_operand.vmem [shape: f32[1,256], index: 18, kind: input, shape index: {}]   ;;  %s14557_s19 = inlined_call_operand.vmem [shape: bf16[256,4096], index: 19, kind: input, shape index: {}]   ;;  %s14558_s20 = inlined_call_operand.vmem [shape: f32[1,4096], index: 20, kind: input, shape index: {}]   ;;  %s14559_s21 = inlined_call_operand.vmem [shape: f32[1,4096], index: 21, kind: input, shape index: {}]   ;;  %s14560_s22 = inlined_call_operand.vmem [shape: f32[2,1,4096], index: 22, kind: output, shape index: {}]  }
   0x1   :  { %14563 = sst [smem:[#allocation5_spill]] %s14538_s0 }
   0x2   :  { %14564 = sst [smem:[#allocation6_spill]] %s14539_s1 }
   0x3   :  { %14565 = sst [smem:[#allocation7_spill]] %s14540_s2 }
   0x4   :  { %14566 = sst [smem:[#allocation8_spill]] %s14541_s3  ;;  %s11114_s3 = smov 0  }
   0x5   :  { %14567 = sst [smem:[#allocation9_spill]] %s14542_s4 }
   0x6   :  { %14568 = sst [smem:[#allocation10_spill]] %s14543_s5 }
   0x7   :  { %14569 = sst [smem:[#allocation11_spill]] %s14544_s6 }
   0x8 LB: > { %14570 = sst [smem:[#allocation3_spill]] %s10991_s28  ;;  %s44_s30 = sadd.s32 1, %s10991_s28  ;;  %s10995_s29 = sphi %s11118_s29, %s32_s29   ;;  %s10991_s28 = sphi %s11116_s28, %s14580_s28   ;;  %s10987_s3 = sphi %s11114_s3, %s14579_s3  }
   0x9   : > { %p9391_p0 = scmp.ge.s32.totalorder %s10995_s29, 1  ;;  %p46_p1 = scmp.ge.s32.totalorder %s44_s30, 2 }
   0xa   : > { %p640_p2 = scmp.lt.s32.totalorder %s10995_s29, 3 }
   0xb   : > { %s14582_s30 = smov (%p46_p1, %s44_s30), 0 }
   0xc   : > { %14571 = sst [smem:[#allocation4_spill]] %s14582_s30  ;;  %p641_p3 = pnand %p9391_p0, %p640_p2 }
   0xd   : > { %p710_p4 = scmp.lt.s32.totalorder (!%p641_p3), %s10987_s3, 1  ;;  %s14572_s23 = sld [smem:[#allocation9_spill]] (!%p641_p3)  ;;  %vm764_vm0 = vcmask (!%p641_p3), 1042432   ;;  %vm739_vm1 = vcmask (!%p641_p3), 23552   ;;  %v10487_v21 = vld [vmem:[%s14545_s7] sm:$0xff] (!%p641_p3)   ;;  %vm919_vm2 = vcmask (!%p641_p3), 523264  }
   0xe   : > { %644 = sbr.rel (%p641_p3) target bundleno = 2450 (0x992), region = 108  ;;  %s14573_s1 = sld [smem:[#allocation5_spill]] (!%p641_p3)  ;;  %v10488_v56 = vld [vmem:[%s14545_s7 + $0x8] sm:$0xff] (!%p641_p3)   ;;  %v10489_v57 = vld [vmem:[%s14545_s7 + $0x10] sm:$0xff] (!%p641_p3)   ;;  %v10490_v58 = vld [vmem:[%s14545_s7 + $0x18] sm:$0xff] (!%p641_p3)  }
   0xf   : > { %s14574_s30 = sld [smem:[#allocation6_spill]] (!%p641_p3)  ;;  %s14576_s26 = sld [smem:[#allocation8_spill]] (!%p641_p3)  ;;  %v1236_v59 = vld [vmem:[%s14548_s10] sm:$0xff] (!%p641_p3)  ;;  %v11211_v61 = vld [vmem:[%s14548_s10 + $0x8] sm:$0xff] (!%p641_p3) }
  0x10   : > { %v1240_v60 = vld [vmem:[%s14548_s10 + $0x20] sm:$0xff] (!%p641_p3)  ;;  %s14578_s0 = sld [smem:[#allocation11_spill]] (!%p641_p3) }
  0x11   : > { %v9427_v62 = vcombine.low (!%p641_p3), %v1236_v59, %v1240_v60  ;;  %v9428_v63 = vcombine.high (!%p641_p3), %v1236_v59, %v1240_v60 }
  0x13   : > { %v909_v0 = vld [vmem:[%s14572_s23] sm:$0xff] (!%p641_p3)  ;;  %v910_v1 = vld [vmem:[%s14572_s23 + $0x8] sm:$0xff] (!%p641_p3)  ;;  %v911_v2 = vld [vmem:[%s14572_s23 + $0x10] sm:$0xff] (!%p641_p3) }
  0x14   : > { %v10417_v3 = vpack.c.bf16 (!%p641_p3), %v910_v1, %v909_v0  ;;  %v912_v4 = vld [vmem:[%s14572_s23 + $0x18] sm:$0xff] (!%p641_p3)  ;;  %v913_v15 = vld [vmem:[%s14572_s23 + $0x20] sm:$0xff] (!%p641_p3)  ;;  %v914_v16 = vld [vmem:[%s14572_s23 + $0x28] sm:$0xff] (!%p641_p3) }
  0x15   : > { %s14584_s3 = smov (!%p710_p4, %s10987_s3), 1  ;;  %v10421_v5 = vpack.c.bf16 %v912_v4, %v911_v2  ;;  %v10425_v17 = vpack.c.bf16 %v914_v16, %v913_v15  ;;  %v915_v18 = vld [vmem:[%s14572_s23 + $0x30] sm:$0xff]  ;;  %v916_v19 = vld [vmem:[%s14572_s23 + $0x38] sm:$0xff]  ;;  %v9406_v23 = vld [vmem:[%s14576_s26] ss:$0 sm:$0xff] }
  0x16   : > { %10418 = vmatprep.subr.bf16.mxu1 %v10417_v3  ;;  %s10325_s2 = sshll.u32 %s14584_s3, 6  ;;  %s9394_s27 = sshll.u32 %s14584_s3, 2  ;;  %v10429_v20 = vpack.c.bf16 %v916_v19, %v915_v18  ;;  %v11216_v0 = vld [vmem:[%s14548_s10 + $0x28] sm:$0xff]  ;;  %v1244_v1 = vld [vmem:[%s14548_s10 + $0x40] sm:$0xff] }
  0x17   : > { %10420 = vmatpush3.bf16.msra.mxu1 %v10417_v3  ;;  %s717_s5 = scalar_lea.vmem %s14573_s1, %s10325_s2  ;;  %s722_s28 = scalar_lea.vmem %s14574_s30, %s9394_s27  ;;  %v1248_v2 = vld [vmem:[%s14548_s10 + $0x60] sm:$0xff]  ;;  %v9429_v3 = vcombine.low %v11211_v61, %v11216_v0  ;;  %v9430_v4 = vcombine.high %v11211_v61, %v11216_v0 }
  0x18   : > { %10422 = vmatprep.subr.bf16.mxu1 %v10421_v5  ;;  %v736_v6 = vld [vmem:[%s722_s28] sm:$0x7]  ;;  %v729_v8 = vld [vmem:[%s717_s5 + $0x8] sm:$0xff]  ;;  %v730_v9 = vld [vmem:[%s717_s5 + $0x10] sm:$0xff]  ;;  %s14575_s28 = sld [smem:[#allocation7_spill]]  ;;  %s14577_s2 = sld [smem:[#allocation10_spill]] }
  0x19   : > { %v728_v7 = vld [vmem:[%s717_s5] sm:$0xff]  ;;  %10359 = vmatprep.subr.msk.mxu0 %vm764_vm0, %v736_v6  ;;  %v731_v10 = vld [vmem:[%s717_s5 + $0x18] sm:$0xff]  ;;  %v733_v12 = vld [vmem:[%s717_s5 + $0x28] sm:$0xff] }
  0x1a   : > { %10361 = vmatprep.mubr.msk.f32.mxu0 %vm739_vm1, %v728_v7  ;;  %10360 = vmatpush3.msk.msra.mxu0 %vm764_vm0, %v736_v6  ;;  %v732_v11 = vld [vmem:[%s717_s5 + $0x20] sm:$0xff]  ;;  %v734_v13 = vld [vmem:[%s717_s5 + $0x30] sm:$0xff]  ;;  %v735_v14 = vld [vmem:[%s717_s5 + $0x38] sm:$0xff] }
  0x1b   : > { %10424 = vmatpush3.bf16.msra.mxu1 %v10421_v5  ;;  %10362 = vmatmul.mubr.msk.f32.vlgmr.msra.gmra.mrb[0].mxu0 %vm739_vm1, %v729_v8  ;;  %v9436_v5 = vcombine.high %v1244_v1, %v1248_v2  ;;  %v1252_v6 = vld [vmem:[%s14548_s10 + $0x80] sm:$0xff]  ;;  %v9435_v8 = vcombine.low %v1244_v1, %v1248_v2 }
  0x1c   : > { %10364 = vmatprep.mubr.msk.f32.mxu0 %vm739_vm1, %v730_v9  ;;  %10426 = vmatprep.subr.bf16.mxu1 %v10425_v17  ;;  %v1256_v7 = vld [vmem:[%s14548_s10 + $0xa0] sm:$0xff] }
  0x1d   : > { %10401 = vmatprep.subr.bf16.mxu0 %v10487_v21  ;;  %v9444_v9 = vcombine.high %v1252_v6, %v1256_v7  ;;  %v1272_v15 = vld [vmem:[%s14548_s10 + $0x120] sm:$0xff] }
  0x1e   : > { %10402 = vmatpush3.bf16.msra.mxu0 %v10487_v21  ;;  %v9405_v22 = vld [vmem:[%s14575_s28] ss:$0 sm:$0xff]  ;;  %s9395_s28 = sshll.u32 %s14584_s3, 5 }
  0x1f   : > { %10365 = vmatmul.mubr.msk.f32.gmra.mrb[2].mxu0 %vm739_vm1, %v731_v10  ;;  %10428 = vmatpush3.bf16.msra.mxu1 %v10425_v17  ;;  %v1260_v10 = vld [vmem:[%s14548_s10 + $0xc0] sm:$0xff]  ;;  %s14106_s4 = scalar_lea.vmem %s14560_s22, %s9395_s28 }
  0x20   : > { %10367 = vmatprep.mubr.msk.f32.mxu0 %vm739_vm1, %v732_v11  ;;  %10430 = vmatprep.subr.bf16.mxu1 %v10429_v20  ;;  %v1264_v11 = vld [vmem:[%s14548_s10 + $0xe0] sm:$0xff] }
  0x21   : > { %10403 = vmatprep.subr.bf16.mxu0 %v10488_v56  ;;  %v9451_v16 = vcombine.low %v1260_v10, %v1264_v11  ;;  %v1276_v18 = vld [vmem:[%s14548_s10 + $0x140] sm:$0xff] }
  0x22   : > { %10404 = vmatpush3.bf16.msra.mxu0 %v10488_v56  ;;  %v1280_v19 = vld [vmem:[%s14548_s10 + $0x160] sm:$0xff]  ;;  %v1253_v56 = vld [vmem:[%s14548_s10 + $0x88] sm:$0xff] }
  0x23   : > { %10368 = vmatmul.mubr.msk.f32.gmra.mrb[4].mxu0 %vm739_vm1, %v733_v12  ;;  %10432 = vmatpush3.bf16.msra.mxu1 %v10429_v20  ;;  %v9443_v12 = vcombine.low %v1252_v6, %v1256_v7  ;;  %v9468_v21 = vcombine.high %v1276_v18, %v1280_v19  ;;  %v1265_v6 = vld [vmem:[%s14548_s10 + $0xe8] sm:$0xff] }
  0x24   : > { %10370 = vmatprep.mubr.msk.f32.mxu0 %vm739_vm1, %v734_v13  ;;  %10405 = vmatprep.subr.bf16.mxu0 %v10489_v57  ;;  %v9452_v13 = vcombine.high %v1260_v10, %v1264_v11 }
  0x25   : > { %1626 = vmatprep.subr.bf16.mxu1 %v9428_v63 }
  0x26   : > { %10406 = vmatpush3.bf16.msra.mxu0 %v10489_v57  ;;  %v1257_v57 = vld [vmem:[%s14548_s10 + $0xa8] sm:$0xff] }
  0x27   : > { %10371 = vmatmul.mubr.msk.f32.gmra.mrb[6].mxu0 %vm739_vm1, %v735_v14  ;;  %10407 = vmatprep.subr.bf16.mxu0 %v10490_v58  ;;  %v1268_v14 = vld [vmem:[%s14548_s10 + $0x100] sm:$0xff]  ;;  %v9446_v2 = vcombine.high %v1253_v56, %v1257_v57  ;;  %v9445_v61 = vcombine.low %v1253_v56, %v1257_v57  ;;  %v1246_v56 = vld [vmem:[%s14548_s10 + $0x50] sm:$0xff] }
  0x28   : > { %v9460_v17 = vcombine.high %v1268_v14, %v1272_v15  ;;  %v9459_v20 = vcombine.low %v1268_v14, %v1272_v15 }
  0x2a   : > { %10408 = vmatpush3.bf16.msra.mxu0 %v10490_v58 }
  0x2b   : > { %1699 = vmatprep.subr.bf16.mxu0 %v9430_v4 }
  0xee   : > { %v10363_v24 = vpop.f32.mrb[0].mxu0 }
  0xef   : > { %v880_v25 = vmul.f32 %v10363_v24, %v9405_v22  ;;  %v834_v26 = vpop.f32.mrb[1].mxu0  ;;  %v9416_v24 = vld [vmem:[%s14578_s0] ss:$0 sm:$0xff] }
  0xf0   : > { %v879_v27 = vmul.f32 %v9405_v22, %v834_v26 }
  0xf1   : > { %v894_v28 = vadd.f32 %v9406_v23, %v880_v25 }
  0xf2   : > { %v10366_v29 = vpop.f32.mrb[2].mxu0  ;;  %v893_v30 = vadd.f32 %v9406_v23, %v879_v27 }
  0xf3   : > { %v882_v31 = vmul.f32 %v10366_v29, %v9405_v22  ;;  %v844_v32 = vpop.f32.mrb[3].mxu0  ;;  %v902_v35 = vmax.f32 %v894_v28, 0.0 }
  0xf4   : > { %v881_v33 = vmul.f32 %v9405_v22, %v844_v32  ;;  %v901_v34 = vmax.f32 %v893_v30, 0.0 }
  0xf5   : > { %v896_v36 = vadd.f32 %v9406_v23, %v882_v31 }
  0xf6   : > { %v895_v37 = vadd.f32 %v9406_v23, %v881_v33  ;;  %10389 = vmatprep.mubr.msk.f32.mxu1 %vm919_vm2, %v901_v34  ;;  %v10369_v38 = vpop.f32.mrb[4].mxu0 }
  0xf7   : > { %10390 = vmatmul.mubr.msk.f32.vlgmr.msra.gmra.mrb[0].mxu1 %vm919_vm2, %v902_v35  ;;  %v884_v39 = vmul.f32 %v10369_v38, %v9405_v22  ;;  %v854_v40 = vpop.f32.mrb[5].mxu0  ;;  %v904_v43 = vmax.f32 %v896_v36, 0.0 }
  0xf8   : > { %v903_v41 = vmax.f32 %v895_v37, 0.0  ;;  %v883_v42 = vmul.f32 %v9405_v22, %v854_v40  ;;  %1627 = vmatpush1.bf16.msra.mxu1 %v9427_v62 }
  0xf9   : > { %v898_v44 = vadd.f32 %v9406_v23, %v884_v39  ;;  %1628 = vmatprep.subr.bf16.mxu1 %v9436_v5  ;;  %v1261_v5 = vld [vmem:[%s14548_s10 + $0xc8] sm:$0xff] }
  0xfa   : > { %v897_v45 = vadd.f32 %v9406_v23, %v883_v42  ;;  %10392 = vmatprep.mubr.msk.f32.mxu1 %vm919_vm2, %v903_v41  ;;  %v10372_v46 = vpop.f32.mrb[6].mxu0  ;;  %v9453_v10 = vcombine.low %v1261_v5, %v1265_v6 }
  0xfb   : > { %v906_v47 = vmax.f32 %v898_v44, 0.0  ;;  %10393 = vmatmul.mubr.msk.f32.gmra.mrb[2].mxu1 %vm919_vm2, %v904_v43  ;;  %v886_v48 = vmul.f32 %v10372_v46, %v9405_v22  ;;  %v864_v49 = vpop.f32.mrb[7].mxu0  ;;  %v1245_v44 = vld [vmem:[%s14548_s10 + $0x48] sm:$0xff] }
  0xfc   : > { %v905_v50 = vmax.f32 %v897_v45, 0.0  ;;  %v885_v51 = vmul.f32 %v9405_v22, %v864_v49  ;;  %1629 = vmatpush1.bf16.msra.mxu1 %v9435_v8  ;;  %v9467_v22 = vcombine.low %v1276_v18, %v1280_v19  ;;  %v1249_v45 = vld [vmem:[%s14548_s10 + $0x68] sm:$0xff]  ;;  %v1288_v18 = vld [vmem:[%s14548_s10 + $0x1a0] sm:$0xff] }
  0xfd   : > { %v900_v52 = vadd.f32 %v9406_v23, %v886_v48  ;;  %1630 = vmatprep.subr.bf16.mxu1 %v9444_v9  ;;  %v9437_v62 = vcombine.low %v1245_v44, %v1249_v45  ;;  %v1269_v8 = vld [vmem:[%s14548_s10 + $0x108] sm:$0xff] }
  0xfe   : > { %v899_v53 = vadd.f32 %v9406_v23, %v885_v51  ;;  %10395 = vmatprep.mubr.msk.f32.mxu1 %vm919_vm2, %v905_v50  ;;  %v9415_v23 = vld [vmem:[%s14577_s2] ss:$0 sm:$0xff]  ;;  %v1273_v9 = vld [vmem:[%s14548_s10 + $0x128] sm:$0xff] }
  0xff   : > { %v908_v54 = vmax.f32 %v900_v52, 0.0  ;;  %10396 = vmatmul.mubr.msk.f32.gmra.mrb[4].mxu1 %vm919_vm2, %v906_v47  ;;  %v9438_v52 = vcombine.high %v1245_v44, %v1249_v45  ;;  %v9462_v11 = vcombine.high %v1269_v8, %v1273_v9  ;;  %v9461_v14 = vcombine.low %v1269_v8, %v1273_v9  ;;  %v1285_v19 = vld [vmem:[%s14548_s10 + $0x188] sm:$0xff]  ;;  %v1254_v9 = vld [vmem:[%s14548_s10 + $0x90] sm:$0xff] }
 0x100   : > { %v907_v55 = vmax.f32 %v899_v53, 0.0  ;;  %1631 = vmatpush1.bf16.msra.mxu1 %v9443_v12  ;;  %v1277_v12 = vld [vmem:[%s14548_s10 + $0x148] sm:$0xff] }
 0x101   : > { %1632 = vmatprep.subr.bf16.mxu1 %v9452_v13  ;;  %v1281_v13 = vld [vmem:[%s14548_s10 + $0x168] sm:$0xff] }
 0x102   : > { %10398 = vmatprep.mubr.msk.f32.mxu1 %vm919_vm2, %v907_v55  ;;  %v9470_v15 = vcombine.high %v1277_v12, %v1281_v13 }
 0x103   : > { %10399 = vmatmul.mubr.msk.f32.gmra.mrb[6].mxu1 %vm919_vm2, %v908_v54 }
 0x104   : > { %1633 = vmatpush1.bf16.msra.mxu1 %v9451_v16  ;;  %v9469_v16 = vcombine.low %v1277_v12, %v1281_v13  ;;  %v1258_v13 = vld [vmem:[%s14548_s10 + $0xb0] sm:$0xff] }
 0x105   : > { %1634 = vmatprep.subr.bf16.mxu1 %v9460_v17  ;;  %v1284_v17 = vld [vmem:[%s14548_s10 + $0x180] sm:$0xff] }
 0x108   : > { %1635 = vmatpush1.bf16.msra.mxu1 %v9459_v20  ;;  %v9476_v20 = vcombine.high %v1284_v17, %v1288_v18 }
 0x109   : > { %1636 = vmatprep.subr.bf16.mxu1 %v9468_v21  ;;  %v1289_v21 = vld [vmem:[%s14548_s10 + $0x1a8] sm:$0xff] }
 0x10c   : > { %1637 = vmatpush1.bf16.msra.mxu1 %v9467_v22  ;;  %v9475_v22 = vcombine.low %v1284_v17, %v1288_v18 }
 0x10d   : > { %1638 = vmatprep.subr.bf16.mxu1 %v9476_v20 }
 0x110   : > { %1639 = vmatpush1.bf16.msra.mxu1 %v9475_v22 }
 0x1ca   : > { %v10391_v25 = vpop.f32.mrb[0].mxu1 }
 0x1cb   : > { %v1056_v26 = vmul.f32 %v10391_v25, %v9415_v23  ;;  %v1010_v27 = vpop.f32.mrb[1].mxu1  ;;  %v1292_v25 = vld [vmem:[%s14548_s10 + $0x1c0] sm:$0xff] }
 0x1cc   : > { %v1055_v28 = vmul.f32 %v9415_v23, %v1010_v27  ;;  %v1293_v27 = vld [vmem:[%s14548_s10 + $0x1c8] sm:$0xff] }
 0x1cd   : > { %v1070_v29 = vadd.f32 %v9416_v24, %v1056_v26  ;;  %v1296_v26 = vld [vmem:[%s14548_s10 + $0x1e0] sm:$0xff] }
 0x1ce   : > { %v1069_v30 = vadd.f32 %v9416_v24, %v1055_v28  ;;  %v10394_v31 = vpop.f32.mrb[2].mxu1  ;;  %v9484_v28 = vcombine.high %v1292_v25, %v1296_v26 }
 0x1cf   : > { %v1078_v32 = vmax.f32 %v1070_v29, 0.0  ;;  %v1058_v33 = vmul.f32 %v10394_v31, %v9415_v23  ;;  %v1020_v34 = vpop.f32.mrb[3].mxu1  ;;  %v1297_v29 = vld [vmem:[%s14548_s10 + $0x1e8] sm:$0xff] }
 0x1d0   : > { %v1077_v35 = vmax.f32 %v1069_v30, 0.0  ;;  %v1057_v36 = vmul.f32 %v9415_v23, %v1020_v34  ;;  %v9483_v30 = vcombine.low %v1292_v25, %v1296_v26  ;;  %v9485_v31 = vcombine.low %v1293_v27, %v1297_v29  ;;  %1640 = vmatprep.subr.bf16.mxu1 %v9484_v28  ;;  %v1242_v34 = vld [vmem:[%s14548_s10 + $0x30] sm:$0xff] }
 0x1d1   : > { %v1072_v37 = vadd.f32 %v9416_v24, %v1058_v33  ;;  %v1238_v33 = vld [vmem:[%s14548_s10 + $0x10] sm:$0xff] }
 0x1d2   : > { %v1095_v38 = vpack.c.bf16 %v1078_v32, %v1077_v35  ;;  %v1071_v39 = vadd.f32 %v9416_v24, %v1057_v36  ;;  %v10397_v40 = vpop.f32.mrb[4].mxu1  ;;  %v9486_v32 = vcombine.high %v1293_v27, %v1297_v29  ;;  %1641 = vmatpush1.bf16.msra.mxu1 %v9483_v30  ;;  %v1239_v35 = vld [vmem:[%s14548_s10 + $0x18] sm:$0xff]  ;;  %v9432_v36 = vcombine.high %v1238_v33, %v1242_v34  ;;  %v1262_v26 = vld [vmem:[%s14548_s10 + $0xd0] sm:$0xff] }
 0x1d3   : > { %v1080_v41 = vmax.f32 %v1072_v37, 0.0  ;;  %v1060_v42 = vmul.f32 %v10397_v40, %v9415_v23  ;;  %v1030_v43 = vpop.f32.mrb[5].mxu1  ;;  %v1243_v37 = vld [vmem:[%s14548_s10 + $0x38] sm:$0xff]  ;;  %v1266_v28 = vld [vmem:[%s14548_s10 + $0xf0] sm:$0xff] }
 0x1d4   : > { %v1079_v46 = vmax.f32 %v1071_v39, 0.0  ;;  %10409 = vmatprep.mubr.msk.bf16.mxu0 %vm919_vm2, %v1095_v38  ;;  %v1059_v47 = vmul.f32 %v9415_v23, %v1030_v43  ;;  %v10997_v38 = vmov 0   ;;  %v9431_v39 = vcombine.low %v1238_v33, %v1242_v34  ;;  %1772 = vmatprep.subr.bf16.mxu1 %v9432_v36  ;;  %v9426_v43 = vld [vmem:[%s14547_s9] ss:$0 sm:$0xff]  ;;  %v1263_v29 = vld [vmem:[%s14548_s10 + $0xd8] sm:$0xff] }
 0x1d5   : > { %v1074_v48 = vadd.f32 %v9416_v24, %v1060_v42  ;;  %1658 = vmatprep.mubr.bf16.mxu1 %v10997_v38  ;;  %v9433_v40 = vcombine.low %v1239_v35, %v1243_v37  ;;  %v9425_v42 = vld [vmem:[%s14546_s8] ss:$0 sm:$0xff]  ;;  %v1267_v30 = vld [vmem:[%s14548_s10 + $0xf8] sm:$0xff]  ;;  %v9447_v33 = vcombine.low %v1254_v9, %v1258_v13  ;;  %v9456_v36 = vcombine.high %v1262_v26, %v1266_v28 }
 0x1d6   : > { %v1096_v49 = vpack.c.bf16 %v1080_v41, %v1079_v46  ;;  %v1073_v50 = vadd.f32 %v9416_v24, %v1059_v47  ;;  %v10400_v51 = vpop.f32.mrb[6].mxu1  ;;  %v9434_v41 = vcombine.high %v1239_v35, %v1243_v37  ;;  %v9458_v37 = vcombine.high %v1263_v29, %v1267_v30 }
 0x1d7   : > { %v1082_v53 = vmax.f32 %v1074_v48, 0.0  ;;  %v1062_v54 = vmul.f32 %v10400_v51, %v9415_v23  ;;  %v1040_v55 = vpop.f32.mrb[7].mxu1 }
 0x1d8   : > { %v1081_v58 = vmax.f32 %v1073_v50, 0.0  ;;  %10410 = vmatmul.mubr.msk.bf16.vlgmr.msra.gmra.mrb[8].mxu0 %vm919_vm2, %v1096_v49  ;;  %v1061_v59 = vmul.f32 %v9415_v23, %v1040_v55  ;;  %v9477_v23 = vcombine.low %v1285_v19, %v1289_v21 }
 0x1d9   : > { %v1076_v60 = vadd.f32 %v9416_v24, %v1062_v54  ;;  %1700 = vmatpush1.bf16.msra.mxu0 %v9429_v3  ;;  %v9454_v3 = vcombine.high %v1261_v5, %v1265_v6 }
 0x1da   : > { %v1097_v63 = vpack.c.bf16 %v1082_v53, %v1081_v58  ;;  %v1075_v1 = vadd.f32 %v9416_v24, %v1061_v59  ;;  %1701 = vmatprep.subr.bf16.mxu0 %v9438_v52  ;;  %v9478_v24 = vcombine.high %v1285_v19, %v1289_v21  ;;  %v1250_v59 = vld [vmem:[%s14548_s10 + $0x70] sm:$0xff] }
 0x1db   : > { %v1084_v4 = vmax.f32 %v1076_v60, 0.0  ;;  %v1247_v60 = vld [vmem:[%s14548_s10 + $0x58] sm:$0xff]  ;;  %v9439_v20 = vcombine.low %v1246_v56, %v1250_v59 }
 0x1dc   : > { %v1083_v7 = vmax.f32 %v1075_v1, 0.0  ;;  %10413 = vmatprep.mubr.msk.bf16.mxu0 %vm919_vm2, %v1097_v63 }
 0x1dd   : > { %1702 = vmatpush1.bf16.msra.mxu0 %v9437_v62  ;;  %v1251_v62 = vld [vmem:[%s14548_s10 + $0x78] sm:$0xff] }
 0x1de   : > { %v1098_v0 = vpack.c.bf16 %v1084_v4, %v1083_v7  ;;  %1703 = vmatprep.subr.bf16.mxu0 %v9446_v2  ;;  %v9442_v8 = vcombine.high %v1247_v60, %v1251_v62  ;;  %v9441_v21 = vcombine.low %v1247_v60, %v1251_v62 }
 0x1e0   : > { %10414 = vmatmul.mubr.msk.bf16.gmra.mrb[12].mxu0 %vm919_vm2, %v1098_v0 }
 0x1e1   : > { %1704 = vmatpush1.bf16.msra.mxu0 %v9445_v61  ;;  %1731 = vmatprep.mubr.bf16.mxu0 %v10997_v38 }
 0x1e2   : > { %1705 = vmatprep.subr.bf16.mxu0 %v9454_v3  ;;  %v9440_v3 = vcombine.high %v1246_v56, %v1250_v59  ;;  %v1290_v56 = vld [vmem:[%s14548_s10 + $0x1b0] sm:$0xff] }
 0x1e5   : > { %1706 = vmatpush1.bf16.msra.mxu0 %v9453_v10 }
 0x1e6   : > { %1707 = vmatprep.subr.bf16.mxu0 %v9462_v11 }
 0x1e9   : > { %1708 = vmatpush1.bf16.msra.mxu0 %v9461_v14  ;;  %v1255_v14 = vld [vmem:[%s14548_s10 + $0x98] sm:$0xff] }
 0x1ea   : > { %1709 = vmatprep.subr.bf16.mxu0 %v9470_v15  ;;  %v1259_v15 = vld [vmem:[%s14548_s10 + $0xb8] sm:$0xff] }
 0x1eb   : > { %v9450_v25 = vcombine.high %v1255_v14, %v1259_v15  ;;  %v9449_v34 = vcombine.low %v1255_v14, %v1259_v15  ;;  %v10497_v14 = vld [vmem:[%s14551_s13 + $0x20] ss:$16 sps:$4 sm:$0xff]   ;;  %v10500_v15 = vld [vmem:[%s14551_s13 + $0x28] ss:$16 sps:$4 sm:$0xff]  }
 0x1ed   : > { %1710 = vmatpush1.bf16.msra.mxu0 %v9469_v16 }
 0x1ee   : > { %1711 = vmatprep.subr.bf16.mxu0 %v9478_v24  ;;  %v9448_v24 = vcombine.high %v1254_v9, %v1258_v13  ;;  %v10502_v13 = vld [vmem:[%s14551_s13 + $0x2c] ss:$16 sps:$4 sm:$0xff]  }
 0x1f1   : > { %1712 = vmatpush1.bf16.msra.mxu0 %v9477_v23 }
 0x1f2   : > { %1713 = vmatprep.subr.bf16.mxu0 %v9486_v32 }
 0x1f5   : > { %1714 = vmatpush1.bf16.msra.mxu0 %v9485_v31 }
 0x1f6   : > { %1845 = vmatprep.subr.bf16.mxu0 %v9434_v41  ;;  %v1271_v41 = vld [vmem:[%s14548_s10 + $0x118] sm:$0xff] }
 0x2ab   : > { %v10411_v44 = vpop.f32.mrb[8].mxu0 }
 0x2ac   : > { %v1208_v45 = vmul.f32 %v10411_v44, %v9425_v42  ;;  %v1169_v46 = vpop.f32.mrb[9].mxu0  ;;  %v9457_v44 = vcombine.low %v1263_v29, %v1267_v30  ;;  %v10526_v29 = vld [vmem:[%s14551_s13 + $0xac] ss:$16 sps:$4 sm:$0xff]   ;;  %v10521_v30 = vld [vmem:[%s14551_s13 + $0xa0] ss:$16 sps:$4 sm:$0xff]  }
 0x2ad   : > { %v1206_v47 = vmul.f32 %v9425_v42, %v1169_v46  ;;  %v10412_v48 = vpop.f32.mrb[10].mxu0 }
 0x2ae   : > { %v1222_v49 = vadd.f32 %v9426_v43, %v1208_v45  ;;  %v1209_v50 = vmul.f32 %v10412_v48, %v9425_v42  ;;  %v1172_v51 = vpop.f32.mrb[11].mxu0  ;;  %v1282_v48 = vld [vmem:[%s14548_s10 + $0x170] sm:$0xff] }
 0x2af   : > { %v1220_v52 = vadd.f32 %v9426_v43, %v1206_v47  ;;  %v1207_v53 = vmul.f32 %v9425_v42, %v1172_v51  ;;  %v1278_v47 = vld [vmem:[%s14548_s10 + $0x150] sm:$0xff] }
 0x2b0   : > { %v1223_v54 = vadd.f32 %v9426_v43, %v1209_v50  ;;  %v1230_v57 = vmax.f32 %v1222_v49, 0.0  ;;  %v1279_v49 = vld [vmem:[%s14548_s10 + $0x158] sm:$0xff]  ;;  %v9471_v59 = vcombine.low %v1278_v47, %v1282_v48 }
 0x2b1   : > { %v1221_v55 = vadd.f32 %v9426_v43, %v1207_v53  ;;  %v1228_v63 = vmax.f32 %v1220_v52, 0.0  ;;  %v1283_v50 = vld [vmem:[%s14548_s10 + $0x178] sm:$0xff]  ;;  %v9472_v53 = vcombine.high %v1278_v47, %v1282_v48  ;;  %v10545_v47 = vld [vmem:[%s14551_s13 + $0x120] ss:$16 sps:$4 sm:$0xff]  }
 0x2b2   : > { %v1231_v58 = vmax.f32 %v1223_v54, 0.0  ;;  %v9474_v54 = vcombine.high %v1279_v49, %v1283_v50  ;;  %v9473_v60 = vcombine.low %v1279_v49, %v1283_v50  ;;  %v10548_v48 = vld [vmem:[%s14551_s13 + $0x128] ss:$16 sps:$4 sm:$0xff]   ;;  %v10553_v49 = vld [vmem:[%s14551_s13 + $0x144] ss:$16 sps:$4 sm:$0xff]  }
 0x2b3   : > { %v1229_v1 = vmax.f32 %v1221_v55, 0.0  ;;  %v10415_v2 = vpop.f32.mrb[12].mxu0  ;;  %v1286_v55 = vld [vmem:[%s14548_s10 + $0x190] sm:$0xff]  ;;  %v10556_v50 = vld [vmem:[%s14551_s13 + $0x14c] ss:$16 sps:$4 sm:$0xff]  }
 0x2b4   : > { %v11351_v4 = vpack.c.bf16 %v1231_v58, %v1230_v57  ;;  %v1212_v5 = vmul.f32 %v10415_v2, %v9425_v42  ;;  %v1185_v6 = vpop.f32.mrb[13].mxu0  ;;  %v1287_v57 = vld [vmem:[%s14548_s10 + $0x198] sm:$0xff]  ;;  %v9480_v62 = vcombine.high %v1286_v55, %v1290_v56  ;;  %v1298_v2 = vld [vmem:[%s14548_s10 + $0x1f0] sm:$0xff] }
 0x2b5   : > { %v11353_v7 = vpack.c.bf16 %v1229_v1, %v1228_v63  ;;  %v1210_v61 = vmul.f32 %v9425_v42, %v1185_v6  ;;  %v10416_v0 = vpop.f32.mrb[14].mxu0  ;;  %v1291_v58 = vld [vmem:[%s14548_s10 + $0x1b8] sm:$0xff]  ;;  %v1294_v1 = vld [vmem:[%s14548_s10 + $0x1d0] sm:$0xff] }
 0x2b6   : > { %v1226_v10 = vadd.f32 %v9426_v43, %v1212_v5  ;;  %v1213_v11 = vmul.f32 %v10416_v0, %v9425_v42  ;;  %v1188_v12 = vpop.f32.mrb[15].mxu0  ;;  %v9482_v63 = vcombine.high %v1287_v57, %v1291_v58  ;;  %v1295_v5 = vld [vmem:[%s14548_s10 + $0x1d8] sm:$0xff]  ;;  %v9481_v0 = vcombine.low %v1287_v57, %v1291_v58  ;;  %v10565_v57 = vld [vmem:[%s14551_s13 + $0x184] ss:$16 sps:$4 sm:$0xff]  }
 0x2b7   : > { %v1224_v16 = vadd.f32 %v9426_v43, %v1210_v61  ;;  %1659 = vmatmul.mubr.bf16.vlgmr.msra.gmra.mrb[8].mxu1 %v11353_v7  ;;  %1732 = vmatmul.mubr.bf16.vlgmr.msra.gmra.mrb[16].mxu0 %v11353_v7  ;;  %v1211_v17 = vmul.f32 %v9425_v42, %v1188_v12  ;;  %v1275_v42 = vld [vmem:[%s14548_s10 + $0x138] sm:$0xff]  ;;  %v9479_v61 = vcombine.low %v1286_v55, %v1290_v56  ;;  %v10499_v12 = vld [vmem:[%s14551_s13 + $0x24] ss:$16 sps:$4 sm:$0xff]   ;;  %v10557_v55 = vld [vmem:[%s14551_s13 + $0x160] ss:$16 sps:$4 sm:$0xff]  }
 0x2b8   : > { %v1234_v18 = vmax.f32 %v1226_v10, 0.0  ;;  %v1227_v19 = vadd.f32 %v9426_v43, %v1213_v11  ;;  %1773 = vmatpush1.bf16.msra.mxu1 %v9431_v39  ;;  %1846 = vmatpush1.bf16.msra.mxu0 %v9433_v40  ;;  %v1270_v39 = vld [vmem:[%s14548_s10 + $0x110] sm:$0xff]  ;;  %v9466_v46 = vcombine.high %v1271_v41, %v1275_v42  ;;  %v9465_v52 = vcombine.low %v1271_v41, %v1275_v42  ;;  %v1299_v6 = vld [vmem:[%s14548_s10 + $0x1f8] sm:$0xff] }
 0x2b9   : > { %v1232_v22 = vmax.f32 %v1224_v16, 0.0  ;;  %v1225_v23 = vadd.f32 %v9426_v43, %v1211_v17  ;;  %1774 = vmatprep.subr.bf16.mxu1 %v9440_v3  ;;  %1847 = vmatprep.subr.bf16.mxu0 %v9442_v8  ;;  %v1274_v40 = vld [vmem:[%s14548_s10 + $0x130] sm:$0xff]  ;;  %v9455_v43 = vcombine.low %v1262_v26, %v1266_v28  ;;  %v9488_v3 = vcombine.high %v1294_v1, %v1298_v2  ;;  %v10508_v17 = vld [vmem:[%s14551_s13 + $0x4c] ss:$16 sps:$4 sm:$0xff]   ;;  %v10560_v56 = vld [vmem:[%s14551_s13 + $0x168] ss:$16 sps:$4 sm:$0xff]  }
 0x2ba   : > { %v1235_v27 = vmax.f32 %v1227_v19, 0.0  ;;  %1668 = vmatprep.mubr.bf16.mxu1 %v10997_v38  ;;  %1741 = vmatprep.mubr.bf16.mxu0 %v10997_v38  ;;  %v9464_v45 = vcombine.high %v1270_v39, %v1274_v40  ;;  %v9463_v51 = vcombine.low %v1270_v39, %v1274_v40  ;;  %v9490_v8 = vcombine.high %v1295_v5, %v1299_v6  ;;  %v10491_v11 = vld [vmem:[%s14551_s13] ss:$16 sps:$4 sm:$0xff]   ;;  %v10505_v16 = vld [vmem:[%s14551_s13 + $0x44] ss:$16 sps:$4 sm:$0xff]  }
 0x2bb   : > { %v1233_v31 = vmax.f32 %v1225_v23, 0.0  ;;  %v9487_v9 = vcombine.low %v1294_v1, %v1298_v2  ;;  %v9489_v10 = vcombine.low %v1295_v5, %v1299_v6  ;;  %v10506_v19 = vld [vmem:[%s14551_s13 + $0x48] ss:$16 sps:$4 sm:$0xff]   ;;  %v10515_v26 = vld [vmem:[%s14551_s13 + $0x80] ss:$16 sps:$4 sm:$0xff]  }
 0x2bc   : > { %v11383_v32 = vpack.c.bf16 %v1235_v27, %v1234_v18  ;;  %1775 = vmatpush1.bf16.msra.mxu1 %v9439_v20  ;;  %1848 = vmatpush1.bf16.msra.mxu0 %v9441_v21  ;;  %v10503_v18 = vld [vmem:[%s14551_s13 + $0x40] ss:$16 sps:$4 sm:$0xff]   ;;  %v10511_v20 = vld [vmem:[%s14551_s13 + $0x64] ss:$16 sps:$4 sm:$0xff]   ;;  %v10514_v21 = vld [vmem:[%s14551_s13 + $0x6c] ss:$16 sps:$4 sm:$0xff]  }
 0x2bd   : > { %v11385_v35 = vpack.c.bf16 %v1233_v31, %v1232_v22  ;;  %1776 = vmatprep.subr.bf16.mxu1 %v9448_v24  ;;  %1849 = vmatprep.subr.bf16.mxu0 %v9450_v25  ;;  %v10509_v22 = vld [vmem:[%s14551_s13 + $0x60] ss:$16 sps:$4 sm:$0xff]   ;;  %v10512_v23 = vld [vmem:[%s14551_s13 + $0x68] ss:$16 sps:$4 sm:$0xff]   ;;  %v10517_v24 = vld [vmem:[%s14551_s13 + $0x84] ss:$16 sps:$4 sm:$0xff]  }
 0x2be   : > { %v10520_v25 = vld [vmem:[%s14551_s13 + $0x8c] ss:$16 sps:$4 sm:$0xff]   ;;  %v10518_v27 = vld [vmem:[%s14551_s13 + $0x88] ss:$16 sps:$4 sm:$0xff]   ;;  %v10523_v28 = vld [vmem:[%s14551_s13 + $0xa4] ss:$16 sps:$4 sm:$0xff]  }
 0x2bf   : > { %1669 = vmatmul.mubr.bf16.gmra.mrb[12].mxu1 %v11351_v4  ;;  %1742 = vmatmul.mubr.bf16.gmra.mrb[20].mxu0 %v11351_v4  ;;  %v10524_v31 = vld [vmem:[%s14551_s13 + $0xa8] ss:$16 sps:$4 sm:$0xff]   ;;  %v10533_v39 = vld [vmem:[%s14551_s13 + $0xe0] ss:$16 sps:$4 sm:$0xff]   ;;  %v10541_v41 = vld [vmem:[%s14551_s13 + $0x104] ss:$16 sps:$4 sm:$0xff]  }
 0x2c0   : > { %1777 = vmatpush1.bf16.msra.mxu1 %v9447_v33  ;;  %1850 = vmatpush1.bf16.msra.mxu0 %v9449_v34  ;;  %v10532_v33 = vld [vmem:[%s14551_s13 + $0xcc] ss:$16 sps:$4 sm:$0xff]   ;;  %v10527_v34 = vld [vmem:[%s14551_s13 + $0xc0] ss:$16 sps:$4 sm:$0xff]   ;;  %v10536_v40 = vld [vmem:[%s14551_s13 + $0xe8] ss:$16 sps:$4 sm:$0xff]  }
 0x2c1   : > { %1778 = vmatprep.subr.bf16.mxu1 %v9456_v36  ;;  %1851 = vmatprep.subr.bf16.mxu0 %v9458_v37  ;;  %v10535_v36 = vld [vmem:[%s14551_s13 + $0xe4] ss:$16 sps:$4 sm:$0xff]   ;;  %v10538_v37 = vld [vmem:[%s14551_s13 + $0xec] ss:$16 sps:$4 sm:$0xff]   ;;  %v10569_v1 = vld [vmem:[%s14551_s13 + $0x1a0] ss:$16 sps:$4 sm:$0xff]  }
 0x2c2   : > { %1678 = vmatprep.mubr.bf16.mxu1 %v10997_v38  ;;  %1751 = vmatprep.mubr.bf16.mxu0 %v10997_v38  ;;  %v10544_v42 = vld [vmem:[%s14551_s13 + $0x10c] ss:$16 sps:$4 sm:$0xff]   ;;  %v10572_v2 = vld [vmem:[%s14551_s13 + $0x1a8] ss:$16 sps:$4 sm:$0xff]   ;;  %v10577_v5 = vld [vmem:[%s14551_s13 + $0x1c4] ss:$16 sps:$4 sm:$0xff]  }
 0x2c3   : > { %v10568_v58 = vld [vmem:[%s14551_s13 + $0x18c] ss:$16 sps:$4 sm:$0xff]  }
 0x2c4   : > { %1779 = vmatpush1.bf16.msra.mxu1 %v9455_v43  ;;  %1852 = vmatpush1.bf16.msra.mxu0 %v9457_v44  ;;  %v10539_v43 = vld [vmem:[%s14551_s13 + $0x100] ss:$16 sps:$4 sm:$0xff]   ;;  %v10542_v44 = vld [vmem:[%s14551_s13 + $0x108] ss:$16 sps:$4 sm:$0xff]   ;;  %v10580_v6 = vld [vmem:[%s14551_s13 + $0x1cc] ss:$16 sps:$4 sm:$0xff]  }
 0x2c5   : > { %1780 = vmatprep.subr.bf16.mxu1 %v9464_v45  ;;  %1853 = vmatprep.subr.bf16.mxu0 %v9466_v46  ;;  %v10547_v45 = vld [vmem:[%s14551_s13 + $0x124] ss:$16 sps:$4 sm:$0xff]   ;;  %v10550_v46 = vld [vmem:[%s14551_s13 + $0x12c] ss:$16 sps:$4 sm:$0xff]  }
 0x2c7   : > { %1679 = vmatmul.mubr.bf16.gmra.mrb[16].mxu1 %v11385_v35  ;;  %1752 = vmatmul.mubr.bf16.gmra.mrb[24].mxu0 %v11385_v35 }
 0x2c8   : > { %1781 = vmatpush1.bf16.msra.mxu1 %v9463_v51  ;;  %1854 = vmatpush1.bf16.msra.mxu0 %v9465_v52  ;;  %v10551_v51 = vld [vmem:[%s14551_s13 + $0x140] ss:$16 sps:$4 sm:$0xff]   ;;  %v10554_v52 = vld [vmem:[%s14551_s13 + $0x148] ss:$16 sps:$4 sm:$0xff]  }
 0x2c9   : > { %1782 = vmatprep.subr.bf16.mxu1 %v9472_v53  ;;  %1855 = vmatprep.subr.bf16.mxu0 %v9474_v54  ;;  %v10559_v53 = vld [vmem:[%s14551_s13 + $0x164] ss:$16 sps:$4 sm:$0xff]   ;;  %v10562_v54 = vld [vmem:[%s14551_s13 + $0x16c] ss:$16 sps:$4 sm:$0xff]  }
 0x2ca   : > { %1688 = vmatprep.mubr.bf16.mxu1 %v10997_v38  ;;  %1761 = vmatprep.mubr.bf16.mxu0 %v10997_v38 }
 0x2cc   : > { %1783 = vmatpush1.bf16.msra.mxu1 %v9471_v59  ;;  %1856 = vmatpush1.bf16.msra.mxu0 %v9473_v60  ;;  %v10563_v59 = vld [vmem:[%s14551_s13 + $0x180] ss:$16 sps:$4 sm:$0xff]   ;;  %v10566_v60 = vld [vmem:[%s14551_s13 + $0x188] ss:$16 sps:$4 sm:$0xff]  }
 0x2cd   : > { %1784 = vmatprep.subr.bf16.mxu1 %v9480_v62  ;;  %1857 = vmatprep.subr.bf16.mxu0 %v9482_v63  ;;  %v10571_v62 = vld [vmem:[%s14551_s13 + $0x1a4] ss:$16 sps:$4 sm:$0xff]   ;;  %v10574_v63 = vld [vmem:[%s14551_s13 + $0x1ac] ss:$16 sps:$4 sm:$0xff]  }
 0x2cf   : > { %1689 = vmatmul.mubr.bf16.gmra.mrb[20].mxu1 %v11383_v32  ;;  %1762 = vmatmul.mubr.bf16.gmra.mrb[28].mxu0 %v11383_v32 }
 0x2d0   : > { %1785 = vmatpush1.bf16.msra.mxu1 %v9479_v61  ;;  %1858 = vmatpush1.bf16.msra.mxu0 %v9481_v0  ;;  %v10575_v61 = vld [vmem:[%s14551_s13 + $0x1c0] ss:$16 sps:$4 sm:$0xff]   ;;  %v10578_v0 = vld [vmem:[%s14551_s13 + $0x1c8] ss:$16 sps:$4 sm:$0xff]  }
 0x2d1   : > { %1786 = vmatprep.subr.bf16.mxu1 %v9488_v3  ;;  %1859 = vmatprep.subr.bf16.mxu0 %v9490_v8  ;;  %v10581_v3 = vld [vmem:[%s14551_s13 + $0x1e0] ss:$16 sps:$4 sm:$0xff]   ;;  %v10583_v8 = vld [vmem:[%s14551_s13 + $0x1e4] ss:$16 sps:$4 sm:$0xff]  }
 0x2d2   : > { %1804 = vmatprep.mubr.bf16.mxu1 %v10997_v38  ;;  %1877 = vmatprep.mubr.bf16.mxu0 %v10997_v38 }
 0x2d4   : > { %1787 = vmatpush1.bf16.msra.mxu1 %v9487_v9  ;;  %1860 = vmatpush1.bf16.msra.mxu0 %v9489_v10  ;;  %v10584_v9 = vld [vmem:[%s14551_s13 + $0x1e8] ss:$16 sps:$4 sm:$0xff]   ;;  %v10586_v10 = vld [vmem:[%s14551_s13 + $0x1ec] ss:$16 sps:$4 sm:$0xff]  }
 0x2d7   : > { %1805 = vmatmul.mubr.bf16.vlgmr.msra.gmra.mrb[24].mxu1 %v11353_v7  ;;  %1878 = vmatmul.mubr.bf16.vlgmr.msra.gmra.mrb[32].mxu0 %v11353_v7  ;;  %v10496_v7 = vld [vmem:[%s14551_s13 + $0xc] ss:$16 sps:$4 sm:$0xff]  }
 0x2d8   : > { %1814 = vmatprep.mubr.bf16.mxu1 %v10997_v38  ;;  %1887 = vmatprep.mubr.bf16.mxu0 %v10997_v38 }
 0x2d9   : > { %4224 = vmatprep.subr.bf16.mxu0 %v10496_v7  ;;  %v10592_v7 = vld [vmem:[%s14551_s13 + $0x20c] ss:$16 sps:$4 sm:$0xff]  }
 0x2df   : > { %1815 = vmatmul.mubr.bf16.gmra.mrb[28].mxu1 %v11351_v4  ;;  %1888 = vmatmul.mubr.bf16.gmra.mrb[36].mxu0 %v11351_v4  ;;  %v10493_v4 = vld [vmem:[%s14551_s13 + $0x4] ss:$16 sps:$4 sm:$0xff]  }
 0x2e0   : > { %1824 = vmatprep.mubr.bf16.mxu1 %v10997_v38  ;;  %1897 = vmatprep.mubr.bf16.mxu0 %v10997_v38 }
 0x2e1   : > { %4060 = vmatprep.subr.bf16.mxu1 %v10493_v4  ;;  %v10589_v4 = vld [vmem:[%s14551_s13 + $0x204] ss:$16 sps:$4 sm:$0xff]  }
 0x2e2   : > { %4061 = vmatpush1.bf16.msra.mxu1 %v10491_v11  ;;  %v1919_v11 = vlaneseq }
 0x2e3   : > { %4062 = vmatprep.subr.bf16.mxu1 %v10499_v12 }
 0x2e6   : > { %4063 = vmatpush1.bf16.msra.mxu1 %v10497_v14  ;;  %v1300_v14 = vld [vmem:[%s14549_s11] sm:$0xff] }
 0x2e7   : > { %1825 = vmatmul.mubr.bf16.gmra.mrb[32].mxu1 %v11385_v35  ;;  %1898 = vmatmul.mubr.bf16.gmra.mrb[40].mxu0 %v11385_v35  ;;  %v10530_v35 = vld [vmem:[%s14551_s13 + $0xc8] ss:$16 sps:$4 sm:$0xff]  }
 0x2e8   : > { %1834 = vmatprep.mubr.bf16.mxu1 %v10997_v38  ;;  %1907 = vmatprep.mubr.bf16.mxu0 %v10997_v38  ;;  %v10494_v38 = vld [vmem:[%s14551_s13 + $0x8] ss:$16 sps:$4 sm:$0xff]  }
 0x2e9   : > { %4225 = vmatpush1.bf16.msra.mxu0 %v10494_v38  ;;  %4064 = vmatprep.subr.bf16.mxu1 %v10505_v16  ;;  %v1920_v38 = vshrl.u32 %v1919_v11, 7 }
 0x2ea   : > { %4226 = vmatprep.subr.bf16.mxu0 %v10502_v13  ;;  %4065 = vmatpush1.bf16.msra.mxu1 %v10503_v18 }
 0x2eb   : > { %4066 = vmatprep.subr.bf16.mxu1 %v10511_v20  ;;  %v11659_v12 = vsub.s32 0, %v1920_v38  ;;  %v11661_v13 = vsub.s32 2, %v1920_v38  ;;  %v11668_v16 = vsub.s32 3, %v1920_v38  ;;  %v11673_v18 = vsub.s32 4, %v1920_v38 }
 0x2ed   : > { %4227 = vmatpush1.bf16.msra.mxu0 %v10500_v15  ;;  %v11666_v15 = vsub.s32 1, %v1920_v38  ;;  %v11678_v20 = vrot.slane %v1300_v14, %v11659_v12 }
 0x2ee   : > { %4228 = vmatprep.subr.bf16.mxu0 %v10508_v17  ;;  %4067 = vmatpush1.bf16.msra.mxu1 %v10509_v22  ;;  %v1301_v17 = vld [vmem:[%s14550_s12] sm:$0xff]  ;;  %v11683_v22 = vsub.s32 5, %v1920_v38 }
 0x2ef   : > { %1835 = vmatmul.mubr.bf16.gmra.mrb[36].mxu1 %v11383_v32  ;;  %1908 = vmatmul.mubr.bf16.gmra.mrb[44].mxu0 %v11383_v32  ;;  %v10529_v32 = vld [vmem:[%s14551_s13 + $0xc4] ss:$16 sps:$4 sm:$0xff]  }
 0x2f0   : > { %4068 = vmatprep.subr.bf16.mxu1 %v10517_v24  ;;  %v11688_v24 = vrot.slane %v1300_v14, %v11666_v15 }
 0x2f1   : > { %4229 = vmatpush1.bf16.msra.mxu0 %v10506_v19  ;;  %v11675_v19 = vsub.s32 6, %v1920_v38 }
 0x2f2   : > { %4230 = vmatprep.subr.bf16.mxu0 %v10514_v21  ;;  %4069 = vmatpush1.bf16.msra.mxu1 %v10515_v26  ;;  %v11681_v21 = vrot.slane %v1300_v14, %v11661_v13  ;;  %v10998_v26 = vmov 1966171168  }
 0x2f3   : > { %4070 = vmatprep.subr.bf16.mxu1 %v10523_v28  ;;  %v11694_v28 = vrot.slane %v1301_v17, %v11659_v12 }
 0x2f5   : > { %4231 = vmatpush1.bf16.msra.mxu0 %v10512_v23  ;;  %v11685_v23 = vsub.s32 7, %v1920_v38 }
 0x2f6   : > { %4232 = vmatprep.subr.bf16.mxu0 %v10520_v25  ;;  %4071 = vmatpush1.bf16.msra.mxu1 %v10521_v30  ;;  %v11691_v25 = vrot.slane %v1300_v14, %v11668_v16 }
 0x2f7   : > { %4072 = vmatprep.subr.bf16.mxu1 %v10529_v32  ;;  %v11700_v32 = vrot.slane %v1301_v17, %v11666_v15 }
 0x2f9   : > { %4233 = vmatpush1.bf16.msra.mxu0 %v10518_v27  ;;  %v2422_v27 = vunpack.c.l.s4 %v10998_v26 }
 0x2fa   : > { %4234 = vmatprep.subr.bf16.mxu0 %v10526_v29  ;;  %4073 = vmatpush1.bf16.msra.mxu1 %v10527_v34  ;;  %v11697_v29 = vrot.slane %v1301_v17, %v11661_v13  ;;  %v11706_v34 = vrot.slane %v1300_v14, %v11673_v18 }
 0x2fb   : > { %4074 = vmatprep.subr.bf16.mxu1 %v10535_v36 }
 0x2fd   : > { %4235 = vmatpush1.bf16.msra.mxu0 %v10524_v31 }
 0x2fe   : > { %4236 = vmatprep.subr.bf16.mxu0 %v10532_v33  ;;  %4075 = vmatpush1.bf16.msra.mxu1 %v10533_v39  ;;  %v11703_v33 = vrot.slane %v1301_v17, %v11668_v16 }
 0x2ff   : > { %4076 = vmatprep.subr.bf16.mxu1 %v10541_v41  ;;  %v11714_v41 = vrot.slane %v1300_v14, %v11683_v22 }
 0x301   : > { %4237 = vmatpush1.bf16.msra.mxu0 %v10530_v35  ;;  %v11709_v35 = vrot.slane %v1300_v14, %v11675_v19 }
 0x302   : > { %4238 = vmatprep.subr.bf16.mxu0 %v10538_v37  ;;  %4077 = vmatpush1.bf16.msra.mxu1 %v10539_v43 }
 0x303   : > { %4078 = vmatprep.subr.bf16.mxu1 %v10547_v45 }
 0x305   : > { %4239 = vmatpush1.bf16.msra.mxu0 %v10536_v40 }
 0x306   : > { %4240 = vmatprep.subr.bf16.mxu0 %v10544_v42  ;;  %4079 = vmatpush1.bf16.msra.mxu1 %v10545_v47  ;;  %v11717_v42 = vrot.slane %v1300_v14, %v11685_v23  ;;  %v2423_v47 = vunpack.c.0.s8 %v2422_v27 }
 0x307   : > { %4080 = vmatprep.subr.bf16.mxu1 %v10553_v49 }
 0x309   : > { %4241 = vmatpush1.bf16.msra.mxu0 %v10542_v44 }
 0x30a   : > { %4242 = vmatprep.subr.bf16.mxu0 %v10550_v46  ;;  %4081 = vmatpush1.bf16.msra.mxu1 %v10551_v51 }
 0x30b   : > { %4082 = vmatprep.subr.bf16.mxu1 %v10559_v53 }
 0x30d   : > { %4243 = vmatpush1.bf16.msra.mxu0 %v10548_v48  ;;  %v11722_v48 = vrot.slane %v1301_v17, %v11673_v18 }
 0x30e   : > { %4244 = vmatprep.subr.bf16.mxu0 %v10556_v50  ;;  %4083 = vmatpush1.bf16.msra.mxu1 %v10557_v55 }
 0x30f   : > { %4084 = vmatprep.subr.bf16.mxu1 %v10565_v57 }
 0x311   : > { %4245 = vmatpush1.bf16.msra.mxu0 %v10554_v52 }
 0x312   : > { %4246 = vmatprep.subr.bf16.mxu0 %v10562_v54  ;;  %4085 = vmatpush1.bf16.msra.mxu1 %v10563_v59 }
 0x313   : > { %4086 = vmatprep.subr.bf16.mxu1 %v10571_v62  ;;  %v11735_v62 = vrot.slane %v1301_v17, %v11675_v19 }
 0x315   : > { %4247 = vmatpush1.bf16.msra.mxu0 %v10560_v56 }
 0x316   : > { %4248 = vmatprep.subr.bf16.mxu0 %v10568_v58  ;;  %4087 = vmatpush1.bf16.msra.mxu1 %v10569_v1 }
 0x317   : > { %4088 = vmatprep.subr.bf16.mxu1 %v10577_v5  ;;  %v11742_v5 = vsub.s32 %v2423_v47, %v1920_v38 }
 0x319   : > { %4249 = vmatpush1.bf16.msra.mxu0 %v10566_v60 }
 0x31a   : > { %4250 = vmatprep.subr.bf16.mxu0 %v10574_v63  ;;  %4089 = vmatpush1.bf16.msra.mxu1 %v10575_v61  ;;  %v11738_v63 = vrot.slane %v1301_v17, %v11683_v22 }
 0x31b   : > { %4090 = vmatprep.subr.bf16.mxu1 %v10583_v8 }
 0x31d   : > { %4251 = vmatpush1.bf16.msra.mxu0 %v10572_v2 }
 0x31e   : > { %4252 = vmatprep.subr.bf16.mxu0 %v10580_v6  ;;  %4091 = vmatpush1.bf16.msra.mxu1 %v10581_v3  ;;  %v11745_v6 = vrot.slane %v1301_v17, %v11685_v23 }
 0x31f   : > { %4101 = vmatprep.subr.bf16.mxu1 %v10589_v4 }
 0x321   : > { %4253 = vmatpush1.bf16.msra.mxu0 %v10578_v0 }
 0x322   : > { %4254 = vmatprep.subr.bf16.mxu0 %v10586_v10 }
 0x325   : > { %4255 = vmatpush1.bf16.msra.mxu0 %v10584_v9 }
 0x326   : > { %4265 = vmatprep.subr.bf16.mxu0 %v10592_v7 }
 0x38a   : > { %v1660_v30 = vpop.f32.mrb[8].mxu1  ;;  %v1733_v31 = vpop.f32.mrb[16].mxu0 }
 0x38b   : > { %v1959_v36 = vmul.f32 %v11678_v20, %v1660_v30  ;;  %v1961_v37 = vmul.f32 %v11681_v21, %v1733_v31  ;;  %v1662_v39 = vpop.f32.mrb[9].mxu1  ;;  %v1735_v40 = vpop.f32.mrb[17].mxu0 }
 0x38c   : > { %v1960_v43 = vmul.f32 %v11688_v24, %v1662_v39  ;;  %v1962_v44 = vmul.f32 %v11691_v25, %v1735_v40  ;;  %v1664_v45 = vpop.f32.mrb[10].mxu1  ;;  %v1737_v46 = vpop.f32.mrb[18].mxu0 }
 0x38d   : > { %v2064_v49 = vadd.f32 %v11694_v28, %v1959_v36  ;;  %v2066_v50 = vadd.f32 %v11697_v29, %v1961_v37  ;;  %v1967_v51 = vmul.f32 %v11678_v20, %v1664_v45  ;;  %v1969_v52 = vmul.f32 %v11681_v21, %v1737_v46  ;;  %v1666_v53 = vpop.f32.mrb[11].mxu1  ;;  %v1739_v54 = vpop.f32.mrb[19].mxu0 }
 0x38e   : > { %v2065_v55 = vadd.f32 %v11700_v32, %v1960_v43  ;;  %v2067_v56 = vadd.f32 %v11703_v33, %v1962_v44  ;;  %v1968_v57 = vmul.f32 %v11688_v24, %v1666_v53  ;;  %v1970_v58 = vmul.f32 %v11691_v25, %v1739_v54 }
 0x38f   : > { %v2072_v59 = vadd.f32 %v11694_v28, %v1967_v51  ;;  %v2074_v60 = vadd.f32 %v11697_v29, %v1969_v52  ;;  %v2128_v61 = vmax.f32 %v2064_v49, 0.0  ;;  %v2130_v0 = vmax.f32 %v2066_v50, 0.0 }
 0x390   : > { %v2073_v1 = vadd.f32 %v11700_v32, %v1968_v57  ;;  %v2075_v2 = vadd.f32 %v11703_v33, %v1970_v58  ;;  %v2129_v9 = vmax.f32 %v2065_v55, 0.0  ;;  %v2131_v10 = vmax.f32 %v2067_v56, 0.0 }
 0x391   : > { %v2136_v3 = vmax.f32 %v2072_v59, 0.0  ;;  %v2138_v8 = vmax.f32 %v2074_v60, 0.0 }
 0x392   : > { %v2137_v4 = vmax.f32 %v2073_v1, 0.0  ;;  %v2139_v7 = vmax.f32 %v2075_v2, 0.0  ;;  %v1670_v11 = vpop.f32.mrb[12].mxu1  ;;  %v1743_v14 = vpop.f32.mrb[20].mxu0 }
 0x393   : > { %v2299_v26 = vmax.f32 %v2128_v61, %v2136_v3  ;;  %v2325_v27 = vmax.f32 %v2130_v0, %v2138_v8  ;;  %v1975_v30 = vmul.f32 %v11678_v20, %v1670_v11  ;;  %v1977_v38 = vmul.f32 %v11681_v21, %v1743_v14  ;;  %v1672_v31 = vpop.f32.mrb[13].mxu1  ;;  %v1745_v36 = vpop.f32.mrb[21].mxu0 }
 0x394   : > { %v2312_v17 = vmax.f32 %v2129_v9, %v2137_v4  ;;  %v2338_v37 = vmax.f32 %v2131_v10, %v2139_v7  ;;  %v1976_v39 = vmul.f32 %v11688_v24, %v1672_v31  ;;  %v1978_v40 = vmul.f32 %v11691_v25, %v1745_v36  ;;  %v1674_v43 = vpop.f32.mrb[14].mxu1  ;;  %v1747_v44 = vpop.f32.mrb[22].mxu0 }
 0x395   : > { %v2080_v45 = vadd.f32 %v11694_v28, %v1975_v30  ;;  %v2082_v46 = vadd.f32 %v11697_v29, %v1977_v38  ;;  %v1983_v47 = vmul.f32 %v11678_v20, %v1674_v43  ;;  %v1985_v49 = vmul.f32 %v11681_v21, %v1747_v44  ;;  %v1676_v50 = vpop.f32.mrb[15].mxu1  ;;  %v1749_v51 = vpop.f32.mrb[23].mxu0 }
 0x396   : > { %v2081_v52 = vadd.f32 %v11700_v32, %v1976_v39  ;;  %v2083_v53 = vadd.f32 %v11703_v33, %v1978_v40  ;;  %v1984_v54 = vmul.f32 %v11688_v24, %v1676_v50  ;;  %v1986_v55 = vmul.f32 %v11691_v25, %v1749_v51 }
 0x397   : > { %v2144_v56 = vmax.f32 %v2080_v45, 0.0  ;;  %v2146_v57 = vmax.f32 %v2082_v46, 0.0  ;;  %v2088_v58 = vadd.f32 %v11694_v28, %v1983_v47  ;;  %v2090_v59 = vadd.f32 %v11697_v29, %v1985_v49 }
 0x398   : > { %v2145_v60 = vmax.f32 %v2081_v52, 0.0  ;;  %v2147_v1 = vmax.f32 %v2083_v53, 0.0  ;;  %v2089_v2 = vadd.f32 %v11700_v32, %v1984_v54  ;;  %v2091_v61 = vadd.f32 %v11703_v33, %v1986_v55 }
 0x399   : > { %v2300_v0 = vmax.f32 %v2299_v26, %v2144_v56  ;;  %v2326_v3 = vmax.f32 %v2325_v27, %v2146_v57  ;;  %v2152_v8 = vmax.f32 %v2088_v58, 0.0  ;;  %v2154_v9 = vmax.f32 %v2090_v59, 0.0 }
 0x39a   : > { %v2313_v10 = vmax.f32 %v2312_v17, %v2145_v60  ;;  %v2339_v4 = vmax.f32 %v2338_v37, %v2147_v1  ;;  %v2153_v7 = vmax.f32 %v2089_v2, 0.0  ;;  %v2155_v11 = vmax.f32 %v2091_v61, 0.0  ;;  %v1680_v14 = vpop.f32.mrb[16].mxu1  ;;  %v1753_v30 = vpop.f32.mrb[24].mxu0 }
 0x39b   : > { %v2301_v38 = vmax.f32 %v2300_v0, %v2152_v8  ;;  %v2327_v31 = vmax.f32 %v2326_v3, %v2154_v9  ;;  %v1991_v36 = vmul.f32 %v11678_v20, %v1680_v14  ;;  %v1993_v39 = vmul.f32 %v11681_v21, %v1753_v30  ;;  %v1682_v40 = vpop.f32.mrb[17].mxu1  ;;  %v1755_v43 = vpop.f32.mrb[25].mxu0 }
 0x39c   : > { %v2314_v44 = vmax.f32 %v2313_v10, %v2153_v7  ;;  %v2340_v45 = vmax.f32 %v2339_v4, %v2155_v11  ;;  %v1992_v26 = vmul.f32 %v11688_v24, %v1682_v40  ;;  %v1994_v27 = vmul.f32 %v11691_v25, %v1755_v43  ;;  %v1684_v17 = vpop.f32.mrb[18].mxu1  ;;  %v1757_v37 = vpop.f32.mrb[26].mxu0 }
 0x39d   : > { %v2096_v46 = vadd.f32 %v11694_v28, %v1991_v36  ;;  %v2098_v47 = vadd.f32 %v11697_v29, %v1993_v39  ;;  %v1999_v49 = vmul.f32 %v11678_v20, %v1684_v17  ;;  %v2001_v50 = vmul.f32 %v11681_v21, %v1757_v37  ;;  %v1686_v51 = vpop.f32.mrb[19].mxu1  ;;  %v1759_v52 = vpop.f32.mrb[27].mxu0 }
 0x39e   : > { %v2097_v53 = vadd.f32 %v11700_v32, %v1992_v26  ;;  %v2099_v54 = vadd.f32 %v11703_v33, %v1994_v27  ;;  %v2000_v55 = vmul.f32 %v11688_v24, %v1686_v51  ;;  %v2002_v56 = vmul.f32 %v11691_v25, %v1759_v52 }
 0x39f   : > { %v2160_v57 = vmax.f32 %v2096_v46, 0.0  ;;  %v2162_v58 = vmax.f32 %v2098_v47, 0.0  ;;  %v2104_v59 = vadd.f32 %v11694_v28, %v1999_v49  ;;  %v2106_v60 = vadd.f32 %v11697_v29, %v2001_v50 }
 0x3a0   : > { %v2161_v1 = vmax.f32 %v2097_v53, 0.0  ;;  %v2163_v2 = vmax.f32 %v2099_v54, 0.0  ;;  %v2105_v61 = vadd.f32 %v11700_v32, %v2000_v55  ;;  %v2107_v0 = vadd.f32 %v11703_v33, %v2002_v56 }
 0x3a1   : > { %v2302_v3 = vmax.f32 %v2301_v38, %v2160_v57  ;;  %v2328_v8 = vmax.f32 %v2327_v31, %v2162_v58  ;;  %v2168_v9 = vmax.f32 %v2104_v59, 0.0  ;;  %v2170_v10 = vmax.f32 %v2106_v60, 0.0 }
 0x3a2   : > { %v2315_v4 = vmax.f32 %v2314_v44, %v2161_v1  ;;  %v2341_v7 = vmax.f32 %v2340_v45, %v2163_v2  ;;  %v2169_v11 = vmax.f32 %v2105_v61, 0.0  ;;  %v2171_v14 = vmax.f32 %v2107_v0, 0.0  ;;  %v1690_v30 = vpop.f32.mrb[20].mxu1  ;;  %v1763_v36 = vpop.f32.mrb[28].mxu0 }
 0x3a3   : > { %v2303_v39 = vmax.f32 %v2302_v3, %v2168_v9  ;;  %v2329_v40 = vmax.f32 %v2328_v8, %v2170_v10  ;;  %v2007_v43 = vmul.f32 %v11678_v20, %v1690_v30  ;;  %v2009_v26 = vmul.f32 %v11681_v21, %v1763_v36  ;;  %v1692_v27 = vpop.f32.mrb[21].mxu1  ;;  %v1765_v17 = vpop.f32.mrb[29].mxu0 }
 0x3a4   : > { %v2316_v37 = vmax.f32 %v2315_v4, %v2169_v11  ;;  %v2342_v46 = vmax.f32 %v2341_v7, %v2171_v14  ;;  %v2008_v38 = vmul.f32 %v11688_v24, %v1692_v27  ;;  %v2010_v31 = vmul.f32 %v11691_v25, %v1765_v17  ;;  %v1694_v44 = vpop.f32.mrb[22].mxu1  ;;  %v1767_v45 = vpop.f32.mrb[30].mxu0 }
 0x3a5   : > { %v2112_v47 = vadd.f32 %v11694_v28, %v2007_v43  ;;  %v2114_v49 = vadd.f32 %v11697_v29, %v2009_v26  ;;  %v2015_v50 = vmul.f32 %v11678_v20, %v1694_v44  ;;  %v2017_v51 = vmul.f32 %v11681_v21, %v1767_v45  ;;  %v1696_v52 = vpop.f32.mrb[23].mxu1  ;;  %v1769_v53 = vpop.f32.mrb[31].mxu0 }
 0x3a6   : > { %v2113_v54 = vadd.f32 %v11700_v32, %v2008_v38  ;;  %v2115_v55 = vadd.f32 %v11703_v33, %v2010_v31  ;;  %v2016_v56 = vmul.f32 %v11688_v24, %v1696_v52  ;;  %v2018_v57 = vmul.f32 %v11691_v25, %v1769_v53 }
 0x3a7   : > { %v2176_v58 = vmax.f32 %v2112_v47, 0.0  ;;  %v2178_v59 = vmax.f32 %v2114_v49, 0.0  ;;  %v2120_v60 = vadd.f32 %v11694_v28, %v2015_v50  ;;  %v2122_v1 = vadd.f32 %v11697_v29, %v2017_v51 }
 0x3a8   : > { %v2177_v2 = vmax.f32 %v2113_v54, 0.0  ;;  %v2179_v20 = vmax.f32 %v2115_v55, 0.0  ;;  %v2121_v21 = vadd.f32 %v11700_v32, %v2016_v56  ;;  %v2123_v61 = vadd.f32 %v11703_v33, %v2018_v57 }
 0x3a9   : > { %v2304_v0 = vmax.f32 %v2303_v39, %v2176_v58  ;;  %v2330_v3 = vmax.f32 %v2329_v40, %v2178_v59  ;;  %v2184_v8 = vmax.f32 %v2120_v60, 0.0  ;;  %v2186_v9 = vmax.f32 %v2122_v1, 0.0 }
 0x3aa   : > { %v2317_v10 = vmax.f32 %v2316_v37, %v2177_v2  ;;  %v2343_v24 = vmax.f32 %v2342_v46, %v2179_v20  ;;  %v2185_v4 = vmax.f32 %v2121_v21, 0.0  ;;  %v2187_v25 = vmax.f32 %v2123_v61, 0.0  ;;  %v1806_v7 = vpop.f32.mrb[24].mxu1  ;;  %v1879_v11 = vpop.f32.mrb[32].mxu0 }
 0x3ab   : > { %v2305_v14 = vmax.f32 %v2304_v0, %v2184_v8  ;;  %v2331_v28 = vmax.f32 %v2330_v3, %v2186_v9  ;;  %v1963_v29 = vmul.f32 %v11706_v34, %v1806_v7  ;;  %v1965_v30 = vmul.f32 %v11709_v35, %v1879_v11  ;;  %v1808_v36 = vpop.f32.mrb[25].mxu1  ;;  %v1881_v32 = vpop.f32.mrb[33].mxu0 }
 0x3ac   : > { %v2318_v43 = vmax.f32 %v2317_v10, %v2185_v4  ;;  %v2344_v33 = vmax.f32 %v2343_v24, %v2187_v25  ;;  %v1964_v39 = vmul.f32 %v11714_v41, %v1808_v36  ;;  %v1966_v40 = vmul.f32 %v11717_v42, %v1881_v32  ;;  %v1810_v26 = vpop.f32.mrb[26].mxu1  ;;  %v1883_v27 = vpop.f32.mrb[34].mxu0 }
 0x3ad   : > { %v2306_v17 = vrot.slane %v2305_v14, 4  ;;  %v2332_v37 = vrot.slane %v2331_v28, 4  ;;  %v2068_v46 = vadd.f32 %v11722_v48, %v1963_v29  ;;  %v2070_v38 = vadd.f32 %v11735_v62, %v1965_v30  ;;  %v1812_v31 = vpop.f32.mrb[27].mxu1  ;;  %v1885_v44 = vpop.f32.mrb[35].mxu0 }
 0x3ae   : > { %v2319_v45 = vrot.slane %v2318_v43, 4  ;;  %v2345_v47 = vrot.slane %v2344_v33, 4  ;;  %v2069_v49 = vadd.f32 %v11738_v63, %v1964_v39  ;;  %v2071_v50 = vadd.f32 %v11745_v6, %v1966_v40 }
 0x3af   : > { %v2307_v51 = vmax.f32 %v2305_v14, %v2306_v17  ;;  %v2333_v52 = vmax.f32 %v2331_v28, %v2332_v37  ;;  %v2132_v53 = vmax.f32 %v2068_v46, 0.0  ;;  %v2134_v54 = vmax.f32 %v2070_v38, 0.0 }
 0x3b0   : > { %v2320_v55 = vmax.f32 %v2318_v43, %v2319_v45  ;;  %v2346_v56 = vmax.f32 %v2344_v33, %v2345_v47  ;;  %v2133_v57 = vmax.f32 %v2069_v49, 0.0  ;;  %v2135_v58 = vmax.f32 %v2071_v50, 0.0 }
 0x3b1   : > { %v2308_v59 = vrot.slane %v2307_v51, 2  ;;  %v2334_v60 = vrot.slane %v2333_v52, 2  ;;  %v1971_v1 = vmul.f32 %v11706_v34, %v1810_v26  ;;  %v1973_v2 = vmul.f32 %v11709_v35, %v1883_v27 }
 0x3b2   : > { %v2321_v20 = vrot.slane %v2320_v55, 2  ;;  %v2347_v21 = vrot.slane %v2346_v56, 2  ;;  %v1972_v61 = vmul.f32 %v11714_v41, %v1812_v31  ;;  %v1974_v0 = vmul.f32 %v11717_v42, %v1885_v44  ;;  %v1816_v3 = vpop.f32.mrb[28].mxu1  ;;  %v1889_v8 = vpop.f32.mrb[36].mxu0 }
 0x3b3   : > { %v2309_v9 = vmax.f32 %v2307_v51, %v2308_v59  ;;  %v2335_v10 = vmax.f32 %v2333_v52, %v2334_v60  ;;  %v2076_v24 = vadd.f32 %v11722_v48, %v1971_v1  ;;  %v2078_v4 = vadd.f32 %v11735_v62, %v1973_v2  ;;  %v1818_v25 = vpop.f32.mrb[29].mxu1  ;;  %v1891_v7 = vpop.f32.mrb[37].mxu0 }
 0x3b4   : > { %v2322_v11 = vmax.f32 %v2320_v55, %v2321_v20  ;;  %v2348_v14 = vmax.f32 %v2346_v56, %v2347_v21  ;;  %v2077_v28 = vadd.f32 %v11738_v63, %v1972_v61  ;;  %v2079_v29 = vadd.f32 %v11745_v6, %v1974_v0  ;;  %v1820_v30 = vpop.f32.mrb[30].mxu1  ;;  %v1893_v36 = vpop.f32.mrb[38].mxu0 }
 0x3b5   : > { %v2310_v32 = vrot.slane %v2309_v9, 1  ;;  %v2336_v43 = vrot.slane %v2335_v10, 1  ;;  %v2140_v33 = vmax.f32 %v2076_v24, 0.0  ;;  %v2142_v39 = vmax.f32 %v2078_v4, 0.0  ;;  %v1822_v40 = vpop.f32.mrb[31].mxu1  ;;  %v1895_v26 = vpop.f32.mrb[39].mxu0 }
 0x3b6   : > { %v2323_v27 = vrot.slane %v2322_v11, 1  ;;  %v2349_v17 = vrot.slane %v2348_v14, 1  ;;  %v2141_v37 = vmax.f32 %v2077_v28, 0.0  ;;  %v2143_v46 = vmax.f32 %v2079_v29, 0.0 }
 0x3b7   : > { %v2311_v38 = vmax.f32 %v2309_v9, %v2310_v32  ;;  %v2337_v31 = vmax.f32 %v2335_v10, %v2336_v43  ;;  %v2351_v44 = vmax.f32 %v2132_v53, %v2140_v33  ;;  %v2377_v45 = vmax.f32 %v2134_v54, %v2142_v39 }
 0x3b8   : > { %v2324_v47 = vmax.f32 %v2322_v11, %v2323_v27  ;;  %v2350_v49 = vmax.f32 %v2348_v14, %v2349_v17  ;;  %v2364_v50 = vmax.f32 %v2133_v57, %v2141_v37  ;;  %v2390_v51 = vmax.f32 %v2135_v58, %v2143_v46 }
 0x3b9   : > { %v1979_v52 = vmul.f32 %v11706_v34, %v1816_v3  ;;  %v1981_v55 = vmul.f32 %v11709_v35, %v1889_v8  ;;  %v1980_v56 = vmul.f32 %v11714_v41, %v1818_v25  ;;  %v1982_v59 = vmul.f32 %v11717_v42, %v1891_v7 }
 0x3ba   : > { %v2417_v60 = vcombine.low %v2311_v38, %v2324_v47  ;;  %v2418_v1 = vcombine.low %v2337_v31, %v2350_v49  ;;  %v1987_v2 = vmul.f32 %v11706_v34, %v1820_v30  ;;  %v1989_v20 = vmul.f32 %v11709_v35, %v1893_v36  ;;  %v1826_v53 = vpop.f32.mrb[32].mxu1  ;;  %v1899_v54 = vpop.f32.mrb[40].mxu0 }
 0x3bb   : > { %v2084_v21 = vadd.f32 %v11722_v48, %v1979_v52  ;;  %v2086_v57 = vadd.f32 %v11735_v62, %v1981_v55  ;;  %v2085_v58 = vadd.f32 %v11738_v63, %v1980_v56  ;;  %v2087_v61 = vadd.f32 %v11745_v6, %v1982_v59  ;;  %v1828_v0 = vpop.f32.mrb[33].mxu1  ;;  %v1901_v3 = vpop.f32.mrb[41].mxu0 }
 0x3bc   : > { %v11822_v8 = vrot.slane %v2417_v60, %v11742_v5  ;;  %v11825_v9 = vrot.slane %v2418_v1, %v11742_v5  ;;  %v2092_v10 = vadd.f32 %v11722_v48, %v1987_v2  ;;  %v2094_v24 = vadd.f32 %v11735_v62, %v1989_v20  ;;  %v1830_v4 = vpop.f32.mrb[34].mxu1  ;;  %v1903_v25 = vpop.f32.mrb[42].mxu0 }
 0x3bd   : > { %v2148_v7 = vmax.f32 %v2084_v21, 0.0  ;;  %v2150_v11 = vmax.f32 %v2086_v57, 0.0  ;;  %v2149_v14 = vmax.f32 %v2085_v58, 0.0  ;;  %v2151_v28 = vmax.f32 %v2087_v61, 0.0  ;;  %v1832_v29 = vpop.f32.mrb[35].mxu1  ;;  %v1905_v30 = vpop.f32.mrb[43].mxu0 }
 0x3be   : > { %v2449_v36 = vcombine.low %v11822_v8, %v11825_v9  ;;  %v2156_v32 = vmax.f32 %v2092_v10, 0.0  ;;  %v2158_v43 = vmax.f32 %v2094_v24, 0.0  ;;  %v1988_v33 = vmul.f32 %v11714_v41, %v1822_v40  ;;  %v10590_v8 = vld [vmem:[%s14551_s13 + $0x208] ss:$16 sps:$4 sm:$0xff]  }
 0x3bf   : > { %v2352_v39 = vmax.f32 %v2351_v44, %v2148_v7  ;;  %v2378_v27 = vmax.f32 %v2377_v45, %v2150_v11  ;;  %v2365_v17 = vmax.f32 %v2364_v50, %v2149_v14  ;;  %v2391_v37 = vmax.f32 %v2390_v51, %v2151_v28 }
 0x3c0   : > { %v2093_v46 = vadd.f32 %v11738_v63, %v1988_v33  ;;  %v1990_v38 = vmul.f32 %v11717_v42, %v1895_v26  ;;  %v1995_v31 = vmul.f32 %v11706_v34, %v1826_v53  ;;  %v1997_v52 = vmul.f32 %v11709_v35, %v1899_v54 }
 0x3c1   : > { %v2353_v47 = vmax.f32 %v2352_v39, %v2156_v32  ;;  %v2379_v49 = vmax.f32 %v2378_v27, %v2158_v43  ;;  %v1996_v55 = vmul.f32 %v11714_v41, %v1828_v0  ;;  %v1998_v44 = vmul.f32 %v11717_v42, %v1901_v3 }
 0x3c2   : > { %v2157_v56 = vmax.f32 %v2093_v46, 0.0  ;;  %v2095_v59 = vadd.f32 %v11745_v6, %v1990_v38  ;;  %v2100_v40 = vadd.f32 %v11722_v48, %v1995_v31  ;;  %v1836_v45 = vpop.f32.mrb[36].mxu1  ;;  %v1909_v50 = vpop.f32.mrb[44].mxu0  ;;  %v2102_v51 = vadd.f32 %v11735_v62, %v1997_v52 }
 0x3c3   : > { %v2101_v26 = vadd.f32 %v11738_v63, %v1996_v55  ;;  %v2003_v60 = vmul.f32 %v11706_v34, %v1830_v4  ;;  %v2005_v1 = vmul.f32 %v11709_v35, %v1903_v25  ;;  %v1838_v2 = vpop.f32.mrb[37].mxu1  ;;  %v1911_v20 = vpop.f32.mrb[45].mxu0  ;;  %v2103_v57 = vadd.f32 %v11745_v6, %v1998_v44 }
 0x3c4   : > { %v2366_v53 = vmax.f32 %v2365_v17, %v2157_v56  ;;  %v2159_v54 = vmax.f32 %v2095_v59, 0.0  ;;  %v2164_v21 = vmax.f32 %v2100_v40, 0.0  ;;  %v1840_v58 = vpop.f32.mrb[38].mxu1  ;;  %v1913_v61 = vpop.f32.mrb[46].mxu0  ;;  %v2166_v0 = vmax.f32 %v2102_v51, 0.0 }
 0x3c5   : > { %v2165_v3 = vmax.f32 %v2101_v26, 0.0  ;;  %v2108_v10 = vadd.f32 %v11722_v48, %v2003_v60  ;;  %v2110_v24 = vadd.f32 %v11735_v62, %v2005_v1  ;;  %v1842_v7 = vpop.f32.mrb[39].mxu1  ;;  %v1915_v11 = vpop.f32.mrb[47].mxu0  ;;  %v2167_v25 = vmax.f32 %v2103_v57, 0.0 }
 0x3c6   : > { %v2392_v4 = vmax.f32 %v2391_v37, %v2159_v54  ;;  %v2354_v14 = vmax.f32 %v2353_v47, %v2164_v21  ;;  %v2004_v28 = vmul.f32 %v11714_v41, %v1832_v29  ;;  %v2380_v32 = vmax.f32 %v2379_v49, %v2166_v0 }
 0x3c7   : > { %v2367_v43 = vmax.f32 %v2366_v53, %v2165_v3  ;;  %v2172_v33 = vmax.f32 %v2108_v10, 0.0  ;;  %v2174_v39 = vmax.f32 %v2110_v24, 0.0  ;;  %v2006_v46 = vmul.f32 %v11717_v42, %v1905_v30 }
 0x3c8   : > { %v2393_v27 = vmax.f32 %v2392_v4, %v2167_v25  ;;  %v2109_v17 = vadd.f32 %v11738_v63, %v2004_v28  ;;  %v2011_v38 = vmul.f32 %v11706_v34, %v1836_v45  ;;  %v2013_v55 = vmul.f32 %v11709_v35, %v1909_v50 }
 0x3c9   : > { %v2355_v31 = vmax.f32 %v2354_v14, %v2172_v33  ;;  %v2381_v52 = vmax.f32 %v2380_v32, %v2174_v39  ;;  %v2012_v37 = vmul.f32 %v11714_v41, %v1838_v2  ;;  %v2111_v29 = vadd.f32 %v11745_v6, %v2006_v46 }
 0x3ca   : > { %v2173_v47 = vmax.f32 %v2109_v17, 0.0  ;;  %v2116_v49 = vadd.f32 %v11722_v48, %v2011_v38  ;;  %v2014_v56 = vmul.f32 %v11717_v42, %v1911_v20  ;;  %v2118_v59 = vadd.f32 %v11735_v62, %v2013_v55 }
 0x3cb   : > { %v2117_v40 = vadd.f32 %v11738_v63, %v2012_v37  ;;  %v2019_v30 = vmul.f32 %v11706_v34, %v1840_v58  ;;  %v2021_v44 = vmul.f32 %v11709_v35, %v1913_v61  ;;  %v2175_v51 = vmax.f32 %v2111_v29, 0.0 }
 0x3cc   : > { %v2368_v45 = vmax.f32 %v2367_v43, %v2173_v47  ;;  %v2180_v50 = vmax.f32 %v2116_v49, 0.0  ;;  %v2119_v26 = vadd.f32 %v11745_v6, %v2014_v56  ;;  %v2182_v60 = vmax.f32 %v2118_v59, 0.0 }
 0x3cd   : > { %v2181_v1 = vmax.f32 %v2117_v40, 0.0  ;;  %v2124_v2 = vadd.f32 %v11722_v48, %v2019_v30  ;;  %v2126_v53 = vadd.f32 %v11735_v62, %v2021_v44  ;;  %v2394_v20 = vmax.f32 %v2393_v27, %v2175_v51 }
 0x3ce   : > { %v2356_v54 = vmax.f32 %v2355_v31, %v2180_v50  ;;  %v2183_v21 = vmax.f32 %v2119_v26, 0.0  ;;  %v2020_v57 = vmul.f32 %v11714_v41, %v1842_v7  ;;  %v2382_v0 = vmax.f32 %v2381_v52, %v2182_v60 }
 0x3cf   : > { %v2369_v34 = vmax.f32 %v2368_v45, %v2181_v1  ;;  %v2188_v58 = vmax.f32 %v2124_v2, 0.0  ;;  %v2190_v35 = vmax.f32 %v2126_v53, 0.0  ;;  %v2022_v10 = vmul.f32 %v11717_v42, %v1915_v11 }
 0x3d0   : > { %v2395_v61 = vmax.f32 %v2394_v20, %v2183_v21  ;;  %v2125_v3 = vadd.f32 %v11738_v63, %v2020_v57  ;;  %v2457_v26 = vrot.slane %v2449_v36, %v11742_v5  ;;  %v10587_v21 = vld [vmem:[%s14551_s13 + $0x200] ss:$16 sps:$4 sm:$0xff]   ;;  %v10595_v36 = vld [vmem:[%s14551_s13 + $0x224] ss:$16 sps:$4 sm:$0xff]   ;;  %v10598_v57 = vld [vmem:[%s14551_s13 + $0x22c] ss:$16 sps:$4 sm:$0xff]  }
 0x3d1   : > { %v2357_v24 = vmax.f32 %v2356_v54, %v2188_v58  ;;  %v2383_v4 = vmax.f32 %v2382_v0, %v2190_v35  ;;  %v2127_v48 = vadd.f32 %v11745_v6, %v2022_v10  ;;  %v10596_v58 = vld [vmem:[%s14551_s13 + $0x228] ss:$16 sps:$4 sm:$0xff]   ;;  %v10601_v35 = vld [vmem:[%s14551_s13 + $0x244] ss:$16 sps:$4 sm:$0xff]  }
 0x3d2   : > { %v2189_v14 = vmax.f32 %v2125_v3, 0.0  ;;  %v10599_v3 = vld [vmem:[%s14551_s13 + $0x240] ss:$16 sps:$4 sm:$0xff]   ;;  %v10602_v10 = vld [vmem:[%s14551_s13 + $0x248] ss:$16 sps:$4 sm:$0xff]  }
 0x3d3   : > { %v2358_v62 = vrot.slane %v2357_v24, 4  ;;  %v2384_v25 = vrot.slane %v2383_v4, 4  ;;  %v2191_v32 = vmax.f32 %v2127_v48, 0.0  ;;  %v10608_v48 = vld [vmem:[%s14551_s13 + $0x268] ss:$16 sps:$4 sm:$0xff]  }
 0x3d4   : > { %v2370_v28 = vmax.f32 %v2369_v34, %v2189_v14  ;;  %v10593_v34 = vld [vmem:[%s14551_s13 + $0x220] ss:$16 sps:$4 sm:$0xff]  }
 0x3d5   : > { %v2359_v43 = vmax.f32 %v2357_v24, %v2358_v62  ;;  %v2385_v41 = vmax.f32 %v2383_v4, %v2384_v25  ;;  %v2396_v33 = vmax.f32 %v2395_v61, %v2191_v32  ;;  %v10604_v61 = vld [vmem:[%s14551_s13 + $0x24c] ss:$16 sps:$4 sm:$0xff]   ;;  %v10607_v24 = vld [vmem:[%s14551_s13 + $0x264] ss:$16 sps:$4 sm:$0xff]   ;;  %v10605_v14 = vld [vmem:[%s14551_s13 + $0x260] ss:$16 sps:$4 sm:$0xff]  }
 0x3d6   : > { %v2371_v7 = vrot.slane %v2370_v28, 4  ;;  %v10610_v4 = vld [vmem:[%s14551_s13 + $0x26c] ss:$16 sps:$4 sm:$0xff]   ;;  %v10613_v62 = vld [vmem:[%s14551_s13 + $0x284] ss:$16 sps:$4 sm:$0xff]  }
 0x3d7   : > { %v2360_v39 = vrot.slane %v2359_v43, 2  ;;  %v2386_v27 = vrot.slane %v2385_v41, 2  ;;  %v2397_v46 = vrot.slane %v2396_v33, 4  ;;  %v10616_v25 = vld [vmem:[%s14551_s13 + $0x28c] ss:$16 sps:$4 sm:$0xff]  }
 0x3d8   : > { %v2372_v17 = vmax.f32 %v2370_v28, %v2371_v7  ;;  %v10611_v28 = vld [vmem:[%s14551_s13 + $0x280] ss:$16 sps:$4 sm:$0xff]   ;;  %v10614_v32 = vld [vmem:[%s14551_s13 + $0x288] ss:$16 sps:$4 sm:$0xff]  }
 0x3d9   : > { %v2361_v63 = vmax.f32 %v2359_v43, %v2360_v39  ;;  %v2387_v38 = vmax.f32 %v2385_v41, %v2386_v27  ;;  %v2398_v11 = vmax.f32 %v2396_v33, %v2397_v46  ;;  %v10619_v43 = vld [vmem:[%s14551_s13 + $0x2a4] ss:$16 sps:$4 sm:$0xff]   ;;  %v10622_v41 = vld [vmem:[%s14551_s13 + $0x2ac] ss:$16 sps:$4 sm:$0xff]   ;;  %v10617_v7 = vld [vmem:[%s14551_s13 + $0x2a0] ss:$16 sps:$4 sm:$0xff]  }
 0x3da   : > { %v2373_v42 = vrot.slane %v2372_v17, 2  ;;  %v10620_v33 = vld [vmem:[%s14551_s13 + $0x2a8] ss:$16 sps:$4 sm:$0xff]   ;;  %v10625_v39 = vld [vmem:[%s14551_s13 + $0x2c4] ss:$16 sps:$4 sm:$0xff]  }
 0x3db   : > { %v2362_v31 = vrot.slane %v2361_v63, 1  ;;  %v2388_v52 = vrot.slane %v2387_v38, 1  ;;  %v2399_v6 = vrot.slane %v2398_v11, 2  ;;  %v10628_v27 = vld [vmem:[%s14551_s13 + $0x2cc] ss:$16 sps:$4 sm:$0xff]  }
 0x3dc   : > { %v2374_v55 = vmax.f32 %v2372_v17, %v2373_v42  ;;  %v10623_v17 = vld [vmem:[%s14551_s13 + $0x2c0] ss:$16 sps:$4 sm:$0xff]   ;;  %v10626_v46 = vld [vmem:[%s14551_s13 + $0x2c8] ss:$16 sps:$4 sm:$0xff]  }
 0x3dd   : > { %v2363_v37 = vmax.f32 %v2361_v63, %v2362_v31  ;;  %v2400_v29 = vmax.f32 %v2398_v11, %v2399_v6  ;;  %v2389_v49 = vmax.f32 %v2387_v38, %v2388_v52  ;;  %v10631_v63 = vld [vmem:[%s14551_s13 + $0x2e4] ss:$16 sps:$4 sm:$0xff]   ;;  %v10634_v38 = vld [vmem:[%s14551_s13 + $0x2ec] ss:$16 sps:$4 sm:$0xff]   ;;  %v10629_v42 = vld [vmem:[%s14551_s13 + $0x2e0] ss:$16 sps:$4 sm:$0xff]  }
 0x3de   : > { %v2375_v47 = vrot.slane %v2374_v55, 1  ;;  %v10632_v11 = vld [vmem:[%s14551_s13 + $0x2e8] ss:$16 sps:$4 sm:$0xff]   ;;  %v10637_v31 = vld [vmem:[%s14551_s13 + $0x304] ss:$16 sps:$4 sm:$0xff]  }
 0x3df   : > { %v2401_v59 = vrot.slane %v2400_v29, 1  ;;  %v10640_v52 = vld [vmem:[%s14551_s13 + $0x30c] ss:$16 sps:$4 sm:$0xff]   ;;  %v10638_v6 = vld [vmem:[%s14551_s13 + $0x308] ss:$16 sps:$4 sm:$0xff]  }
 0x3e0   : > { %v2376_v56 = vmax.f32 %v2374_v55, %v2375_v47  ;;  %v10635_v55 = vld [vmem:[%s14551_s13 + $0x300] ss:$16 sps:$4 sm:$0xff]   ;;  %v10646_v47 = vld [vmem:[%s14551_s13 + $0x32c] ss:$16 sps:$4 sm:$0xff]  }
 0x3e1   : > { %v2402_v30 = vmax.f32 %v2400_v29, %v2401_v59  ;;  %v10641_v29 = vld [vmem:[%s14551_s13 + $0x320] ss:$16 sps:$4 sm:$0xff]   ;;  %v10652_v59 = vld [vmem:[%s14551_s13 + $0x34c] ss:$16 sps:$4 sm:$0xff]  }
 0x3e2   : > { %v2419_v40 = vcombine.low %v2363_v37, %v2376_v56  ;;  %v10643_v37 = vld [vmem:[%s14551_s13 + $0x324] ss:$16 sps:$4 sm:$0xff]  }
 0x3e3   : > { %v2420_v45 = vcombine.low %v2389_v49, %v2402_v30  ;;  %v10644_v49 = vld [vmem:[%s14551_s13 + $0x328] ss:$16 sps:$4 sm:$0xff]   ;;  %v10649_v56 = vld [vmem:[%s14551_s13 + $0x344] ss:$16 sps:$4 sm:$0xff]  }
 0x3e4   : > { %v2441_v44 = vrot.slane %v2419_v40, %v11742_v5  ;;  %v10647_v40 = vld [vmem:[%s14551_s13 + $0x340] ss:$16 sps:$4 sm:$0xff]   ;;  %v10650_v30 = vld [vmem:[%s14551_s13 + $0x348] ss:$16 sps:$4 sm:$0xff]  }
 0x3e5   : > { %v2448_v51 = vrot.slane %v2420_v45, %v11742_v5  ;;  %v10658_v45 = vld [vmem:[%s14551_s13 + $0x36c] ss:$16 sps:$4 sm:$0xff]  }
 0x3e7   : > { %v2450_v50 = vcombine.low %v2441_v44, %v2448_v51  ;;  %v10655_v44 = vld [vmem:[%s14551_s13 + $0x364] ss:$16 sps:$4 sm:$0xff]   ;;  %v10653_v51 = vld [vmem:[%s14551_s13 + $0x360] ss:$16 sps:$4 sm:$0xff]  }
 0x3e9   : > { %v2464_v60 = vrot.slane %v2450_v50, %v11742_v5  ;;  %v10656_v50 = vld [vmem:[%s14551_s13 + $0x368] ss:$16 sps:$4 sm:$0xff]  }
 0x3eb   : > { %v11874_v1 = vcombine.low %v2457_v26, %v2464_v60  ;;  %v10661_v26 = vld [vmem:[%s14551_s13 + $0x384] ss:$16 sps:$4 sm:$0xff]   ;;  %v10664_v60 = vld [vmem:[%s14551_s13 + $0x38c] ss:$16 sps:$4 sm:$0xff]  }
 0x3ed   : > { %v2739_v2 = vrot.slane %v11874_v1, %v11666_v15  ;;  %v2735_v53 = vrot.slane %v11874_v1, %v11659_v12  ;;  %v2747_v20 = vrot.slane %v11874_v1, %v11668_v16 }
 0x3ef   : > { %v2773_v54 = vpack.c.bf16 %v2739_v2, %v2739_v2  ;;  %v2772_v9 = vpack.c.bf16 %v2735_v53, %v2735_v53  ;;  %v2775_v0 = vpack.c.bf16 %v2747_v20, %v2747_v20  ;;  %v10659_v2 = vld [vmem:[%s14551_s13 + $0x380] ss:$16 sps:$4 sm:$0xff]   ;;  %v10662_v53 = vld [vmem:[%s14551_s13 + $0x388] ss:$16 sps:$4 sm:$0xff]   ;;  %v10667_v20 = vld [vmem:[%s14551_s13 + $0x3a4] ss:$16 sps:$4 sm:$0xff]  }
 0x3f1   : > { %4092 = vmatprep.mubr.bf16.mxu1 %v2773_v54  ;;  %4256 = vmatprep.mubr.bf16.mxu0 %v2773_v54  ;;  %v10670_v54 = vld [vmem:[%s14551_s13 + $0x3ac] ss:$16 sps:$4 sm:$0xff]  }
 0x3f2   : > { %4093 = vmatmul.mubr.bf16.vlgmr.msra.gmra.mrb[40].mxu1 %v2772_v9  ;;  %4257 = vmatmul.mubr.bf16.vlgmr.msra.gmra.mrb[48].mxu0 %v2772_v9  ;;  %v10673_v9 = vld [vmem:[%s14551_s13 + $0x3c4] ss:$16 sps:$4 sm:$0xff]  }
 0x3f3   : > { %4102 = vmatpush1.bf16.msra.mxu1 %v10587_v21  ;;  %4266 = vmatpush1.bf16.msra.mxu0 %v10590_v8  ;;  %v10665_v21 = vld [vmem:[%s14551_s13 + $0x3a0] ss:$16 sps:$4 sm:$0xff]   ;;  %v10668_v8 = vld [vmem:[%s14551_s13 + $0x3a8] ss:$16 sps:$4 sm:$0xff]  }
 0x3f4   : > { %4133 = vmatprep.mubr.bf16.mxu1 %v2775_v0  ;;  %4297 = vmatprep.mubr.bf16.mxu0 %v2775_v0  ;;  %v10674_v0 = vld [vmem:[%s14551_s13 + $0x3c8] ss:$16 sps:$4 sm:$0xff]  }
 0x3f5   : > { %4103 = vmatprep.subr.bf16.mxu1 %v10595_v36  ;;  %4267 = vmatprep.subr.bf16.mxu0 %v10598_v57  ;;  %v10676_v36 = vld [vmem:[%s14551_s13 + $0x3cc] ss:$16 sps:$4 sm:$0xff]   ;;  %v10671_v57 = vld [vmem:[%s14551_s13 + $0x3c0] ss:$16 sps:$4 sm:$0xff]  }
 0x3f7   : > { %4104 = vmatpush1.bf16.msra.mxu1 %v10593_v34  ;;  %4268 = vmatpush1.bf16.msra.mxu0 %v10596_v58  ;;  %v10679_v34 = vld [vmem:[%s14551_s13 + $0x3e4] ss:$16 sps:$4 sm:$0xff]   ;;  %v10682_v58 = vld [vmem:[%s14551_s13 + $0x3ec] ss:$16 sps:$4 sm:$0xff]  }
 0x3f8   : > { %4105 = vmatprep.subr.bf16.mxu1 %v10601_v35  ;;  %4269 = vmatprep.subr.bf16.mxu0 %v10604_v61  ;;  %v10677_v35 = vld [vmem:[%s14551_s13 + $0x3e0] ss:$16 sps:$4 sm:$0xff]   ;;  %v10680_v61 = vld [vmem:[%s14551_s13 + $0x3e8] ss:$16 sps:$4 sm:$0xff]  }
 0x3fb   : > { %4106 = vmatpush1.bf16.msra.mxu1 %v10599_v3  ;;  %4270 = vmatpush1.bf16.msra.mxu0 %v10602_v10  ;;  %v2743_v3 = vrot.slane %v11874_v1, %v11661_v13  ;;  %v10685_v10 = vld [vmem:[%s14551_s13 + $0x404] ss:$16 sps:$4 sm:$0xff]  }
 0x3fc   : > { %4107 = vmatprep.subr.bf16.mxu1 %v10607_v24  ;;  %4271 = vmatprep.subr.bf16.mxu0 %v10610_v4  ;;  %v10688_v24 = vld [vmem:[%s14551_s13 + $0x40c] ss:$16 sps:$4 sm:$0xff]   ;;  %v2755_v4 = vrot.slane %v11874_v1, %v11683_v22 }
 0x3ff   : > { %4108 = vmatpush1.bf16.msra.mxu1 %v10605_v14  ;;  %4272 = vmatpush1.bf16.msra.mxu0 %v10608_v48  ;;  %v10683_v14 = vld [vmem:[%s14551_s13 + $0x400] ss:$16 sps:$4 sm:$0xff]   ;;  %v2774_v48 = vpack.c.bf16 %v2743_v3, %v2743_v3 }
 0x400   : > { %4109 = vmatprep.subr.bf16.mxu1 %v10613_v62  ;;  %4273 = vmatprep.subr.bf16.mxu0 %v10616_v25  ;;  %v10686_v62 = vld [vmem:[%s14551_s13 + $0x408] ss:$16 sps:$4 sm:$0xff]   ;;  %v2777_v25 = vpack.c.bf16 %v2755_v4, %v2755_v4  ;;  %v10755_v3 = vld [vmem:[%s14551_s13 + $0x580] ss:$16 sps:$4 sm:$0xff]   ;;  %v10766_v4 = vld [vmem:[%s14551_s13 + $0x5ac] ss:$16 sps:$4 sm:$0xff]  }
 0x403   : > { %4110 = vmatpush1.bf16.msra.mxu1 %v10611_v28  ;;  %4274 = vmatpush1.bf16.msra.mxu0 %v10614_v32  ;;  %v10691_v28 = vld [vmem:[%s14551_s13 + $0x424] ss:$16 sps:$4 sm:$0xff]   ;;  %v10694_v32 = vld [vmem:[%s14551_s13 + $0x42c] ss:$16 sps:$4 sm:$0xff]  }
 0x404   : > { %4111 = vmatprep.subr.bf16.mxu1 %v10619_v43  ;;  %4275 = vmatprep.subr.bf16.mxu0 %v10622_v41  ;;  %v10689_v43 = vld [vmem:[%s14551_s13 + $0x420] ss:$16 sps:$4 sm:$0xff]   ;;  %v10692_v41 = vld [vmem:[%s14551_s13 + $0x428] ss:$16 sps:$4 sm:$0xff]  }
 0x407   : > { %4112 = vmatpush1.bf16.msra.mxu1 %v10617_v7  ;;  %4276 = vmatpush1.bf16.msra.mxu0 %v10620_v33  ;;  %v10697_v7 = vld [vmem:[%s14551_s13 + $0x444] ss:$16 sps:$4 sm:$0xff]   ;;  %v10700_v33 = vld [vmem:[%s14551_s13 + $0x44c] ss:$16 sps:$4 sm:$0xff]  }
 0x408   : > { %4113 = vmatprep.subr.bf16.mxu1 %v10625_v39  ;;  %4277 = vmatprep.subr.bf16.mxu0 %v10628_v27  ;;  %v10695_v39 = vld [vmem:[%s14551_s13 + $0x440] ss:$16 sps:$4 sm:$0xff]   ;;  %v10698_v27 = vld [vmem:[%s14551_s13 + $0x448] ss:$16 sps:$4 sm:$0xff]  }
 0x40b   : > { %4114 = vmatpush1.bf16.msra.mxu1 %v10623_v17  ;;  %4278 = vmatpush1.bf16.msra.mxu0 %v10626_v46  ;;  %v10703_v17 = vld [vmem:[%s14551_s13 + $0x464] ss:$16 sps:$4 sm:$0xff]   ;;  %v10706_v46 = vld [vmem:[%s14551_s13 + $0x46c] ss:$16 sps:$4 sm:$0xff]  }
 0x40c   : > { %4115 = vmatprep.subr.bf16.mxu1 %v10631_v63  ;;  %4279 = vmatprep.subr.bf16.mxu0 %v10634_v38  ;;  %v10701_v63 = vld [vmem:[%s14551_s13 + $0x460] ss:$16 sps:$4 sm:$0xff]   ;;  %v10704_v38 = vld [vmem:[%s14551_s13 + $0x468] ss:$16 sps:$4 sm:$0xff]  }
 0x40f   : > { %4116 = vmatpush1.bf16.msra.mxu1 %v10629_v42  ;;  %4280 = vmatpush1.bf16.msra.mxu0 %v10632_v11  ;;  %v10709_v42 = vld [vmem:[%s14551_s13 + $0x484] ss:$16 sps:$4 sm:$0xff]   ;;  %v10712_v11 = vld [vmem:[%s14551_s13 + $0x48c] ss:$16 sps:$4 sm:$0xff]  }
 0x410   : > { %4117 = vmatprep.subr.bf16.mxu1 %v10637_v31  ;;  %4281 = vmatprep.subr.bf16.mxu0 %v10640_v52  ;;  %v10707_v31 = vld [vmem:[%s14551_s13 + $0x480] ss:$16 sps:$4 sm:$0xff]   ;;  %v10710_v52 = vld [vmem:[%s14551_s13 + $0x488] ss:$16 sps:$4 sm:$0xff]  }
 0x413   : > { %4118 = vmatpush1.bf16.msra.mxu1 %v10635_v55  ;;  %4282 = vmatpush1.bf16.msra.mxu0 %v10638_v6  ;;  %v10715_v55 = vld [vmem:[%s14551_s13 + $0x4a4] ss:$16 sps:$4 sm:$0xff]   ;;  %v10718_v6 = vld [vmem:[%s14551_s13 + $0x4ac] ss:$16 sps:$4 sm:$0xff]  }
 0x414   : > { %4119 = vmatprep.subr.bf16.mxu1 %v10643_v37  ;;  %4283 = vmatprep.subr.bf16.mxu0 %v10646_v47  ;;  %v10713_v37 = vld [vmem:[%s14551_s13 + $0x4a0] ss:$16 sps:$4 sm:$0xff]   ;;  %v10716_v47 = vld [vmem:[%s14551_s13 + $0x4a8] ss:$16 sps:$4 sm:$0xff]  }
 0x417   : > { %4120 = vmatpush1.bf16.msra.mxu1 %v10641_v29  ;;  %4284 = vmatpush1.bf16.msra.mxu0 %v10644_v49  ;;  %v10721_v29 = vld [vmem:[%s14551_s13 + $0x4c4] ss:$16 sps:$4 sm:$0xff]   ;;  %v10724_v49 = vld [vmem:[%s14551_s13 + $0x4cc] ss:$16 sps:$4 sm:$0xff]  }
 0x418   : > { %4121 = vmatprep.subr.bf16.mxu1 %v10649_v56  ;;  %4285 = vmatprep.subr.bf16.mxu0 %v10652_v59  ;;  %v10719_v56 = vld [vmem:[%s14551_s13 + $0x4c0] ss:$16 sps:$4 sm:$0xff]   ;;  %v10722_v59 = vld [vmem:[%s14551_s13 + $0x4c8] ss:$16 sps:$4 sm:$0xff]  }
 0x41b   : > { %4122 = vmatpush1.bf16.msra.mxu1 %v10647_v40  ;;  %4286 = vmatpush1.bf16.msra.mxu0 %v10650_v30  ;;  %v10727_v40 = vld [vmem:[%s14551_s13 + $0x4e4] ss:$16 sps:$4 sm:$0xff]   ;;  %v10730_v30 = vld [vmem:[%s14551_s13 + $0x4ec] ss:$16 sps:$4 sm:$0xff]  }
 0x41c   : > { %4123 = vmatprep.subr.bf16.mxu1 %v10655_v44  ;;  %4287 = vmatprep.subr.bf16.mxu0 %v10658_v45  ;;  %v10725_v44 = vld [vmem:[%s14551_s13 + $0x4e0] ss:$16 sps:$4 sm:$0xff]   ;;  %v10728_v45 = vld [vmem:[%s14551_s13 + $0x4e8] ss:$16 sps:$4 sm:$0xff]  }
 0x41f   : > { %4124 = vmatpush1.bf16.msra.mxu1 %v10653_v51  ;;  %4288 = vmatpush1.bf16.msra.mxu0 %v10656_v50  ;;  %v10733_v51 = vld [vmem:[%s14551_s13 + $0x504] ss:$16 sps:$4 sm:$0xff]   ;;  %v10736_v50 = vld [vmem:[%s14551_s13 + $0x50c] ss:$16 sps:$4 sm:$0xff]  }
 0x420   : > { %4125 = vmatprep.subr.bf16.mxu1 %v10661_v26  ;;  %4289 = vmatprep.subr.bf16.mxu0 %v10664_v60  ;;  %v10731_v26 = vld [vmem:[%s14551_s13 + $0x500] ss:$16 sps:$4 sm:$0xff]   ;;  %v10734_v60 = vld [vmem:[%s14551_s13 + $0x508] ss:$16 sps:$4 sm:$0xff]  }
 0x423   : > { %4126 = vmatpush1.bf16.msra.mxu1 %v10659_v2  ;;  %4290 = vmatpush1.bf16.msra.mxu0 %v10662_v53  ;;  %v10739_v2 = vld [vmem:[%s14551_s13 + $0x524] ss:$16 sps:$4 sm:$0xff]   ;;  %v10742_v53 = vld [vmem:[%s14551_s13 + $0x52c] ss:$16 sps:$4 sm:$0xff]  }
 0x424   : > { %4127 = vmatprep.subr.bf16.mxu1 %v10667_v20  ;;  %4291 = vmatprep.subr.bf16.mxu0 %v10670_v54  ;;  %v10737_v20 = vld [vmem:[%s14551_s13 + $0x520] ss:$16 sps:$4 sm:$0xff]   ;;  %v10740_v54 = vld [vmem:[%s14551_s13 + $0x528] ss:$16 sps:$4 sm:$0xff]  }
 0x427   : > { %4128 = vmatpush1.bf16.msra.mxu1 %v10665_v21  ;;  %4292 = vmatpush1.bf16.msra.mxu0 %v10668_v8  ;;  %v10745_v21 = vld [vmem:[%s14551_s13 + $0x544] ss:$16 sps:$4 sm:$0xff]   ;;  %v10748_v8 = vld [vmem:[%s14551_s13 + $0x54c] ss:$16 sps:$4 sm:$0xff]  }
 0x428   : > { %4129 = vmatprep.subr.bf16.mxu1 %v10673_v9  ;;  %4293 = vmatprep.subr.bf16.mxu0 %v10676_v36  ;;  %v10743_v9 = vld [vmem:[%s14551_s13 + $0x540] ss:$16 sps:$4 sm:$0xff]   ;;  %v10746_v36 = vld [vmem:[%s14551_s13 + $0x548] ss:$16 sps:$4 sm:$0xff]  }
 0x42b   : > { %4130 = vmatpush1.bf16.msra.mxu1 %v10671_v57  ;;  %4294 = vmatpush1.bf16.msra.mxu0 %v10674_v0  ;;  %v10751_v57 = vld [vmem:[%s14551_s13 + $0x564] ss:$16 sps:$4 sm:$0xff]   ;;  %v10754_v0 = vld [vmem:[%s14551_s13 + $0x56c] ss:$16 sps:$4 sm:$0xff]  }
 0x42c   : > { %4131 = vmatprep.subr.bf16.mxu1 %v10679_v34  ;;  %4295 = vmatprep.subr.bf16.mxu0 %v10682_v58  ;;  %v10749_v34 = vld [vmem:[%s14551_s13 + $0x560] ss:$16 sps:$4 sm:$0xff]   ;;  %v10752_v58 = vld [vmem:[%s14551_s13 + $0x568] ss:$16 sps:$4 sm:$0xff]  }
 0x42f   : > { %4132 = vmatpush1.bf16.msra.mxu1 %v10677_v35  ;;  %4296 = vmatpush1.bf16.msra.mxu0 %v10680_v61  ;;  %v10757_v35 = vld [vmem:[%s14551_s13 + $0x584] ss:$16 sps:$4 sm:$0xff]   ;;  %v10760_v61 = vld [vmem:[%s14551_s13 + $0x58c] ss:$16 sps:$4 sm:$0xff]  }
 0x430   : > { %4142 = vmatprep.subr.bf16.mxu1 %v10685_v10  ;;  %4306 = vmatprep.subr.bf16.mxu0 %v10688_v24  ;;  %v10758_v10 = vld [vmem:[%s14551_s13 + $0x588] ss:$16 sps:$4 sm:$0xff]   ;;  %v10763_v24 = vld [vmem:[%s14551_s13 + $0x5a4] ss:$16 sps:$4 sm:$0xff]  }
 0x432   : > { %4134 = vmatmul.mubr.bf16.vlgmr.msra.gmra.mrb[40].mxu1 %v2774_v48  ;;  %4298 = vmatmul.mubr.bf16.vlgmr.msra.gmra.mrb[48].mxu0 %v2774_v48  ;;  %v10764_v48 = vld [vmem:[%s14551_s13 + $0x5a8] ss:$16 sps:$4 sm:$0xff]  }
 0x433   : > { %4143 = vmatpush1.bf16.msra.mxu1 %v10683_v14  ;;  %4174 = vmatprep.mubr.bf16.mxu1 %v2777_v25  ;;  %v10761_v14 = vld [vmem:[%s14551_s13 + $0x5a0] ss:$16 sps:$4 sm:$0xff]  }
 0x434   : > { %4307 = vmatpush1.bf16.msra.mxu0 %v10686_v62  ;;  %4338 = vmatprep.mubr.bf16.mxu0 %v2777_v25  ;;  %v10769_v62 = vld [vmem:[%s14551_s13 + $0x5c4] ss:$16 sps:$4 sm:$0xff]   ;;  %v10772_v25 = vld [vmem:[%s14551_s13 + $0x5cc] ss:$16 sps:$4 sm:$0xff]  }
 0x435   : > { %4144 = vmatprep.subr.bf16.mxu1 %v10691_v28  ;;  %4308 = vmatprep.subr.bf16.mxu0 %v10694_v32  ;;  %v10767_v28 = vld [vmem:[%s14551_s13 + $0x5c0] ss:$16 sps:$4 sm:$0xff]   ;;  %v10770_v32 = vld [vmem:[%s14551_s13 + $0x5c8] ss:$16 sps:$4 sm:$0xff]  }
 0x437   : > { %4145 = vmatpush1.bf16.msra.mxu1 %v10689_v43  ;;  %v10775_v43 = vld [vmem:[%s14551_s13 + $0x5e4] ss:$16 sps:$4 sm:$0xff]  }
 0x438   : > { %4309 = vmatpush1.bf16.msra.mxu0 %v10692_v41  ;;  %4146 = vmatprep.subr.bf16.mxu1 %v10697_v7  ;;  %v10778_v41 = vld [vmem:[%s14551_s13 + $0x5ec] ss:$16 sps:$4 sm:$0xff]   ;;  %v10773_v7 = vld [vmem:[%s14551_s13 + $0x5e0] ss:$16 sps:$4 sm:$0xff]  }
 0x439   : > { %4310 = vmatprep.subr.bf16.mxu0 %v10700_v33  ;;  %v10776_v33 = vld [vmem:[%s14551_s13 + $0x5e8] ss:$16 sps:$4 sm:$0xff]  }
 0x43b   : > { %4147 = vmatpush1.bf16.msra.mxu1 %v10695_v39  ;;  %v2751_v39 = vrot.slane %v11874_v1, %v11673_v18 }
 0x43c   : > { %4311 = vmatpush1.bf16.msra.mxu0 %v10698_v27  ;;  %4148 = vmatprep.subr.bf16.mxu1 %v10703_v17  ;;  %v10781_v27 = vld [vmem:[%s14551_s13 + $0x604] ss:$16 sps:$4 sm:$0xff]   ;;  %v10784_v17 = vld [vmem:[%s14551_s13 + $0x60c] ss:$16 sps:$4 sm:$0xff]  }
 0x43d   : > { %4312 = vmatprep.subr.bf16.mxu0 %v10706_v46  ;;  %v2763_v46 = vrot.slane %v11874_v1, %v11685_v23 }
 0x43f   : > { %4149 = vmatpush1.bf16.msra.mxu1 %v10701_v63  ;;  %v10779_v63 = vld [vmem:[%s14551_s13 + $0x600] ss:$16 sps:$4 sm:$0xff]  }
 0x440   : > { %4313 = vmatpush1.bf16.msra.mxu0 %v10704_v38  ;;  %4150 = vmatprep.subr.bf16.mxu1 %v10709_v42  ;;  %v2776_v38 = vpack.c.bf16 %v2751_v39, %v2751_v39  ;;  %v10782_v42 = vld [vmem:[%s14551_s13 + $0x608] ss:$16 sps:$4 sm:$0xff]   ;;  %v10851_v39 = vld [vmem:[%s14551_s13 + $0x780] ss:$16 sps:$4 sm:$0xff]  }
 0x441   : > { %4314 = vmatprep.subr.bf16.mxu0 %v10712_v11  ;;  %v10787_v11 = vld [vmem:[%s14551_s13 + $0x624] ss:$16 sps:$4 sm:$0xff]  }
 0x443   : > { %4151 = vmatpush1.bf16.msra.mxu1 %v10707_v31  ;;  %v2779_v31 = vpack.c.bf16 %v2763_v46, %v2763_v46  ;;  %v10862_v46 = vld [vmem:[%s14551_s13 + $0x7ac] ss:$16 sps:$4 sm:$0xff]  }
 0x444   : > { %4315 = vmatpush1.bf16.msra.mxu0 %v10710_v52  ;;  %4152 = vmatprep.subr.bf16.mxu1 %v10715_v55  ;;  %v10790_v52 = vld [vmem:[%s14551_s13 + $0x62c] ss:$16 sps:$4 sm:$0xff]   ;;  %v10785_v55 = vld [vmem:[%s14551_s13 + $0x620] ss:$16 sps:$4 sm:$0xff]  }
 0x445   : > { %4316 = vmatprep.subr.bf16.mxu0 %v10718_v6  ;;  %v10788_v6 = vld [vmem:[%s14551_s13 + $0x628] ss:$16 sps:$4 sm:$0xff]  }
 0x447   : > { %4153 = vmatpush1.bf16.msra.mxu1 %v10713_v37  ;;  %v10793_v37 = vld [vmem:[%s14551_s13 + $0x644] ss:$16 sps:$4 sm:$0xff]  }
 0x448   : > { %4317 = vmatpush1.bf16.msra.mxu0 %v10716_v47  ;;  %4154 = vmatprep.subr.bf16.mxu1 %v10721_v29  ;;  %v10796_v47 = vld [vmem:[%s14551_s13 + $0x64c] ss:$16 sps:$4 sm:$0xff]   ;;  %v10791_v29 = vld [vmem:[%s14551_s13 + $0x640] ss:$16 sps:$4 sm:$0xff]  }
 0x449   : > { %4318 = vmatprep.subr.bf16.mxu0 %v10724_v49  ;;  %v10794_v49 = vld [vmem:[%s14551_s13 + $0x648] ss:$16 sps:$4 sm:$0xff]  }
 0x44b   : > { %4155 = vmatpush1.bf16.msra.mxu1 %v10719_v56  ;;  %v10799_v56 = vld [vmem:[%s14551_s13 + $0x664] ss:$16 sps:$4 sm:$0xff]  }
 0x44c   : > { %4319 = vmatpush1.bf16.msra.mxu0 %v10722_v59  ;;  %4156 = vmatprep.subr.bf16.mxu1 %v10727_v40  ;;  %v10802_v59 = vld [vmem:[%s14551_s13 + $0x66c] ss:$16 sps:$4 sm:$0xff]   ;;  %v10797_v40 = vld [vmem:[%s14551_s13 + $0x660] ss:$16 sps:$4 sm:$0xff]  }
 0x44d   : > { %4320 = vmatprep.subr.bf16.mxu0 %v10730_v30  ;;  %v10800_v30 = vld [vmem:[%s14551_s13 + $0x668] ss:$16 sps:$4 sm:$0xff]  }
 0x44f   : > { %4157 = vmatpush1.bf16.msra.mxu1 %v10725_v44  ;;  %v10805_v44 = vld [vmem:[%s14551_s13 + $0x684] ss:$16 sps:$4 sm:$0xff]  }
 0x450   : > { %4321 = vmatpush1.bf16.msra.mxu0 %v10728_v45  ;;  %4158 = vmatprep.subr.bf16.mxu1 %v10733_v51  ;;  %v10808_v45 = vld [vmem:[%s14551_s13 + $0x68c] ss:$16 sps:$4 sm:$0xff]   ;;  %v10803_v51 = vld [vmem:[%s14551_s13 + $0x680] ss:$16 sps:$4 sm:$0xff]  }
 0x451   : > { %4322 = vmatprep.subr.bf16.mxu0 %v10736_v50  ;;  %v10806_v50 = vld [vmem:[%s14551_s13 + $0x688] ss:$16 sps:$4 sm:$0xff]  }
 0x453   : > { %4159 = vmatpush1.bf16.msra.mxu1 %v10731_v26  ;;  %v10811_v26 = vld [vmem:[%s14551_s13 + $0x6a4] ss:$16 sps:$4 sm:$0xff]  }
 0x454   : > { %4323 = vmatpush1.bf16.msra.mxu0 %v10734_v60  ;;  %4160 = vmatprep.subr.bf16.mxu1 %v10739_v2  ;;  %v10814_v60 = vld [vmem:[%s14551_s13 + $0x6ac] ss:$16 sps:$4 sm:$0xff]   ;;  %v10809_v2 = vld [vmem:[%s14551_s13 + $0x6a0] ss:$16 sps:$4 sm:$0xff]  }
 0x455   : > { %4324 = vmatprep.subr.bf16.mxu0 %v10742_v53  ;;  %v10812_v53 = vld [vmem:[%s14551_s13 + $0x6a8] ss:$16 sps:$4 sm:$0xff]  }
 0x457   : > { %4161 = vmatpush1.bf16.msra.mxu1 %v10737_v20  ;;  %v10817_v20 = vld [vmem:[%s14551_s13 + $0x6c4] ss:$16 sps:$4 sm:$0xff]  }
 0x458   : > { %4325 = vmatpush1.bf16.msra.mxu0 %v10740_v54  ;;  %4162 = vmatprep.subr.bf16.mxu1 %v10745_v21  ;;  %v10820_v54 = vld [vmem:[%s14551_s13 + $0x6cc] ss:$16 sps:$4 sm:$0xff]   ;;  %v10815_v21 = vld [vmem:[%s14551_s13 + $0x6c0] ss:$16 sps:$4 sm:$0xff]  }
 0x459   : > { %4326 = vmatprep.subr.bf16.mxu0 %v10748_v8  ;;  %v10818_v8 = vld [vmem:[%s14551_s13 + $0x6c8] ss:$16 sps:$4 sm:$0xff]  }
 0x45b   : > { %4163 = vmatpush1.bf16.msra.mxu1 %v10743_v9  ;;  %v10823_v9 = vld [vmem:[%s14551_s13 + $0x6e4] ss:$16 sps:$4 sm:$0xff]  }
 0x45c   : > { %4327 = vmatpush1.bf16.msra.mxu0 %v10746_v36  ;;  %4164 = vmatprep.subr.bf16.mxu1 %v10751_v57  ;;  %v10826_v36 = vld [vmem:[%s14551_s13 + $0x6ec] ss:$16 sps:$4 sm:$0xff]   ;;  %v10821_v57 = vld [vmem:[%s14551_s13 + $0x6e0] ss:$16 sps:$4 sm:$0xff]  }
 0x45d   : > { %4328 = vmatprep.subr.bf16.mxu0 %v10754_v0  ;;  %v10824_v0 = vld [vmem:[%s14551_s13 + $0x6e8] ss:$16 sps:$4 sm:$0xff]  }
 0x45f   : > { %4165 = vmatpush1.bf16.msra.mxu1 %v10749_v34  ;;  %v10829_v34 = vld [vmem:[%s14551_s13 + $0x704] ss:$16 sps:$4 sm:$0xff]  }
 0x460   : > { %4329 = vmatpush1.bf16.msra.mxu0 %v10752_v58  ;;  %4166 = vmatprep.subr.bf16.mxu1 %v10757_v35  ;;  %v10832_v58 = vld [vmem:[%s14551_s13 + $0x70c] ss:$16 sps:$4 sm:$0xff]   ;;  %v10827_v35 = vld [vmem:[%s14551_s13 + $0x700] ss:$16 sps:$4 sm:$0xff]  }
 0x461   : > { %4330 = vmatprep.subr.bf16.mxu0 %v10760_v61  ;;  %v10830_v61 = vld [vmem:[%s14551_s13 + $0x708] ss:$16 sps:$4 sm:$0xff]  }
 0x463   : > { %4167 = vmatpush1.bf16.msra.mxu1 %v10755_v3  ;;  %v10835_v3 = vld [vmem:[%s14551_s13 + $0x724] ss:$16 sps:$4 sm:$0xff]  }
 0x464   : > { %4331 = vmatpush1.bf16.msra.mxu0 %v10758_v10  ;;  %4168 = vmatprep.subr.bf16.mxu1 %v10763_v24  ;;  %v10838_v10 = vld [vmem:[%s14551_s13 + $0x72c] ss:$16 sps:$4 sm:$0xff]   ;;  %v10833_v24 = vld [vmem:[%s14551_s13 + $0x720] ss:$16 sps:$4 sm:$0xff]  }
 0x465   : > { %4332 = vmatprep.subr.bf16.mxu0 %v10766_v4  ;;  %v10836_v4 = vld [vmem:[%s14551_s13 + $0x728] ss:$16 sps:$4 sm:$0xff]  }
 0x467   : > { %4169 = vmatpush1.bf16.msra.mxu1 %v10761_v14  ;;  %v10841_v14 = vld [vmem:[%s14551_s13 + $0x744] ss:$16 sps:$4 sm:$0xff]  }
 0x468   : > { %4333 = vmatpush1.bf16.msra.mxu0 %v10764_v48  ;;  %4170 = vmatprep.subr.bf16.mxu1 %v10769_v62  ;;  %v10844_v48 = vld [vmem:[%s14551_s13 + $0x74c] ss:$16 sps:$4 sm:$0xff]   ;;  %v10839_v62 = vld [vmem:[%s14551_s13 + $0x740] ss:$16 sps:$4 sm:$0xff]  }
 0x469   : > { %4334 = vmatprep.subr.bf16.mxu0 %v10772_v25  ;;  %v10842_v25 = vld [vmem:[%s14551_s13 + $0x748] ss:$16 sps:$4 sm:$0xff]  }
 0x46b   : > { %4171 = vmatpush1.bf16.msra.mxu1 %v10767_v28  ;;  %v10847_v28 = vld [vmem:[%s14551_s13 + $0x764] ss:$16 sps:$4 sm:$0xff]  }
 0x46c   : > { %4335 = vmatpush1.bf16.msra.mxu0 %v10770_v32  ;;  %4172 = vmatprep.subr.bf16.mxu1 %v10775_v43  ;;  %v10850_v32 = vld [vmem:[%s14551_s13 + $0x76c] ss:$16 sps:$4 sm:$0xff]   ;;  %v10845_v43 = vld [vmem:[%s14551_s13 + $0x760] ss:$16 sps:$4 sm:$0xff]  }
 0x46d   : > { %4336 = vmatprep.subr.bf16.mxu0 %v10778_v41  ;;  %v10848_v41 = vld [vmem:[%s14551_s13 + $0x768] ss:$16 sps:$4 sm:$0xff]  }
 0x46f   : > { %4173 = vmatpush1.bf16.msra.mxu1 %v10773_v7  ;;  %v10853_v7 = vld [vmem:[%s14551_s13 + $0x784] ss:$16 sps:$4 sm:$0xff]  }
 0x470   : > { %4337 = vmatpush1.bf16.msra.mxu0 %v10776_v33  ;;  %4183 = vmatprep.subr.bf16.mxu1 %v10781_v27  ;;  %v10856_v33 = vld [vmem:[%s14551_s13 + $0x78c] ss:$16 sps:$4 sm:$0xff]   ;;  %v10854_v27 = vld [vmem:[%s14551_s13 + $0x788] ss:$16 sps:$4 sm:$0xff]  }
 0x471   : > { %4347 = vmatprep.subr.bf16.mxu0 %v10784_v17  ;;  %v10859_v17 = vld [vmem:[%s14551_s13 + $0x7a4] ss:$16 sps:$4 sm:$0xff]  }
 0x472   : > { %4175 = vmatmul.mubr.bf16.vlgmr.msra.gmra.mrb[40].mxu1 %v2776_v38 }
 0x473   : > { %4339 = vmatmul.mubr.bf16.vlgmr.msra.gmra.mrb[48].mxu0 %v2776_v38  ;;  %4184 = vmatpush1.bf16.msra.mxu1 %v10779_v63  ;;  %v10857_v63 = vld [vmem:[%s14551_s13 + $0x7a0] ss:$16 sps:$4 sm:$0xff]   ;;  %v10860_v38 = vld [vmem:[%s14551_s13 + $0x7a8] ss:$16 sps:$4 sm:$0xff]  }
 0x474   : > { %4215 = vmatprep.mubr.bf16.mxu1 %v2779_v31  ;;  %4348 = vmatpush1.bf16.msra.mxu0 %v10782_v42  ;;  %v10865_v42 = vld [vmem:[%s14551_s13 + $0x7c4] ss:$16 sps:$4 sm:$0xff]  }
 0x475   : > { %4379 = vmatprep.mubr.bf16.mxu0 %v2779_v31  ;;  %4185 = vmatprep.subr.bf16.mxu1 %v10787_v11  ;;  %v10868_v11 = vld [vmem:[%s14551_s13 + $0x7cc] ss:$16 sps:$4 sm:$0xff]   ;;  %v10863_v31 = vld [vmem:[%s14551_s13 + $0x7c0] ss:$16 sps:$4 sm:$0xff]  }
 0x476   : > { %4349 = vmatprep.subr.bf16.mxu0 %v10790_v52  ;;  %v10866_v52 = vld [vmem:[%s14551_s13 + $0x7c8] ss:$16 sps:$4 sm:$0xff]  }
 0x477   : > { %4186 = vmatpush1.bf16.msra.mxu1 %v10785_v55  ;;  %v10871_v55 = vld [vmem:[%s14551_s13 + $0x7e4] ss:$16 sps:$4 sm:$0xff]  }
 0x478   : > { %4350 = vmatpush1.bf16.msra.mxu0 %v10788_v6  ;;  %4187 = vmatprep.subr.bf16.mxu1 %v10793_v37  ;;  %v10874_v6 = vld [vmem:[%s14551_s13 + $0x7ec] ss:$16 sps:$4 sm:$0xff]   ;;  %v10869_v37 = vld [vmem:[%s14551_s13 + $0x7e0] ss:$16 sps:$4 sm:$0xff]  }
 0x479   : > { %4351 = vmatprep.subr.bf16.mxu0 %v10796_v47  ;;  %v10872_v47 = vld [vmem:[%s14551_s13 + $0x7e8] ss:$16 sps:$4 sm:$0xff]  }
 0x47b   : > { %4188 = vmatpush1.bf16.msra.mxu1 %v10791_v29  ;;  %v2759_v29 = vrot.slane %v11874_v1, %v11675_v19  ;;  %v10878_v1 = vld [vmem:[%s14554_s16 + $0x10] ss:$8 sps:$4 sm:$0xff]  }
 0x47c   : > { %4352 = vmatpush1.bf16.msra.mxu0 %v10794_v49  ;;  %4189 = vmatprep.subr.bf16.mxu1 %v10799_v56  ;;  %v10877_v49 = vld [vmem:[%s14554_s16 + $0x4] ss:$8 sps:$4 sm:$0xff]   ;;  %v10875_v56 = vld [vmem:[%s14554_s16] ss:$8 sps:$4 sm:$0xff]  }
 0x47d   : > { %4353 = vmatprep.subr.bf16.mxu0 %v10802_v59  ;;  %v2778_v59 = vpack.c.bf16 %v2759_v29, %v2759_v29  ;;  %v5102_v29 = vld [vmem:[%s14557_s19 + $0x500] sm:$0xff] }
 0x47f   : > { %4190 = vmatpush1.bf16.msra.mxu1 %v10797_v40  ;;  %v10880_v40 = vld [vmem:[%s14554_s16 + $0x14] ss:$8 sps:$4 sm:$0xff]  }
 0x480   : > { %4354 = vmatpush1.bf16.msra.mxu0 %v10800_v30  ;;  %4191 = vmatprep.subr.bf16.mxu1 %v10805_v44  ;;  %v10883_v30 = vld [vmem:[%s14554_s16 + $0x24] ss:$8 sps:$4 sm:$0xff]   ;;  %v10881_v44 = vld [vmem:[%s14554_s16 + $0x20] ss:$8 sps:$4 sm:$0xff]  }
 0x481   : > { %4355 = vmatprep.subr.bf16.mxu0 %v10808_v45  ;;  %v10886_v45 = vld [vmem:[%s14554_s16 + $0x34] ss:$8 sps:$4 sm:$0xff]  }
 0x483   : > { %4192 = vmatpush1.bf16.msra.mxu1 %v10803_v51  ;;  %v10884_v51 = vld [vmem:[%s14554_s16 + $0x30] ss:$8 sps:$4 sm:$0xff]  }
 0x484   : > { %4356 = vmatpush1.bf16.msra.mxu0 %v10806_v50  ;;  %4193 = vmatprep.subr.bf16.mxu1 %v10811_v26  ;;  %v10889_v50 = vld [vmem:[%s14554_s16 + $0x44] ss:$8 sps:$4 sm:$0xff]   ;;  %v10887_v26 = vld [vmem:[%s14554_s16 + $0x40] ss:$8 sps:$4 sm:$0xff]  }
 0x485   : > { %4357 = vmatprep.subr.bf16.mxu0 %v10814_v60  ;;  %v10892_v60 = vld [vmem:[%s14554_s16 + $0x54] ss:$8 sps:$4 sm:$0xff]  }
 0x487   : > { %4194 = vmatpush1.bf16.msra.mxu1 %v10809_v2  ;;  %v10890_v2 = vld [vmem:[%s14554_s16 + $0x50] ss:$8 sps:$4 sm:$0xff]  }
 0x488   : > { %4358 = vmatpush1.bf16.msra.mxu0 %v10812_v53  ;;  %4195 = vmatprep.subr.bf16.mxu1 %v10817_v20  ;;  %v10895_v53 = vld [vmem:[%s14554_s16 + $0x64] ss:$8 sps:$4 sm:$0xff]   ;;  %v10893_v20 = vld [vmem:[%s14554_s16 + $0x60] ss:$8 sps:$4 sm:$0xff]  }
 0x489   : > { %4359 = vmatprep.subr.bf16.mxu0 %v10820_v54  ;;  %v10898_v54 = vld [vmem:[%s14554_s16 + $0x74] ss:$8 sps:$4 sm:$0xff]  }
 0x48b   : > { %4196 = vmatpush1.bf16.msra.mxu1 %v10815_v21  ;;  %v10896_v21 = vld [vmem:[%s14554_s16 + $0x70] ss:$8 sps:$4 sm:$0xff]  }
 0x48c   : > { %4360 = vmatpush1.bf16.msra.mxu0 %v10818_v8  ;;  %4197 = vmatprep.subr.bf16.mxu1 %v10823_v9  ;;  %v10901_v8 = vld [vmem:[%s14554_s16 + $0x84] ss:$8 sps:$4 sm:$0xff]   ;;  %v10899_v9 = vld [vmem:[%s14554_s16 + $0x80] ss:$8 sps:$4 sm:$0xff]  }
 0x48d   : > { %4361 = vmatprep.subr.bf16.mxu0 %v10826_v36  ;;  %v10904_v36 = vld [vmem:[%s14554_s16 + $0x94] ss:$8 sps:$4 sm:$0xff]  }
 0x48f   : > { %4198 = vmatpush1.bf16.msra.mxu1 %v10821_v57  ;;  %v10902_v57 = vld [vmem:[%s14554_s16 + $0x90] ss:$8 sps:$4 sm:$0xff]  }
 0x490   : > { %4362 = vmatpush1.bf16.msra.mxu0 %v10824_v0  ;;  %4199 = vmatprep.subr.bf16.mxu1 %v10829_v34  ;;  %v10907_v0 = vld [vmem:[%s14554_s16 + $0xa4] ss:$8 sps:$4 sm:$0xff]   ;;  %v10905_v34 = vld [vmem:[%s14554_s16 + $0xa0] ss:$8 sps:$4 sm:$0xff]  }
 0x491   : > { %4363 = vmatprep.subr.bf16.mxu0 %v10832_v58  ;;  %v10910_v58 = vld [vmem:[%s14554_s16 + $0xb4] ss:$8 sps:$4 sm:$0xff]  }
 0x493   : > { %4200 = vmatpush1.bf16.msra.mxu1 %v10827_v35  ;;  %v10908_v35 = vld [vmem:[%s14554_s16 + $0xb0] ss:$8 sps:$4 sm:$0xff]  }
 0x494   : > { %4364 = vmatpush1.bf16.msra.mxu0 %v10830_v61  ;;  %4201 = vmatprep.subr.bf16.mxu1 %v10835_v3  ;;  %v10913_v61 = vld [vmem:[%s14554_s16 + $0xc4] ss:$8 sps:$4 sm:$0xff]   ;;  %v10911_v3 = vld [vmem:[%s14554_s16 + $0xc0] ss:$8 sps:$4 sm:$0xff]  }
 0x495   : > { %4365 = vmatprep.subr.bf16.mxu0 %v10838_v10  ;;  %v10916_v10 = vld [vmem:[%s14554_s16 + $0xd4] ss:$8 sps:$4 sm:$0xff]  }
 0x497   : > { %4202 = vmatpush1.bf16.msra.mxu1 %v10833_v24  ;;  %v10914_v24 = vld [vmem:[%s14554_s16 + $0xd0] ss:$8 sps:$4 sm:$0xff]  }
 0x498   : > { %4366 = vmatpush1.bf16.msra.mxu0 %v10836_v4  ;;  %4203 = vmatprep.subr.bf16.mxu1 %v10841_v14  ;;  %v10919_v4 = vld [vmem:[%s14554_s16 + $0xe4] ss:$8 sps:$4 sm:$0xff]   ;;  %v10917_v14 = vld [vmem:[%s14554_s16 + $0xe0] ss:$8 sps:$4 sm:$0xff]  }
 0x499   : > { %4367 = vmatprep.subr.bf16.mxu0 %v10844_v48  ;;  %v10922_v48 = vld [vmem:[%s14554_s16 + $0xf4] ss:$8 sps:$4 sm:$0xff]  }
 0x49b   : > { %4204 = vmatpush1.bf16.msra.mxu1 %v10839_v62  ;;  %v10920_v62 = vld [vmem:[%s14554_s16 + $0xf0] ss:$8 sps:$4 sm:$0xff]  }
 0x49c   : > { %4368 = vmatpush1.bf16.msra.mxu0 %v10842_v25  ;;  %4205 = vmatprep.subr.bf16.mxu1 %v10847_v28  ;;  %v10925_v25 = vld [vmem:[%s14554_s16 + $0x104] ss:$8 sps:$4 sm:$0xff]  }
 0x49d   : > { %4369 = vmatprep.subr.bf16.mxu0 %v10850_v32  ;;  %v4942_v28 = vld [vmem:[%s14557_s19] sm:$0xff] }
 0x49e   : > { %v4958_v32 = vld [vmem:[%s14557_s19 + $0x80] sm:$0xff] }
 0x49f   : > { %4206 = vmatpush1.bf16.msra.mxu1 %v10845_v43  ;;  %v9811_v43 = vcombine.low %v4942_v28, %v4958_v32 }
 0x4a0   : > { %4370 = vmatpush1.bf16.msra.mxu0 %v10848_v41  ;;  %4207 = vmatprep.subr.bf16.mxu1 %v10853_v7  ;;  %v9812_v41 = vcombine.high %v4942_v28, %v4958_v32  ;;  %v4974_v7 = vld [vmem:[%s14557_s19 + $0x100] sm:$0xff] }
 0x4a1   : > { %4371 = vmatprep.subr.bf16.mxu0 %v10856_v33  ;;  %v4990_v33 = vld [vmem:[%s14557_s19 + $0x180] sm:$0xff] }
 0x4a2   : > { %v5374_v28 = vld [vmem:[%s14557_s19 + $0xd80] sm:$0xff] }
 0x4a3   : > { %4208 = vmatpush1.bf16.msra.mxu1 %v10851_v39  ;;  %v9844_v39 = vcombine.high %v4974_v7, %v4990_v33 }
 0x4a4   : > { %4372 = vmatpush1.bf16.msra.mxu0 %v10854_v27  ;;  %4209 = vmatprep.subr.bf16.mxu1 %v10859_v17  ;;  %v9843_v27 = vcombine.low %v4974_v7, %v4990_v33  ;;  %v5006_v17 = vld [vmem:[%s14557_s19 + $0x200] sm:$0xff] }
 0x4a5   : > { %4373 = vmatprep.subr.bf16.mxu0 %v10862_v46  ;;  %v5022_v46 = vld [vmem:[%s14557_s19 + $0x280] sm:$0xff] }
 0x4a7   : > { %4210 = vmatpush1.bf16.msra.mxu1 %v10857_v63  ;;  %v9876_v63 = vcombine.high %v5006_v17, %v5022_v46 }
 0x4a8   : > { %4374 = vmatpush1.bf16.msra.mxu0 %v10860_v38  ;;  %4211 = vmatprep.subr.bf16.mxu1 %v10865_v42  ;;  %v9875_v38 = vcombine.low %v5006_v17, %v5022_v46  ;;  %v5038_v42 = vld [vmem:[%s14557_s19 + $0x300] sm:$0xff] }
 0x4a9   : > { %4375 = vmatprep.subr.bf16.mxu0 %v10868_v11  ;;  %v5054_v11 = vld [vmem:[%s14557_s19 + $0x380] sm:$0xff] }
 0x4ab   : > { %4212 = vmatpush1.bf16.msra.mxu1 %v10863_v31  ;;  %v9908_v31 = vcombine.high %v5038_v42, %v5054_v11 }
 0x4ac   : > { %4376 = vmatpush1.bf16.msra.mxu0 %v10866_v52  ;;  %4213 = vmatprep.subr.bf16.mxu1 %v10871_v55  ;;  %v9907_v52 = vcombine.low %v5038_v42, %v5054_v11  ;;  %v5070_v55 = vld [vmem:[%s14557_s19 + $0x400] sm:$0xff] }
 0x4ad   : > { %4377 = vmatprep.subr.bf16.mxu0 %v10874_v6  ;;  %v5086_v6 = vld [vmem:[%s14557_s19 + $0x480] sm:$0xff] }
 0x4af   : > { %4214 = vmatpush1.bf16.msra.mxu1 %v10869_v37  ;;  %v9940_v37 = vcombine.high %v5070_v55, %v5086_v6 }
 0x4b0   : > { %4378 = vmatpush1.bf16.msra.mxu0 %v10872_v47  ;;  %4832 = vmatprep.subr.bf16.mxu1 %v10877_v49  ;;  %v9939_v47 = vcombine.low %v5070_v55, %v5086_v6  ;;  %v5118_v49 = vld [vmem:[%s14557_s19 + $0x580] sm:$0xff] }
 0x4b1   : > { %8024 = vmatprep.subr.bf16.mxu0 %v9812_v41 }
 0x4b2   : > { %4216 = vmatmul.mubr.bf16.vlgmr.msra.gmra.mrb[40].mxu1 %v2778_v59 }
 0x4b3   : > { %4380 = vmatmul.mubr.bf16.vlgmr.msra.gmra.mrb[48].mxu0 %v2778_v59  ;;  %4833 = vmatpush1.bf16.msra.mxu1 %v10875_v56  ;;  %v9972_v56 = vcombine.high %v5102_v29, %v5118_v49  ;;  %v9971_v59 = vcombine.low %v5102_v29, %v5118_v49 }
 0x4b4   : > { %4834 = vmatprep.subr.bf16.mxu1 %v10880_v40  ;;  %8025 = vmatpush1.bf16.msra.mxu0 %v9811_v43  ;;  %v5134_v40 = vld [vmem:[%s14557_s19 + $0x600] sm:$0xff] }
 0x4b5   : > { %8026 = vmatprep.subr.bf16.mxu0 %v9844_v39 }
 0x4b7   : > { %4835 = vmatpush1.bf16.msra.mxu1 %v10878_v1  ;;  %v5150_v1 = vld [vmem:[%s14557_s19 + $0x680] sm:$0xff] }
 0x4b8   : > { %4836 = vmatprep.subr.bf16.mxu1 %v10883_v30  ;;  %8027 = vmatpush1.bf16.msra.mxu0 %v9843_v27  ;;  %v10004_v30 = vcombine.high %v5134_v40, %v5150_v1 }
 0x4b9   : > { %8028 = vmatprep.subr.bf16.mxu0 %v9876_v63 }
 0x4bb   : > { %4837 = vmatpush1.bf16.msra.mxu1 %v10881_v44  ;;  %v10003_v44 = vcombine.low %v5134_v40, %v5150_v1 }
 0x4bc   : > { %4838 = vmatprep.subr.bf16.mxu1 %v10886_v45  ;;  %8029 = vmatpush1.bf16.msra.mxu0 %v9875_v38  ;;  %v5166_v45 = vld [vmem:[%s14557_s19 + $0x700] sm:$0xff] }
 0x4bd   : > { %8030 = vmatprep.subr.bf16.mxu0 %v9908_v31 }
 0x4bf   : > { %4839 = vmatpush1.bf16.msra.mxu1 %v10884_v51  ;;  %v5182_v51 = vld [vmem:[%s14557_s19 + $0x780] sm:$0xff] }
 0x4c0   : > { %4840 = vmatprep.subr.bf16.mxu1 %v10889_v50  ;;  %8031 = vmatpush1.bf16.msra.mxu0 %v9907_v52  ;;  %v10036_v50 = vcombine.high %v5166_v45, %v5182_v51 }
 0x4c1   : > { %8032 = vmatprep.subr.bf16.mxu0 %v9940_v37 }
 0x4c3   : > { %4841 = vmatpush1.bf16.msra.mxu1 %v10887_v26  ;;  %v10035_v26 = vcombine.low %v5166_v45, %v5182_v51 }
 0x4c4   : > { %4842 = vmatprep.subr.bf16.mxu1 %v10892_v60  ;;  %8033 = vmatpush1.bf16.msra.mxu0 %v9939_v47  ;;  %v5198_v60 = vld [vmem:[%s14557_s19 + $0x800] sm:$0xff] }
 0x4c5   : > { %8034 = vmatprep.subr.bf16.mxu0 %v9972_v56 }
 0x4c7   : > { %4843 = vmatpush1.bf16.msra.mxu1 %v10890_v2  ;;  %v5214_v2 = vld [vmem:[%s14557_s19 + $0x880] sm:$0xff] }
 0x4c8   : > { %4844 = vmatprep.subr.bf16.mxu1 %v10895_v53  ;;  %8035 = vmatpush1.bf16.msra.mxu0 %v9971_v59  ;;  %v10068_v53 = vcombine.high %v5198_v60, %v5214_v2 }
 0x4c9   : > { %8036 = vmatprep.subr.bf16.mxu0 %v10004_v30 }
 0x4cb   : > { %4845 = vmatpush1.bf16.msra.mxu1 %v10893_v20  ;;  %v10067_v20 = vcombine.low %v5198_v60, %v5214_v2  ;;  %v10928_v2 = vld [vmem:[%s14554_s16 + $0x114] ss:$8 sps:$4 sm:$0xff]  }
 0x4cc   : > { %4846 = vmatprep.subr.bf16.mxu1 %v10898_v54  ;;  %8037 = vmatpush1.bf16.msra.mxu0 %v10003_v44  ;;  %v5230_v54 = vld [vmem:[%s14557_s19 + $0x900] sm:$0xff] }
 0x4cd   : > { %8038 = vmatprep.subr.bf16.mxu0 %v10036_v50 }
 0x4cf   : > { %4847 = vmatpush1.bf16.msra.mxu1 %v10896_v21  ;;  %v5246_v21 = vld [vmem:[%s14557_s19 + $0x980] sm:$0xff] }
 0x4d0   : > { %4848 = vmatprep.subr.bf16.mxu1 %v10901_v8  ;;  %8039 = vmatpush1.bf16.msra.mxu0 %v10035_v26  ;;  %v10100_v8 = vcombine.high %v5230_v54, %v5246_v21  ;;  %v10923_v26 = vld [vmem:[%s14554_s16 + $0x100] ss:$8 sps:$4 sm:$0xff]  }
 0x4d1   : > { %8040 = vmatprep.subr.bf16.mxu0 %v10068_v53 }
 0x4d3   : > { %4849 = vmatpush1.bf16.msra.mxu1 %v10899_v9  ;;  %v10099_v9 = vcombine.low %v5230_v54, %v5246_v21  ;;  %v10931_v54 = vld [vmem:[%s14554_s16 + $0x124] ss:$8 sps:$4 sm:$0xff]   ;;  %v10929_v21 = vld [vmem:[%s14554_s16 + $0x120] ss:$8 sps:$4 sm:$0xff]  }
 0x4d4   : > { %4850 = vmatprep.subr.bf16.mxu1 %v10904_v36  ;;  %8041 = vmatpush1.bf16.msra.mxu0 %v10067_v20  ;;  %v5262_v36 = vld [vmem:[%s14557_s19 + $0xa00] sm:$0xff]  ;;  %v10926_v20 = vld [vmem:[%s14554_s16 + $0x110] ss:$8 sps:$4 sm:$0xff]  }
 0x4d5   : > { %8042 = vmatprep.subr.bf16.mxu0 %v10100_v8  ;;  %v10934_v8 = vld [vmem:[%s14554_s16 + $0x134] ss:$8 sps:$4 sm:$0xff]  }
 0x4d7   : > { %4851 = vmatpush1.bf16.msra.mxu1 %v10902_v57  ;;  %v5278_v57 = vld [vmem:[%s14557_s19 + $0xa80] sm:$0xff] }
 0x4d8   : > { %4852 = vmatprep.subr.bf16.mxu1 %v10907_v0  ;;  %v10132_v0 = vcombine.high %v5262_v36, %v5278_v57  ;;  %8043 = vmatpush1.bf16.msra.mxu0 %v10099_v9  ;;  %v10932_v9 = vld [vmem:[%s14554_s16 + $0x130] ss:$8 sps:$4 sm:$0xff]  }
 0x4da   : > { %8044 = vmatprep.subr.bf16.mxu0 %v10132_v0  ;;  %v10940_v0 = vld [vmem:[%s14554_s16 + $0x154] ss:$8 sps:$4 sm:$0xff]  }
 0x4db   : > { %4853 = vmatpush1.bf16.msra.mxu1 %v10905_v34  ;;  %v10131_v34 = vcombine.low %v5262_v36, %v5278_v57  ;;  %v10937_v36 = vld [vmem:[%s14554_s16 + $0x144] ss:$8 sps:$4 sm:$0xff]   ;;  %v10935_v57 = vld [vmem:[%s14554_s16 + $0x140] ss:$8 sps:$4 sm:$0xff]  }
 0x4dc   : > { %4854 = vmatprep.subr.bf16.mxu1 %v10910_v58  ;;  %v5294_v58 = vld [vmem:[%s14557_s19 + $0xb00] sm:$0xff] }
 0x4dd   : > { %8045 = vmatpush1.bf16.msra.mxu0 %v10131_v34  ;;  %v10938_v34 = vld [vmem:[%s14554_s16 + $0x150] ss:$8 sps:$4 sm:$0xff]  }
 0x4df   : > { %4855 = vmatpush1.bf16.msra.mxu1 %v10908_v35  ;;  %v5310_v35 = vld [vmem:[%s14557_s19 + $0xb80] sm:$0xff] }
 0x4e0   : > { %4856 = vmatprep.subr.bf16.mxu1 %v10913_v61  ;;  %v10164_v61 = vcombine.high %v5294_v58, %v5310_v35 }
 0x4e2   : > { %8046 = vmatprep.subr.bf16.mxu0 %v10164_v61  ;;  %v10946_v61 = vld [vmem:[%s14554_s16 + $0x174] ss:$8 sps:$4 sm:$0xff]  }
 0x4e3   : > { %4857 = vmatpush1.bf16.msra.mxu1 %v10911_v3  ;;  %v10163_v3 = vcombine.low %v5294_v58, %v5310_v35  ;;  %v10943_v58 = vld [vmem:[%s14554_s16 + $0x164] ss:$8 sps:$4 sm:$0xff]   ;;  %v10941_v35 = vld [vmem:[%s14554_s16 + $0x160] ss:$8 sps:$4 sm:$0xff]  }
 0x4e4   : > { %4858 = vmatprep.subr.bf16.mxu1 %v10916_v10  ;;  %v5326_v10 = vld [vmem:[%s14557_s19 + $0xc00] sm:$0xff] }
 0x4e5   : > { %8047 = vmatpush1.bf16.msra.mxu0 %v10163_v3  ;;  %v10944_v3 = vld [vmem:[%s14554_s16 + $0x170] ss:$8 sps:$4 sm:$0xff]  }
 0x4e7   : > { %4859 = vmatpush1.bf16.msra.mxu1 %v10914_v24  ;;  %v5342_v24 = vld [vmem:[%s14557_s19 + $0xc80] sm:$0xff] }
 0x4e8   : > { %4860 = vmatprep.subr.bf16.mxu1 %v10919_v4  ;;  %v10196_v4 = vcombine.high %v5326_v10, %v5342_v24 }
 0x4ea   : > { %8048 = vmatprep.subr.bf16.mxu0 %v10196_v4  ;;  %v10952_v4 = vld [vmem:[%s14554_s16 + $0x194] ss:$8 sps:$4 sm:$0xff]  }
 0x4eb   : > { %4861 = vmatpush1.bf16.msra.mxu1 %v10917_v14  ;;  %v2729_v14 = vld [vmem:[%s14552_s14] sm:$0xf] }
 0x4ec   : > { %4862 = vmatprep.subr.bf16.mxu1 %v10922_v48  ;;  %v10195_v48 = vcombine.low %v5326_v10, %v5342_v24  ;;  %v4392_v32 = vrot.slane %v2729_v14, %v11659_v12  ;;  %v4400_v41 = vrot.slane %v2729_v14, %v11661_v13  ;;  %v4396_v7 = vrot.slane %v2729_v14, %v11666_v15  ;;  %v10949_v10 = vld [vmem:[%s14554_s16 + $0x184] ss:$8 sps:$4 sm:$0xff]   ;;  %v10947_v24 = vld [vmem:[%s14554_s16 + $0x180] ss:$8 sps:$4 sm:$0xff]  }
 0x4ed   : > { %v4404_v39 = vrot.slane %v2729_v14, %v11668_v16  ;;  %v10950_v14 = vld [vmem:[%s14554_s16 + $0x190] ss:$8 sps:$4 sm:$0xff]  }
 0x4ee   : > { %8049 = vmatpush1.bf16.msra.mxu0 %v10195_v48  ;;  %v10955_v48 = vld [vmem:[%s14554_s16 + $0x1a4] ss:$8 sps:$4 sm:$0xff]  }
 0x4ef   : > { %4863 = vmatpush1.bf16.msra.mxu1 %v10920_v62  ;;  %v2730_v62 = vld [vmem:[%s14553_s15] sm:$0xf] }
 0x4f0   : > { %4873 = vmatprep.subr.bf16.mxu1 %v10925_v25  ;;  %v5358_v25 = vld [vmem:[%s14557_s19 + $0xd00] sm:$0xff]  ;;  %v4417_v33 = vrot.slane %v2730_v62, %v11659_v12  ;;  %v4425_v46 = vrot.slane %v2730_v62, %v11661_v13  ;;  %v4421_v63 = vrot.slane %v2730_v62, %v11666_v15  ;;  %v4429_v31 = vrot.slane %v2730_v62, %v11668_v16 }
 0x4f1   : > { %v10228_v43 = vcombine.high %v5358_v25, %v5374_v28  ;;  %v10227_v27 = vcombine.low %v5358_v25, %v5374_v28  ;;  %v10953_v62 = vld [vmem:[%s14554_s16 + $0x1a0] ss:$8 sps:$4 sm:$0xff]   ;;  %v10958_v25 = vld [vmem:[%s14554_s16 + $0x1b4] ss:$8 sps:$4 sm:$0xff]   ;;  %v10956_v28 = vld [vmem:[%s14554_s16 + $0x1b0] ss:$8 sps:$4 sm:$0xff]  }
 0x4f3   : > { %8050 = vmatprep.subr.bf16.mxu0 %v10228_v43  ;;  %v10959_v43 = vld [vmem:[%s14554_s16 + $0x1c0] ss:$8 sps:$4 sm:$0xff]  }
 0x4f4   : > { %8051 = vmatpush1.bf16.msra.mxu0 %v10227_v27  ;;  %v10970_v27 = vld [vmem:[%s14554_s16 + $0x1f4] ss:$8 sps:$4 sm:$0xff]  }
 0x585   : > { %v4217_v17 = vpop.f32.mrb[40].mxu1 }
 0x586   : > { %v4409_v38 = vmul.f32 %v4392_v32, %v4217_v17  ;;  %v4381_v42 = vpop.f32.mrb[48].mxu0  ;;  %v4219_v11 = vpop.f32.mrb[41].mxu1  ;;  %v10961_v32 = vld [vmem:[%s14554_s16 + $0x1c4] ss:$8 sps:$4 sm:$0xff]   ;;  %v4944_v17 = vld [vmem:[%s14557_s19 + $0x10] sm:$0xff] }
 0x587   : > { %v4411_v52 = vmul.f32 %v4400_v41, %v4381_v42  ;;  %v4410_v55 = vmul.f32 %v4396_v7, %v4219_v11  ;;  %v4383_v6 = vpop.f32.mrb[49].mxu0  ;;  %v4221_v37 = vpop.f32.mrb[42].mxu1  ;;  %v10964_v41 = vld [vmem:[%s14554_s16 + $0x1d4] ss:$8 sps:$4 sm:$0xff]   ;;  %v10962_v7 = vld [vmem:[%s14554_s16 + $0x1d0] ss:$8 sps:$4 sm:$0xff]  }
 0x588   : > { %v4434_v47 = vadd.f32 %v4417_v33, %v4409_v38  ;;  %v4412_v29 = vmul.f32 %v4404_v39, %v4383_v6  ;;  %v4385_v49 = vpop.f32.mrb[50].mxu0  ;;  %v4222_v56 = vpop.f32.mrb[43].mxu1  ;;  %v10967_v33 = vld [vmem:[%s14554_s16 + $0x1e4] ss:$8 sps:$4 sm:$0xff]   ;;  %v10965_v39 = vld [vmem:[%s14554_s16 + $0x1e0] ss:$8 sps:$4 sm:$0xff]  }
 0x589   : > { %v12659_v59 = vadd.f32 %v4425_v46, %v4411_v52  ;;  %v4435_v40 = vadd.f32 %v4421_v63, %v4410_v55  ;;  %v4386_v1 = vpop.f32.mrb[51].mxu0  ;;  %v4960_v46 = vld [vmem:[%s14557_s19 + $0x90] sm:$0xff] }
 0x58a   : > { %v4438_v30 = vmax.f32 %v4434_v47, 0.0  ;;  %v4437_v44 = vadd.f32 %v4429_v31, %v4412_v29  ;;  %v10968_v63 = vld [vmem:[%s14554_s16 + $0x1f0] ss:$8 sps:$4 sm:$0xff]   ;;  %v9816_v42 = vcombine.high %v4944_v17, %v4960_v46  ;;  %v9815_v52 = vcombine.low %v4944_v17, %v4960_v46 }
 0x58b   : > { %v4439_v45 = vmax.f32 %v4435_v40, 0.0  ;;  %v4440_v38 = vmax.f32 %v12659_v59, 0.0  ;;  %v4976_v11 = vld [vmem:[%s14557_s19 + $0x110] sm:$0xff] }
 0x58c   : > { %v4441_v51 = vmax.f32 %v4437_v44, 0.0  ;;  %v4508_v60 = vpack.c.bf16 %v4438_v30, %v4438_v30  ;;  %v4992_v31 = vld [vmem:[%s14557_s19 + $0x190] sm:$0xff] }
 0x58d   : > { %v4509_v50 = vpack.c.bf16 %v4439_v45, %v4439_v45  ;;  %v4510_v55 = vpack.c.bf16 %v4440_v38, %v4440_v38  ;;  %v9848_v6 = vcombine.high %v4976_v11, %v4992_v31  ;;  %v5008_v37 = vld [vmem:[%s14557_s19 + $0x210] sm:$0xff]  ;;  %v9847_v29 = vcombine.low %v4976_v11, %v4992_v31  ;;  %v5406_v11 = vld [vmem:[%s14557_s19 + $0xe80] sm:$0xff] }
 0x58e   : > { %v4511_v53 = vpack.c.bf16 %v4441_v51, %v4441_v51  ;;  %v5024_v47 = vld [vmem:[%s14557_s19 + $0x290] sm:$0xff] }
 0x58f   : > { %4864 = vmatprep.mubr.bf16.mxu1 %v4509_v50  ;;  %v9880_v49 = vcombine.high %v5008_v37, %v5024_v47  ;;  %v5040_v56 = vld [vmem:[%s14557_s19 + $0x310] sm:$0xff]  ;;  %v9879_v40 = vcombine.low %v5008_v37, %v5024_v47 }
 0x590   : > { %4865 = vmatmul.mubr.bf16.vlgmr.msra.gmra.mrb[44].mxu1 %v4508_v60  ;;  %v5056_v59 = vld [vmem:[%s14557_s19 + $0x390] sm:$0xff] }
 0x591   : > { %4874 = vmatpush1.bf16.msra.mxu1 %v10923_v26  ;;  %4905 = vmatprep.mubr.bf16.mxu1 %v4511_v53  ;;  %v9912_v1 = vcombine.high %v5040_v56, %v5056_v59  ;;  %v5072_v30 = vld [vmem:[%s14557_s19 + $0x410] sm:$0xff]  ;;  %v9911_v45 = vcombine.low %v5040_v56, %v5056_v59 }
 0x592   : > { %4875 = vmatprep.subr.bf16.mxu1 %v10928_v2  ;;  %v5088_v44 = vld [vmem:[%s14557_s19 + $0x490] sm:$0xff] }
 0x593   : > { %v9944_v51 = vcombine.high %v5072_v30, %v5088_v44  ;;  %v5104_v50 = vld [vmem:[%s14557_s19 + $0x510] sm:$0xff]  ;;  %v9943_v60 = vcombine.low %v5072_v30, %v5088_v44 }
 0x594   : > { %v5120_v26 = vld [vmem:[%s14557_s19 + $0x590] sm:$0xff] }
 0x595   : > { %4876 = vmatpush1.bf16.msra.mxu1 %v10926_v20  ;;  %v9976_v2 = vcombine.high %v5104_v50, %v5120_v26  ;;  %v5136_v53 = vld [vmem:[%s14557_s19 + $0x610] sm:$0xff] }
 0x596   : > { %4877 = vmatprep.subr.bf16.mxu1 %v10931_v54  ;;  %v5152_v20 = vld [vmem:[%s14557_s19 + $0x690] sm:$0xff]  ;;  %v9975_v54 = vcombine.low %v5104_v50, %v5120_v26  ;;  %v4946_v50 = vld [vmem:[%s14557_s19 + $0x20] sm:$0xff] }
 0x597   : > { %v5376_v17 = vld [vmem:[%s14557_s19 + $0xd90] sm:$0xff] }
 0x598   : > { %v5392_v31 = vld [vmem:[%s14557_s19 + $0xe10] sm:$0xff] }
 0x599   : > { %4878 = vmatpush1.bf16.msra.mxu1 %v10929_v21  ;;  %v10008_v21 = vcombine.high %v5136_v53, %v5152_v20  ;;  %v5424_v56 = vld [vmem:[%s14557_s19 + $0xf10] sm:$0xff] }
 0x59a   : > { %4879 = vmatprep.subr.bf16.mxu1 %v10934_v8  ;;  %v5168_v8 = vld [vmem:[%s14557_s19 + $0x710] sm:$0xff] }
 0x59d   : > { %4880 = vmatpush1.bf16.msra.mxu1 %v10932_v9  ;;  %v5184_v9 = vld [vmem:[%s14557_s19 + $0x790] sm:$0xff] }
 0x59e   : > { %4881 = vmatprep.subr.bf16.mxu1 %v10937_v36  ;;  %v10007_v36 = vcombine.low %v5136_v53, %v5152_v20 }
 0x5a1   : > { %4882 = vmatpush1.bf16.msra.mxu1 %v10935_v57  ;;  %v10040_v57 = vcombine.high %v5168_v8, %v5184_v9 }
 0x5a2   : > { %4883 = vmatprep.subr.bf16.mxu1 %v10940_v0  ;;  %v5200_v0 = vld [vmem:[%s14557_s19 + $0x810] sm:$0xff] }
 0x5a5   : > { %4884 = vmatpush1.bf16.msra.mxu1 %v10938_v34  ;;  %v5216_v34 = vld [vmem:[%s14557_s19 + $0x890] sm:$0xff] }
 0x5a6   : > { %4885 = vmatprep.subr.bf16.mxu1 %v10943_v58  ;;  %v10039_v58 = vcombine.low %v5168_v8, %v5184_v9 }
 0x5a9   : > { %4886 = vmatpush1.bf16.msra.mxu1 %v10941_v35  ;;  %v10072_v35 = vcombine.high %v5200_v0, %v5216_v34 }
 0x5aa   : > { %4887 = vmatprep.subr.bf16.mxu1 %v10946_v61  ;;  %v5232_v61 = vld [vmem:[%s14557_s19 + $0x910] sm:$0xff] }
 0x5ad   : > { %4888 = vmatpush1.bf16.msra.mxu1 %v10944_v3  ;;  %v5248_v3 = vld [vmem:[%s14557_s19 + $0x990] sm:$0xff] }
 0x5ae   : > { %4889 = vmatprep.subr.bf16.mxu1 %v10949_v10  ;;  %v10071_v10 = vcombine.low %v5200_v0, %v5216_v34 }
 0x5b1   : > { %4890 = vmatpush1.bf16.msra.mxu1 %v10947_v24  ;;  %v10104_v24 = vcombine.high %v5232_v61, %v5248_v3 }
 0x5b2   : > { %4891 = vmatprep.subr.bf16.mxu1 %v10952_v4  ;;  %v5264_v4 = vld [vmem:[%s14557_s19 + $0xa10] sm:$0xff] }
 0x5b5   : > { %4892 = vmatpush1.bf16.msra.mxu1 %v10950_v14  ;;  %v5280_v14 = vld [vmem:[%s14557_s19 + $0xa90] sm:$0xff] }
 0x5b6   : > { %4893 = vmatprep.subr.bf16.mxu1 %v10955_v48  ;;  %v10103_v48 = vcombine.low %v5232_v61, %v5248_v3 }
 0x5b9   : > { %4894 = vmatpush1.bf16.msra.mxu1 %v10953_v62  ;;  %v10136_v62 = vcombine.high %v5264_v4, %v5280_v14 }
 0x5ba   : > { %4895 = vmatprep.subr.bf16.mxu1 %v10958_v25  ;;  %v5296_v25 = vld [vmem:[%s14557_s19 + $0xb10] sm:$0xff] }
 0x5bd   : > { %4896 = vmatpush1.bf16.msra.mxu1 %v10956_v28  ;;  %v5312_v28 = vld [vmem:[%s14557_s19 + $0xb90] sm:$0xff] }
 0x5be   : > { %4897 = vmatprep.subr.bf16.mxu1 %v10961_v32  ;;  %v10135_v32 = vcombine.low %v5264_v4, %v5280_v14 }
 0x5c1   : > { %4898 = vmatpush1.bf16.msra.mxu1 %v10959_v43  ;;  %v10168_v43 = vcombine.high %v5296_v25, %v5312_v28 }
 0x5c2   : > { %4899 = vmatprep.subr.bf16.mxu1 %v10964_v41  ;;  %v5328_v41 = vld [vmem:[%s14557_s19 + $0xc10] sm:$0xff] }
 0x5c5   : > { %4900 = vmatpush1.bf16.msra.mxu1 %v10962_v7  ;;  %v5344_v7 = vld [vmem:[%s14557_s19 + $0xc90] sm:$0xff] }
 0x5c6   : > { %4901 = vmatprep.subr.bf16.mxu1 %v10967_v33  ;;  %v10167_v33 = vcombine.low %v5296_v25, %v5312_v28  ;;  %v10199_v46 = vcombine.low %v5328_v41, %v5344_v7  ;;  %v4978_v25 = vld [vmem:[%s14557_s19 + $0x120] sm:$0xff] }
 0x5c7   : > { %v4994_v28 = vld [vmem:[%s14557_s19 + $0x1a0] sm:$0xff] }
 0x5c9   : > { %4902 = vmatpush1.bf16.msra.mxu1 %v10965_v39  ;;  %v10200_v39 = vcombine.high %v5328_v41, %v5344_v7  ;;  %v5007_v41 = vld [vmem:[%s14557_s19 + $0x208] sm:$0xff] }
 0x5ca   : > { %4903 = vmatprep.subr.bf16.mxu1 %v10970_v27  ;;  %v5360_v27 = vld [vmem:[%s14557_s19 + $0xd10] sm:$0xff] }
 0x5cb   : > { %v10231_v38 = vcombine.low %v5360_v27, %v5376_v17 }
 0x5cd   : > { %4904 = vmatpush1.bf16.msra.mxu1 %v10968_v63  ;;  %v10232_v63 = vcombine.high %v5360_v27, %v5376_v17  ;;  %v5010_v27 = vld [vmem:[%s14557_s19 + $0x220] sm:$0xff] }
 0x5ce   : > { %8106 = vmatprep.subr.bf16.mxu1 %v9816_v42  ;;  %v5390_v42 = vld [vmem:[%s14557_s19 + $0xe00] sm:$0xff] }
 0x5cf   : > { %v5026_v17 = vld [vmem:[%s14557_s19 + $0x2a0] sm:$0xff] }
 0x5d0   : > { %4906 = vmatmul.mubr.bf16.vlgmr.msra.gmra.mrb[44].mxu1 %v4510_v55  ;;  %v5408_v55 = vld [vmem:[%s14557_s19 + $0xe90] sm:$0xff] }
 0x5d1   : > { %8107 = vmatpush1.bf16.msra.mxu1 %v9815_v52  ;;  %v10260_v52 = vcombine.high %v5390_v42, %v5406_v11  ;;  %v10263_v37 = vcombine.low %v5392_v31, %v5408_v55  ;;  %v10264_v47 = vcombine.high %v5392_v31, %v5408_v55  ;;  %v5055_v31 = vld [vmem:[%s14557_s19 + $0x388] sm:$0xff]  ;;  %v5058_v55 = vld [vmem:[%s14557_s19 + $0x3a0] sm:$0xff] }
 0x5d2   : > { %8108 = vmatprep.subr.bf16.mxu1 %v9848_v6  ;;  %v10259_v6 = vcombine.low %v5390_v42, %v5406_v11  ;;  %v9884_v42 = vcombine.high %v5010_v27, %v5026_v17  ;;  %v5039_v11 = vld [vmem:[%s14557_s19 + $0x308] sm:$0xff] }
 0x5d3   : > { %8052 = vmatprep.subr.bf16.mxu0 %v10260_v52  ;;  %v5042_v52 = vld [vmem:[%s14557_s19 + $0x320] sm:$0xff] }
 0x5d4   : > { %8053 = vmatpush1.bf16.msra.mxu0 %v10259_v6 }
 0x5d5   : > { %8109 = vmatpush1.bf16.msra.mxu1 %v9847_v29  ;;  %v5422_v29 = vld [vmem:[%s14557_s19 + $0xf00] sm:$0xff] }
 0x5d6   : > { %8110 = vmatprep.subr.bf16.mxu1 %v9880_v49  ;;  %v5438_v49 = vld [vmem:[%s14557_s19 + $0xf80] sm:$0xff] }
 0x5d7   : > { %v10292_v59 = vcombine.high %v5422_v29, %v5438_v49 }
 0x5d9   : > { %8111 = vmatpush1.bf16.msra.mxu1 %v9879_v40  ;;  %v5440_v40 = vld [vmem:[%s14557_s19 + $0xf90] sm:$0xff]  ;;  %8054 = vmatprep.subr.bf16.mxu0 %v10292_v59  ;;  %v5074_v59 = vld [vmem:[%s14557_s19 + $0x420] sm:$0xff] }
 0x5da   : > { %8112 = vmatprep.subr.bf16.mxu1 %v9912_v1  ;;  %v10291_v1 = vcombine.low %v5422_v29, %v5438_v49  ;;  %v10295_v30 = vcombine.low %v5424_v56, %v5440_v40  ;;  %v10296_v44 = vcombine.high %v5424_v56, %v5440_v40  ;;  %v9916_v29 = vcombine.high %v5042_v52, %v5058_v55  ;;  %v5071_v49 = vld [vmem:[%s14557_s19 + $0x408] sm:$0xff]  ;;  %v5090_v40 = vld [vmem:[%s14557_s19 + $0x4a0] sm:$0xff] }
 0x5db   : > { %v5087_v56 = vld [vmem:[%s14557_s19 + $0x488] sm:$0xff] }
 0x5dc   : > { %8055 = vmatpush1.bf16.msra.mxu0 %v10291_v1  ;;  %v9909_v1 = vcombine.low %v5039_v11, %v5055_v31 }
 0x5dd   : > { %8113 = vmatpush1.bf16.msra.mxu1 %v9911_v45  ;;  %v4943_v45 = vld [vmem:[%s14557_s19 + $0x8] sm:$0xff] }
 0x5de   : > { %8114 = vmatprep.subr.bf16.mxu1 %v9944_v51  ;;  %v4959_v51 = vld [vmem:[%s14557_s19 + $0x88] sm:$0xff] }
 0x5df   : > { %v9814_v26 = vcombine.high %v4943_v45, %v4959_v51 }
 0x5e1   : > { %8115 = vmatpush1.bf16.msra.mxu1 %v9943_v60  ;;  %v4962_v60 = vld [vmem:[%s14557_s19 + $0xa0] sm:$0xff]  ;;  %8065 = vmatprep.subr.bf16.mxu0 %v9814_v26 }
 0x5e2   : > { %8116 = vmatprep.subr.bf16.mxu1 %v9976_v2  ;;  %v9813_v2 = vcombine.low %v4943_v45, %v4959_v51  ;;  %v9819_v53 = vcombine.low %v4946_v50, %v4962_v60  ;;  %v9820_v20 = vcombine.high %v4946_v50, %v4962_v60  ;;  %v9948_v45 = vcombine.high %v5074_v59, %v5090_v40  ;;  %v5103_v51 = vld [vmem:[%s14557_s19 + $0x508] sm:$0xff]  ;;  %v5106_v26 = vld [vmem:[%s14557_s19 + $0x520] sm:$0xff] }
 0x5e3   : > { %v5119_v50 = vld [vmem:[%s14557_s19 + $0x588] sm:$0xff]  ;;  %v5122_v60 = vld [vmem:[%s14557_s19 + $0x5a0] sm:$0xff] }
 0x5e5   : > { %8117 = vmatpush1.bf16.msra.mxu1 %v9975_v54  ;;  %v4506_v54 = vld [vmem:[%s14555_s17] sm:$0x3] }
 0x5e6   : > { %8118 = vmatprep.subr.bf16.mxu1 %v10008_v21  ;;  %v4507_v21 = vld [vmem:[%s14556_s18] sm:$0x3]  ;;  %v4918_v8 = vrot.slane %v4506_v54, %v11659_v12  ;;  %v4922_v9 = vrot.slane %v4506_v54, %v11666_v15  ;;  %v9980_v54 = vcombine.high %v5106_v26, %v5122_v60 }
 0x5e7   : > { %v4935_v0 = vrot.slane %v4507_v21, %v11666_v15 }
 0x5e9   : > { %8119 = vmatpush1.bf16.msra.mxu1 %v10007_v36  ;;  %v4931_v36 = vrot.slane %v4507_v21, %v11659_v12  ;;  %v5135_v21 = vld [vmem:[%s14557_s19 + $0x608] sm:$0xff] }
 0x5ea   : > { %8120 = vmatprep.subr.bf16.mxu1 %v10040_v57 }
 0x5ed   : > { %8121 = vmatpush1.bf16.msra.mxu1 %v10039_v58 }
 0x5ee   : > { %8122 = vmatprep.subr.bf16.mxu1 %v10072_v35 }
 0x5f1   : > { %8123 = vmatpush1.bf16.msra.mxu1 %v10071_v10 }
 0x5f2   : > { %8124 = vmatprep.subr.bf16.mxu1 %v10104_v24 }
 0x5f5   : > { %8125 = vmatpush1.bf16.msra.mxu1 %v10103_v48  ;;  %v4975_v48 = vld [vmem:[%s14557_s19 + $0x108] sm:$0xff] }
 0x5f6   : > { %8126 = vmatprep.subr.bf16.mxu1 %v10136_v62  ;;  %v4991_v62 = vld [vmem:[%s14557_s19 + $0x188] sm:$0xff] }
 0x5f7   : > { %v9846_v7 = vcombine.high %v4975_v48, %v4991_v62 }
 0x5f9   : > { %8127 = vmatpush1.bf16.msra.mxu1 %v10135_v32 }
 0x5fa   : > { %8128 = vmatprep.subr.bf16.mxu1 %v10168_v43 }
 0x5fd   : > { %8129 = vmatpush1.bf16.msra.mxu1 %v10167_v33  ;;  %v9852_v33 = vcombine.high %v4978_v25, %v4994_v28 }
 0x5fe   : > { %8130 = vmatprep.subr.bf16.mxu1 %v10200_v39  ;;  %v5023_v39 = vld [vmem:[%s14557_s19 + $0x288] sm:$0xff] }
 0x5ff   : > { %v9877_v6 = vcombine.low %v5007_v41, %v5023_v39 }
 0x601   : > { %8131 = vmatpush1.bf16.msra.mxu1 %v10199_v46  ;;  %v9845_v46 = vcombine.low %v4975_v48, %v4991_v62  ;;  %v5199_v62 = vld [vmem:[%s14557_s19 + $0x808] sm:$0xff] }
 0x602   : > { %8132 = vmatprep.subr.bf16.mxu1 %v10232_v63  ;;  %v9851_v63 = vcombine.low %v4978_v25, %v4994_v28  ;;  %v5215_v25 = vld [vmem:[%s14557_s19 + $0x888] sm:$0xff]  ;;  %v5202_v28 = vld [vmem:[%s14557_s19 + $0x820] sm:$0xff] }
 0x605   : > { %8133 = vmatpush1.bf16.msra.mxu1 %v10231_v38  ;;  %v9878_v38 = vcombine.high %v5007_v41, %v5023_v39  ;;  %v5218_v41 = vld [vmem:[%s14557_s19 + $0x8a0] sm:$0xff]  ;;  %v10070_v39 = vcombine.high %v5199_v62, %v5215_v25 }
 0x606   : > { %8134 = vmatprep.subr.bf16.mxu1 %v10264_v47  ;;  %v9910_v47 = vcombine.high %v5039_v11, %v5055_v31  ;;  %v10075_v11 = vcombine.low %v5202_v28, %v5218_v41 }
 0x609   : > { %8135 = vmatpush1.bf16.msra.mxu1 %v10263_v37  ;;  %v9883_v37 = vcombine.low %v5010_v27, %v5026_v17  ;;  %v10076_v27 = vcombine.high %v5202_v28, %v5218_v41  ;;  %v5231_v17 = vld [vmem:[%s14557_s19 + $0x908] sm:$0xff] }
 0x60a   : > { %8136 = vmatprep.subr.bf16.mxu1 %v10296_v44  ;;  %v9942_v44 = vcombine.high %v5071_v49, %v5087_v56  ;;  %v5423_v41 = vld [vmem:[%s14557_s19 + $0xf08] sm:$0xff] }
 0x60d   : > { %8137 = vmatpush1.bf16.msra.mxu1 %v10295_v30  ;;  %v9915_v30 = vcombine.low %v5042_v52, %v5058_v55  ;;  %v5263_v55 = vld [vmem:[%s14557_s19 + $0xa08] sm:$0xff] }
 0x60e   : > { %8188 = vmatprep.subr.bf16.mxu1 %v9820_v20  ;;  %v9974_v20 = vcombine.high %v5103_v51, %v5119_v50 }
 0x6a3   : > { %v4907_v57 = vpop.f32.mrb[44].mxu1 }
 0x6a4   : > { %v4925_v34 = vmul.f32 %v4918_v8, %v4907_v57  ;;  %v4909_v58 = vpop.f32.mrb[45].mxu1  ;;  %v5151_v8 = vld [vmem:[%s14557_s19 + $0x688] sm:$0xff]  ;;  %v9973_v57 = vcombine.low %v5103_v51, %v5119_v50 }
 0x6a5   : > { %v4926_v35 = vmul.f32 %v4922_v9, %v4909_v58  ;;  %v4911_v61 = vpop.f32.mrb[46].mxu1  ;;  %v5138_v9 = vld [vmem:[%s14557_s19 + $0x620] sm:$0xff] }
 0x6a6   : > { %v4938_v3 = vadd.f32 %v4931_v36, %v4925_v34  ;;  %v4912_v10 = vpop.f32.mrb[47].mxu1  ;;  %v5154_v36 = vld [vmem:[%s14557_s19 + $0x6a0] sm:$0xff]  ;;  %v10006_v34 = vcombine.high %v5135_v21, %v5151_v8  ;;  %v5183_v61 = vld [vmem:[%s14557_s19 + $0x788] sm:$0xff] }
 0x6a7   : > { %v4939_v24 = vadd.f32 %v4935_v0, %v4926_v35  ;;  %v9979_v0 = vcombine.low %v5106_v26, %v5122_v60  ;;  %v10012_v58 = vcombine.high %v5138_v9, %v5154_v36  ;;  %v5167_v35 = vld [vmem:[%s14557_s19 + $0x708] sm:$0xff]  ;;  %v5186_v10 = vld [vmem:[%s14557_s19 + $0x7a0] sm:$0xff] }
 0x6a8   : > { %v4940_v4 = vmax.f32 %v4938_v3, 0.0  ;;  %v5170_v3 = vld [vmem:[%s14557_s19 + $0x720] sm:$0xff]  ;;  %v5327_v60 = vld [vmem:[%s14557_s19 + $0xc08] sm:$0xff] }
 0x6a9   : > { %v4941_v14 = vmax.f32 %v4939_v24, 0.0  ;;  %v10005_v24 = vcombine.low %v5135_v21, %v5151_v8  ;;  %v10044_v48 = vcombine.high %v5170_v3, %v5186_v10 }
 0x6aa   : > { %v12899_v43 = vpack.c.bf16 %v4940_v4, %v4940_v4  ;;  %v10011_v4 = vcombine.low %v5138_v9, %v5154_v36  ;;  %v5359_v36 = vld [vmem:[%s14557_s19 + $0xd08] sm:$0xff] }
 0x6ab   : > { %v12897_v32 = vpack.c.bf16 %v4941_v14, %v4941_v14  ;;  %v10038_v14 = vcombine.high %v5167_v35, %v5183_v61 }
 0x6ad   : > { %8056 = vmatprep.mubr.bf16.mxu0 %v12897_v32  ;;  %8138 = vmatprep.mubr.bf16.mxu1 %v12897_v32 }
 0x6ae   : > { %8057 = vmatmul.mubr.bf16.vlgmr.msra.gmra.mrb[52].mxu0 %v12899_v43  ;;  %8139 = vmatmul.mubr.bf16.vlgmr.msra.gmra.mrb[48].mxu1 %v12899_v43 }
 0x6af   : > { %8066 = vmatpush1.bf16.msra.mxu0 %v9813_v2  ;;  %8189 = vmatpush1.bf16.msra.mxu1 %v9819_v53  ;;  %v9941_v2 = vcombine.low %v5071_v49, %v5087_v56  ;;  %v9947_v53 = vcombine.low %v5074_v59, %v5090_v40  ;;  %v5295_v40 = vld [vmem:[%s14557_s19 + $0xb08] sm:$0xff] }
 0x6b0   : > { %8097 = vmatprep.mubr.bf16.mxu0 %v12897_v32  ;;  %8220 = vmatprep.mubr.bf16.mxu1 %v12897_v32 }
 0x6b1   : > { %8067 = vmatprep.subr.bf16.mxu0 %v9846_v7  ;;  %8190 = vmatprep.subr.bf16.mxu1 %v9852_v33  ;;  %v10037_v7 = vcombine.low %v5167_v35, %v5183_v61  ;;  %v10043_v33 = vcombine.low %v5170_v3, %v5186_v10  ;;  %v5391_v10 = vld [vmem:[%s14557_s19 + $0xe08] sm:$0xff] }
 0x6b3   : > { %8068 = vmatpush1.bf16.msra.mxu0 %v9845_v46  ;;  %8191 = vmatpush1.bf16.msra.mxu1 %v9851_v63  ;;  %v5247_v46 = vld [vmem:[%s14557_s19 + $0x988] sm:$0xff]  ;;  %v5234_v63 = vld [vmem:[%s14557_s19 + $0x920] sm:$0xff] }
 0x6b4   : > { %8069 = vmatprep.subr.bf16.mxu0 %v9878_v38  ;;  %8192 = vmatprep.subr.bf16.mxu1 %v9884_v42  ;;  %v5250_v38 = vld [vmem:[%s14557_s19 + $0x9a0] sm:$0xff]  ;;  %v10069_v42 = vcombine.low %v5199_v62, %v5215_v25  ;;  %v10102_v31 = vcombine.high %v5231_v17, %v5247_v46 }
 0x6b5   : > { %v10108_v52 = vcombine.high %v5234_v63, %v5250_v38  ;;  %v10107_v49 = vcombine.low %v5234_v63, %v5250_v38  ;;  %v4945_v38 = vld [vmem:[%s14557_s19 + $0x18] sm:$0xff] }
 0x6b7   : > { %8070 = vmatpush1.bf16.msra.mxu0 %v9877_v6  ;;  %8193 = vmatpush1.bf16.msra.mxu1 %v9883_v37  ;;  %v5279_v6 = vld [vmem:[%s14557_s19 + $0xa88] sm:$0xff]  ;;  %v5266_v37 = vld [vmem:[%s14557_s19 + $0xa20] sm:$0xff] }
 0x6b8   : > { %8071 = vmatprep.subr.bf16.mxu0 %v9910_v47  ;;  %8194 = vmatprep.subr.bf16.mxu1 %v9916_v29  ;;  %v5282_v47 = vld [vmem:[%s14557_s19 + $0xaa0] sm:$0xff]  ;;  %v10101_v29 = vcombine.low %v5231_v17, %v5247_v46  ;;  %v10134_v56 = vcombine.high %v5263_v55, %v5279_v6 }
 0x6b9   : > { %v10140_v59 = vcombine.high %v5266_v37, %v5282_v47  ;;  %v10139_v51 = vcombine.low %v5266_v37, %v5282_v47  ;;  %v4977_v47 = vld [vmem:[%s14557_s19 + $0x118] sm:$0xff] }
 0x6bb   : > { %8072 = vmatpush1.bf16.msra.mxu0 %v9909_v1  ;;  %8195 = vmatpush1.bf16.msra.mxu1 %v9915_v30  ;;  %v5311_v1 = vld [vmem:[%s14557_s19 + $0xb88] sm:$0xff]  ;;  %v5298_v30 = vld [vmem:[%s14557_s19 + $0xb20] sm:$0xff] }
 0x6bc   : > { %8073 = vmatprep.subr.bf16.mxu0 %v9942_v44  ;;  %8196 = vmatprep.subr.bf16.mxu1 %v9948_v45  ;;  %v5314_v44 = vld [vmem:[%s14557_s19 + $0xba0] sm:$0xff]  ;;  %v10133_v45 = vcombine.low %v5263_v55, %v5279_v6  ;;  %v10166_v50 = vcombine.high %v5295_v40, %v5311_v1 }
 0x6bd   : > { %v10172_v26 = vcombine.high %v5298_v30, %v5314_v44  ;;  %v10171_v21 = vcombine.low %v5298_v30, %v5314_v44  ;;  %v5009_v44 = vld [vmem:[%s14557_s19 + $0x218] sm:$0xff] }
 0x6bf   : > { %8074 = vmatpush1.bf16.msra.mxu0 %v9941_v2  ;;  %8197 = vmatpush1.bf16.msra.mxu1 %v9947_v53  ;;  %v5343_v2 = vld [vmem:[%s14557_s19 + $0xc88] sm:$0xff]  ;;  %v5330_v53 = vld [vmem:[%s14557_s19 + $0xc20] sm:$0xff] }
 0x6c0   : > { %8075 = vmatprep.subr.bf16.mxu0 %v9974_v20  ;;  %8198 = vmatprep.subr.bf16.mxu1 %v9980_v54  ;;  %v5346_v20 = vld [vmem:[%s14557_s19 + $0xca0] sm:$0xff]  ;;  %v10165_v54 = vcombine.low %v5295_v40, %v5311_v1  ;;  %v10198_v8 = vcombine.high %v5327_v60, %v5343_v2 }
 0x6c1   : > { %v10204_v9 = vcombine.high %v5330_v53, %v5346_v20  ;;  %v10203_v35 = vcombine.low %v5330_v53, %v5346_v20  ;;  %v5041_v20 = vld [vmem:[%s14557_s19 + $0x318] sm:$0xff] }
 0x6c3   : > { %8076 = vmatpush1.bf16.msra.mxu0 %v9973_v57  ;;  %8199 = vmatpush1.bf16.msra.mxu1 %v9979_v0  ;;  %v5375_v57 = vld [vmem:[%s14557_s19 + $0xd88] sm:$0xff]  ;;  %v5362_v0 = vld [vmem:[%s14557_s19 + $0xd20] sm:$0xff] }
 0x6c4   : > { %8077 = vmatprep.subr.bf16.mxu0 %v10006_v34  ;;  %8200 = vmatprep.subr.bf16.mxu1 %v10012_v58  ;;  %v5378_v34 = vld [vmem:[%s14557_s19 + $0xda0] sm:$0xff]  ;;  %v10197_v58 = vcombine.low %v5327_v60, %v5343_v2  ;;  %v10230_v61 = vcombine.high %v5359_v36, %v5375_v57 }
 0x6c5   : > { %v10236_v3 = vcombine.high %v5362_v0, %v5378_v34  ;;  %v10235_v62 = vcombine.low %v5362_v0, %v5378_v34  ;;  %v5073_v34 = vld [vmem:[%s14557_s19 + $0x418] sm:$0xff] }
 0x6c7   : > { %8078 = vmatpush1.bf16.msra.mxu0 %v10005_v24  ;;  %8201 = vmatpush1.bf16.msra.mxu1 %v10011_v4  ;;  %v5407_v24 = vld [vmem:[%s14557_s19 + $0xe88] sm:$0xff]  ;;  %v5394_v4 = vld [vmem:[%s14557_s19 + $0xe20] sm:$0xff] }
 0x6c8   : > { %8079 = vmatprep.subr.bf16.mxu0 %v10038_v14  ;;  %8202 = vmatprep.subr.bf16.mxu1 %v10044_v48  ;;  %v5410_v14 = vld [vmem:[%s14557_s19 + $0xea0] sm:$0xff]  ;;  %v10229_v48 = vcombine.low %v5359_v36, %v5375_v57  ;;  %v10262_v25 = vcombine.high %v5391_v10, %v5407_v24 }
 0x6c9   : > { %v10268_v28 = vcombine.high %v5394_v4, %v5410_v14  ;;  %v10267_v17 = vcombine.low %v5394_v4, %v5410_v14  ;;  %v5105_v14 = vld [vmem:[%s14557_s19 + $0x518] sm:$0xff] }
 0x6cb   : > { %8080 = vmatpush1.bf16.msra.mxu0 %v10037_v7  ;;  %8203 = vmatpush1.bf16.msra.mxu1 %v10043_v33  ;;  %v5439_v7 = vld [vmem:[%s14557_s19 + $0xf88] sm:$0xff]  ;;  %v5426_v33 = vld [vmem:[%s14557_s19 + $0xf20] sm:$0xff] }
 0x6cc   : > { %8081 = vmatprep.subr.bf16.mxu0 %v10070_v39  ;;  %8204 = vmatprep.subr.bf16.mxu1 %v10076_v27  ;;  %v5442_v39 = vld [vmem:[%s14557_s19 + $0xfa0] sm:$0xff]  ;;  %v10261_v27 = vcombine.low %v5391_v10, %v5407_v24  ;;  %v10294_v46 = vcombine.high %v5423_v41, %v5439_v7 }
 0x6cd   : > { %v10300_v63 = vcombine.high %v5426_v33, %v5442_v39  ;;  %v10299_v55 = vcombine.low %v5426_v33, %v5442_v39  ;;  %v5137_v39 = vld [vmem:[%s14557_s19 + $0x618] sm:$0xff] }
 0x6cf   : > { %8082 = vmatpush1.bf16.msra.mxu0 %v10069_v42  ;;  %8205 = vmatpush1.bf16.msra.mxu1 %v10075_v11  ;;  %v4961_v42 = vld [vmem:[%s14557_s19 + $0x98] sm:$0xff]  ;;  %v4948_v11 = vld [vmem:[%s14557_s19 + $0x30] sm:$0xff] }
 0x6d0   : > { %8083 = vmatprep.subr.bf16.mxu0 %v10102_v31  ;;  %8206 = vmatprep.subr.bf16.mxu1 %v10108_v52  ;;  %v4964_v31 = vld [vmem:[%s14557_s19 + $0xb0] sm:$0xff]  ;;  %v10293_v52 = vcombine.low %v5423_v41, %v5439_v7  ;;  %v9818_v6 = vcombine.high %v4945_v38, %v4961_v42 }
 0x6d1   : > { %v9824_v37 = vcombine.high %v4948_v11, %v4964_v31  ;;  %v9823_v40 = vcombine.low %v4948_v11, %v4964_v31  ;;  %v5169_v31 = vld [vmem:[%s14557_s19 + $0x718] sm:$0xff] }
 0x6d3   : > { %8084 = vmatpush1.bf16.msra.mxu0 %v10101_v29  ;;  %8207 = vmatpush1.bf16.msra.mxu1 %v10107_v49  ;;  %v4993_v29 = vld [vmem:[%s14557_s19 + $0x198] sm:$0xff]  ;;  %v4980_v49 = vld [vmem:[%s14557_s19 + $0x130] sm:$0xff] }
 0x6d4   : > { %8085 = vmatprep.subr.bf16.mxu0 %v10134_v56  ;;  %8208 = vmatprep.subr.bf16.mxu1 %v10140_v59  ;;  %v4996_v56 = vld [vmem:[%s14557_s19 + $0x1b0] sm:$0xff]  ;;  %v9817_v59 = vcombine.low %v4945_v38, %v4961_v42  ;;  %v9850_v1 = vcombine.high %v4977_v47, %v4993_v29 }
 0x6d5   : > { %v9856_v30 = vcombine.high %v4980_v49, %v4996_v56  ;;  %v9855_v60 = vcombine.low %v4980_v49, %v4996_v56  ;;  %v5201_v56 = vld [vmem:[%s14557_s19 + $0x818] sm:$0xff] }
 0x6d7   : > { %8086 = vmatpush1.bf16.msra.mxu0 %v10133_v45  ;;  %8209 = vmatpush1.bf16.msra.mxu1 %v10139_v51  ;;  %v5025_v45 = vld [vmem:[%s14557_s19 + $0x298] sm:$0xff]  ;;  %v5012_v51 = vld [vmem:[%s14557_s19 + $0x230] sm:$0xff] }
 0x6d8   : > { %8087 = vmatprep.subr.bf16.mxu0 %v10166_v50  ;;  %8210 = vmatprep.subr.bf16.mxu1 %v10172_v26  ;;  %v5028_v50 = vld [vmem:[%s14557_s19 + $0x2b0] sm:$0xff]  ;;  %v9849_v26 = vcombine.low %v4977_v47, %v4993_v29  ;;  %v9882_v2 = vcombine.high %v5009_v44, %v5025_v45 }
 0x6d9   : > { %v9888_v53 = vcombine.high %v5012_v51, %v5028_v50  ;;  %v9887_v36 = vcombine.low %v5012_v51, %v5028_v50  ;;  %v5233_v50 = vld [vmem:[%s14557_s19 + $0x918] sm:$0xff] }
 0x6db   : > { %8088 = vmatpush1.bf16.msra.mxu0 %v10165_v54  ;;  %8211 = vmatpush1.bf16.msra.mxu1 %v10171_v21  ;;  %v5057_v54 = vld [vmem:[%s14557_s19 + $0x398] sm:$0xff]  ;;  %v5044_v21 = vld [vmem:[%s14557_s19 + $0x330] sm:$0xff] }
 0x6dc   : > { %8089 = vmatprep.subr.bf16.mxu0 %v10198_v8  ;;  %8212 = vmatprep.subr.bf16.mxu1 %v10204_v9  ;;  %v5060_v8 = vld [vmem:[%s14557_s19 + $0x3b0] sm:$0xff]  ;;  %v9881_v9 = vcombine.low %v5009_v44, %v5025_v45  ;;  %v9914_v57 = vcombine.high %v5041_v20, %v5057_v54 }
 0x6dd   : > { %v9920_v0 = vcombine.high %v5044_v21, %v5060_v8  ;;  %v9919_v10 = vcombine.low %v5044_v21, %v5060_v8  ;;  %v5265_v8 = vld [vmem:[%s14557_s19 + $0xa18] sm:$0xff] }
 0x6df   : > { %8090 = vmatpush1.bf16.msra.mxu0 %v10197_v58  ;;  %8213 = vmatpush1.bf16.msra.mxu1 %v10203_v35  ;;  %v5089_v58 = vld [vmem:[%s14557_s19 + $0x498] sm:$0xff]  ;;  %v5076_v35 = vld [vmem:[%s14557_s19 + $0x430] sm:$0xff] }
 0x6e0   : > { %8091 = vmatprep.subr.bf16.mxu0 %v10230_v61  ;;  %8214 = vmatprep.subr.bf16.mxu1 %v10236_v3  ;;  %v5092_v61 = vld [vmem:[%s14557_s19 + $0x4b0] sm:$0xff]  ;;  %v9913_v3 = vcombine.low %v5041_v20, %v5057_v54  ;;  %v9946_v24 = vcombine.high %v5073_v34, %v5089_v58 }
 0x6e1   : > { %v9952_v4 = vcombine.high %v5076_v35, %v5092_v61  ;;  %v9951_v41 = vcombine.low %v5076_v35, %v5092_v61  ;;  %v5297_v61 = vld [vmem:[%s14557_s19 + $0xb18] sm:$0xff] }
 0x6e3   : > { %8092 = vmatpush1.bf16.msra.mxu0 %v10229_v48  ;;  %8215 = vmatpush1.bf16.msra.mxu1 %v10235_v62  ;;  %v5121_v48 = vld [vmem:[%s14557_s19 + $0x598] sm:$0xff]  ;;  %v5108_v62 = vld [vmem:[%s14557_s19 + $0x530] sm:$0xff] }
 0x6e4   : > { %8093 = vmatprep.subr.bf16.mxu0 %v10262_v25  ;;  %8216 = vmatprep.subr.bf16.mxu1 %v10268_v28  ;;  %v5124_v25 = vld [vmem:[%s14557_s19 + $0x5b0] sm:$0xff]  ;;  %v9945_v28 = vcombine.low %v5073_v34, %v5089_v58  ;;  %v9978_v7 = vcombine.high %v5105_v14, %v5121_v48 }
 0x6e5   : > { %v9984_v33 = vcombine.high %v5108_v62, %v5124_v25  ;;  %v9983_v38 = vcombine.low %v5108_v62, %v5124_v25  ;;  %v5329_v25 = vld [vmem:[%s14557_s19 + $0xc18] sm:$0xff] }
 0x6e7   : > { %8094 = vmatpush1.bf16.msra.mxu0 %v10261_v27  ;;  %8217 = vmatpush1.bf16.msra.mxu1 %v10267_v17  ;;  %v5153_v27 = vld [vmem:[%s14557_s19 + $0x698] sm:$0xff]  ;;  %v5140_v17 = vld [vmem:[%s14557_s19 + $0x630] sm:$0xff] }
 0x6e8   : > { %8095 = vmatprep.subr.bf16.mxu0 %v10294_v46  ;;  %8218 = vmatprep.subr.bf16.mxu1 %v10300_v63  ;;  %v5156_v46 = vld [vmem:[%s14557_s19 + $0x6b0] sm:$0xff]  ;;  %v9977_v63 = vcombine.low %v5105_v14, %v5121_v48  ;;  %v10010_v42 = vcombine.high %v5137_v39, %v5153_v27 }
 0x6e9   : > { %v10016_v11 = vcombine.high %v5140_v17, %v5156_v46  ;;  %v10015_v47 = vcombine.low %v5140_v17, %v5156_v46  ;;  %v5361_v46 = vld [vmem:[%s14557_s19 + $0xd18] sm:$0xff] }
 0x6eb   : > { %8096 = vmatpush1.bf16.msra.mxu0 %v10293_v52  ;;  %8219 = vmatpush1.bf16.msra.mxu1 %v10299_v55  ;;  %v5185_v52 = vld [vmem:[%s14557_s19 + $0x798] sm:$0xff]  ;;  %v5172_v55 = vld [vmem:[%s14557_s19 + $0x730] sm:$0xff] }
 0x6ec   : > { %8147 = vmatprep.subr.bf16.mxu0 %v9818_v6  ;;  %8270 = vmatprep.subr.bf16.mxu1 %v9824_v37  ;;  %v5188_v6 = vld [vmem:[%s14557_s19 + $0x7b0] sm:$0xff]  ;;  %v10009_v37 = vcombine.low %v5137_v39, %v5153_v27  ;;  %v10042_v29 = vcombine.high %v5169_v31, %v5185_v52 }
 0x6ed   : > { %v10048_v49 = vcombine.high %v5172_v55, %v5188_v6  ;;  %v10047_v44 = vcombine.low %v5172_v55, %v5188_v6  ;;  %v5393_v6 = vld [vmem:[%s14557_s19 + $0xe18] sm:$0xff] }
 0x6ee   : > { %8098 = vmatmul.mubr.bf16.vlgmr.msra.gmra.mrb[56].mxu0 %v12899_v43  ;;  %8221 = vmatmul.mubr.bf16.vlgmr.msra.gmra.mrb[52].mxu1 %v12899_v43 }
 0x6ef   : > { %8148 = vmatpush1.bf16.msra.mxu0 %v9817_v59  ;;  %8179 = vmatprep.mubr.bf16.mxu0 %v12897_v32  ;;  %v5217_v59 = vld [vmem:[%s14557_s19 + $0x898] sm:$0xff] }
 0x6f0   : > { %8271 = vmatpush1.bf16.msra.mxu1 %v9823_v40  ;;  %8302 = vmatprep.mubr.bf16.mxu1 %v12897_v32  ;;  %v5204_v40 = vld [vmem:[%s14557_s19 + $0x830] sm:$0xff]  ;;  %v10074_v45 = vcombine.high %v5201_v56, %v5217_v59 }
 0x6f1   : > { %8149 = vmatprep.subr.bf16.mxu0 %v9850_v1  ;;  %8272 = vmatprep.subr.bf16.mxu1 %v9856_v30  ;;  %v5220_v1 = vld [vmem:[%s14557_s19 + $0x8b0] sm:$0xff]  ;;  %v10041_v30 = vcombine.low %v5169_v31, %v5185_v52 }
 0x6f2   : > { %v10080_v51 = vcombine.high %v5204_v40, %v5220_v1  ;;  %v10079_v20 = vcombine.low %v5204_v40, %v5220_v1  ;;  %v5425_v1 = vld [vmem:[%s14557_s19 + $0xf18] sm:$0xff] }
 0x6f3   : > { %8150 = vmatpush1.bf16.msra.mxu0 %v9849_v26  ;;  %v5249_v26 = vld [vmem:[%s14557_s19 + $0x998] sm:$0xff] }
 0x6f4   : > { %8273 = vmatpush1.bf16.msra.mxu1 %v9855_v60  ;;  %8151 = vmatprep.subr.bf16.mxu0 %v9882_v2  ;;  %v5236_v60 = vld [vmem:[%s14557_s19 + $0x930] sm:$0xff]  ;;  %v10106_v54 = vcombine.high %v5233_v50, %v5249_v26 }
 0x6f5   : > { %8274 = vmatprep.subr.bf16.mxu1 %v9888_v53  ;;  %v5252_v2 = vld [vmem:[%s14557_s19 + $0x9b0] sm:$0xff]  ;;  %v10073_v53 = vcombine.low %v5201_v56, %v5217_v59 }
 0x6f6   : > { %v10112_v21 = vcombine.high %v5236_v60, %v5252_v2  ;;  %v10111_v34 = vcombine.low %v5236_v60, %v5252_v2  ;;  %v4947_v2 = vld [vmem:[%s14557_s19 + $0x28] sm:$0xff] }
 0x6f7   : > { %8152 = vmatpush1.bf16.msra.mxu0 %v9881_v9  ;;  %v5281_v9 = vld [vmem:[%s14557_s19 + $0xa98] sm:$0xff] }
 0x6f8   : > { %8275 = vmatpush1.bf16.msra.mxu1 %v9887_v36  ;;  %8153 = vmatprep.subr.bf16.mxu0 %v9914_v57  ;;  %v5268_v36 = vld [vmem:[%s14557_s19 + $0xa30] sm:$0xff]  ;;  %v10138_v58 = vcombine.high %v5265_v8, %v5281_v9 }
 0x6f9   : > { %8276 = vmatprep.subr.bf16.mxu1 %v9920_v0  ;;  %v5284_v57 = vld [vmem:[%s14557_s19 + $0xab0] sm:$0xff]  ;;  %v10105_v0 = vcombine.low %v5233_v50, %v5249_v26 }
 0x6fa   : > { %v10144_v35 = vcombine.high %v5268_v36, %v5284_v57  ;;  %v10143_v14 = vcombine.low %v5268_v36, %v5284_v57  ;;  %v4979_v57 = vld [vmem:[%s14557_s19 + $0x128] sm:$0xff] }
 0x6fb   : > { %8154 = vmatpush1.bf16.msra.mxu0 %v9913_v3  ;;  %v5313_v3 = vld [vmem:[%s14557_s19 + $0xb98] sm:$0xff] }
 0x6fc   : > { %8277 = vmatpush1.bf16.msra.mxu1 %v9919_v10  ;;  %8155 = vmatprep.subr.bf16.mxu0 %v9946_v24  ;;  %v5300_v10 = vld [vmem:[%s14557_s19 + $0xb30] sm:$0xff]  ;;  %v10170_v48 = vcombine.high %v5297_v61, %v5313_v3 }
 0x6fd   : > { %8278 = vmatprep.subr.bf16.mxu1 %v9952_v4  ;;  %v5316_v24 = vld [vmem:[%s14557_s19 + $0xbb0] sm:$0xff]  ;;  %v10137_v4 = vcombine.low %v5265_v8, %v5281_v9 }
 0x6fe   : > { %v10176_v62 = vcombine.high %v5300_v10, %v5316_v24  ;;  %v10175_v39 = vcombine.low %v5300_v10, %v5316_v24  ;;  %v5011_v10 = vld [vmem:[%s14557_s19 + $0x228] sm:$0xff] }
 0x6ff   : > { %8156 = vmatpush1.bf16.msra.mxu0 %v9945_v28  ;;  %v5345_v28 = vld [vmem:[%s14557_s19 + $0xc98] sm:$0xff]  ;;  %v5027_v24 = vld [vmem:[%s14557_s19 + $0x2a8] sm:$0xff] }
 0x700   : > { %8279 = vmatpush1.bf16.msra.mxu1 %v9951_v41  ;;  %8157 = vmatprep.subr.bf16.mxu0 %v9978_v7  ;;  %v5332_v41 = vld [vmem:[%s14557_s19 + $0xc30] sm:$0xff]  ;;  %v10202_v27 = vcombine.high %v5329_v25, %v5345_v28 }
 0x701   : > { %8280 = vmatprep.subr.bf16.mxu1 %v9984_v33  ;;  %v5348_v7 = vld [vmem:[%s14557_s19 + $0xcb0] sm:$0xff]  ;;  %v10169_v33 = vcombine.low %v5297_v61, %v5313_v3 }
 0x702   : > { %v10208_v17 = vcombine.high %v5332_v41, %v5348_v7  ;;  %v10207_v31 = vcombine.low %v5332_v41, %v5348_v7  ;;  %v5043_v7 = vld [vmem:[%s14557_s19 + $0x328] sm:$0xff] }
 0x703   : > { %8158 = vmatpush1.bf16.msra.mxu0 %v9977_v63  ;;  %v5377_v63 = vld [vmem:[%s14557_s19 + $0xd98] sm:$0xff] }
 0x704   : > { %8281 = vmatpush1.bf16.msra.mxu1 %v9983_v38  ;;  %8159 = vmatprep.subr.bf16.mxu0 %v10010_v42  ;;  %v5364_v38 = vld [vmem:[%s14557_s19 + $0xd30] sm:$0xff]  ;;  %v10234_v52 = vcombine.high %v5361_v46, %v5377_v63 }
 0x705   : > { %8282 = vmatprep.subr.bf16.mxu1 %v10016_v11  ;;  %v5380_v42 = vld [vmem:[%s14557_s19 + $0xdb0] sm:$0xff]  ;;  %v10201_v11 = vcombine.low %v5329_v25, %v5345_v28  ;;  %v9886_v28 = vcombine.high %v5011_v10, %v5027_v24 }
 0x706   : > { %v10240_v55 = vcombine.high %v5364_v38, %v5380_v42  ;;  %v10239_v56 = vcombine.low %v5364_v38, %v5380_v42  ;;  %v5075_v42 = vld [vmem:[%s14557_s19 + $0x428] sm:$0xff] }
 0x707   : > { %8160 = vmatpush1.bf16.msra.mxu0 %v10009_v37  ;;  %v5409_v37 = vld [vmem:[%s14557_s19 + $0xe98] sm:$0xff] }
 0x708   : > { %8283 = vmatpush1.bf16.msra.mxu1 %v10015_v47  ;;  %8161 = vmatprep.subr.bf16.mxu0 %v10042_v29  ;;  %v5396_v47 = vld [vmem:[%s14557_s19 + $0xe30] sm:$0xff]  ;;  %v10266_v59 = vcombine.high %v5393_v6, %v5409_v37 }
 0x709   : > { %8284 = vmatprep.subr.bf16.mxu1 %v10048_v49  ;;  %v5412_v29 = vld [vmem:[%s14557_s19 + $0xeb0] sm:$0xff]  ;;  %v10233_v49 = vcombine.low %v5361_v46, %v5377_v63 }
 0x70a   : > { %v10272_v40 = vcombine.high %v5396_v47, %v5412_v29  ;;  %v10271_v50 = vcombine.low %v5396_v47, %v5412_v29  ;;  %v5107_v29 = vld [vmem:[%s14557_s19 + $0x528] sm:$0xff] }
 0x70b   : > { %8162 = vmatpush1.bf16.msra.mxu0 %v10041_v30  ;;  %v5441_v30 = vld [vmem:[%s14557_s19 + $0xf98] sm:$0xff] }
 0x70c   : > { %8285 = vmatpush1.bf16.msra.mxu1 %v10047_v44  ;;  %8163 = vmatprep.subr.bf16.mxu0 %v10074_v45  ;;  %v5428_v44 = vld [vmem:[%s14557_s19 + $0xf30] sm:$0xff]  ;;  %v10298_v26 = vcombine.high %v5425_v1, %v5441_v30 }
 0x70d   : > { %8286 = vmatprep.subr.bf16.mxu1 %v10080_v51  ;;  %v5444_v45 = vld [vmem:[%s14557_s19 + $0xfb0] sm:$0xff]  ;;  %v10265_v51 = vcombine.low %v5393_v6, %v5409_v37 }
 0x70e   : > { %v10304_v60 = vcombine.high %v5428_v44, %v5444_v45  ;;  %v10303_v8 = vcombine.low %v5428_v44, %v5444_v45  ;;  %v5139_v45 = vld [vmem:[%s14557_s19 + $0x628] sm:$0xff] }
 0x70f   : > { %8164 = vmatpush1.bf16.msra.mxu0 %v10073_v53  ;;  %v4963_v53 = vld [vmem:[%s14557_s19 + $0xa8] sm:$0xff] }
 0x710   : > { %8287 = vmatpush1.bf16.msra.mxu1 %v10079_v20  ;;  %8165 = vmatprep.subr.bf16.mxu0 %v10106_v54  ;;  %v4950_v20 = vld [vmem:[%s14557_s19 + $0x40] sm:$0xff]  ;;  %v9822_v9 = vcombine.high %v4947_v2, %v4963_v53 }
 0x711   : > { %8288 = vmatprep.subr.bf16.mxu1 %v10112_v21  ;;  %v4966_v54 = vld [vmem:[%s14557_s19 + $0xc0] sm:$0xff]  ;;  %v10297_v21 = vcombine.low %v5425_v1, %v5441_v30 }
 0x712   : > { %v9828_v36 = vcombine.high %v4950_v20, %v4966_v54  ;;  %v9827_v61 = vcombine.low %v4950_v20, %v4966_v54  ;;  %v5171_v54 = vld [vmem:[%s14557_s19 + $0x728] sm:$0xff] }
 0x713   : > { %8166 = vmatpush1.bf16.msra.mxu0 %v10105_v0  ;;  %v4995_v0 = vld [vmem:[%s14557_s19 + $0x1a8] sm:$0xff] }
 0x714   : > { %8289 = vmatpush1.bf16.msra.mxu1 %v10111_v34  ;;  %8167 = vmatprep.subr.bf16.mxu0 %v10138_v58  ;;  %v9821_v34 = vcombine.low %v4947_v2, %v4963_v53  ;;  %v4982_v58 = vld [vmem:[%s14557_s19 + $0x140] sm:$0xff]  ;;  %v9854_v3 = vcombine.high %v4979_v57, %v4995_v0 }
 0x715   : > { %8290 = vmatprep.subr.bf16.mxu1 %v10144_v35  ;;  %v4998_v35 = vld [vmem:[%s14557_s19 + $0x1c0] sm:$0xff] }
 0x716   : > { %v9859_v25 = vcombine.low %v4982_v58, %v4998_v35 }
 0x717   : > { %8168 = vmatpush1.bf16.msra.mxu0 %v10137_v4  ;;  %v9860_v4 = vcombine.high %v4982_v58, %v4998_v35  ;;  %v5203_v58 = vld [vmem:[%s14557_s19 + $0x828] sm:$0xff] }
 0x718   : > { %8291 = vmatpush1.bf16.msra.mxu1 %v10143_v14  ;;  %8169 = vmatprep.subr.bf16.mxu0 %v10170_v48  ;;  %v5014_v14 = vld [vmem:[%s14557_s19 + $0x240] sm:$0xff]  ;;  %v5219_v35 = vld [vmem:[%s14557_s19 + $0x8a8] sm:$0xff] }
 0x719   : > { %8292 = vmatprep.subr.bf16.mxu1 %v10176_v62  ;;  %v5030_v48 = vld [vmem:[%s14557_s19 + $0x2c0] sm:$0xff]  ;;  %v9853_v62 = vcombine.low %v4979_v57, %v4995_v0 }
 0x71a   : > { %v9892_v41 = vcombine.high %v5014_v14, %v5030_v48  ;;  %v9891_v46 = vcombine.low %v5014_v14, %v5030_v48  ;;  %v5235_v48 = vld [vmem:[%s14557_s19 + $0x928] sm:$0xff] }
 0x71b   : > { %8170 = vmatpush1.bf16.msra.mxu0 %v10169_v33  ;;  %v5059_v33 = vld [vmem:[%s14557_s19 + $0x3a8] sm:$0xff] }
 0x71c   : > { %8293 = vmatpush1.bf16.msra.mxu1 %v10175_v39  ;;  %8171 = vmatprep.subr.bf16.mxu0 %v10202_v27  ;;  %v5046_v39 = vld [vmem:[%s14557_s19 + $0x340] sm:$0xff]  ;;  %v9918_v63 = vcombine.high %v5043_v7, %v5059_v33 }
 0x71d   : > { %8294 = vmatprep.subr.bf16.mxu1 %v10208_v17  ;;  %v5062_v27 = vld [vmem:[%s14557_s19 + $0x3c0] sm:$0xff]  ;;  %v9885_v17 = vcombine.low %v5011_v10, %v5027_v24 }
 0x71e   : > { %v9924_v38 = vcombine.high %v5046_v39, %v5062_v27  ;;  %v9923_v6 = vcombine.low %v5046_v39, %v5062_v27  ;;  %v5267_v27 = vld [vmem:[%s14557_s19 + $0xa28] sm:$0xff] }
 0x71f   : > { %8172 = vmatpush1.bf16.msra.mxu0 %v10201_v11  ;;  %v5091_v11 = vld [vmem:[%s14557_s19 + $0x4a8] sm:$0xff] }
 0x720   : > { %8295 = vmatpush1.bf16.msra.mxu1 %v10207_v31  ;;  %8173 = vmatprep.subr.bf16.mxu0 %v10234_v52  ;;  %v5078_v31 = vld [vmem:[%s14557_s19 + $0x440] sm:$0xff]  ;;  %v9950_v37 = vcombine.high %v5075_v42, %v5091_v11 }
 0x721   : > { %8296 = vmatprep.subr.bf16.mxu1 %v10240_v55  ;;  %v5094_v52 = vld [vmem:[%s14557_s19 + $0x4c0] sm:$0xff]  ;;  %v9917_v55 = vcombine.low %v5043_v7, %v5059_v33 }
 0x722   : > { %v9956_v47 = vcombine.high %v5078_v31, %v5094_v52  ;;  %v9955_v1 = vcombine.low %v5078_v31, %v5094_v52  ;;  %v5299_v52 = vld [vmem:[%s14557_s19 + $0xb28] sm:$0xff] }
 0x723   : > { %8174 = vmatpush1.bf16.msra.mxu0 %v10233_v49  ;;  %v5123_v49 = vld [vmem:[%s14557_s19 + $0x5a8] sm:$0xff] }
 0x724   : > { %8297 = vmatpush1.bf16.msra.mxu1 %v10239_v56  ;;  %8175 = vmatprep.subr.bf16.mxu0 %v10266_v59  ;;  %v5110_v56 = vld [vmem:[%s14557_s19 + $0x540] sm:$0xff]  ;;  %v9982_v30 = vcombine.high %v5107_v29, %v5123_v49 }
 0x725   : > { %8298 = vmatprep.subr.bf16.mxu1 %v10272_v40  ;;  %v5126_v59 = vld [vmem:[%s14557_s19 + $0x5c0] sm:$0xff]  ;;  %v9949_v40 = vcombine.low %v5075_v42, %v5091_v11 }
 0x726   : > { %v9988_v44 = vcombine.high %v5110_v56, %v5126_v59  ;;  %v9987_v2 = vcombine.low %v5110_v56, %v5126_v59  ;;  %v5331_v59 = vld [vmem:[%s14557_s19 + $0xc28] sm:$0xff] }
 0x727   : > { %8176 = vmatpush1.bf16.msra.mxu0 %v10265_v51  ;;  %v5155_v51 = vld [vmem:[%s14557_s19 + $0x6a8] sm:$0xff] }
 0x728   : > { %8299 = vmatpush1.bf16.msra.mxu1 %v10271_v50  ;;  %8177 = vmatprep.subr.bf16.mxu0 %v10298_v26  ;;  %v5142_v50 = vld [vmem:[%s14557_s19 + $0x640] sm:$0xff]  ;;  %v10014_v53 = vcombine.high %v5139_v45, %v5155_v51 }
 0x729   : > { %8300 = vmatprep.subr.bf16.mxu1 %v10304_v60  ;;  %v5158_v26 = vld [vmem:[%s14557_s19 + $0x6c0] sm:$0xff]  ;;  %v9981_v60 = vcombine.low %v5107_v29, %v5123_v49 }
 0x72a   : > { %v10020_v20 = vcombine.high %v5142_v50, %v5158_v26  ;;  %v10019_v57 = vcombine.low %v5142_v50, %v5158_v26  ;;  %v5363_v26 = vld [vmem:[%s14557_s19 + $0xd28] sm:$0xff] }
 0x72b   : > { %8178 = vmatpush1.bf16.msra.mxu0 %v10297_v21  ;;  %v5187_v21 = vld [vmem:[%s14557_s19 + $0x7a8] sm:$0xff] }
 0x72c   : > { %8301 = vmatpush1.bf16.msra.mxu1 %v10303_v8  ;;  %8229 = vmatprep.subr.bf16.mxu0 %v9822_v9  ;;  %v5174_v8 = vld [vmem:[%s14557_s19 + $0x740] sm:$0xff]  ;;  %v10046_v0 = vcombine.high %v5171_v54, %v5187_v21  ;;  %v10045_v10 = vcombine.low %v5171_v54, %v5187_v21 }
 0x72d   : > { %8352 = vmatprep.subr.bf16.mxu1 %v9828_v36  ;;  %v5190_v9 = vld [vmem:[%s14557_s19 + $0x7c0] sm:$0xff]  ;;  %v10013_v36 = vcombine.low %v5139_v45, %v5155_v51 }
 0x72e   : > { %8180 = vmatmul.mubr.bf16.vlgmr.msra.gmra.mrb[60].mxu0 %v12899_v43  ;;  %v10051_v24 = vcombine.low %v5174_v8, %v5190_v9 }
 0x72f   : > { %8303 = vmatmul.mubr.bf16.vlgmr.msra.gmra.mrb[56].mxu1 %v12899_v43  ;;  %8230 = vmatpush1.bf16.msra.mxu0 %v9821_v34  ;;  %v10052_v34 = vcombine.high %v5174_v8, %v5190_v9  ;;  %v5395_v9 = vld [vmem:[%s14557_s19 + $0xe28] sm:$0xff] }
 0x730   : > { %8261 = vmatprep.mubr.bf16.mxu0 %v12897_v32  ;;  %8353 = vmatpush1.bf16.msra.mxu1 %v9827_v61  ;;  %v5206_v61 = vld [vmem:[%s14557_s19 + $0x840] sm:$0xff] }
 0x731   : > { %8384 = vmatprep.mubr.bf16.mxu1 %v12897_v32  ;;  %8231 = vmatprep.subr.bf16.mxu0 %v9854_v3  ;;  %v5222_v3 = vld [vmem:[%s14557_s19 + $0x8c0] sm:$0xff] }
 0x732   : > { %8354 = vmatprep.subr.bf16.mxu1 %v9860_v4  ;;  %v10078_v4 = vcombine.high %v5203_v58, %v5219_v35  ;;  %v10084_v14 = vcombine.high %v5206_v61, %v5222_v3  ;;  %v10083_v7 = vcombine.low %v5206_v61, %v5222_v3  ;;  %v5427_v3 = vld [vmem:[%s14557_s19 + $0xf28] sm:$0xff] }
 0x733   : > { %8232 = vmatpush1.bf16.msra.mxu0 %v9853_v62  ;;  %v5251_v62 = vld [vmem:[%s14557_s19 + $0x9a8] sm:$0xff] }
 0x734   : > { %8355 = vmatpush1.bf16.msra.mxu1 %v9859_v25  ;;  %8233 = vmatprep.subr.bf16.mxu0 %v9886_v28  ;;  %v5238_v25 = vld [vmem:[%s14557_s19 + $0x940] sm:$0xff]  ;;  %v10110_v33 = vcombine.high %v5235_v48, %v5251_v62 }
 0x735   : > { %8356 = vmatprep.subr.bf16.mxu1 %v9892_v41  ;;  %v5254_v28 = vld [vmem:[%s14557_s19 + $0x9c0] sm:$0xff]  ;;  %v10077_v41 = vcombine.low %v5203_v58, %v5219_v35 }
 0x736   : > { %v10116_v39 = vcombine.high %v5238_v25, %v5254_v28  ;;  %v10115_v42 = vcombine.low %v5238_v25, %v5254_v28  ;;  %v4949_v28 = vld [vmem:[%s14557_s19 + $0x38] sm:$0xff] }
 0x737   : > { %8234 = vmatpush1.bf16.msra.mxu0 %v9885_v17  ;;  %v5283_v17 = vld [vmem:[%s14557_s19 + $0xaa8] sm:$0xff] }
 0x738   : > { %8357 = vmatpush1.bf16.msra.mxu1 %v9891_v46  ;;  %8235 = vmatprep.subr.bf16.mxu0 %v9918_v63  ;;  %v5270_v46 = vld [vmem:[%s14557_s19 + $0xa40] sm:$0xff]  ;;  %v10142_v11 = vcombine.high %v5267_v27, %v5283_v17 }
 0x739   : > { %8358 = vmatprep.subr.bf16.mxu1 %v9924_v38  ;;  %v5286_v63 = vld [vmem:[%s14557_s19 + $0xac0] sm:$0xff]  ;;  %v10109_v38 = vcombine.low %v5235_v48, %v5251_v62 }
 0x73a   : > { %v10148_v31 = vcombine.high %v5270_v46, %v5286_v63  ;;  %v10147_v29 = vcombine.low %v5270_v46, %v5286_v63  ;;  %v4981_v63 = vld [vmem:[%s14557_s19 + $0x138] sm:$0xff] }
 0x73b   : > { %8236 = vmatpush1.bf16.msra.mxu0 %v9917_v55  ;;  %v5315_v55 = vld [vmem:[%s14557_s19 + $0xba8] sm:$0xff] }
 0x73c   : > { %8359 = vmatpush1.bf16.msra.mxu1 %v9923_v6  ;;  %8237 = vmatprep.subr.bf16.mxu0 %v9950_v37  ;;  %v5302_v6 = vld [vmem:[%s14557_s19 + $0xb40] sm:$0xff]  ;;  %v10174_v49 = vcombine.high %v5299_v52, %v5315_v55 }
 0x73d   : > { %8360 = vmatprep.subr.bf16.mxu1 %v9956_v47  ;;  %v5318_v37 = vld [vmem:[%s14557_s19 + $0xbc0] sm:$0xff]  ;;  %v10141_v47 = vcombine.low %v5267_v27, %v5283_v17 }
 0x73e   : > { %v10180_v56 = vcombine.high %v5302_v6, %v5318_v37  ;;  %v10179_v45 = vcombine.low %v5302_v6, %v5318_v37  ;;  %v5013_v6 = vld [vmem:[%s14557_s19 + $0x238] sm:$0xff] }
 0x73f   : > { %8238 = vmatpush1.bf16.msra.mxu0 %v9949_v40  ;;  %v5347_v40 = vld [vmem:[%s14557_s19 + $0xca8] sm:$0xff]  ;;  %v5029_v37 = vld [vmem:[%s14557_s19 + $0x2b8] sm:$0xff] }
 0x740   : > { %8361 = vmatpush1.bf16.msra.mxu1 %v9955_v1  ;;  %8239 = vmatprep.subr.bf16.mxu0 %v9982_v30  ;;  %v5334_v1 = vld [vmem:[%s14557_s19 + $0xc40] sm:$0xff]  ;;  %v10206_v51 = vcombine.high %v5331_v59, %v5347_v40 }
 0x741   : > { %8362 = vmatprep.subr.bf16.mxu1 %v9988_v44  ;;  %v5350_v30 = vld [vmem:[%s14557_s19 + $0xcc0] sm:$0xff]  ;;  %v10173_v44 = vcombine.low %v5299_v52, %v5315_v55 }
 0x742   : > { %v10212_v50 = vcombine.high %v5334_v1, %v5350_v30  ;;  %v10211_v54 = vcombine.low %v5334_v1, %v5350_v30  ;;  %v5045_v30 = vld [vmem:[%s14557_s19 + $0x338] sm:$0xff] }
 0x743   : > { %8240 = vmatpush1.bf16.msra.mxu0 %v9981_v60  ;;  %v5379_v60 = vld [vmem:[%s14557_s19 + $0xda8] sm:$0xff] }
 0x744   : > { %8363 = vmatpush1.bf16.msra.mxu1 %v9987_v2  ;;  %8241 = vmatprep.subr.bf16.mxu0 %v10014_v53  ;;  %v5366_v2 = vld [vmem:[%s14557_s19 + $0xd40] sm:$0xff]  ;;  %v10238_v21 = vcombine.high %v5363_v26, %v5379_v60 }
 0x745   : > { %8364 = vmatprep.subr.bf16.mxu1 %v10020_v20  ;;  %v5382_v53 = vld [vmem:[%s14557_s19 + $0xdc0] sm:$0xff]  ;;  %v10205_v20 = vcombine.low %v5331_v59, %v5347_v40  ;;  %v9890_v40 = vcombine.high %v5013_v6, %v5029_v37 }
 0x746   : > { %v10244_v8 = vcombine.high %v5366_v2, %v5382_v53  ;;  %v10243_v58 = vcombine.low %v5366_v2, %v5382_v53  ;;  %v5077_v53 = vld [vmem:[%s14557_s19 + $0x438] sm:$0xff] }
 0x747   : > { %8242 = vmatpush1.bf16.msra.mxu0 %v10013_v36  ;;  %v5411_v36 = vld [vmem:[%s14557_s19 + $0xea8] sm:$0xff] }
 0x748   : > { %8365 = vmatpush1.bf16.msra.mxu1 %v10019_v57  ;;  %8243 = vmatprep.subr.bf16.mxu0 %v10046_v0  ;;  %v5398_v57 = vld [vmem:[%s14557_s19 + $0xe40] sm:$0xff]  ;;  %v10270_v35 = vcombine.high %v5395_v9, %v5411_v36 }
 0x749   : > { %8366 = vmatprep.subr.bf16.mxu1 %v10052_v34  ;;  %v5414_v0 = vld [vmem:[%s14557_s19 + $0xec0] sm:$0xff]  ;;  %v10237_v34 = vcombine.low %v5363_v26, %v5379_v60 }
 0x74a   : > { %v10276_v61 = vcombine.high %v5398_v57, %v5414_v0  ;;  %v10275_v48 = vcombine.low %v5398_v57, %v5414_v0  ;;  %v5109_v0 = vld [vmem:[%s14557_s19 + $0x538] sm:$0xff] }
 0x74b   : > { %8244 = vmatpush1.bf16.msra.mxu0 %v10045_v10  ;;  %v5443_v10 = vld [vmem:[%s14557_s19 + $0xfa8] sm:$0xff] }
 0x74c   : > { %8367 = vmatpush1.bf16.msra.mxu1 %v10051_v24  ;;  %8245 = vmatprep.subr.bf16.mxu0 %v10078_v4  ;;  %v5430_v24 = vld [vmem:[%s14557_s19 + $0xf40] sm:$0xff]  ;;  %v10302_v62 = vcombine.high %v5427_v3, %v5443_v10 }
 0x74d   : > { %8368 = vmatprep.subr.bf16.mxu1 %v10084_v14  ;;  %v5446_v4 = vld [vmem:[%s14557_s19 + $0xfc0] sm:$0xff]  ;;  %v10269_v14 = vcombine.low %v5395_v9, %v5411_v36 }
 0x74e   : > { %v10308_v25 = vcombine.high %v5430_v24, %v5446_v4  ;;  %v10307_v27 = vcombine.low %v5430_v24, %v5446_v4  ;;  %v13551_v24 = vld [vmem:[%s14559_s21] sm:$0xff] }
 0x74f   : > { %8246 = vmatpush1.bf16.msra.mxu0 %v10077_v41  ;;  %v4965_v41 = vld [vmem:[%s14557_s19 + $0xb8] sm:$0xff] }
 0x750   : > { %8369 = vmatpush1.bf16.msra.mxu1 %v10083_v7  ;;  %8247 = vmatprep.subr.bf16.mxu0 %v10110_v33  ;;  %v4952_v7 = vld [vmem:[%s14557_s19 + $0x50] sm:$0xff]  ;;  %v9826_v17 = vcombine.high %v4949_v28, %v4965_v41 }
 0x751   : > { %8370 = vmatprep.subr.bf16.mxu1 %v10116_v39  ;;  %v4968_v33 = vld [vmem:[%s14557_s19 + $0xd0] sm:$0xff]  ;;  %v10301_v39 = vcombine.low %v5427_v3, %v5443_v10  ;;  %v13546_v3 = vld [vmem:[%s14558_s20] sm:$0xff] }
 0x752   : > { %v9832_v46 = vcombine.high %v4952_v7, %v4968_v33  ;;  %v9831_v52 = vcombine.low %v4952_v7, %v4968_v33  ;;  %v5160_v7 = vld [vmem:[%s14557_s19 + $0x6d0] sm:$0xff]  ;;  %v8883_v33 = vrot.slane %v13551_v24, %v11659_v12 }
 0x753   : > { %8248 = vmatpush1.bf16.msra.mxu0 %v10109_v38  ;;  %v4997_v38 = vld [vmem:[%s14557_s19 + $0x1b8] sm:$0xff] }
 0x754   : > { %8371 = vmatpush1.bf16.msra.mxu1 %v10115_v42  ;;  %8249 = vmatprep.subr.bf16.mxu0 %v10142_v11  ;;  %v9825_v42 = vcombine.low %v4949_v28, %v4965_v41  ;;  %v4984_v11 = vld [vmem:[%s14557_s19 + $0x150] sm:$0xff]  ;;  %v9858_v55 = vcombine.high %v4981_v63, %v4997_v38  ;;  %v8703_v28 = vrot.slane %v13546_v3, %v11673_v18 }
 0x755   : > { %8372 = vmatprep.subr.bf16.mxu1 %v10148_v31  ;;  %v5000_v31 = vld [vmem:[%s14557_s19 + $0x1d0] sm:$0xff] }
 0x756   : > { %v9863_v59 = vcombine.low %v4984_v11, %v5000_v31  ;;  %v5144_v41 = vld [vmem:[%s14557_s19 + $0x650] sm:$0xff] }
 0x757   : > { %8250 = vmatpush1.bf16.msra.mxu0 %v10141_v47  ;;  %v9864_v47 = vcombine.high %v4984_v11, %v5000_v31  ;;  %v8887_v31 = vrot.slane %v13551_v24, %v11666_v15 }
 0x758   : > { %8373 = vmatpush1.bf16.msra.mxu1 %v10147_v29  ;;  %8251 = vmatprep.subr.bf16.mxu0 %v10174_v49  ;;  %v5016_v29 = vld [vmem:[%s14557_s19 + $0x250] sm:$0xff] }
 0x759   : > { %8374 = vmatprep.subr.bf16.mxu1 %v10180_v56  ;;  %v5032_v49 = vld [vmem:[%s14557_s19 + $0x2d0] sm:$0xff]  ;;  %v9857_v56 = vcombine.low %v4981_v63, %v4997_v38 }
 0x75a   : > { %v9896_v1 = vcombine.high %v5016_v29, %v5032_v49  ;;  %v9895_v26 = vcombine.low %v5016_v29, %v5032_v49 }
 0x75b   : > { %8252 = vmatpush1.bf16.msra.mxu0 %v10173_v44  ;;  %v5061_v44 = vld [vmem:[%s14557_s19 + $0x3b8] sm:$0xff] }
 0x75c   : > { %8375 = vmatpush1.bf16.msra.mxu1 %v10179_v45  ;;  %8253 = vmatprep.subr.bf16.mxu0 %v10206_v51  ;;  %v5048_v45 = vld [vmem:[%s14557_s19 + $0x350] sm:$0xff]  ;;  %v9922_v60 = vcombine.high %v5045_v30, %v5061_v44 }
 0x75d   : > { %8376 = vmatprep.subr.bf16.mxu1 %v10212_v50  ;;  %v5064_v51 = vld [vmem:[%s14557_s19 + $0x3d0] sm:$0xff]  ;;  %v9889_v50 = vcombine.low %v5013_v6, %v5029_v37  ;;  %v5173_v6 = vld [vmem:[%s14557_s19 + $0x738] sm:$0xff] }
 0x75e   : > { %v9928_v2 = vcombine.high %v5048_v45, %v5064_v51  ;;  %v9927_v9 = vcombine.low %v5048_v45, %v5064_v51  ;;  %v5189_v37 = vld [vmem:[%s14557_s19 + $0x7b8] sm:$0xff] }
 0x75f   : > { %8254 = vmatpush1.bf16.msra.mxu0 %v10205_v20  ;;  %v5093_v20 = vld [vmem:[%s14557_s19 + $0x4b8] sm:$0xff] }
 0x760   : > { %8377 = vmatpush1.bf16.msra.mxu1 %v10211_v54  ;;  %8255 = vmatprep.subr.bf16.mxu0 %v10238_v21  ;;  %v5080_v54 = vld [vmem:[%s14557_s19 + $0x450] sm:$0xff]  ;;  %v9954_v36 = vcombine.high %v5077_v53, %v5093_v20 }
 0x761   : > { %8378 = vmatprep.subr.bf16.mxu1 %v10244_v8  ;;  %v5096_v21 = vld [vmem:[%s14557_s19 + $0x4d0] sm:$0xff]  ;;  %v9921_v8 = vcombine.low %v5045_v30, %v5061_v44 }
 0x762   : > { %v9960_v57 = vcombine.high %v5080_v54, %v5096_v21  ;;  %v9959_v10 = vcombine.low %v5080_v54, %v5096_v21 }
 0x763   : > { %8256 = vmatpush1.bf16.msra.mxu0 %v10237_v34  ;;  %v5125_v34 = vld [vmem:[%s14557_s19 + $0x5b8] sm:$0xff] }
 0x764   : > { %8379 = vmatpush1.bf16.msra.mxu1 %v10243_v58  ;;  %8257 = vmatprep.subr.bf16.mxu0 %v10270_v35  ;;  %v5112_v58 = vld [vmem:[%s14557_s19 + $0x550] sm:$0xff]  ;;  %v9986_v4 = vcombine.high %v5109_v0, %v5125_v34 }
 0x765   : > { %8380 = vmatprep.subr.bf16.mxu1 %v10276_v61  ;;  %v5128_v35 = vld [vmem:[%s14557_s19 + $0x5d0] sm:$0xff]  ;;  %v9953_v61 = vcombine.low %v5077_v53, %v5093_v20  ;;  %v10050_v20 = vcombine.high %v5173_v6, %v5189_v37 }
 0x766   : > { %v9991_v63 = vcombine.low %v5112_v58, %v5128_v35 }
 0x767   : > { %8258 = vmatpush1.bf16.msra.mxu0 %v10269_v14  ;;  %v9992_v14 = vcombine.high %v5112_v58, %v5128_v35  ;;  %v10049_v35 = vcombine.low %v5173_v6, %v5189_v37  ;;  %v5320_v6 = vld [vmem:[%s14557_s19 + $0xbd0] sm:$0xff] }
 0x768   : > { %8381 = vmatpush1.bf16.msra.mxu1 %v10275_v48  ;;  %8259 = vmatprep.subr.bf16.mxu0 %v10302_v62  ;;  %v5141_v48 = vld [vmem:[%s14557_s19 + $0x638] sm:$0xff] }
 0x769   : > { %8382 = vmatprep.subr.bf16.mxu1 %v10308_v25  ;;  %v5157_v62 = vld [vmem:[%s14557_s19 + $0x6b8] sm:$0xff]  ;;  %v8687_v25 = vrot.slane %v13546_v3, %v11659_v12 }
 0x76a   : > { %v10018_v38 = vcombine.high %v5141_v48, %v5157_v62  ;;  %v10017_v51 = vcombine.low %v5141_v48, %v5157_v62  ;;  %v5253_v48 = vld [vmem:[%s14557_s19 + $0x9b8] sm:$0xff]  ;;  %v5240_v62 = vld [vmem:[%s14557_s19 + $0x950] sm:$0xff] }
 0x76b   : > { %8260 = vmatpush1.bf16.msra.mxu0 %v10301_v39  ;;  %v9985_v39 = vcombine.low %v5109_v0, %v5125_v34  ;;  %v5224_v0 = vld [vmem:[%s14557_s19 + $0x8d0] sm:$0xff] }
 0x76c   : > { %8383 = vmatpush1.bf16.msra.mxu1 %v10307_v27  ;;  %8311 = vmatprep.subr.bf16.mxu0 %v9826_v17  ;;  %v8691_v27 = vrot.slane %v13546_v3, %v11666_v15  ;;  %v8707_v17 = vrot.slane %v13546_v3, %v11683_v22 }
 0x76d   : > { %8434 = vmatprep.subr.bf16.mxu1 %v9832_v46  ;;  %v8899_v46 = vrot.slane %v13551_v24, %v11673_v18 }
 0x76e   : > { %8262 = vmatmul.mubr.bf16.vlgmr.msra.gmra.mrb[64].mxu0 %v12899_v43 }
 0x76f   : > { %8385 = vmatmul.mubr.bf16.vlgmr.msra.gmra.mrb[60].mxu1 %v12899_v43  ;;  %8312 = vmatpush1.bf16.msra.mxu0 %v9825_v42 }
 0x770   : > { %8343 = vmatprep.mubr.bf16.mxu0 %v12897_v32  ;;  %8435 = vmatpush1.bf16.msra.mxu1 %v9831_v52  ;;  %v8903_v52 = vrot.slane %v13551_v24, %v11683_v22 }
 0x771   : > { %8466 = vmatprep.mubr.bf16.mxu1 %v12897_v32  ;;  %8313 = vmatprep.subr.bf16.mxu0 %v9858_v55  ;;  %v10024_v55 = vcombine.high %v5144_v41, %v5160_v7 }
 0x772   : > { %8436 = vmatprep.subr.bf16.mxu1 %v9864_v47 }
 0x773   : > { %8314 = vmatpush1.bf16.msra.mxu0 %v9857_v56 }
 0x774   : > { %8437 = vmatpush1.bf16.msra.mxu1 %v9863_v59  ;;  %8315 = vmatprep.subr.bf16.mxu0 %v9890_v40  ;;  %v5176_v59 = vld [vmem:[%s14557_s19 + $0x750] sm:$0xff] }
 0x775   : > { %8438 = vmatprep.subr.bf16.mxu1 %v9896_v1  ;;  %v5192_v40 = vld [vmem:[%s14557_s19 + $0x7d0] sm:$0xff] }
 0x777   : > { %8316 = vmatpush1.bf16.msra.mxu0 %v9889_v50  ;;  %v10023_v50 = vcombine.low %v5144_v41, %v5160_v7 }
 0x778   : > { %8439 = vmatpush1.bf16.msra.mxu1 %v9895_v26  ;;  %8317 = vmatprep.subr.bf16.mxu0 %v9922_v60 }
 0x779   : > { %8440 = vmatprep.subr.bf16.mxu1 %v9928_v2 }
 0x77b   : > { %8318 = vmatpush1.bf16.msra.mxu0 %v9921_v8  ;;  %v10056_v8 = vcombine.high %v5176_v59, %v5192_v40 }
 0x77c   : > { %8441 = vmatpush1.bf16.msra.mxu1 %v9927_v9  ;;  %8319 = vmatprep.subr.bf16.mxu0 %v9954_v36  ;;  %v5205_v9 = vld [vmem:[%s14557_s19 + $0x838] sm:$0xff] }
 0x77d   : > { %8442 = vmatprep.subr.bf16.mxu1 %v9960_v57  ;;  %v5221_v36 = vld [vmem:[%s14557_s19 + $0x8b8] sm:$0xff]  ;;  %v5208_v57 = vld [vmem:[%s14557_s19 + $0x850] sm:$0xff] }
 0x77e   : > { %v10087_v41 = vcombine.low %v5208_v57, %v5224_v0 }
 0x77f   : > { %8320 = vmatpush1.bf16.msra.mxu0 %v9953_v61  ;;  %v10055_v61 = vcombine.low %v5176_v59, %v5192_v40  ;;  %v5349_v59 = vld [vmem:[%s14557_s19 + $0xcb8] sm:$0xff]  ;;  %v5336_v40 = vld [vmem:[%s14557_s19 + $0xc50] sm:$0xff] }
 0x780   : > { %8443 = vmatpush1.bf16.msra.mxu1 %v9959_v10  ;;  %8321 = vmatprep.subr.bf16.mxu0 %v9986_v4  ;;  %v10082_v10 = vcombine.high %v5205_v9, %v5221_v36  ;;  %v10088_v4 = vcombine.high %v5208_v57, %v5224_v0  ;;  %v5397_v0 = vld [vmem:[%s14557_s19 + $0xe38] sm:$0xff] }
 0x781   : > { %v8058_v42 = vpop.f32.mrb[52].mxu0  ;;  %v8140_v11 = vpop.f32.mrb[48].mxu1  ;;  %8444 = vmatprep.subr.bf16.mxu1 %v9992_v14  ;;  %v5237_v14 = vld [vmem:[%s14557_s19 + $0x938] sm:$0xff] }
 0x782   : > { %v8844_v47 = vmul.f32 %v8687_v25, %v8058_v42  ;;  %v8848_v29 = vmul.f32 %v8703_v28, %v8140_v11  ;;  %v8060_v49 = vpop.f32.mrb[53].mxu0  ;;  %v8142_v56 = vpop.f32.mrb[49].mxu1  ;;  %v5256_v25 = vld [vmem:[%s14557_s19 + $0x9d0] sm:$0xff]  ;;  %v10081_v28 = vcombine.low %v5205_v9, %v5221_v36  ;;  %v10114_v7 = vcombine.high %v5237_v14, %v5253_v48 }
 0x783   : > { %v8845_v1 = vmul.f32 %v8691_v27, %v8060_v49  ;;  %v8849_v30 = vmul.f32 %v8707_v17, %v8142_v56  ;;  %8322 = vmatpush1.bf16.msra.mxu0 %v9985_v39  ;;  %v8062_v44 = vpop.f32.mrb[54].mxu0  ;;  %v8144_v45 = vpop.f32.mrb[50].mxu1  ;;  %v5269_v39 = vld [vmem:[%s14557_s19 + $0xa38] sm:$0xff]  ;;  %v5272_v17 = vld [vmem:[%s14557_s19 + $0xa50] sm:$0xff] }
 0x784   : > { %v13593_v26 = vadd.f32 %v8883_v33, %v8844_v47  ;;  %v13595_v60 = vadd.f32 %v8899_v46, %v8848_v29  ;;  %8445 = vmatpush1.bf16.msra.mxu1 %v9991_v63  ;;  %v8063_v2 = vpop.f32.mrb[55].mxu0  ;;  %v8145_v53 = vpop.f32.mrb[51].mxu1  ;;  %8323 = vmatprep.subr.bf16.mxu0 %v10018_v38  ;;  %v10120_v33 = vcombine.high %v5240_v62, %v5256_v25  ;;  %v5285_v27 = vld [vmem:[%s14557_s19 + $0xab8] sm:$0xff]  ;;  %v5288_v46 = vld [vmem:[%s14557_s19 + $0xad0] sm:$0xff] }
 0x785   : > { %v13597_v54 = vadd.f32 %v8887_v31, %v8845_v1  ;;  %v13599_v21 = vadd.f32 %v8903_v52, %v8849_v30  ;;  %8446 = vmatprep.subr.bf16.mxu1 %v10024_v55  ;;  %v10113_v63 = vcombine.low %v5237_v14, %v5253_v48  ;;  %v10119_v38 = vcombine.low %v5240_v62, %v5256_v25  ;;  %v5301_v31 = vld [vmem:[%s14557_s19 + $0xb38] sm:$0xff]  ;;  %v5304_v55 = vld [vmem:[%s14557_s19 + $0xb50] sm:$0xff] }
 0x786   : > { %v10146_v42 = vcombine.high %v5269_v39, %v5285_v27  ;;  %v10152_v11 = vcombine.high %v5272_v17, %v5288_v46  ;;  %v5317_v52 = vld [vmem:[%s14557_s19 + $0xbb8] sm:$0xff]  ;;  %v10145_v37 = vcombine.low %v5269_v39, %v5285_v27  ;;  %v10151_v47 = vcombine.low %v5272_v17, %v5288_v46  ;;  %v5352_v1 = vld [vmem:[%s14557_s19 + $0xcd0] sm:$0xff]  ;;  %v4951_v46 = vld [vmem:[%s14557_s19 + $0x48] sm:$0xff] }
 0x787   : > { %v9104_v34 = vcombine.low %v13593_v26, %v13597_v54  ;;  %v9106_v58 = vcombine.low %v13595_v60, %v13599_v21  ;;  %8324 = vmatpush1.bf16.msra.mxu0 %v10017_v51  ;;  %v10178_v29 = vcombine.high %v5301_v31, %v5317_v52  ;;  %v10184_v49 = vcombine.high %v5304_v55, %v5320_v6  ;;  %v5333_v56 = vld [vmem:[%s14557_s19 + $0xc38] sm:$0xff]  ;;  %v5368_v53 = vld [vmem:[%s14557_s19 + $0xd50] sm:$0xff]  ;;  %v5258_v26 = vld [vmem:[%s14557_s19 + $0x9e0] sm:$0xff] }
 0x788   : > { %8447 = vmatpush1.bf16.msra.mxu1 %v10023_v50  ;;  %8325 = vmatprep.subr.bf16.mxu0 %v10050_v20  ;;  %v10177_v30 = vcombine.low %v5301_v31, %v5317_v52  ;;  %v10183_v44 = vcombine.low %v5304_v55, %v5320_v6  ;;  %v10210_v45 = vcombine.high %v5333_v56, %v5349_v59  ;;  %v5365_v50 = vld [vmem:[%s14557_s19 + $0xd38] sm:$0xff]  ;;  %v5384_v20 = vld [vmem:[%s14557_s19 + $0xdd0] sm:$0xff]  ;;  %v4983_v6 = vld [vmem:[%s14557_s19 + $0x148] sm:$0xff] }
 0x789   : > { %8448 = vmatprep.subr.bf16.mxu1 %v10056_v8  ;;  %v10216_v51 = vcombine.high %v5336_v40, %v5352_v1  ;;  %v5381_v2 = vld [vmem:[%s14557_s19 + $0xdb8] sm:$0xff]  ;;  %v10209_v8 = vcombine.low %v5333_v56, %v5349_v59  ;;  %v10215_v9 = vcombine.low %v5336_v40, %v5352_v1  ;;  %v10248_v57 = vcombine.high %v5368_v53, %v5384_v20  ;;  %v5015_v40 = vld [vmem:[%s14557_s19 + $0x248] sm:$0xff]  ;;  %v5260_v60 = vld [vmem:[%s14557_s19 + $0x9f0] sm:$0xff] }
 0x78a   : > { %v10242_v36 = vcombine.high %v5365_v50, %v5381_v2  ;;  %v10247_v14 = vcombine.low %v5368_v53, %v5384_v20  ;;  %v5429_v25 = vld [vmem:[%s14557_s19 + $0xf38] sm:$0xff]  ;;  %v5031_v1 = vld [vmem:[%s14557_s19 + $0x2c8] sm:$0xff] }
 0x78b   : > { %8326 = vmatpush1.bf16.msra.mxu0 %v10049_v35  ;;  %v5413_v35 = vld [vmem:[%s14557_s19 + $0xeb8] sm:$0xff]  ;;  %v5047_v20 = vld [vmem:[%s14557_s19 + $0x348] sm:$0xff] }
 0x78c   : > { %8449 = vmatpush1.bf16.msra.mxu1 %v10055_v61  ;;  %8327 = vmatprep.subr.bf16.mxu0 %v10082_v10  ;;  %v5400_v61 = vld [vmem:[%s14557_s19 + $0xe50] sm:$0xff]  ;;  %v10274_v48 = vcombine.high %v5397_v0, %v5413_v35 }
 0x78d   : > { %8450 = vmatprep.subr.bf16.mxu1 %v10088_v4  ;;  %v5416_v10 = vld [vmem:[%s14557_s19 + $0xed0] sm:$0xff]  ;;  %v10241_v4 = vcombine.low %v5365_v50, %v5381_v2  ;;  %v9894_v2 = vcombine.high %v5015_v40, %v5031_v1 }
 0x78e   : > { %v10280_v62 = vcombine.high %v5400_v61, %v5416_v10  ;;  %v10279_v39 = vcombine.low %v5400_v61, %v5416_v10  ;;  %v5079_v10 = vld [vmem:[%s14557_s19 + $0x448] sm:$0xff] }
 0x78f   : > { %8328 = vmatpush1.bf16.msra.mxu0 %v10081_v28  ;;  %v5445_v28 = vld [vmem:[%s14557_s19 + $0xfb8] sm:$0xff] }
 0x790   : > { %8451 = vmatpush1.bf16.msra.mxu1 %v10087_v41  ;;  %8329 = vmatprep.subr.bf16.mxu0 %v10114_v7  ;;  %v5432_v41 = vld [vmem:[%s14557_s19 + $0xf50] sm:$0xff]  ;;  %v10306_v27 = vcombine.high %v5429_v25, %v5445_v28 }
 0x791   : > { %8452 = vmatprep.subr.bf16.mxu1 %v10120_v33  ;;  %v5448_v7 = vld [vmem:[%s14557_s19 + $0xfd0] sm:$0xff]  ;;  %v10273_v33 = vcombine.low %v5397_v0, %v5413_v35 }
 0x792   : > { %v10312_v17 = vcombine.high %v5432_v41, %v5448_v7  ;;  %v10311_v31 = vcombine.low %v5432_v41, %v5448_v7  ;;  %v5111_v7 = vld [vmem:[%s14557_s19 + $0x548] sm:$0xff] }
 0x793   : > { %8330 = vmatpush1.bf16.msra.mxu0 %v10113_v63  ;;  %v4967_v63 = vld [vmem:[%s14557_s19 + $0xc8] sm:$0xff] }
 0x794   : > { %8453 = vmatpush1.bf16.msra.mxu1 %v10119_v38  ;;  %8331 = vmatprep.subr.bf16.mxu0 %v10146_v42  ;;  %v4954_v38 = vld [vmem:[%s14557_s19 + $0x60] sm:$0xff]  ;;  %v9830_v52 = vcombine.high %v4951_v46, %v4967_v63 }
 0x795   : > { %8454 = vmatprep.subr.bf16.mxu1 %v10152_v11  ;;  %v4970_v42 = vld [vmem:[%s14557_s19 + $0xe0] sm:$0xff]  ;;  %v10305_v11 = vcombine.low %v5429_v25, %v5445_v28 }
 0x796   : > { %v9836_v55 = vcombine.high %v4954_v38, %v4970_v42  ;;  %v9835_v56 = vcombine.low %v4954_v38, %v4970_v42  ;;  %v13785_v42 = vld [vmem:[%s14559_s21 + $0x8] sm:$0xff] }
 0x797   : > { %8332 = vmatpush1.bf16.msra.mxu0 %v10145_v37  ;;  %v4999_v37 = vld [vmem:[%s14557_s19 + $0x1c8] sm:$0xff] }
 0x798   : > { %8455 = vmatpush1.bf16.msra.mxu1 %v10151_v47  ;;  %8333 = vmatprep.subr.bf16.mxu0 %v10178_v29  ;;  %v9829_v47 = vcombine.low %v4951_v46, %v4967_v63  ;;  %v4986_v29 = vld [vmem:[%s14557_s19 + $0x160] sm:$0xff]  ;;  %v9862_v59 = vcombine.high %v4983_v6, %v4999_v37  ;;  %v13780_v46 = vld [vmem:[%s14558_s20 + $0x8] sm:$0xff] }
 0x799   : > { %8456 = vmatprep.subr.bf16.mxu1 %v10184_v49  ;;  %v5002_v49 = vld [vmem:[%s14557_s19 + $0x1e0] sm:$0xff] }
 0x79a   : > { %v9867_v50 = vcombine.low %v4986_v29, %v5002_v49 }
 0x79b   : > { %8334 = vmatpush1.bf16.msra.mxu0 %v10177_v30  ;;  %v9868_v30 = vcombine.high %v4986_v29, %v5002_v49  ;;  %v8891_v29 = vrot.slane %v13551_v24, %v11661_v13  ;;  %v8699_v49 = vrot.slane %v13546_v3, %v11668_v16 }
 0x79c   : > { %8457 = vmatpush1.bf16.msra.mxu1 %v10183_v44  ;;  %8335 = vmatprep.subr.bf16.mxu0 %v10210_v45  ;;  %v5018_v44 = vld [vmem:[%s14557_s19 + $0x260] sm:$0xff] }
 0x79d   : > { %8458 = vmatprep.subr.bf16.mxu1 %v10216_v51  ;;  %v5034_v45 = vld [vmem:[%s14557_s19 + $0x2e0] sm:$0xff]  ;;  %v9861_v51 = vcombine.low %v4983_v6, %v4999_v37  ;;  %v8719_v6 = vrot.slane %v13780_v46, %v11659_v12 }
 0x79e   : > { %v9900_v53 = vcombine.high %v5018_v44, %v5034_v45  ;;  %v9899_v0 = vcombine.low %v5018_v44, %v5034_v45  ;;  %v5146_v37 = vld [vmem:[%s14557_s19 + $0x660] sm:$0xff] }
 0x79f   : > { %8336 = vmatpush1.bf16.msra.mxu0 %v10209_v8  ;;  %v5063_v8 = vld [vmem:[%s14557_s19 + $0x3c8] sm:$0xff] }
 0x7a0   : > { %8459 = vmatpush1.bf16.msra.mxu1 %v10215_v9  ;;  %8337 = vmatprep.subr.bf16.mxu0 %v10242_v36  ;;  %v5050_v9 = vld [vmem:[%s14557_s19 + $0x360] sm:$0xff]  ;;  %v9926_v35 = vcombine.high %v5047_v20, %v5063_v8 }
 0x7a1   : > { %8460 = vmatprep.subr.bf16.mxu1 %v10248_v57  ;;  %v5066_v36 = vld [vmem:[%s14557_s19 + $0x3e0] sm:$0xff]  ;;  %v9893_v57 = vcombine.low %v5015_v40, %v5031_v1  ;;  %v8915_v40 = vrot.slane %v13785_v42, %v11659_v12 }
 0x7a2   : > { %v9932_v61 = vcombine.high %v5050_v9, %v5066_v36  ;;  %v9931_v25 = vcombine.low %v5050_v9, %v5066_v36 }
 0x7a3   : > { %8338 = vmatpush1.bf16.msra.mxu0 %v10241_v4  ;;  %v5095_v4 = vld [vmem:[%s14557_s19 + $0x4c8] sm:$0xff] }
 0x7a4   : > { %8461 = vmatpush1.bf16.msra.mxu1 %v10247_v14  ;;  %8339 = vmatprep.subr.bf16.mxu0 %v10274_v48  ;;  %v5082_v14 = vld [vmem:[%s14557_s19 + $0x460] sm:$0xff]  ;;  %v9958_v28 = vcombine.high %v5079_v10, %v5095_v4 }
 0x7a5   : > { %8462 = vmatprep.subr.bf16.mxu1 %v10280_v62  ;;  %v5098_v48 = vld [vmem:[%s14557_s19 + $0x4e0] sm:$0xff]  ;;  %v9925_v62 = vcombine.low %v5047_v20, %v5063_v8  ;;  %v5191_v20 = vld [vmem:[%s14557_s19 + $0x7c8] sm:$0xff] }
 0x7a6   : > { %v9964_v41 = vcombine.high %v5082_v14, %v5098_v48  ;;  %v9963_v63 = vcombine.low %v5082_v14, %v5098_v48 }
 0x7a7   : > { %8340 = vmatpush1.bf16.msra.mxu0 %v10273_v33  ;;  %v5127_v33 = vld [vmem:[%s14557_s19 + $0x5c8] sm:$0xff] }
 0x7a8   : > { %8463 = vmatpush1.bf16.msra.mxu1 %v10279_v39  ;;  %8341 = vmatprep.subr.bf16.mxu0 %v10306_v27  ;;  %v5114_v39 = vld [vmem:[%s14557_s19 + $0x560] sm:$0xff]  ;;  %v9990_v38 = vcombine.high %v5111_v7, %v5127_v33 }
 0x7a9   : > { %8464 = vmatprep.subr.bf16.mxu1 %v10312_v17  ;;  %v5130_v27 = vld [vmem:[%s14557_s19 + $0x5e0] sm:$0xff]  ;;  %v9957_v17 = vcombine.low %v5079_v10, %v5095_v4 }
 0x7aa   : > { %v9995_v1 = vcombine.low %v5114_v39, %v5130_v27 }
 0x7ab   : > { %8342 = vmatpush1.bf16.msra.mxu0 %v10305_v11  ;;  %v9996_v11 = vcombine.high %v5114_v39, %v5130_v27 }
 0x7ac   : > { %8465 = vmatpush1.bf16.msra.mxu1 %v10311_v31  ;;  %8393 = vmatprep.subr.bf16.mxu0 %v9830_v52  ;;  %v5143_v31 = vld [vmem:[%s14557_s19 + $0x648] sm:$0xff] }
 0x7ad   : > { %8516 = vmatprep.subr.bf16.mxu1 %v9836_v55  ;;  %v5159_v52 = vld [vmem:[%s14557_s19 + $0x6c8] sm:$0xff]  ;;  %v8695_v55 = vrot.slane %v13546_v3, %v11661_v13 }
 0x7ae   : > { %8344 = vmatmul.mubr.bf16.vlgmr.msra.gmra.mrb[68].mxu0 %v12899_v43  ;;  %v10021_v48 = vcombine.low %v5143_v31, %v5159_v52 }
 0x7af   : > { %8467 = vmatmul.mubr.bf16.vlgmr.msra.gmra.mrb[64].mxu1 %v12899_v43  ;;  %8394 = vmatpush1.bf16.msra.mxu0 %v9829_v47  ;;  %v5162_v47 = vld [vmem:[%s14557_s19 + $0x6e0] sm:$0xff] }
 0x7b0   : > { %8425 = vmatprep.mubr.bf16.mxu0 %v12897_v32  ;;  %8517 = vmatpush1.bf16.msra.mxu1 %v9835_v56  ;;  %v8723_v56 = vrot.slane %v13780_v46, %v11666_v15 }
 0x7b1   : > { %8548 = vmatprep.mubr.bf16.mxu1 %v12897_v32  ;;  %8395 = vmatprep.subr.bf16.mxu0 %v9862_v59  ;;  %v9989_v59 = vcombine.low %v5111_v7, %v5127_v33 }
 0x7b2   : > { %8518 = vmatprep.subr.bf16.mxu1 %v9868_v30  ;;  %v10022_v30 = vcombine.high %v5143_v31, %v5159_v52  ;;  %v5226_v31 = vld [vmem:[%s14557_s19 + $0x8e0] sm:$0xff] }
 0x7b3   : > { %8396 = vmatpush1.bf16.msra.mxu0 %v9861_v51  ;;  %v8895_v51 = vrot.slane %v13551_v24, %v11668_v16 }
 0x7b4   : > { %8519 = vmatpush1.bf16.msra.mxu1 %v9867_v50  ;;  %8397 = vmatprep.subr.bf16.mxu0 %v9894_v2  ;;  %v8919_v50 = vrot.slane %v13785_v42, %v11666_v15  ;;  %v10028_v2 = vcombine.high %v5146_v37, %v5162_v47 }
 0x7b5   : > { %8520 = vmatprep.subr.bf16.mxu1 %v9900_v53  ;;  %v5175_v53 = vld [vmem:[%s14557_s19 + $0x748] sm:$0xff] }
 0x7b6   : > { %v10054_v33 = vcombine.high %v5175_v53, %v5191_v20 }
 0x7b7   : > { %8398 = vmatpush1.bf16.msra.mxu0 %v9893_v57 }
 0x7b8   : > { %8521 = vmatpush1.bf16.msra.mxu1 %v9899_v0  ;;  %8399 = vmatprep.subr.bf16.mxu0 %v9926_v35  ;;  %v5178_v0 = vld [vmem:[%s14557_s19 + $0x760] sm:$0xff] }
 0x7b9   : > { %8522 = vmatprep.subr.bf16.mxu1 %v9932_v61  ;;  %v5194_v35 = vld [vmem:[%s14557_s19 + $0x7e0] sm:$0xff] }
 0x7bb   : > { %8400 = vmatpush1.bf16.msra.mxu0 %v9925_v62  ;;  %v10027_v62 = vcombine.low %v5146_v37, %v5162_v47  ;;  %v10059_v37 = vcombine.low %v5178_v0, %v5194_v35 }
 0x7bc   : > { %8523 = vmatpush1.bf16.msra.mxu1 %v9931_v25  ;;  %8401 = vmatprep.subr.bf16.mxu0 %v9958_v28 }
 0x7bd   : > { %8524 = vmatprep.subr.bf16.mxu1 %v9964_v41 }
 0x7bf   : > { %8402 = vmatpush1.bf16.msra.mxu0 %v9957_v17  ;;  %v10060_v17 = vcombine.high %v5178_v0, %v5194_v35  ;;  %v5319_v0 = vld [vmem:[%s14557_s19 + $0xbc8] sm:$0xff]  ;;  %v5306_v35 = vld [vmem:[%s14557_s19 + $0xb60] sm:$0xff] }
 0x7c0   : > { %8525 = vmatpush1.bf16.msra.mxu1 %v9963_v63  ;;  %8403 = vmatprep.subr.bf16.mxu0 %v9990_v38  ;;  %v5207_v63 = vld [vmem:[%s14557_s19 + $0x848] sm:$0xff] }
 0x7c1   : > { %v8099_v44 = vpop.f32.mrb[56].mxu0  ;;  %v8222_v45 = vpop.f32.mrb[52].mxu1  ;;  %8526 = vmatprep.subr.bf16.mxu1 %v9996_v11  ;;  %v5223_v38 = vld [vmem:[%s14557_s19 + $0x8c8] sm:$0xff]  ;;  %v5210_v11 = vld [vmem:[%s14557_s19 + $0x860] sm:$0xff] }
 0x7c2   : > { %v8846_v8 = vmul.f32 %v8695_v55, %v8099_v44  ;;  %v8852_v9 = vmul.f32 %v8719_v6, %v8222_v45  ;;  %v8101_v36 = vpop.f32.mrb[57].mxu0  ;;  %v8224_v57 = vpop.f32.mrb[53].mxu1  ;;  %v10053_v6 = vcombine.low %v5175_v53, %v5191_v20  ;;  %v10086_v47 = vcombine.high %v5207_v63, %v5223_v38  ;;  %v5290_v53 = vld [vmem:[%s14557_s19 + $0xae0] sm:$0xff] }
 0x7c3   : > { %v8847_v61 = vmul.f32 %v8699_v49, %v8101_v36  ;;  %v8853_v10 = vmul.f32 %v8723_v56, %v8224_v57  ;;  %v8103_v4 = vpop.f32.mrb[58].mxu0  ;;  %v8226_v14 = vpop.f32.mrb[54].mxu1  ;;  %8404 = vmatpush1.bf16.msra.mxu0 %v9989_v59  ;;  %v10092_v56 = vcombine.high %v5210_v11, %v5226_v31  ;;  %v5239_v59 = vld [vmem:[%s14557_s19 + $0x948] sm:$0xff] }
 0x7c4   : > { %v9042_v25 = vadd.f32 %v8891_v29, %v8846_v8  ;;  %v13827_v28 = vadd.f32 %v8915_v40, %v8852_v9  ;;  %8527 = vmatpush1.bf16.msra.mxu1 %v9995_v1  ;;  %v8104_v41 = vpop.f32.mrb[59].mxu0  ;;  %v8227_v7 = vpop.f32.mrb[55].mxu1  ;;  %8405 = vmatprep.subr.bf16.mxu0 %v10022_v30  ;;  %v13849_v29 = vrot.slane %v9104_v34, %v11742_v5  ;;  %v5255_v40 = vld [vmem:[%s14557_s19 + $0x9c8] sm:$0xff]  ;;  %v5242_v1 = vld [vmem:[%s14557_s19 + $0x960] sm:$0xff] }
 0x7c5   : > { %v9043_v39 = vadd.f32 %v8895_v51, %v8847_v61  ;;  %v13829_v27 = vadd.f32 %v8919_v50, %v8853_v10  ;;  %8528 = vmatprep.subr.bf16.mxu1 %v10028_v2  ;;  %v10085_v34 = vcombine.low %v5207_v63, %v5223_v38  ;;  %v10091_v30 = vcombine.low %v5210_v11, %v5226_v31  ;;  %v5271_v51 = vld [vmem:[%s14557_s19 + $0xa48] sm:$0xff]  ;;  %v5274_v2 = vld [vmem:[%s14557_s19 + $0xa60] sm:$0xff] }
 0x7c6   : > { %v10118_v44 = vcombine.high %v5239_v59, %v5255_v40  ;;  %v10124_v45 = vcombine.high %v5242_v1, %v5258_v26  ;;  %v5287_v50 = vld [vmem:[%s14557_s19 + $0xac8] sm:$0xff]  ;;  %v10117_v20 = vcombine.low %v5239_v59, %v5255_v40  ;;  %v10123_v8 = vcombine.low %v5242_v1, %v5258_v26  ;;  %v5322_v61 = vld [vmem:[%s14557_s19 + $0xbe0] sm:$0xff] }
 0x7c7   : > { %v9105_v52 = vcombine.low %v9042_v25, %v9043_v39  ;;  %v9153_v55 = vcombine.low %v13827_v28, %v13829_v27  ;;  %8406 = vmatpush1.bf16.msra.mxu0 %v10021_v48  ;;  %v10150_v9 = vcombine.high %v5271_v51, %v5287_v50  ;;  %v10156_v36 = vcombine.high %v5274_v2, %v5290_v53  ;;  %v5303_v57 = vld [vmem:[%s14557_s19 + $0xb48] sm:$0xff]  ;;  %v5338_v41 = vld [vmem:[%s14557_s19 + $0xc60] sm:$0xff] }
 0x7c8   : > { %8529 = vmatpush1.bf16.msra.mxu1 %v10027_v62  ;;  %8407 = vmatprep.subr.bf16.mxu0 %v10054_v33  ;;  %v10149_v10 = vcombine.low %v5271_v51, %v5287_v50  ;;  %v10155_v4 = vcombine.low %v5274_v2, %v5290_v53  ;;  %v10182_v14 = vcombine.high %v5303_v57, %v5319_v0  ;;  %v5335_v62 = vld [vmem:[%s14557_s19 + $0xc48] sm:$0xff]  ;;  %v5354_v7 = vld [vmem:[%s14557_s19 + $0xce0] sm:$0xff] }
 0x7c9   : > { %v13852_v49 = vrot.slane %v9105_v52, %v11742_v5  ;;  %8530 = vmatprep.subr.bf16.mxu1 %v10060_v17  ;;  %v10188_v48 = vcombine.high %v5306_v35, %v5322_v61  ;;  %v5351_v25 = vld [vmem:[%s14557_s19 + $0xcc8] sm:$0xff]  ;;  %v10181_v33 = vcombine.low %v5303_v57, %v5319_v0  ;;  %v10187_v39 = vcombine.low %v5306_v35, %v5322_v61  ;;  %v5370_v31 = vld [vmem:[%s14557_s19 + $0xd60] sm:$0xff]  ;;  %v4953_v57 = vld [vmem:[%s14557_s19 + $0x58] sm:$0xff] }
 0x7ca   : > { %v10214_v17 = vcombine.high %v5335_v62, %v5351_v25  ;;  %v10220_v63 = vcombine.high %v5338_v41, %v5354_v7  ;;  %v5367_v38 = vld [vmem:[%s14557_s19 + $0xd48] sm:$0xff]  ;;  %v5386_v52 = vld [vmem:[%s14557_s19 + $0xde0] sm:$0xff]  ;;  %v4969_v0 = vld [vmem:[%s14557_s19 + $0xd8] sm:$0xff] }
 0x7cb   : > { %v9136_v54 = vcombine.low %v13849_v29, %v13852_v49  ;;  %8408 = vmatpush1.bf16.msra.mxu0 %v10053_v6  ;;  %v5383_v11 = vld [vmem:[%s14557_s19 + $0xdc8] sm:$0xff]  ;;  %v10213_v6 = vcombine.low %v5335_v62, %v5351_v25  ;;  %v5402_v1 = vld [vmem:[%s14557_s19 + $0xe60] sm:$0xff]  ;;  %v4956_v35 = vld [vmem:[%s14557_s19 + $0x70] sm:$0xff] }
 0x7cc   : > { %8531 = vmatpush1.bf16.msra.mxu1 %v10059_v37  ;;  %8409 = vmatprep.subr.bf16.mxu0 %v10086_v47  ;;  %v10219_v37 = vcombine.low %v5338_v41, %v5354_v7  ;;  %v10246_v47 = vcombine.high %v5367_v38, %v5383_v11  ;;  %v5399_v59 = vld [vmem:[%s14557_s19 + $0xe48] sm:$0xff]  ;;  %v5418_v26 = vld [vmem:[%s14557_s19 + $0xee0] sm:$0xff]  ;;  %v4972_v61 = vld [vmem:[%s14557_s19 + $0xf0] sm:$0xff]  ;;  %v9833_v41 = vcombine.low %v4953_v57, %v4969_v0 }
 0x7cd   : > { %8532 = vmatprep.subr.bf16.mxu1 %v10092_v56  ;;  %v10252_v56 = vcombine.high %v5370_v31, %v5386_v52  ;;  %v5415_v40 = vld [vmem:[%s14557_s19 + $0xec8] sm:$0xff]  ;;  %v5434_v2 = vld [vmem:[%s14557_s19 + $0xf60] sm:$0xff]  ;;  %v4985_v62 = vld [vmem:[%s14557_s19 + $0x158] sm:$0xff] }
 0x7ce   : > { %v5431_v51 = vld [vmem:[%s14557_s19 + $0xf48] sm:$0xff]  ;;  %v5450_v53 = vld [vmem:[%s14557_s19 + $0xfe0] sm:$0xff]  ;;  %v5001_v25 = vld [vmem:[%s14557_s19 + $0x1d8] sm:$0xff] }
 0x7cf   : > { %8410 = vmatpush1.bf16.msra.mxu0 %v10085_v34  ;;  %v10245_v34 = vcombine.low %v5367_v38, %v5383_v11  ;;  %v5447_v50 = vld [vmem:[%s14557_s19 + $0xfc8] sm:$0xff]  ;;  %v4988_v7 = vld [vmem:[%s14557_s19 + $0x170] sm:$0xff]  ;;  %v5033_v38 = vld [vmem:[%s14557_s19 + $0x2d8] sm:$0xff] }
 0x7d0   : > { %8533 = vmatpush1.bf16.msra.mxu1 %v10091_v30  ;;  %8411 = vmatprep.subr.bf16.mxu0 %v10118_v44  ;;  %v10251_v30 = vcombine.low %v5370_v31, %v5386_v52  ;;  %v10278_v44 = vcombine.high %v5399_v59, %v5415_v40  ;;  %v5020_v31 = vld [vmem:[%s14557_s19 + $0x270] sm:$0xff]  ;;  %v5275_v27 = vld [vmem:[%s14557_s19 + $0xa68] sm:$0xff] }
 0x7d1   : > { %8534 = vmatprep.subr.bf16.mxu1 %v10124_v45  ;;  %v10284_v45 = vcombine.high %v5402_v1, %v5418_v26  ;;  %v5036_v52 = vld [vmem:[%s14557_s19 + $0x2f0] sm:$0xff] }
 0x7d2   : > { %v5276_v29 = vld [vmem:[%s14557_s19 + $0xa70] sm:$0xff] }
 0x7d3   : > { %8412 = vmatpush1.bf16.msra.mxu0 %v10117_v20  ;;  %v10277_v20 = vcombine.low %v5399_v59, %v5415_v40  ;;  %v5049_v59 = vld [vmem:[%s14557_s19 + $0x358] sm:$0xff]  ;;  %v5292_v49 = vld [vmem:[%s14557_s19 + $0xaf0] sm:$0xff] }
 0x7d4   : > { %8535 = vmatpush1.bf16.msra.mxu1 %v10123_v8  ;;  %8413 = vmatprep.subr.bf16.mxu0 %v10150_v9  ;;  %v10283_v8 = vcombine.low %v5402_v1, %v5418_v26  ;;  %v10310_v9 = vcombine.high %v5431_v51, %v5447_v50  ;;  %v5065_v40 = vld [vmem:[%s14557_s19 + $0x3d8] sm:$0xff]  ;;  %v5052_v1 = vld [vmem:[%s14557_s19 + $0x370] sm:$0xff] }
 0x7d5   : > { %8536 = vmatprep.subr.bf16.mxu1 %v10156_v36  ;;  %v10316_v36 = vcombine.high %v5434_v2, %v5450_v53  ;;  %v5068_v26 = vld [vmem:[%s14557_s19 + $0x3f0] sm:$0xff] }
 0x7d7   : > { %8414 = vmatpush1.bf16.msra.mxu0 %v10149_v10  ;;  %v10309_v10 = vcombine.low %v5431_v51, %v5447_v50  ;;  %v5081_v51 = vld [vmem:[%s14557_s19 + $0x458] sm:$0xff] }
 0x7d8   : > { %8537 = vmatpush1.bf16.msra.mxu1 %v10155_v4  ;;  %8415 = vmatprep.subr.bf16.mxu0 %v10182_v14  ;;  %v10315_v4 = vcombine.low %v5434_v2, %v5450_v53  ;;  %v9834_v14 = vcombine.high %v4953_v57, %v4969_v0  ;;  %v5097_v50 = vld [vmem:[%s14557_s19 + $0x4d8] sm:$0xff]  ;;  %v5084_v2 = vld [vmem:[%s14557_s19 + $0x470] sm:$0xff] }
 0x7d9   : > { %8538 = vmatprep.subr.bf16.mxu1 %v10188_v48  ;;  %v9840_v48 = vcombine.high %v4956_v35, %v4972_v61  ;;  %v5100_v53 = vld [vmem:[%s14557_s19 + $0x4f0] sm:$0xff]  ;;  %v5113_v57 = vld [vmem:[%s14557_s19 + $0x558] sm:$0xff] }
 0x7da   : > { %v5129_v0 = vld [vmem:[%s14557_s19 + $0x5d8] sm:$0xff] }
 0x7db   : > { %8416 = vmatpush1.bf16.msra.mxu0 %v10181_v33  ;;  %v5004_v33 = vld [vmem:[%s14557_s19 + $0x1f0] sm:$0xff] }
 0x7dc   : > { %8539 = vmatpush1.bf16.msra.mxu1 %v10187_v39  ;;  %8417 = vmatprep.subr.bf16.mxu0 %v10214_v17  ;;  %v9839_v39 = vcombine.low %v4956_v35, %v4972_v61  ;;  %v9866_v17 = vcombine.high %v4985_v62, %v5001_v25  ;;  %v9872_v11 = vcombine.high %v4988_v7, %v5004_v33  ;;  %v5116_v35 = vld [vmem:[%s14557_s19 + $0x570] sm:$0xff] }
 0x7dd   : > { %8540 = vmatprep.subr.bf16.mxu1 %v10220_v63  ;;  %v5017_v63 = vld [vmem:[%s14557_s19 + $0x258] sm:$0xff]  ;;  %v5132_v61 = vld [vmem:[%s14557_s19 + $0x5f0] sm:$0xff] }
 0x7df   : > { %8418 = vmatpush1.bf16.msra.mxu0 %v10213_v6  ;;  %v9865_v6 = vcombine.low %v4985_v62, %v5001_v25  ;;  %v5145_v62 = vld [vmem:[%s14557_s19 + $0x658] sm:$0xff] }
 0x7e0   : > { %8541 = vmatpush1.bf16.msra.mxu1 %v10219_v37  ;;  %8419 = vmatprep.subr.bf16.mxu0 %v10246_v47  ;;  %v9871_v37 = vcombine.low %v4988_v7, %v5004_v33  ;;  %v9898_v47 = vcombine.high %v5017_v63, %v5033_v38  ;;  %v5161_v25 = vld [vmem:[%s14557_s19 + $0x6d8] sm:$0xff]  ;;  %v5148_v7 = vld [vmem:[%s14557_s19 + $0x670] sm:$0xff] }
 0x7e1   : > { %8542 = vmatprep.subr.bf16.mxu1 %v10252_v56  ;;  %v9904_v56 = vcombine.high %v5020_v31, %v5036_v52  ;;  %v5164_v33 = vld [vmem:[%s14557_s19 + $0x6f0] sm:$0xff] }
 0x7e3   : > { %8420 = vmatpush1.bf16.msra.mxu0 %v10245_v34  ;;  %v9897_v34 = vcombine.low %v5017_v63, %v5033_v38  ;;  %v8715_v63 = vrot.slane %v13546_v3, %v11685_v23  ;;  %v9993_v38 = vcombine.low %v5113_v57, %v5129_v0 }
 0x7e4   : > { %8543 = vmatpush1.bf16.msra.mxu1 %v10251_v30  ;;  %8421 = vmatprep.subr.bf16.mxu0 %v10278_v44  ;;  %v9903_v30 = vcombine.low %v5020_v31, %v5036_v52  ;;  %v9930_v44 = vcombine.high %v5049_v59, %v5065_v40  ;;  %v9999_v31 = vcombine.low %v5116_v35, %v5132_v61 }
 0x7e5   : > { %8544 = vmatprep.subr.bf16.mxu1 %v10284_v45  ;;  %v9936_v45 = vcombine.high %v5052_v1, %v5068_v26  ;;  %v10026_v52 = vcombine.high %v5145_v62, %v5161_v25 }
 0x7e7   : > { %8422 = vmatpush1.bf16.msra.mxu0 %v10277_v20  ;;  %v9929_v20 = vcombine.low %v5049_v59, %v5065_v40  ;;  %v5193_v59 = vld [vmem:[%s14557_s19 + $0x7d8] sm:$0xff] }
 0x7e8   : > { %8545 = vmatpush1.bf16.msra.mxu1 %v10283_v8  ;;  %8423 = vmatprep.subr.bf16.mxu0 %v10310_v9  ;;  %v9935_v8 = vcombine.low %v5052_v1, %v5068_v26  ;;  %v9962_v9 = vcombine.high %v5081_v51, %v5097_v50 }
 0x7e9   : > { %8546 = vmatprep.subr.bf16.mxu1 %v10316_v36  ;;  %v9968_v36 = vcombine.high %v5084_v2, %v5100_v53 }
 0x7eb   : > { %8424 = vmatpush1.bf16.msra.mxu0 %v10309_v10  ;;  %v9961_v10 = vcombine.low %v5081_v51, %v5097_v50 }
 0x7ec   : > { %8547 = vmatpush1.bf16.msra.mxu1 %v10315_v4  ;;  %8475 = vmatprep.subr.bf16.mxu0 %v9834_v14  ;;  %v9967_v4 = vcombine.low %v5084_v2, %v5100_v53  ;;  %v9994_v14 = vcombine.high %v5113_v57, %v5129_v0  ;;  %v10025_v2 = vcombine.low %v5145_v62, %v5161_v25  ;;  %v5212_v62 = vld [vmem:[%s14557_s19 + $0x870] sm:$0xff] }
 0x7ed   : > { %8598 = vmatprep.subr.bf16.mxu1 %v9840_v48  ;;  %v10000_v48 = vcombine.high %v5116_v35, %v5132_v61  ;;  %v10031_v53 = vcombine.low %v5148_v7, %v5164_v33  ;;  %v5228_v25 = vld [vmem:[%s14557_s19 + $0x8f0] sm:$0xff] }
 0x7ee   : > { %8426 = vmatmul.mubr.bf16.vlgmr.msra.gmra.mrb[72].mxu0 %v12899_v43 }
 0x7ef   : > { %8549 = vmatmul.mubr.bf16.vlgmr.msra.gmra.mrb[68].mxu1 %v12899_v43  ;;  %8476 = vmatpush1.bf16.msra.mxu0 %v9833_v41  ;;  %v8711_v41 = vrot.slane %v13546_v3, %v11675_v19  ;;  %v5177_v3 = vld [vmem:[%s14557_s19 + $0x758] sm:$0xff] }
 0x7f0   : > { %8507 = vmatprep.mubr.bf16.mxu0 %v12897_v32  ;;  %8599 = vmatpush1.bf16.msra.mxu1 %v9839_v39  ;;  %v8907_v39 = vrot.slane %v13551_v24, %v11675_v19  ;;  %v10058_v57 = vcombine.high %v5177_v3, %v5193_v59 }
 0x7f1   : > { %8630 = vmatprep.mubr.bf16.mxu1 %v12897_v32  ;;  %8477 = vmatprep.subr.bf16.mxu0 %v9866_v17  ;;  %v8735_v17 = vrot.slane %v13780_v46, %v11673_v18 }
 0x7f2   : > { %8600 = vmatprep.subr.bf16.mxu1 %v9872_v11  ;;  %v8739_v11 = vrot.slane %v13780_v46, %v11683_v22 }
 0x7f3   : > { %8478 = vmatpush1.bf16.msra.mxu0 %v9865_v6 }
 0x7f4   : > { %8601 = vmatpush1.bf16.msra.mxu1 %v9871_v37  ;;  %8479 = vmatprep.subr.bf16.mxu0 %v9898_v47  ;;  %v8931_v37 = vrot.slane %v13785_v42, %v11673_v18  ;;  %v8911_v47 = vrot.slane %v13551_v24, %v11685_v23  ;;  %v5180_v24 = vld [vmem:[%s14557_s19 + $0x770] sm:$0xff] }
 0x7f5   : > { %8602 = vmatprep.subr.bf16.mxu1 %v9904_v56  ;;  %v10032_v56 = vcombine.high %v5148_v7, %v5164_v33  ;;  %v10057_v7 = vcombine.low %v5177_v3, %v5193_v59 }
 0x7f7   : > { %8480 = vmatpush1.bf16.msra.mxu0 %v9897_v34  ;;  %v8935_v34 = vrot.slane %v13785_v42, %v11683_v22 }
 0x7f8   : > { %8603 = vmatpush1.bf16.msra.mxu1 %v9903_v30  ;;  %8481 = vmatprep.subr.bf16.mxu0 %v9930_v44  ;;  %v5196_v30 = vld [vmem:[%s14557_s19 + $0x7f0] sm:$0xff] }
 0x7f9   : > { %8604 = vmatprep.subr.bf16.mxu1 %v9936_v45 }
 0x7fb   : > { %8482 = vmatpush1.bf16.msra.mxu0 %v9929_v20 }
 0x7fc   : > { %8605 = vmatpush1.bf16.msra.mxu1 %v9935_v8  ;;  %8483 = vmatprep.subr.bf16.mxu0 %v9962_v9 }
 0x7fd   : > { %8606 = vmatprep.subr.bf16.mxu1 %v9968_v36 }
 0x7ff   : > { %8484 = vmatpush1.bf16.msra.mxu0 %v9961_v10  ;;  %v10064_v10 = vcombine.high %v5180_v24, %v5196_v30 }
 0x800   : > { %8607 = vmatpush1.bf16.msra.mxu1 %v9967_v4  ;;  %8485 = vmatprep.subr.bf16.mxu0 %v9994_v14  ;;  %v5209_v4 = vld [vmem:[%s14557_s19 + $0x858] sm:$0xff] }
 0x801   : > { %v8181_v6 = vpop.f32.mrb[60].mxu0  ;;  %8608 = vmatprep.subr.bf16.mxu1 %v10000_v48  ;;  %v5225_v14 = vld [vmem:[%s14557_s19 + $0x8d8] sm:$0xff] }
 0x802   : > { %v8850_v40 = vmul.f32 %v8711_v41, %v8181_v6  ;;  %v8304_v1 = vpop.f32.mrb[56].mxu1  ;;  %v8183_v26 = vpop.f32.mrb[61].mxu0  ;;  %v5244_v6 = vld [vmem:[%s14557_s19 + $0x970] sm:$0xff] }
 0x803   : > { %v8856_v44 = vmul.f32 %v8735_v17, %v8304_v1  ;;  %v8851_v45 = vmul.f32 %v8715_v63, %v8183_v26  ;;  %v8306_v51 = vpop.f32.mrb[57].mxu1  ;;  %v8185_v50 = vpop.f32.mrb[62].mxu0  ;;  %8486 = vmatpush1.bf16.msra.mxu0 %v9993_v38  ;;  %v10090_v17 = vcombine.high %v5209_v4, %v5225_v14  ;;  %v9128_v63 = vrot.slane %v9106_v58, %v11742_v5  ;;  %v5289_v1 = vld [vmem:[%s14557_s19 + $0xad8] sm:$0xff] }
 0x804   : > { %v9046_v20 = vadd.f32 %v8907_v39, %v8850_v40  ;;  %v8857_v8 = vmul.f32 %v8739_v11, %v8306_v51  ;;  %v8308_v9 = vpop.f32.mrb[58].mxu1  ;;  %8609 = vmatpush1.bf16.msra.mxu1 %v9999_v31  ;;  %v8186_v36 = vpop.f32.mrb[63].mxu0  ;;  %8487 = vmatprep.subr.bf16.mxu0 %v10026_v52  ;;  %v10063_v39 = vcombine.low %v5180_v24, %v5196_v30  ;;  %v5241_v31 = vld [vmem:[%s14557_s19 + $0x958] sm:$0xff]  ;;  %v5308_v51 = vld [vmem:[%s14557_s19 + $0xb70] sm:$0xff] }
 0x805   : > { %v14056_v0 = vadd.f32 %v8931_v37, %v8856_v44  ;;  %v9047_v35 = vadd.f32 %v8911_v47, %v8851_v45  ;;  %v8309_v61 = vpop.f32.mrb[59].mxu1  ;;  %8610 = vmatprep.subr.bf16.mxu1 %v10032_v56  ;;  %v10096_v11 = vcombine.high %v5212_v62, %v5228_v25  ;;  %v5257_v52 = vld [vmem:[%s14557_s19 + $0x9d8] sm:$0xff]  ;;  %v10089_v58 = vcombine.low %v5209_v4, %v5225_v14  ;;  %v5324_v50 = vld [vmem:[%s14557_s19 + $0xbf0] sm:$0xff] }
 0x806   : > { %v14064_v48 = vadd.f32 %v8935_v34, %v8857_v8  ;;  %v10095_v37 = vcombine.low %v5212_v62, %v5228_v25  ;;  %v10122_v47 = vcombine.high %v5241_v31, %v5257_v52  ;;  %v9144_v56 = vrot.slane %v9136_v54, %v11742_v5  ;;  %v5273_v40 = vld [vmem:[%s14557_s19 + $0xa58] sm:$0xff] }
 0x807   : > { %v9107_v41 = vcombine.low %v9046_v20, %v9047_v35  ;;  %8488 = vmatpush1.bf16.msra.mxu0 %v10025_v2  ;;  %v10128_v59 = vcombine.high %v5244_v6, %v5260_v60  ;;  %v10121_v26 = vcombine.low %v5241_v31, %v5257_v52  ;;  %v10127_v34 = vcombine.low %v5244_v6, %v5260_v60  ;;  %v5305_v44 = vld [vmem:[%s14557_s19 + $0xb58] sm:$0xff]  ;;  %v5356_v35 = vld [vmem:[%s14557_s19 + $0xcf0] sm:$0xff] }
 0x808   : > { %v9155_v33 = vcombine.low %v14056_v0, %v14064_v48  ;;  %8611 = vmatpush1.bf16.msra.mxu1 %v10031_v53  ;;  %8489 = vmatprep.subr.bf16.mxu0 %v10058_v57  ;;  %v10154_v24 = vcombine.high %v5273_v40, %v5289_v1  ;;  %v10160_v30 = vcombine.high %v5276_v29, %v5292_v49  ;;  %v5321_v45 = vld [vmem:[%s14557_s19 + $0xbd8] sm:$0xff]  ;;  %v5340_v57 = vld [vmem:[%s14557_s19 + $0xc70] sm:$0xff] }
 0x809   : > { %v9135_v38 = vrot.slane %v9107_v41, %v11742_v5  ;;  %8612 = vmatprep.subr.bf16.mxu1 %v10064_v10  ;;  %v10153_v2 = vcombine.low %v5273_v40, %v5289_v1  ;;  %v10159_v53 = vcombine.low %v5276_v29, %v5292_v49  ;;  %v10186_v20 = vcombine.high %v5305_v44, %v5321_v45  ;;  %v5337_v9 = vld [vmem:[%s14557_s19 + $0xc58] sm:$0xff]  ;;  %v5372_v41 = vld [vmem:[%s14557_s19 + $0xd70] sm:$0xff] }
 0x80a   : > { %v10192_v8 = vcombine.high %v5308_v51, %v5324_v50  ;;  %v5353_v36 = vld [vmem:[%s14557_s19 + $0xcd8] sm:$0xff]  ;;  %v10185_v61 = vcombine.low %v5305_v44, %v5321_v45  ;;  %v10191_v10 = vcombine.low %v5308_v51, %v5324_v50  ;;  %v10224_v14 = vcombine.high %v5340_v57, %v5356_v35  ;;  %v5404_v52 = vld [vmem:[%s14557_s19 + $0xe70] sm:$0xff]  ;;  %v4987_v44 = vld [vmem:[%s14557_s19 + $0x168] sm:$0xff] }
 0x80b   : > { %v9137_v21 = vcombine.low %v9128_v63, %v9135_v38  ;;  %8490 = vmatpush1.bf16.msra.mxu0 %v10057_v7  ;;  %v10218_v4 = vcombine.high %v5337_v9, %v5353_v36  ;;  %v5369_v62 = vld [vmem:[%s14557_s19 + $0xd58] sm:$0xff]  ;;  %v5388_v7 = vld [vmem:[%s14557_s19 + $0xdf0] sm:$0xff]  ;;  %v5003_v45 = vld [vmem:[%s14557_s19 + $0x1e8] sm:$0xff] }
 0x80c   : > { %8613 = vmatpush1.bf16.msra.mxu1 %v10063_v39  ;;  %8491 = vmatprep.subr.bf16.mxu0 %v10090_v17  ;;  %v5385_v25 = vld [vmem:[%s14557_s19 + $0xdd8] sm:$0xff]  ;;  %v10217_v39 = vcombine.low %v5337_v9, %v5353_v36  ;;  %v10223_v17 = vcombine.low %v5340_v57, %v5356_v35  ;;  %v10256_v38 = vcombine.high %v5372_v41, %v5388_v7  ;;  %v5420_v6 = vld [vmem:[%s14557_s19 + $0xef0] sm:$0xff]  ;;  %v5051_v9 = vld [vmem:[%s14557_s19 + $0x368] sm:$0xff] }
 0x80d   : > { %v9151_v3 = vrot.slane %v9137_v21, %v11742_v5  ;;  %8614 = vmatprep.subr.bf16.mxu1 %v10096_v11  ;;  %v10250_v63 = vcombine.high %v5369_v62, %v5385_v25  ;;  %v5401_v11 = vld [vmem:[%s14557_s19 + $0xe58] sm:$0xff]  ;;  %v10249_v60 = vcombine.low %v5369_v62, %v5385_v25  ;;  %v10255_v21 = vcombine.low %v5372_v41, %v5388_v7  ;;  %v5067_v36 = vld [vmem:[%s14557_s19 + $0x3e8] sm:$0xff]  ;;  %v14217_v7 = vld [vmem:[%s14558_s20 + $0x10] sm:$0xff] }
 0x80e   : > { %v5417_v31 = vld [vmem:[%s14557_s19 + $0xed8] sm:$0xff]  ;;  %v10287_v1 = vcombine.low %v5404_v52, %v5420_v6  ;;  %v9870_v50 = vcombine.high %v4987_v44, %v5003_v45  ;;  %v9934_v35 = vcombine.high %v5051_v9, %v5067_v36  ;;  %v5115_v62 = vld [vmem:[%s14557_s19 + $0x568] sm:$0xff] }
 0x80f   : > { %v9152_v54 = vcombine.low %v9144_v56, %v9151_v3  ;;  %8492 = vmatpush1.bf16.msra.mxu0 %v10089_v58  ;;  %v10282_v58 = vcombine.high %v5401_v11, %v5417_v31  ;;  %v5449_v56 = vld [vmem:[%s14557_s19 + $0xfd8] sm:$0xff]  ;;  %v5436_v3 = vld [vmem:[%s14557_s19 + $0xf70] sm:$0xff]  ;;  %v10281_v40 = vcombine.low %v5401_v11, %v5417_v31  ;;  %v5131_v25 = vld [vmem:[%s14557_s19 + $0x5e8] sm:$0xff]  ;;  %v8751_v31 = vrot.slane %v14217_v7, %v11659_v12 }
 0x810   : > { %8615 = vmatpush1.bf16.msra.mxu1 %v10095_v37  ;;  %8493 = vmatprep.subr.bf16.mxu0 %v10122_v47  ;;  %v10288_v37 = vcombine.high %v5404_v52, %v5420_v6  ;;  %v5433_v47 = vld [vmem:[%s14557_s19 + $0xf58] sm:$0xff]  ;;  %v14230_v11 = vld [vmem:[%s14559_s21 + $0x10] sm:$0xff]  ;;  %v8731_v52 = vrot.slane %v13780_v46, %v11668_v16  ;;  %v9997_v6 = vcombine.low %v5115_v62, %v5131_v25 }
 0x811   : > { %9304 = vst [vmem:[%s14106_s4] sm:$0xff] %v9152_v54  ;;  %8616 = vmatprep.subr.bf16.mxu1 %v10128_v59  ;;  %v5452_v59 = vld [vmem:[%s14557_s19 + $0xff0] sm:$0xff]  ;;  %v10314_v29 = vcombine.high %v5433_v47, %v5449_v56  ;;  %v4955_v54 = vld [vmem:[%s14557_s19 + $0x68] sm:$0xff] }
 0x812   : > { %v10320_v49 = vcombine.high %v5436_v3, %v5452_v59 }
 0x813   : > { %8494 = vmatpush1.bf16.msra.mxu0 %v10121_v26  ;;  %v4971_v26 = vld [vmem:[%s14557_s19 + $0xe8] sm:$0xff] }
 0x814   : > { %8617 = vmatpush1.bf16.msra.mxu1 %v10127_v34  ;;  %8495 = vmatprep.subr.bf16.mxu0 %v10154_v24  ;;  %v10313_v34 = vcombine.low %v5433_v47, %v5449_v56  ;;  %v10319_v24 = vcombine.low %v5436_v3, %v5452_v59  ;;  %v9837_v51 = vcombine.low %v4955_v54, %v4971_v26  ;;  %v5195_v3 = vld [vmem:[%s14557_s19 + $0x7e8] sm:$0xff] }
 0x815   : > { %8618 = vmatprep.subr.bf16.mxu1 %v10160_v30  ;;  %v9838_v30 = vcombine.high %v4955_v54, %v4971_v26  ;;  %v8947_v47 = vrot.slane %v14230_v11, %v11659_v12  ;;  %v8927_v56 = vrot.slane %v13785_v42, %v11668_v16 }
 0x817   : > { %8496 = vmatpush1.bf16.msra.mxu0 %v10153_v2  ;;  %v5019_v2 = vld [vmem:[%s14557_s19 + $0x268] sm:$0xff] }
 0x818   : > { %8619 = vmatpush1.bf16.msra.mxu1 %v10159_v53  ;;  %8497 = vmatprep.subr.bf16.mxu0 %v10186_v20  ;;  %v5035_v53 = vld [vmem:[%s14557_s19 + $0x2e8] sm:$0xff]  ;;  %v9869_v20 = vcombine.low %v4987_v44, %v5003_v45 }
 0x819   : > { %8620 = vmatprep.subr.bf16.mxu1 %v10192_v8  ;;  %v9902_v8 = vcombine.high %v5019_v2, %v5035_v53  ;;  %v9901_v57 = vcombine.low %v5019_v2, %v5035_v53 }
 0x81b   : > { %8498 = vmatpush1.bf16.msra.mxu0 %v10185_v61  ;;  %v5083_v61 = vld [vmem:[%s14557_s19 + $0x468] sm:$0xff] }
 0x81c   : > { %8621 = vmatpush1.bf16.msra.mxu1 %v10191_v10  ;;  %8499 = vmatprep.subr.bf16.mxu0 %v10218_v4  ;;  %v5099_v10 = vld [vmem:[%s14557_s19 + $0x4e8] sm:$0xff]  ;;  %v9933_v4 = vcombine.low %v5051_v9, %v5067_v36 }
 0x81d   : > { %8622 = vmatprep.subr.bf16.mxu1 %v10224_v14  ;;  %v9966_v14 = vcombine.high %v5083_v61, %v5099_v10  ;;  %v9965_v41 = vcombine.low %v5083_v61, %v5099_v10  ;;  %v14268_v10 = vrot.slane %v9153_v55, %v11742_v5  ;;  %v5291_v55 = vld [vmem:[%s14557_s19 + $0xae8] sm:$0xff] }
 0x81f   : > { %8500 = vmatpush1.bf16.msra.mxu0 %v10217_v39  ;;  %v9998_v39 = vcombine.high %v5115_v62, %v5131_v25  ;;  %v5259_v62 = vld [vmem:[%s14557_s19 + $0x9e8] sm:$0xff] }
 0x820   : > { %8623 = vmatpush1.bf16.msra.mxu1 %v10223_v17  ;;  %8501 = vmatprep.subr.bf16.mxu0 %v10250_v63  ;;  %v5147_v17 = vld [vmem:[%s14557_s19 + $0x668] sm:$0xff] }
 0x821   : > { %8624 = vmatprep.subr.bf16.mxu1 %v10256_v38  ;;  %v5163_v63 = vld [vmem:[%s14557_s19 + $0x6e8] sm:$0xff]  ;;  %v8727_v38 = vrot.slane %v13780_v46, %v11661_v13 }
 0x822   : > { %v5179_v46 = vld [vmem:[%s14557_s19 + $0x768] sm:$0xff] }
 0x823   : > { %8502 = vmatpush1.bf16.msra.mxu0 %v10249_v60  ;;  %v8923_v60 = vrot.slane %v13785_v42, %v11661_v13  ;;  %v10029_v42 = vcombine.low %v5147_v17, %v5163_v63 }
 0x824   : > { %8625 = vmatpush1.bf16.msra.mxu1 %v10255_v21  ;;  %8503 = vmatprep.subr.bf16.mxu0 %v10282_v58  ;;  %v8755_v21 = vrot.slane %v14217_v7, %v11666_v15  ;;  %v10030_v58 = vcombine.high %v5147_v17, %v5163_v63  ;;  %v10158_v17 = vcombine.high %v5275_v27, %v5291_v55  ;;  %v5307_v63 = vld [vmem:[%s14557_s19 + $0xb68] sm:$0xff] }
 0x825   : > { %8626 = vmatprep.subr.bf16.mxu1 %v10288_v37 }
 0x827   : > { %8504 = vmatpush1.bf16.msra.mxu0 %v10281_v40 }
 0x828   : > { %8627 = vmatpush1.bf16.msra.mxu1 %v10287_v1  ;;  %8505 = vmatprep.subr.bf16.mxu0 %v10314_v29  ;;  %v8951_v29 = vrot.slane %v14230_v11, %v11666_v15 }
 0x829   : > { %8628 = vmatprep.subr.bf16.mxu1 %v10320_v49 }
 0x82b   : > { %8506 = vmatpush1.bf16.msra.mxu0 %v10313_v34 }
 0x82c   : > { %8629 = vmatpush1.bf16.msra.mxu1 %v10319_v24  ;;  %8557 = vmatprep.subr.bf16.mxu0 %v9838_v30 }
 0x82e   : > { %8508 = vmatmul.mubr.bf16.vlgmr.msra.gmra.mrb[76].mxu0 %v12899_v43 }
 0x82f   : > { %8631 = vmatmul.mubr.bf16.vlgmr.msra.gmra.mrb[72].mxu1 %v12899_v43  ;;  %8558 = vmatpush1.bf16.msra.mxu0 %v9837_v51  ;;  %v10062_v51 = vcombine.high %v5179_v46, %v5195_v3 }
 0x830   : > { %8589 = vmatprep.mubr.bf16.mxu0 %v12897_v32  ;;  %8559 = vmatprep.subr.bf16.mxu0 %v9870_v50 }
 0x833   : > { %8560 = vmatpush1.bf16.msra.mxu0 %v9869_v20  ;;  %v5211_v20 = vld [vmem:[%s14557_s19 + $0x868] sm:$0xff] }
 0x834   : > { %8561 = vmatprep.subr.bf16.mxu0 %v9902_v8  ;;  %v5227_v8 = vld [vmem:[%s14557_s19 + $0x8e8] sm:$0xff] }
 0x835   : > { %v10094_v61 = vcombine.high %v5211_v20, %v5227_v8 }
 0x837   : > { %8562 = vmatpush1.bf16.msra.mxu0 %v9901_v57  ;;  %v10061_v57 = vcombine.low %v5179_v46, %v5195_v3  ;;  %v5403_v3 = vld [vmem:[%s14557_s19 + $0xe68] sm:$0xff] }
 0x838   : > { %8563 = vmatprep.subr.bf16.mxu0 %v9934_v35 }
 0x83b   : > { %8564 = vmatpush1.bf16.msra.mxu0 %v9933_v4 }
 0x83c   : > { %8565 = vmatprep.subr.bf16.mxu0 %v9966_v14  ;;  %v5243_v14 = vld [vmem:[%s14557_s19 + $0x968] sm:$0xff] }
 0x83d   : > { %v10126_v28 = vcombine.high %v5243_v14, %v5259_v62 }
 0x83f   : > { %8566 = vmatpush1.bf16.msra.mxu0 %v9965_v41  ;;  %v10093_v41 = vcombine.low %v5211_v20, %v5227_v8  ;;  %v5037_v20 = vld [vmem:[%s14557_s19 + $0x2f8] sm:$0xff] }
 0x840   : > { %8567 = vmatprep.subr.bf16.mxu0 %v9998_v39  ;;  %v10125_v39 = vcombine.low %v5243_v14, %v5259_v62 }
 0x841   : > { %v8263_v37 = vpop.f32.mrb[64].mxu0 }
 0x842   : > { %v8854_v59 = vmul.f32 %v8727_v38, %v8263_v37  ;;  %v8386_v40 = vpop.f32.mrb[60].mxu1  ;;  %v8265_v1 = vpop.f32.mrb[65].mxu0  ;;  %v5323_v38 = vld [vmem:[%s14557_s19 + $0xbe8] sm:$0xff] }
 0x843   : > { %v8860_v49 = vmul.f32 %v8751_v31, %v8386_v40  ;;  %v8855_v54 = vmul.f32 %v8731_v52, %v8265_v1  ;;  %v8388_v26 = vpop.f32.mrb[61].mxu1  ;;  %v8267_v34 = vpop.f32.mrb[66].mxu0  ;;  %8568 = vmatpush1.bf16.msra.mxu0 %v9997_v6  ;;  %v10157_v31 = vcombine.low %v5275_v27, %v5291_v55  ;;  %v10190_v52 = vcombine.high %v5307_v63, %v5323_v38  ;;  %v5339_v6 = vld [vmem:[%s14557_s19 + $0xc68] sm:$0xff]  ;;  %v5117_v55 = vld [vmem:[%s14557_s19 + $0x578] sm:$0xff] }
 0x844   : > { %v9050_v24 = vadd.f32 %v8923_v60, %v8854_v59  ;;  %v8861_v30 = vmul.f32 %v8755_v21, %v8388_v26  ;;  %v8390_v44 = vpop.f32.mrb[62].mxu1  ;;  %v8268_v45 = vpop.f32.mrb[67].mxu0  ;;  %8569 = vmatprep.subr.bf16.mxu0 %v10030_v58  ;;  %v5355_v60 = vld [vmem:[%s14557_s19 + $0xce8] sm:$0xff]  ;;  %v10189_v21 = vcombine.low %v5307_v63, %v5323_v38  ;;  %v4957_v34 = vld [vmem:[%s14557_s19 + $0x78] sm:$0xff] }
 0x845   : > { %v14252_v50 = vadd.f32 %v8947_v47, %v8860_v49  ;;  %v9051_v2 = vadd.f32 %v8927_v56, %v8855_v54  ;;  %v8391_v53 = vpop.f32.mrb[63].mxu1  ;;  %v10222_v58 = vcombine.high %v5339_v6, %v5355_v60  ;;  %v5371_v37 = vld [vmem:[%s14557_s19 + $0xd68] sm:$0xff]  ;;  %v10221_v56 = vcombine.low %v5339_v6, %v5355_v60  ;;  %v4989_v44 = vld [vmem:[%s14557_s19 + $0x178] sm:$0xff] }
 0x846   : > { %v14260_v9 = vadd.f32 %v8951_v29, %v8861_v30  ;;  %v5387_v47 = vld [vmem:[%s14557_s19 + $0xde8] sm:$0xff]  ;;  %v5005_v45 = vld [vmem:[%s14557_s19 + $0x1f8] sm:$0xff]  ;;  %v8767_v60 = vrot.slane %v14217_v7, %v11673_v18 }
 0x847   : > { %v9154_v36 = vcombine.low %v9050_v24, %v9051_v2  ;;  %8570 = vmatpush1.bf16.msra.mxu0 %v10029_v42  ;;  %v10254_v46 = vcombine.high %v5371_v37, %v5387_v47  ;;  %v5419_v59 = vld [vmem:[%s14557_s19 + $0xee8] sm:$0xff]  ;;  %v10253_v40 = vcombine.low %v5371_v37, %v5387_v47  ;;  %v4973_v42 = vld [vmem:[%s14557_s19 + $0xf8] sm:$0xff]  ;;  %v9874_v2 = vcombine.high %v4989_v44, %v5005_v45 }
 0x848   : > { %v9202_v35 = vcombine.low %v14252_v50, %v14260_v9  ;;  %8571 = vmatprep.subr.bf16.mxu0 %v10062_v51  ;;  %v10286_v1 = vcombine.high %v5403_v3, %v5419_v59  ;;  %v5435_v29 = vld [vmem:[%s14557_s19 + $0xf68] sm:$0xff]  ;;  %v10285_v54 = vcombine.low %v5403_v3, %v5419_v59  ;;  %v9842_v30 = vcombine.high %v4957_v34, %v4973_v42  ;;  %v5021_v53 = vld [vmem:[%s14557_s19 + $0x278] sm:$0xff] }
 0x849   : > { %v14271_v4 = vrot.slane %v9154_v36, %v11742_v5  ;;  %v5451_v49 = vld [vmem:[%s14557_s19 + $0xfe8] sm:$0xff]  ;;  %v9841_v51 = vcombine.low %v4957_v34, %v4973_v42  ;;  %v9873_v8 = vcombine.low %v4989_v44, %v5005_v45  ;;  %v9906_v36 = vcombine.high %v5021_v53, %v5037_v20  ;;  %v5149_v38 = vld [vmem:[%s14557_s19 + $0x678] sm:$0xff] }
 0x84a   : > { %v10318_v26 = vcombine.high %v5435_v29, %v5451_v49  ;;  %v10317_v24 = vcombine.low %v5435_v29, %v5451_v49  ;;  %v9905_v14 = vcombine.low %v5021_v53, %v5037_v20  ;;  %v10972_v37 = vld [vmem:[%s14559_s21 + $0x8] sm:$0xff]  ;;  %v8963_v59 = vrot.slane %v14230_v11, %v11673_v18  ;;  %v5197_v29 = vld [vmem:[%s14557_s19 + $0x7f8] sm:$0xff] }
 0x84b   : > { %v9185_v25 = vcombine.low %v14268_v10, %v14271_v4  ;;  %8572 = vmatpush1.bf16.msra.mxu0 %v10061_v57  ;;  %v5053_v57 = vld [vmem:[%s14557_s19 + $0x378] sm:$0xff]  ;;  %v8939_v47 = vrot.slane %v10972_v37, %v11675_v19  ;;  %v8967_v34 = vrot.slane %v14230_v11, %v11683_v22 }
 0x84c   : > { %8573 = vmatprep.subr.bf16.mxu0 %v10094_v61  ;;  %v5069_v61 = vld [vmem:[%s14557_s19 + $0x3f8] sm:$0xff] }
 0x84d   : > { %v9938_v62 = vcombine.high %v5053_v57, %v5069_v61  ;;  %v9193_v0 = vrot.slane %v9185_v25, %v11742_v5  ;;  %v5309_v10 = vld [vmem:[%s14557_s19 + $0xb78] sm:$0xff] }
 0x84e   : > { %v5325_v4 = vld [vmem:[%s14557_s19 + $0xbf8] sm:$0xff] }
 0x84f   : > { %8574 = vmatpush1.bf16.msra.mxu0 %v10093_v41  ;;  %v5085_v41 = vld [vmem:[%s14557_s19 + $0x478] sm:$0xff] }
 0x850   : > { %8575 = vmatprep.subr.bf16.mxu0 %v10126_v28  ;;  %v9937_v28 = vcombine.low %v5053_v57, %v5069_v61 }
 0x853   : > { %8576 = vmatpush1.bf16.msra.mxu0 %v10125_v39  ;;  %v5133_v39 = vld [vmem:[%s14557_s19 + $0x5f8] sm:$0xff] }
 0x854   : > { %8577 = vmatprep.subr.bf16.mxu0 %v10158_v17  ;;  %v10002_v63 = vcombine.high %v5117_v55, %v5133_v39 }
 0x857   : > { %8578 = vmatpush1.bf16.msra.mxu0 %v10157_v31  ;;  %v5165_v31 = vld [vmem:[%s14557_s19 + $0x6f8] sm:$0xff] }
 0x858   : > { %8579 = vmatprep.subr.bf16.mxu0 %v10190_v52  ;;  %v10971_v52 = vld [vmem:[%s14558_s20 + $0x8] sm:$0xff]  ;;  %v10033_v45 = vcombine.low %v5149_v38, %v5165_v31 }
 0x859   : > { %v8743_v6 = vrot.slane %v10971_v52, %v11675_v19 }
 0x85b   : > { %8580 = vmatpush1.bf16.msra.mxu0 %v10189_v21  ;;  %v8747_v21 = vrot.slane %v10971_v52, %v11685_v23 }
 0x85c   : > { %8581 = vmatprep.subr.bf16.mxu0 %v10222_v58  ;;  %v10001_v58 = vcombine.low %v5117_v55, %v5133_v39  ;;  %v9177_v39 = vrot.slane %v9155_v33, %v11742_v5  ;;  %v5277_v33 = vld [vmem:[%s14557_s19 + $0xa78] sm:$0xff] }
 0x85f   : > { %8582 = vmatpush1.bf16.msra.mxu0 %v10221_v56  ;;  %v8771_v56 = vrot.slane %v14217_v7, %v11683_v22 }
 0x860   : > { %8583 = vmatprep.subr.bf16.mxu0 %v10254_v46  ;;  %v10034_v46 = vcombine.high %v5149_v38, %v5165_v31  ;;  %v5261_v38 = vld [vmem:[%s14557_s19 + $0x9f8] sm:$0xff] }
 0x863   : > { %8584 = vmatpush1.bf16.msra.mxu0 %v10253_v40  ;;  %v8943_v40 = vrot.slane %v10972_v37, %v11685_v23 }
 0x864   : > { %8585 = vmatprep.subr.bf16.mxu0 %v10286_v1  ;;  %v5181_v1 = vld [vmem:[%s14557_s19 + $0x778] sm:$0xff] }
 0x867   : > { %8586 = vmatpush1.bf16.msra.mxu0 %v10285_v54 }
 0x868   : > { %8587 = vmatprep.subr.bf16.mxu0 %v10318_v26 }
 0x86b   : > { %8588 = vmatpush1.bf16.msra.mxu0 %v10317_v24 }
 0x86c   : > { %8639 = vmatprep.subr.bf16.mxu0 %v9842_v30 }
 0x86e   : > { %8590 = vmatmul.mubr.bf16.vlgmr.msra.gmra.mrb[80].mxu0 %v12899_v43 }
 0x86f   : > { %8640 = vmatpush1.bf16.msra.mxu0 %v9841_v51  ;;  %8671 = vmatprep.mubr.bf16.mxu0 %v12897_v32  ;;  %v5101_v32 = vld [vmem:[%s14557_s19 + $0x4f8] sm:$0xff] }
 0x870   : > { %8641 = vmatprep.subr.bf16.mxu0 %v9874_v2  ;;  %v9970_v27 = vcombine.high %v5085_v41, %v5101_v32  ;;  %v9969_v17 = vcombine.low %v5085_v41, %v5101_v32 }
 0x873   : > { %8642 = vmatpush1.bf16.msra.mxu0 %v9873_v8  ;;  %v10066_v8 = vcombine.high %v5181_v1, %v5197_v29 }
 0x874   : > { %8643 = vmatprep.subr.bf16.mxu0 %v9906_v36 }
 0x877   : > { %8644 = vmatpush1.bf16.msra.mxu0 %v9905_v14  ;;  %v5213_v14 = vld [vmem:[%s14557_s19 + $0x878] sm:$0xff] }
 0x878   : > { %8645 = vmatprep.subr.bf16.mxu0 %v9938_v62  ;;  %v5229_v62 = vld [vmem:[%s14557_s19 + $0x8f8] sm:$0xff] }
 0x879   : > { %v10098_v55 = vcombine.high %v5213_v14, %v5229_v62  ;;  %v10097_v52 = vcombine.low %v5213_v14, %v5229_v62 }
 0x87b   : > { %8646 = vmatpush1.bf16.msra.mxu0 %v9937_v28  ;;  %v10065_v28 = vcombine.low %v5181_v1, %v5197_v29  ;;  %v5389_v1 = vld [vmem:[%s14557_s19 + $0xdf8] sm:$0xff] }
 0x87c   : > { %8647 = vmatprep.subr.bf16.mxu0 %v9970_v27 }
 0x87f   : > { %8648 = vmatpush1.bf16.msra.mxu0 %v9969_v17 }
 0x880   : > { %8649 = vmatprep.subr.bf16.mxu0 %v10002_v63  ;;  %v5245_v63 = vld [vmem:[%s14557_s19 + $0x978] sm:$0xff] }
 0x881   : > { %v8345_v3 = vpop.f32.mrb[68].mxu0 }
 0x882   : > { %v8858_v49 = vmul.f32 %v8743_v6, %v8345_v3  ;;  %v8468_v54 = vpop.f32.mrb[64].mxu1  ;;  %v8347_v26 = vpop.f32.mrb[69].mxu0  ;;  %v10130_v6 = vcombine.high %v5245_v63, %v5261_v38  ;;  %v10193_v3 = vcombine.low %v5309_v10, %v5325_v4 }
 0x883   : > { %v8864_v42 = vmul.f32 %v8767_v60, %v8468_v54  ;;  %v8859_v24 = vmul.f32 %v8747_v21, %v8347_v26  ;;  %v8470_v30 = vpop.f32.mrb[65].mxu1  ;;  %v8349_v44 = vpop.f32.mrb[70].mxu0  ;;  %8650 = vmatpush1.bf16.msra.mxu0 %v10001_v58  ;;  %v5293_v60 = vld [vmem:[%s14557_s19 + $0xaf8] sm:$0xff]  ;;  %v10129_v58 = vcombine.low %v5245_v63, %v5261_v38 }
 0x884   : > { %v9054_v51 = vadd.f32 %v8939_v47, %v8858_v49  ;;  %v8865_v2 = vmul.f32 %v8771_v56, %v8470_v30  ;;  %v8472_v53 = vpop.f32.mrb[66].mxu1  ;;  %v8350_v20 = vpop.f32.mrb[71].mxu0  ;;  %8651 = vmatprep.subr.bf16.mxu0 %v10034_v46  ;;  %v10162_v37 = vcombine.high %v5277_v33, %v5293_v60  ;;  %v10161_v25 = vcombine.low %v5277_v33, %v5293_v60  ;;  %v5341_v56 = vld [vmem:[%s14557_s19 + $0xc78] sm:$0xff] }
 0x885   : > { %v14385_v36 = vadd.f32 %v8963_v59, %v8864_v42  ;;  %v9055_v57 = vadd.f32 %v8943_v40, %v8859_v24  ;;  %v8473_v61 = vpop.f32.mrb[67].mxu1  ;;  %v10194_v47 = vcombine.high %v5309_v10, %v5325_v4  ;;  %v5357_v46 = vld [vmem:[%s14557_s19 + $0xcf8] sm:$0xff]  ;;  %v8759_v53 = vrot.slane %v14217_v7, %v11661_v13 }
 0x886   : > { %v14393_v41 = vadd.f32 %v8967_v34, %v8865_v2  ;;  %v10226_v59 = vcombine.high %v5341_v56, %v5357_v46  ;;  %v5373_v40 = vld [vmem:[%s14557_s19 + $0xd78] sm:$0xff]  ;;  %v10225_v29 = vcombine.low %v5341_v56, %v5357_v46  ;;  %v9212_v4 = vrot.slane %v9202_v35, %v11742_v5 }
 0x887   : > { %v9156_v32 = vcombine.low %v9054_v51, %v9055_v57  ;;  %8652 = vmatpush1.bf16.msra.mxu0 %v10033_v45  ;;  %v10258_v49 = vcombine.high %v5373_v40, %v5389_v1  ;;  %v5405_v54 = vld [vmem:[%s14557_s19 + $0xe78] sm:$0xff]  ;;  %v10257_v34 = vcombine.low %v5373_v40, %v5389_v1  ;;  %v8763_v57 = vrot.slane %v14217_v7, %v11668_v16 }
 0x888   : > { %v9204_v27 = vcombine.low %v14385_v36, %v14393_v41  ;;  %8653 = vmatprep.subr.bf16.mxu0 %v10066_v8  ;;  %v5421_v26 = vld [vmem:[%s14557_s19 + $0xef8] sm:$0xff]  ;;  %v8779_v46 = vrot.slane %v14217_v7, %v11685_v23  ;;  %v8975_v35 = vrot.slane %v14230_v11, %v11685_v23 }
 0x889   : > { %v9184_v17 = vrot.slane %v9156_v32, %v11742_v5  ;;  %v10290_v42 = vcombine.high %v5405_v54, %v5421_v26  ;;  %v5437_v24 = vld [vmem:[%s14557_s19 + $0xf78] sm:$0xff]  ;;  %v10289_v44 = vcombine.low %v5405_v54, %v5421_v26  ;;  %v8959_v32 = vrot.slane %v14230_v11, %v11668_v16 }
 0x88a   : > { %v5453_v30 = vld [vmem:[%s14557_s19 + $0xff8] sm:$0xff] }
 0x88b   : > { %v9186_v31 = vcombine.low %v9177_v39, %v9184_v17  ;;  %8654 = vmatpush1.bf16.msra.mxu0 %v10065_v28  ;;  %v10322_v45 = vcombine.high %v5437_v24, %v5453_v30  ;;  %v10321_v51 = vcombine.low %v5437_v24, %v5453_v30  ;;  %v14454_v2 = vld [vmem:[%s14558_s20 + $0x18] sm:$0xff] }
 0x88c   : > { %8655 = vmatprep.subr.bf16.mxu0 %v10098_v55  ;;  %v14461_v20 = vld [vmem:[%s14559_s21 + $0x18] sm:$0xff]  ;;  %v8783_v8 = vrot.slane %v14454_v2, %v11659_v12  ;;  %v8787_v61 = vrot.slane %v14454_v2, %v11666_v15  ;;  %v8799_v56 = vrot.slane %v14454_v2, %v11673_v18 }
 0x88d   : > { %v9200_v48 = vrot.slane %v9186_v31, %v11742_v5  ;;  %v8979_v62 = vrot.slane %v14461_v20, %v11659_v12  ;;  %v8983_v17 = vrot.slane %v14461_v20, %v11666_v15  ;;  %v8995_v9 = vrot.slane %v14461_v20, %v11673_v18 }
 0x88e   : > { %v8991_v41 = vrot.slane %v14461_v20, %v11668_v16 }
 0x88f   : > { %v9201_v21 = vcombine.low %v9193_v0, %v9200_v48  ;;  %8656 = vmatpush1.bf16.msra.mxu0 %v10097_v52 }
 0x890   : > { %8657 = vmatprep.subr.bf16.mxu0 %v10130_v6 }
 0x891   : > { %9305 = vst [vmem:[%s14106_s4 + $0x8] sm:$0xff] %v9201_v21 }
 0x893   : > { %8658 = vmatpush1.bf16.msra.mxu0 %v10129_v58 }
 0x894   : > { %8659 = vmatprep.subr.bf16.mxu0 %v10162_v37 }
 0x897   : > { %8660 = vmatpush1.bf16.msra.mxu0 %v10161_v25 }
 0x898   : > { %8661 = vmatprep.subr.bf16.mxu0 %v10194_v47  ;;  %v8775_v47 = vrot.slane %v14217_v7, %v11675_v19 }
 0x89b   : > { %8662 = vmatpush1.bf16.msra.mxu0 %v10193_v3  ;;  %v8971_v3 = vrot.slane %v14230_v11, %v11675_v19 }
 0x89c   : > { %8663 = vmatprep.subr.bf16.mxu0 %v10226_v59  ;;  %v8803_v59 = vrot.slane %v14454_v2, %v11683_v22 }
 0x89f   : > { %8664 = vmatpush1.bf16.msra.mxu0 %v10225_v29 }
 0x8a0   : > { %8665 = vmatprep.subr.bf16.mxu0 %v10258_v49  ;;  %v8999_v49 = vrot.slane %v14461_v20, %v11683_v22  ;;  %v9226_v22 = vrot.slane %v9204_v27, %v11742_v5 }
 0x8a3   : > { %8666 = vmatpush1.bf16.msra.mxu0 %v10257_v34 }
 0x8a4   : > { %8667 = vmatprep.subr.bf16.mxu0 %v10290_v42 }
 0x8a7   : > { %8668 = vmatpush1.bf16.msra.mxu0 %v10289_v44 }
 0x8a8   : > { %8669 = vmatprep.subr.bf16.mxu0 %v10322_v45 }
 0x8ab   : > { %8670 = vmatpush1.bf16.msra.mxu0 %v10321_v51 }
 0x8ae   : > { %8672 = vmatmul.mubr.bf16.vlgmr.msra.gmra.mrb[84].mxu0 %v12899_v43  ;;  %v8955_v43 = vrot.slane %v14230_v11, %v11661_v13 }
 0x8c1   : > { %v8427_v14 = vpop.f32.mrb[72].mxu0 }
 0x8c2   : > { %v8862_v28 = vmul.f32 %v8759_v53, %v8427_v14  ;;  %v8550_v55 = vpop.f32.mrb[68].mxu1  ;;  %v8429_v39 = vpop.f32.mrb[73].mxu0 }
 0x8c3   : > { %v8868_v63 = vmul.f32 %v8783_v8, %v8550_v55  ;;  %v8863_v38 = vmul.f32 %v8763_v57, %v8429_v39  ;;  %v8552_v31 = vpop.f32.mrb[69].mxu1  ;;  %v8431_v52 = vpop.f32.mrb[74].mxu0  ;;  %v8987_v55 = vrot.slane %v14461_v20, %v11661_v13 }
 0x8c4   : > { %v9058_v6 = vadd.f32 %v8955_v43, %v8862_v28  ;;  %v8869_v0 = vmul.f32 %v8787_v61, %v8552_v31  ;;  %v8554_v48 = vpop.f32.mrb[70].mxu1  ;;  %v8432_v33 = vpop.f32.mrb[75].mxu0  ;;  %v8795_v28 = vrot.slane %v14454_v2, %v11668_v16  ;;  %v9003_v16 = vrot.slane %v14461_v20, %v11675_v19 }
 0x8c5   : > { %v9064_v60 = vadd.f32 %v8979_v62, %v8868_v63  ;;  %v9059_v21 = vadd.f32 %v8959_v32, %v8863_v38  ;;  %v8555_v12 = vpop.f32.mrb[71].mxu1  ;;  %v8791_v32 = vrot.slane %v14454_v2, %v11661_v13  ;;  %v8807_v13 = vrot.slane %v14454_v2, %v11675_v19 }
 0x8c6   : > { %v9065_v58 = vadd.f32 %v8983_v17, %v8869_v0  ;;  %v9007_v12 = vrot.slane %v14461_v20, %v11685_v23 }
 0x8c7   : > { %v9203_v37 = vcombine.low %v9058_v6, %v9059_v21 }
 0x8c8   : > { %v9251_v10 = vcombine.low %v9064_v60, %v9065_v58  ;;  %v8811_v60 = vrot.slane %v14454_v2, %v11685_v23 }
 0x8c9   : > { %v9219_v15 = vrot.slane %v9203_v37, %v11742_v5 }
 0x8ca   : > { %v9261_v0 = vrot.slane %v9251_v10, %v11742_v5 }
 0x8cb   : > { %v9234_v25 = vcombine.low %v9212_v4, %v9219_v15 }
 0x8cd   : > { %v9242_v61 = vrot.slane %v9234_v25, %v11742_v5 }
 0x901   : > { %v8509_v50 = vpop.f32.mrb[76].mxu0 }
 0x902   : > { %v8866_v40 = vmul.f32 %v8775_v47, %v8509_v50  ;;  %v8632_v1 = vpop.f32.mrb[72].mxu1  ;;  %v8511_v29 = vpop.f32.mrb[77].mxu0 }
 0x903   : > { %v8872_v7 = vmul.f32 %v8799_v56, %v8632_v1  ;;  %v8867_v54 = vmul.f32 %v8779_v46, %v8511_v29  ;;  %v8634_v26 = vpop.f32.mrb[73].mxu1  ;;  %v8513_v34 = vpop.f32.mrb[78].mxu0 }
 0x904   : > { %v9062_v42 = vadd.f32 %v8971_v3, %v8866_v40  ;;  %v8873_v24 = vmul.f32 %v8803_v59, %v8634_v26  ;;  %v8636_v30 = vpop.f32.mrb[74].mxu1  ;;  %v8514_v44 = vpop.f32.mrb[79].mxu0 }
 0x905   : > { %v9068_v45 = vadd.f32 %v8995_v9, %v8872_v7  ;;  %v9063_v18 = vadd.f32 %v8975_v35, %v8867_v54  ;;  %v8637_v51 = vpop.f32.mrb[75].mxu1 }
 0x906   : > { %v9069_v53 = vadd.f32 %v8999_v49, %v8873_v24 }
 0x907   : > { %v9205_v11 = vcombine.low %v9062_v42, %v9063_v18 }
 0x908   : > { %v9253_v8 = vcombine.low %v9068_v45, %v9069_v53 }
 0x909   : > { %v9233_v57 = vrot.slane %v9205_v11, %v11742_v5 }
 0x90a   : > { %v9275_v46 = vrot.slane %v9253_v8, %v11742_v5 }
 0x90b   : > { %v9235_v43 = vcombine.low %v9226_v22, %v9233_v57 }
 0x90d   : > { %v9249_v14 = vrot.slane %v9235_v43, %v11742_v5 }
 0x90f   : > { %v9250_v62 = vcombine.low %v9242_v61, %v9249_v14 }
 0x911   : > { %9306 = vst [vmem:[%s14106_s4 + $0x10] sm:$0xff] %v9250_v62 }
 0x941   : > { %v8591_v36 = vpop.f32.mrb[80].mxu0 }
 0x942   : > { %v8870_v27 = vmul.f32 %v8791_v32, %v8591_v36  ;;  %v8593_v39 = vpop.f32.mrb[81].mxu0 }
 0x943   : > { %v8871_v17 = vmul.f32 %v8795_v28, %v8593_v39  ;;  %v8595_v63 = vpop.f32.mrb[82].mxu0 }
 0x944   : > { %v9066_v38 = vadd.f32 %v8987_v55, %v8870_v27  ;;  %v8596_v31 = vpop.f32.mrb[83].mxu0 }
 0x945   : > { %v9067_v52 = vadd.f32 %v8991_v41, %v8871_v17 }
 0x947   : > { %v9252_v6 = vcombine.low %v9066_v38, %v9067_v52 }
 0x949   : > { %v9268_v48 = vrot.slane %v9252_v6, %v11742_v5 }
 0x94b   : > { %v9283_v33 = vcombine.low %v9261_v0, %v9268_v48 }
 0x94d   : > { %v9291_v19 = vrot.slane %v9283_v33, %v11742_v5 }
 0x981   : > { %v8673_v21 = vpop.f32.mrb[84].mxu0 }
 0x982   : > { %v8874_v58 = vmul.f32 %v8807_v13, %v8673_v21  ;;  %v8675_v37 = vpop.f32.mrb[85].mxu0 }
 0x983   : > { %v8875_v10 = vmul.f32 %v8811_v60, %v8675_v37  ;;  %v8677_v4 = vpop.f32.mrb[86].mxu0 }
 0x984   : > { %v9070_v15 = vadd.f32 %v9003_v16, %v8874_v58  ;;  %v8678_v25 = vpop.f32.mrb[87].mxu0 }
 0x985   : > { %v9071_v47 = vadd.f32 %v9007_v12, %v8875_v10 }
 0x987   : > { %v9254_v56 = vcombine.low %v9070_v15, %v9071_v47 }
 0x989   : > { %v9282_v2 = vrot.slane %v9254_v56, %v11742_v5 }
 0x98b   : > { %v9284_v3 = vcombine.low %v9275_v46, %v9282_v2 }
 0x98d   : > { %v9298_v59 = vrot.slane %v9284_v3, %v11742_v5 }
 0x98f   : > { %v9299_v50 = vcombine.low %v9291_v19, %v9298_v59 }
 0x991   : > { %9307 = vst [vmem:[%s14106_s4 + $0x18] sm:$0xff] %v9299_v50 }
 0x992 PF: > { %s32_s29 = sadd.s32 1, %s10995_s29   ;;  %s14579_s3 = sld [smem:[#allocation3_spill]] }
 0x993   : > { %p29_p5 = scmp.ge.s32.totalorder %s32_s29, 4   ;;  %s14580_s28 = sld [smem:[#allocation4_spill]] }
 0x995   :  { %31 = sbr.rel (!%p29_p5) target bundleno = 8 (0x8), region = 149 }

</bundles_post_ra>
